<compile_context>
chip_gen: v7x
topology: tpu7x:2x2x1
jax: 0.10.0
libtpu: 0.0.40
codegen_flags: <defaults>
</compile_context>

<pallas_src>
import functools

import jax
import jax.numpy as jnp
from jax.experimental import pallas as pl
from jax.experimental.pallas import tpu as pltpu

_SQRT_HALF = 0.7071067811865476
_HI = jax.lax.Precision.HIGHEST


# --------------------------------------------------------------------------- #
#  small helpers (used inside the kernel)
# --------------------------------------------------------------------------- #
def _erf_f32(x):
    # Abramowitz & Stegun 7.1.26, |err| <= 1.5e-7 -> f32-accurate exact-erf GELU.
    a1, a2, a3, a4, a5 = (0.254829592, -0.284496736, 1.421413741,
                          -1.453152027, 1.061405429)
    p = 0.3275911
    sgn = jnp.where(x >= 0.0, 1.0, -1.0)
    ax = jnp.abs(x)
    t = 1.0 / (1.0 + p * ax)
    poly = ((((a5 * t + a4) * t + a3) * t + a2) * t + a1) * t
    return sgn * (1.0 - poly * jnp.exp(-ax * ax))


def _layernorm_cm(x, g_col, b_col):
    """LayerNorm over the channel axis (axis 0) of a channel-major (C, T) tile."""
    mu = jnp.mean(x, axis=0, keepdims=True)
    xc = x - mu
    var = jnp.mean(xc * xc, axis=0, keepdims=True)
    return xc * jax.lax.rsqrt(var + 1e-5) * g_col + b_col


# --------------------------------------------------------------------------- #
#  fused SSMTDA kernel (one grid step = lane_fold batch elements)
# --------------------------------------------------------------------------- #
def _ssmtda_kernel(x_ref, bias_ref, smask_ref, wc_ref, wout_ref, vec_ref,
                   lepek_ref, dwk_ref, o_ref, *, W, heads):
    f32 = jnp.float32
    C = x_ref.shape[1]
    FM = x_ref.shape[2]            # lane_fold * H * W tokens (lane-dense)
    Ch = C // 2                    # channels per LePE branch
    hb = heads // 2                # heads per branch
    hd = Ch // hb                  # head dim
    hp = wout_ref.shape[1]         # padded FFN hidden size (multiple of 8)

    # static offsets into the packed per-channel vector slab
    offs, cur = {}, 0
    for name, size in (("n1g", C), ("n1b", C), ("n2g", C), ("n2b", C),
                       ("bqkv", 3 * C), ("pb", C), ("finb", 2 * hp),
                       ("dwb", 2 * hp), ("fob", C), ("l0b", Ch), ("l1b", Ch)):
        offs[name] = (cur, size)
        cur += size

    def vec(name):
        s, n = offs[name]
        return vec_ref[s:s + n, :]

    def shifted(arr, off):
        # arr[:, t + off] at column t; out-of-strip / out-of-image reads are
        # zeroed by the precomputed boundary masks, so a lane rotate suffices.
        return arr if off == 0 else pltpu.roll(arr, (-off) % FM, axis=1)

    x = x_ref[0].astype(f32)                       # (C, FM) channel-major

    # ---------------- LN1 + fused qkv (q scale folded into the weight) -------
    xn = _layernorm_cm(x, vec("n1g"), vec("n1b"))
    qkv = jnp.dot(wc_ref[0:3 * C, :], xn, preferred_element_type=f32) + vec("bqkv")
    q, k, v = qkv[:C], qkv[C:2 * C], qkv[2 * C:]

    # ---------------- LePE: depthwise 1x3 conv along each strip --------------
    def lepe_1d(vb, row0, bname, step, mrow0):
        acc = jnp.zeros((Ch, FM), f32) + vec(bname)
        for j, kk in enumerate((-1, 0, 1)):
            term = shifted(vb, kk * step) * lepek_ref[row0:row0 + Ch, j:j + 1]
            if kk != 0:
                term = term * smask_ref[mrow0 + j:mrow0 + j + 1, :]
            acc = acc + term
        return acc

    lepe0 = lepe_1d(v[:Ch], 0, "l0b", W, 0)        # vertical strips: step = W
    lepe1 = lepe_1d(v[Ch:], Ch, "l1b", 1, 3)       # horizontal strips: step = 1

    # ---------------- CSWin strip attention (masked softmax per branch/head) -
    # head outputs are full sublane-tile row blocks in channel-major, so the
    # final assembly is an aligned sublane stack (no lane shuffles).
    chunks = []
    for br in range(2):
        bias = bias_ref[br]                        # (FM, FM) strip + batch mask
        lep = lepe0 if br == 0 else lepe1
        r0 = br * Ch
        qt = q[r0:r0 + Ch, :].T                    # (FM, Ch) token-major queries
        vt = v[r0:r0 + Ch, :].T                    # (FM, Ch) token-major values
        for hh in range(hb):
            c0 = hh * hd
            sc = jnp.dot(qt[:, c0:c0 + hd], k[r0 + c0:r0 + c0 + hd, :],
                         preferred_element_type=f32) + bias
            sc = sc - jnp.max(sc, axis=-1, keepdims=True)
            e = jnp.exp(sc)
            p = e * pl.reciprocal(jnp.sum(e, axis=-1, keepdims=True), approx=True)
            ot = jnp.dot(p, vt[:, c0:c0 + hd], preferred_element_type=f32)
            chunks.append(ot.T + lep[c0:c0 + hd, :])
    attn = jnp.concatenate(chunks, axis=0)         # (C, FM)

    # proj (einops g=4 shuffle folded into the weight rows) + residual
    x = x + jnp.dot(wc_ref[3 * C:4 * C, :], attn,
                    preferred_element_type=f32) + vec("pb")

    # ---------------- LN2 + gated depthwise-conv FFN --------------------------
    xn2 = _layernorm_cm(x, vec("n2g"), vec("n2b"))
    y = jnp.dot(wc_ref[4 * C:4 * C + 2 * hp, :], xn2,
                preferred_element_type=f32) + vec("finb")

    d = jnp.zeros((2 * hp, FM), f32) + vec("dwb")  # full-image 3x3 depthwise conv
    for dh in (-1, 0, 1):
        for dw in (-1, 0, 1):
            idx = (dh + 1) * 3 + (dw + 1)
            term = shifted(y, dh * W + dw) * dwk_ref[:, idx:idx + 1]
            if not (dh == 0 and dw == 0):
                term = term * smask_ref[6 + idx:7 + idx, :]
            d = d + term

    x1, x2 = d[:hp], d[hp:]
    gated = 0.5 * x1 * (1.0 + _erf_f32(x1 * _SQRT_HALF)) * x2      # GELU(x1)*x2
    x = x + jnp.dot(wout_ref[...], gated, preferred_element_type=f32) + vec("fob")

    o_ref[...] = x[None].astype(o_ref.dtype)


# --------------------------------------------------------------------------- #
#  trace-time constants: strip masks + boundary masks (hoisted out of kernel)
# --------------------------------------------------------------------------- #
def _build_masks(H, W, ws, fold):
    M = H * W
    FM = fold * M
    t = jnp.arange(FM, dtype=jnp.int32)
    b = t // M
    m = t % M
    h = m // W
    w = m % W
    neg = jnp.float32(-1e30)
    zero = jnp.float32(0.0)
    same_b = b[:, None] == b[None, :]
    # branch 0: vertical strips (H_sp=ws, W_sp=1) inside each window
    strip0 = (w[:, None] == w[None, :]) & ((h[:, None] // ws) == (h[None, :] // ws))
    # branch 1: horizontal strips (H_sp=1, W_sp=ws) inside each window
    strip1 = (h[:, None] == h[None, :]) & ((w[:, None] // ws) == (w[None, :] // ws))
    attn_bias = jnp.stack([jnp.where(same_b & strip0, zero, neg),
                           jnp.where(same_b & strip1, zero, neg)], axis=0)

    f = lambda c: c.astype(jnp.float32)
    ones = jnp.ones((FM,), jnp.float32)
    pos0, pos1 = h % ws, w % ws
    lepe0_m = jnp.stack([f(pos0 > 0), ones, f(pos0 < ws - 1)], axis=0)
    lepe1_m = jnp.stack([f(pos1 > 0), ones, f(pos1 < ws - 1)], axis=0)
    dw_m = []
    for dh in (-1, 0, 1):
        for dw in (-1, 0, 1):
            ok = jnp.ones((FM,), bool)
            if dh == -1:
                ok = ok & (h > 0)
            elif dh == 1:
                ok = ok & (h < H - 1)
            if dw == -1:
                ok = ok & (w > 0)
            elif dw == 1:
                ok = ok & (w < W - 1)
            dw_m.append(f(ok))
    shift_masks = jnp.concatenate([lepe0_m, lepe1_m, jnp.stack(dw_m, axis=0)], 0)
    return attn_bias, shift_masks                  # (2, FM, FM), (15, FM)


# --------------------------------------------------------------------------- #
#  parameter preparation (trace-time folding / fusing / padding / packing)
# --------------------------------------------------------------------------- #
def prepare_params(params, *, dim, num_heads):
    C = dim
    assert C % 16 == 0
    hb = num_heads // 2
    hd = (C // 2) // hb
    scale = float(hd) ** -0.5

    # fused (q|k|v) weight, transposed to channel-major (out, in); q scale folded
    wq = params['qk_w'][:, :C] * scale
    bq = params['qk_b'][:C] * scale
    wqkv_t = jnp.concatenate([wq.T, params['qk_w'][:, C:].T, params['v_w'].T], 0)
    bqkv = jnp.concatenate([bq, params['qk_b'][C:], params['v_b']], 0)

    # einops 'b n (g d) -> b n (d g)' (g=4) folded into a proj row permutation
    d = C // 4
    perm = jnp.array([(i % d) * 4 + i // d for i in range(C)], jnp.int32)
    pw_t = params['proj_w'][perm, :].T

    # LePE 3x3 on (ws,1)/(1,ws) strips degenerates to a 1x3 conv along the strip
    lepe_k = jnp.concatenate([params['lepe0_w'][:, 1, :].T,
                              params['lepe1_w'][1, :, :].T], axis=0)       # (C, 3)

    hidden = params['ff_out_w'].shape[0]
    hp = -(-hidden // 8) * 8            # pad hidden (85 -> 88): aligned row slices
    pad = hp - hidden
    pad_r = lambda a: jnp.pad(a, ((0, pad),) + ((0, 0),) * (a.ndim - 1))
    pad_v = lambda a: jnp.pad(a, (0, pad))

    fin_t = jnp.concatenate([pad_r(params['ff_in_w'][:, :hidden].T),
                             pad_r(params['ff_in_w'][:, hidden:].T)], 0)   # (2hp, C)
    fin_b = jnp.concatenate([pad_v(params['ff_in_b'][:hidden]),
                             pad_v(params['ff_in_b'][hidden:])], 0)
    dw9 = params['ff_dw_w'].reshape(9, 2 * hidden)
    dw_k = jnp.concatenate([pad_r(dw9[:, :hidden].T),
                            pad_r(dw9[:, hidden:].T)], 0)                  # (2hp, 9)
    dw_b = jnp.concatenate([pad_v(params['ff_dw_b'][:hidden]),
                            pad_v(params['ff_dw_b'][hidden:])], 0)
    fow_t = jnp.pad(params['ff_out_w'].T, ((0, 0), (0, pad)))              # (C, hp)

    # one slab for all matmuls contracting over C, one slab for all column vecs
    w_c32 = jnp.concatenate([wqkv_t, pw_t, fin_t], axis=0)                 # (4C+2hp, C)
    col = lambda a: a.reshape(-1, 1)
    vecs = jnp.concatenate([
        col(params['norm1_g']), col(params['norm1_b']),
        col(params['norm2_g']), col(params['norm2_b']),
        col(bqkv), col(params['proj_b']),
        col(fin_b), col(dw_b), col(params['ff_out_b']),
        col(params['lepe0_b']), col(params['lepe1_b']),
    ], axis=0)

    return {'w_c32': w_c32, 'w_out': fow_t, 'vecs': vecs,
            'lepe_k': lepe_k, 'dw_k': dw_k}


def ssmtda_forward(x_nchw, prepped, *, num_heads, window_size, shift_size=0,
                   split_size=1, lane_fold=None):
    B, C, H, W = x_nchw.shape
    # TODO(synk): shift_size > 0 / split_size > 1 would need different in-kernel
    # masks + LePE patterns; the module defaults (0, 1) used here are supported.
    assert shift_size == 0 and split_size == 1
    assert H % window_size == 0 and W % window_size == 0
    M = H * W
    if lane_fold is None:
        # Fold 2 batch elements along the token (lane) axis when the token count
        # is below a full 128-lane vreg -> unmasked 128-wide stores.  Capped at 2
        # so the dense (FM, FM) strip mask stays tiny.  (On v7x with B == 2 this
        # leaves one TensorCore idle; with B >= 4 the grid stays >= 2.)
        lane_fold = 2 if (B % 2 == 0 and M < 128) else 1
    F = lane_fold
    assert B % F == 0
    FM = F * M

    x_cm = x_nchw.reshape(B, C, M)
    if F > 1:   # wrapper-side layout plumbing so kernel blocks are lane-dense
        x_cm = x_cm.reshape(B // F, F, C, M).transpose(0, 2, 1, 3)
        x_cm = x_cm.reshape(B // F, C, FM)

    attn_bias, shift_masks = _build_masks(H, W, window_size, F)
    consts = (attn_bias, shift_masks, prepped['w_c32'], prepped['w_out'],
              prepped['vecs'], prepped['lepe_k'], prepped['dw_k'])
    const_specs = [pl.BlockSpec(c.shape, lambda i, _n=c.ndim: (0,) * _n)
                   for c in consts]

    kernel = functools.partial(_ssmtda_kernel, W=W, heads=num_heads)
    out = pl.pallas_call(
        kernel,
        out_shape=jax.ShapeDtypeStruct((B // F, C, FM), x_nchw.dtype),
        grid=(B // F,),
        in_specs=[pl.BlockSpec((1, C, FM), lambda i: (i, 0, 0))] + const_specs,
        out_specs=pl.BlockSpec((1, C, FM), lambda i: (i, 0, 0)),
        compiler_params=pltpu.CompilerParams(
            dimension_semantics=("parallel",)),
    )(x_cm, *consts)

    if F > 1:
        out = out.reshape(B // F, C, F, M).transpose(0, 2, 1, 3).reshape(B, C, M)
    return out.reshape(B, C, H, W)


# --------------------------------------------------------------------------- #
#  deterministic parameters
#  (when importing torch weights: Linear weights must be transposed to (in,out),
#   depthwise Conv2d weights (C,1,3,3) permuted to (3,3,C).)
# --------------------------------------------------------------------------- #
def init_params(key, dim=32, ffn_expansion_factor=2.66):
    hidden = int(dim * ffn_expansion_factor)
    half = dim // 2
    keys = jax.random.split(key, 16)

    def rnd(k, shape, scale=0.1):
        return (scale * jax.random.normal(k, shape)).astype(jnp.float32)

    return {
        'norm1_g': jnp.ones((dim,), jnp.float32),
        'norm1_b': jnp.zeros((dim,), jnp.float32),
        'norm2_g': jnp.ones((dim,), jnp.float32),
        'norm2_b': jnp.zeros((dim,), jnp.float32),
        'qk_w': rnd(keys[0], (dim, 2 * dim)),
        'qk_b': rnd(keys[1], (2 * dim,)),
        'v_w': rnd(keys[2], (dim, dim)),
        'v_b': rnd(keys[3], (dim,)),
        'lepe0_w': rnd(keys[4], (3, 3, half)),
        'lepe0_b': rnd(keys[5], (half,)),
        'lepe1_w': rnd(keys[6], (3, 3, half)),
        'lepe1_b': rnd(keys[7], (half,)),
        'proj_w': rnd(keys[8], (dim, dim)),
        'proj_b': rnd(keys[9], (dim,)),
        'ff_in_w': rnd(keys[10], (dim, 2 * hidden)),
        'ff_in_b': rnd(keys[11], (2 * hidden,)),
        'ff_dw_w': rnd(keys[12], (3, 3, 2 * hidden)),
        'ff_dw_b': rnd(keys[13], (2 * hidden,)),
        'ff_out_w': rnd(keys[14], (hidden, dim)),
        'ff_out_b': rnd(keys[15], (dim,)),
    }


# --------------------------------------------------------------------------- #
#  pure-JAX reference (direct transcription of the PyTorch module)
# --------------------------------------------------------------------------- #
def window_partition(x, ws):
    B, H, W, C = x.shape
    x = x.reshape(B, H // ws, ws, W // ws, ws, C).transpose(0, 1, 3, 2, 4, 5)
    return x.reshape(-1, ws, ws, C)


def window_reverse(windows, ws, H, W):
    C = windows.shape[-1]
    B = windows.shape[0] // ((H // ws) * (W // ws))
    x = windows.reshape(B, H // ws, W // ws, ws, ws, C).transpose(0, 1, 3, 2, 4, 5)
    return x.reshape(B, H, W, C)


def img2windows(img_bchw, H_sp, W_sp):
    B, C, H, W = img_bchw.shape
    x = img_bchw.reshape(B, C, H // H_sp, H_sp, W // W_sp, W_sp)
    return x.transpose(0, 2, 4, 3, 5, 1).reshape(-1, H_sp * W_sp, C)


def windows2img(wins, H_sp, W_sp, H, W):
    C = wins.shape[-1]
    B = wins.shape[0] // ((H * W) // (H_sp * W_sp))
    x = wins.reshape(B, H // H_sp, W // W_sp, H_sp, W_sp, C).transpose(0, 1, 3, 2, 4, 5)
    return x.reshape(B, H, W, C)


def _ref_ln(x, g, b):
    mu = x.mean(-1, keepdims=True)
    xc = x - mu
    var = (xc * xc).mean(-1, keepdims=True)
    return xc * jax.lax.rsqrt(var + 1e-5) * g + b


def _ref_dwconv(x_nhwc, w, b):
    C = x_nhwc.shape[-1]
    y = jax.lax.conv_general_dilated(
        x_nhwc, w[:, :, None, :], (1, 1), ((1, 1), (1, 1)),
        dimension_numbers=("NHWC", "HWIO", "NHWC"),
        feature_group_count=C, precision=_HI)
    return y + b


def _ref_lepe_attention(q, k, v, idx, num_heads, resolution, split_size, cw, cb):
    B, N, C = q.shape
    H = W = resolution
    H_sp, W_sp = (resolution, split_size) if idx == 0 else (split_size, resolution)
    head_dim = C // num_heads
    scale = head_dim ** -0.5
    L = H_sp * W_sp

    def im2cswin(x):
        x = x.transpose(0, 2, 1).reshape(B, C, H, W)
        x = img2windows(x, H_sp, W_sp)
        return x.reshape(-1, L, num_heads, head_dim).transpose(0, 2, 1, 3)

    qh = im2cswin(q) * scale
    kh = im2cswin(k)
    vw = v.transpose(0, 2, 1).reshape(B, C, H, W)
    vw = vw.reshape(B, C, H // H_sp, H_sp, W // W_sp, W_sp)
    vw = vw.transpose(0, 2, 4, 1, 3, 5).reshape(-1, C, H_sp, W_sp)
    lepe = _ref_dwconv(vw.transpose(0, 2, 3, 1), cw, cb).transpose(0, 3, 1, 2)
    lepe = lepe.reshape(-1, num_heads, head_dim, L).transpose(0, 1, 3, 2)
    vh = vw.reshape(-1, num_heads, head_dim, L).transpose(0, 1, 3, 2)

    attn = jnp.einsum('bhld,bhmd->bhlm', qh, kh, precision=_HI)
    attn = jax.nn.softmax(attn, axis=-1)
    out = jnp.einsum('bhlm,bhmd->bhld', attn, vh, precision=_HI) + lepe
    out = out.transpose(0, 2, 1, 3).reshape(-1, L, C)
    return windows2img(out, H_sp, W_sp, H, W).reshape(B, -1, C)


def _ref_window_attention(xw, p, num_heads, window_size, split_size):
    Bn, N, C = xw.shape
    qk = jnp.dot(xw, p['qk_w'], precision=_HI) + p['qk_b']
    v = jnp.dot(xw, p['v_w'], precision=_HI) + p['v_b']
    qkv = jnp.concatenate([qk, v], -1).reshape(Bn, N, 3, C).transpose(2, 0, 1, 3)
    q_, k_, v_ = qkv[0], qkv[1], qkv[2]
    Ch = C // 2
    x1 = _ref_lepe_attention(q_[..., :Ch], k_[..., :Ch], v_[..., :Ch], 0,
                             num_heads // 2, window_size, split_size,
                             p['lepe0_w'], p['lepe0_b'])
    x2 = _ref_lepe_attention(q_[..., Ch:], k_[..., Ch:], v_[..., Ch:], 1,
                             num_heads // 2, window_size, split_size,
                             p['lepe1_w'], p['lepe1_b'])
    att = jnp.concatenate([x1, x2], axis=2)
    g, d = 4, C // 4
    att = att.reshape(Bn, N, g, d).transpose(0, 1, 3, 2).reshape(Bn, N, C)
    return jnp.dot(att, p['proj_w'], precision=_HI) + p['proj_b']


def _ref_feed_forward(x_nchw, p):
    B, C, H, W = x_nchw.shape
    x = x_nchw.transpose(0, 2, 3, 1).reshape(B * H * W, C)
    y = (jnp.dot(x, p['ff_in_w'], precision=_HI) + p['ff_in_b']).reshape(B, H, W, -1)
    y = _ref_dwconv(y, p['ff_dw_w'], p['ff_dw_b'])
    h = y.shape[-1] // 2
    x1, x2 = y[..., :h], y[..., h:]
    out = jax.nn.gelu(x1, approximate=False) * x2
    out = jnp.dot(out.reshape(B * H * W, h), p['ff_out_w'], precision=_HI) + p['ff_out_b']
    return out.reshape(B, H, W, C).transpose(0, 3, 1, 2)


def ssmtda_reference(x_nchw, p, *, num_heads, window_size, shift_size, split_size):
    B, C, H, W = x_nchw.shape
    tokens = x_nchw.reshape(B, C, H * W).transpose(0, 2, 1)
    shortcut = tokens
    xn = _ref_ln(tokens, p['norm1_g'], p['norm1_b']).reshape(B, H, W, C)
    if shift_size > 0:
        xn = jnp.roll(xn, (-shift_size, -shift_size), (1, 2))
    xw = window_partition(xn, window_size).reshape(-1, window_size * window_size, C)
    aw = _ref_window_attention(xw, p, num_heads, window_size, split_size)
    aw = aw.reshape(-1, window_size, window_size, C)
    xr = window_reverse(aw, window_size, H, W)
    if shift_size > 0:
        xr = jnp.roll(xr, (shift_size, shift_size), (1, 2))
    x = shortcut + xr.reshape(B, H * W, C)
    nx = _ref_ln(x, p['norm2_g'], p['norm2_b'])
    nx_nchw = nx.transpose(0, 2, 1).reshape(B, C, H, W)
    x = x + _ref_feed_forward(nx_nchw, p).reshape(B, C, H * W).transpose(0, 2, 1)
    return x.transpose(0, 2, 1).reshape(B, C, H, W)


# --------------------------------------------------------------------------- #
if __name__ == "__main__":
    key = jax.random.PRNGKey(0)
    kx, kp = jax.random.split(key)

    B, C, H, W = 2, 32, 8, 8                    # dim=32, window_size=4, num_heads=4
    num_heads, window_size, shift_size, split_size = 4, 4, 0, 1

    x = jax.random.normal(kx, (B, C, H, W), dtype=jnp.float32)
    params = init_params(kp, dim=C)
    prepped = prepare_params(params, dim=C, num_heads=num_heads)

    fwd = jax.jit(functools.partial(ssmtda_forward, num_heads=num_heads,
                                    window_size=window_size,
                                    shift_size=shift_size, split_size=split_size))
    out = fwd(x, prepped)
    jax.block_until_ready(out)

    assert out.shape == (B, C, H, W) and out.dtype == jnp.float32
    assert bool(jnp.all(jnp.isfinite(out)))

    # numerical check against a pure-JAX transcription of the PyTorch module
    ref = ssmtda_reference(x, params, num_heads=num_heads, window_size=window_size,
                           shift_size=shift_size, split_size=split_size)
    err = float(jnp.max(jnp.abs(out - ref)))
    assert err < 5e-3, f"mismatch vs reference: max abs err {err}"

    print("KERNEL_OK")
</pallas_src>

<mosaic_0001>
module attributes {stable_mosaic.version = 11 : i64} {
  func.func @_ssmtda_kernel(%arg0: i32, %arg1: memref<1x32x128xf32, #tpu.memory_space<vmem>>, %arg2: memref<2x128x128xf32, #tpu.memory_space<vmem>>, %arg3: memref<15x128xf32, #tpu.memory_space<vmem>>, %arg4: memref<304x32xf32, #tpu.memory_space<vmem>>, %arg5: memref<32x88xf32, #tpu.memory_space<vmem>>, %arg6: memref<672x1xf32, #tpu.memory_space<vmem>>, %arg7: memref<32x3xf32, #tpu.memory_space<vmem>>, %arg8: memref<176x9xf32, #tpu.memory_space<vmem>>, %arg9: memref<1x32x128xf32, #tpu.memory_space<vmem>>) attributes {dimension_semantics = [#tpu.dimension_semantics<parallel>], iteration_bounds = array<i64: 1>, scalar_prefetch = 0 : i64, scratch_operands = 0 : i64, tpu.core_type = #tpu.core_type<tc>, window_params = [{transform_indices = @transform_0, window_bounds = array<i64: 1, 32, 128>}, {pipeline_mode = #tpu.pipeline_mode<synchronous>, transform_indices = @transform_1, window_bounds = array<i64: 2, 128, 128>}, {pipeline_mode = #tpu.pipeline_mode<synchronous>, transform_indices = @transform_2, window_bounds = array<i64: 15, 128>}, {pipeline_mode = #tpu.pipeline_mode<synchronous>, transform_indices = @transform_3, window_bounds = array<i64: 304, 32>}, {pipeline_mode = #tpu.pipeline_mode<synchronous>, transform_indices = @transform_4, window_bounds = array<i64: 32, 88>}, {pipeline_mode = #tpu.pipeline_mode<synchronous>, transform_indices = @transform_5, window_bounds = array<i64: 672, 1>}, {pipeline_mode = #tpu.pipeline_mode<synchronous>, transform_indices = @transform_6, window_bounds = array<i64: 32, 3>}, {pipeline_mode = #tpu.pipeline_mode<synchronous>, transform_indices = @transform_7, window_bounds = array<i64: 176, 9>}, {transform_indices = @transform_8, window_bounds = array<i64: 1, 32, 128>}]} {
    %c0 = arith.constant 0 : index
    %c0_0 = arith.constant 0 : index
    %c0_1 = arith.constant 0 : index
    %0 = vector.load %arg1[%c0, %c0_0, %c0_1] : memref<1x32x128xf32, #tpu.memory_space<vmem>>, vector<1x32x128xf32>
    %1 = vector.shape_cast %0 : vector<1x32x128xf32> to vector<32x128xf32>
    %c0_2 = arith.constant 0 : index
    %c0_3 = arith.constant 0 : index
    %2 = vector.load %arg6[%c0_2, %c0_3] : memref<672x1xf32, #tpu.memory_space<vmem>>, vector<32x1xf32>
    %c32 = arith.constant 32 : index
    %c0_4 = arith.constant 0 : index
    %3 = vector.load %arg6[%c32, %c0_4] : memref<672x1xf32, #tpu.memory_space<vmem>>, vector<32x1xf32>
    %cst = arith.constant dense<0.000000e+00> : vector<128xf32>
    %4 = vector.multi_reduction <add>, %1, %cst [0] : vector<32x128xf32> to vector<128xf32>
    %5 = vector.shape_cast %4 : vector<128xf32> to vector<1x128xf32>
    %cst_5 = arith.constant 3.200000e+01 : f32
    %6 = vector.broadcast %cst_5 : f32 to vector<1x128xf32>
    %7 = arith.divf %5, %6 : vector<1x128xf32>
    %8 = vector.broadcast %7 : vector<1x128xf32> to vector<32x128xf32>
    %9 = arith.subf %1, %8 : vector<32x128xf32>
    %10 = arith.mulf %9, %9 : vector<32x128xf32>
    %cst_6 = arith.constant dense<0.000000e+00> : vector<128xf32>
    %11 = vector.multi_reduction <add>, %10, %cst_6 [0] : vector<32x128xf32> to vector<128xf32>
    %12 = vector.shape_cast %11 : vector<128xf32> to vector<1x128xf32>
    %cst_7 = arith.constant 3.200000e+01 : f32
    %13 = vector.broadcast %cst_7 : f32 to vector<1x128xf32>
    %14 = arith.divf %12, %13 : vector<1x128xf32>
    %cst_8 = arith.constant 9.99999974E-6 : f32
    %15 = vector.broadcast %cst_8 : f32 to vector<1x128xf32>
    %16 = arith.addf %14, %15 : vector<1x128xf32>
    %17 = math.rsqrt %16 : vector<1x128xf32>
    %18 = vector.broadcast %17 : vector<1x128xf32> to vector<32x128xf32>
    %19 = arith.mulf %9, %18 : vector<32x128xf32>
    %20 = vector.broadcast %2 : vector<32x1xf32> to vector<32x128xf32>
    %21 = arith.mulf %19, %20 : vector<32x128xf32>
    %22 = vector.broadcast %3 : vector<32x1xf32> to vector<32x128xf32>
    %23 = arith.addf %21, %22 : vector<32x128xf32>
    %c0_9 = arith.constant 0 : index
    %c0_10 = arith.constant 0 : index
    %24 = vector.load %arg4[%c0_9, %c0_10] : memref<304x32xf32, #tpu.memory_space<vmem>>, vector<96x32xf32>
    %cst_11 = arith.constant dense<0.000000e+00> : vector<96x128xf32>
    %25 = tpu.matmul %24, %23, %cst_11 {dimension_numbers = #tpu.dot_dimension_numbers<[1], [0], [0], [1], [0, 0, 1, 1], [], []>} : vector<96x32xf32>, vector<32x128xf32>, vector<96x128xf32> -> vector<96x128xf32>
    %c128 = arith.constant 128 : index
    %c0_12 = arith.constant 0 : index
    %26 = vector.load %arg6[%c128, %c0_12] : memref<672x1xf32, #tpu.memory_space<vmem>>, vector<96x1xf32>
    %27 = vector.broadcast %26 : vector<96x1xf32> to vector<96x128xf32>
    %28 = arith.addf %25, %27 : vector<96x128xf32>
    %29 = vector.extract_strided_slice %28 {offsets = [0, 0], sizes = [32, 128], strides = [1, 1]} : vector<96x128xf32> to vector<32x128xf32>
    %30 = vector.extract_strided_slice %28 {offsets = [32, 0], sizes = [32, 128], strides = [1, 1]} : vector<96x128xf32> to vector<32x128xf32>
    %31 = vector.extract_strided_slice %28 {offsets = [64, 0], sizes = [32, 128], strides = [1, 1]} : vector<96x128xf32> to vector<32x128xf32>
    %32 = vector.extract_strided_slice %31 {offsets = [0, 0], sizes = [16, 128], strides = [1, 1]} : vector<32x128xf32> to vector<16x128xf32>
    %cst_13 = arith.constant 0.000000e+00 : f32
    %33 = vector.broadcast %cst_13 : f32 to vector<16x128xf32>
    %c640 = arith.constant 640 : index
    %c0_14 = arith.constant 0 : index
    %34 = vector.load %arg6[%c640, %c0_14] : memref<672x1xf32, #tpu.memory_space<vmem>>, vector<16x1xf32>
    %35 = vector.broadcast %34 : vector<16x1xf32> to vector<16x128xf32>
    %36 = arith.addf %33, %35 : vector<16x128xf32>
    %c8_i32 = arith.constant 8 : i32
    %37 = tpu.dynamic_rotate %32 by %c8_i32 dim 1 : vector<16x128xf32>, i32 -> vector<16x128xf32>
    %c0_15 = arith.constant 0 : index
    %c0_16 = arith.constant 0 : index
    %38 = vector.load %arg7[%c0_15, %c0_16] : memref<32x3xf32, #tpu.memory_space<vmem>>, vector<16x1xf32>
    %39 = vector.broadcast %38 : vector<16x1xf32> to vector<16x128xf32>
    %40 = arith.mulf %37, %39 : vector<16x128xf32>
    %c0_17 = arith.constant 0 : index
    %c0_18 = arith.constant 0 : index
    %41 = vector.load %arg3[%c0_17, %c0_18] : memref<15x128xf32, #tpu.memory_space<vmem>>, vector<1x128xf32>
    %42 = vector.broadcast %41 : vector<1x128xf32> to vector<16x128xf32>
    %43 = arith.mulf %40, %42 : vector<16x128xf32>
    %44 = arith.addf %36, %43 : vector<16x128xf32>
    %c0_19 = arith.constant 0 : index
    %c1 = arith.constant 1 : index
    %45 = vector.load %arg7[%c0_19, %c1] : memref<32x3xf32, #tpu.memory_space<vmem>>, vector<16x1xf32>
    %46 = vector.broadcast %45 : vector<16x1xf32> to vector<16x128xf32>
    %47 = arith.mulf %32, %46 : vector<16x128xf32>
    %48 = arith.addf %44, %47 : vector<16x128xf32>
    %c120_i32 = arith.constant 120 : i32
    %49 = tpu.dynamic_rotate %32 by %c120_i32 dim 1 : vector<16x128xf32>, i32 -> vector<16x128xf32>
    %c0_20 = arith.constant 0 : index
    %c2 = arith.constant 2 : index
    %50 = vector.load %arg7[%c0_20, %c2] : memref<32x3xf32, #tpu.memory_space<vmem>>, vector<16x1xf32>
    %51 = vector.broadcast %50 : vector<16x1xf32> to vector<16x128xf32>
    %52 = arith.mulf %49, %51 : vector<16x128xf32>
    %c2_21 = arith.constant 2 : index
    %c0_22 = arith.constant 0 : index
    %53 = vector.load %arg3[%c2_21, %c0_22] : memref<15x128xf32, #tpu.memory_space<vmem>>, vector<1x128xf32>
    %54 = vector.broadcast %53 : vector<1x128xf32> to vector<16x128xf32>
    %55 = arith.mulf %52, %54 : vector<16x128xf32>
    %56 = arith.addf %48, %55 : vector<16x128xf32>
    %57 = vector.extract_strided_slice %31 {offsets = [16, 0], sizes = [16, 128], strides = [1, 1]} : vector<32x128xf32> to vector<16x128xf32>
    %cst_23 = arith.constant 0.000000e+00 : f32
    %58 = vector.broadcast %cst_23 : f32 to vector<16x128xf32>
    %c656 = arith.constant 656 : index
    %c0_24 = arith.constant 0 : index
    %59 = vector.load %arg6[%c656, %c0_24] : memref<672x1xf32, #tpu.memory_space<vmem>>, vector<16x1xf32>
    %60 = vector.broadcast %59 : vector<16x1xf32> to vector<16x128xf32>
    %61 = arith.addf %58, %60 : vector<16x128xf32>
    %c1_i32 = arith.constant 1 : i32
    %62 = tpu.dynamic_rotate %57 by %c1_i32 dim 1 : vector<16x128xf32>, i32 -> vector<16x128xf32>
    %c16 = arith.constant 16 : index
    %c0_25 = arith.constant 0 : index
    %63 = vector.load %arg7[%c16, %c0_25] : memref<32x3xf32, #tpu.memory_space<vmem>>, vector<16x1xf32>
    %64 = vector.broadcast %63 : vector<16x1xf32> to vector<16x128xf32>
    %65 = arith.mulf %62, %64 : vector<16x128xf32>
    %c3 = arith.constant 3 : index
    %c0_26 = arith.constant 0 : index
    %66 = vector.load %arg3[%c3, %c0_26] : memref<15x128xf32, #tpu.memory_space<vmem>>, vector<1x128xf32>
    %67 = vector.broadcast %66 : vector<1x128xf32> to vector<16x128xf32>
    %68 = arith.mulf %65, %67 : vector<16x128xf32>
    %69 = arith.addf %61, %68 : vector<16x128xf32>
    %c16_27 = arith.constant 16 : index
    %c1_28 = arith.constant 1 : index
    %70 = vector.load %arg7[%c16_27, %c1_28] : memref<32x3xf32, #tpu.memory_space<vmem>>, vector<16x1xf32>
    %71 = vector.broadcast %70 : vector<16x1xf32> to vector<16x128xf32>
    %72 = arith.mulf %57, %71 : vector<16x128xf32>
    %73 = arith.addf %69, %72 : vector<16x128xf32>
    %c127_i32 = arith.constant 127 : i32
    %74 = tpu.dynamic_rotate %57 by %c127_i32 dim 1 : vector<16x128xf32>, i32 -> vector<16x128xf32>
    %c16_29 = arith.constant 16 : index
    %c2_30 = arith.constant 2 : index
    %75 = vector.load %arg7[%c16_29, %c2_30] : memref<32x3xf32, #tpu.memory_space<vmem>>, vector<16x1xf32>
    %76 = vector.broadcast %75 : vector<16x1xf32> to vector<16x128xf32>
    %77 = arith.mulf %74, %76 : vector<16x128xf32>
    %c5 = arith.constant 5 : index
    %c0_31 = arith.constant 0 : index
    %78 = vector.load %arg3[%c5, %c0_31] : memref<15x128xf32, #tpu.memory_space<vmem>>, vector<1x128xf32>
    %79 = vector.broadcast %78 : vector<1x128xf32> to vector<16x128xf32>
    %80 = arith.mulf %77, %79 : vector<16x128xf32>
    %81 = arith.addf %73, %80 : vector<16x128xf32>
    %c0_32 = arith.constant 0 : index
    %c0_33 = arith.constant 0 : index
    %c0_34 = arith.constant 0 : index
    %82 = vector.load %arg2[%c0_32, %c0_33, %c0_34] : memref<2x128x128xf32, #tpu.memory_space<vmem>>, vector<1x128x128xf32>
    %83 = vector.shape_cast %82 : vector<1x128x128xf32> to vector<128x128xf32>
    %84 = vector.extract_strided_slice %29 {offsets = [0, 0], sizes = [16, 128], strides = [1, 1]} : vector<32x128xf32> to vector<16x128xf32>
    %85 = tpu.transpose %84, [1, 0] : vector<16x128xf32> -> vector<128x16xf32>
    %86 = vector.extract_strided_slice %31 {offsets = [0, 0], sizes = [16, 128], strides = [1, 1]} : vector<32x128xf32> to vector<16x128xf32>
    %87 = tpu.transpose %86, [1, 0] : vector<16x128xf32> -> vector<128x16xf32>
    %88 = vector.extract_strided_slice %85 {offsets = [0, 0], sizes = [128, 8], strides = [1, 1]} : vector<128x16xf32> to vector<128x8xf32>
    %89 = vector.extract_strided_slice %30 {offsets = [0, 0], sizes = [8, 128], strides = [1, 1]} : vector<32x128xf32> to vector<8x128xf32>
    %cst_35 = arith.constant dense<0.000000e+00> : vector<128x128xf32>
    %90 = tpu.matmul %88, %89, %cst_35 {dimension_numbers = #tpu.dot_dimension_numbers<[1], [0], [0], [1], [0, 0, 1, 1], [], []>} : vector<128x8xf32>, vector<8x128xf32>, vector<128x128xf32> -> vector<128x128xf32>
    %91 = arith.addf %90, %83 : vector<128x128xf32>
    %cst_36 = arith.constant dense<0xFF800000> : vector<128xf32>
    %92 = vector.multi_reduction <maximumf>, %91, %cst_36 [1] : vector<128x128xf32> to vector<128xf32>
    %93 = vector.shape_cast %92 : vector<128xf32> to vector<128x1xf32>
    %94 = vector.broadcast %93 : vector<128x1xf32> to vector<128x128xf32>
    %95 = arith.subf %91, %94 : vector<128x128xf32>
    %96 = math.exp %95 : vector<128x128xf32>
    %cst_37 = arith.constant dense<0.000000e+00> : vector<128xf32>
    %97 = vector.multi_reduction <add>, %96, %cst_37 [1] : vector<128x128xf32> to vector<128xf32>
    %98 = vector.shape_cast %97 : vector<128xf32> to vector<128x1xf32>
    %99 = tpu.reciprocal %98 {approx = true} : vector<128x1xf32> -> vector<128x1xf32>
    %100 = vector.broadcast %99 : vector<128x1xf32> to vector<128x128xf32>
    %101 = arith.mulf %96, %100 : vector<128x128xf32>
    %102 = vector.extract_strided_slice %87 {offsets = [0, 0], sizes = [128, 8], strides = [1, 1]} : vector<128x16xf32> to vector<128x8xf32>
    %cst_38 = arith.constant dense<0.000000e+00> : vector<128x8xf32>
    %103 = tpu.matmul %101, %102, %cst_38 {dimension_numbers = #tpu.dot_dimension_numbers<[1], [0], [0], [1], [0, 0, 1, 1], [], []>} : vector<128x128xf32>, vector<128x8xf32>, vector<128x8xf32> -> vector<128x8xf32>
    %104 = tpu.transpose %103, [1, 0] : vector<128x8xf32> -> vector<8x128xf32>
    %105 = vector.extract_strided_slice %56 {offsets = [0, 0], sizes = [8, 128], strides = [1, 1]} : vector<16x128xf32> to vector<8x128xf32>
    %106 = arith.addf %104, %105 : vector<8x128xf32>
    %107 = vector.extract_strided_slice %85 {offsets = [0, 8], sizes = [128, 8], strides = [1, 1]} : vector<128x16xf32> to vector<128x8xf32>
    %108 = vector.extract_strided_slice %30 {offsets = [8, 0], sizes = [8, 128], strides = [1, 1]} : vector<32x128xf32> to vector<8x128xf32>
    %cst_39 = arith.constant dense<0.000000e+00> : vector<128x128xf32>
    %109 = tpu.matmul %107, %108, %cst_39 {dimension_numbers = #tpu.dot_dimension_numbers<[1], [0], [0], [1], [0, 0, 1, 1], [], []>} : vector<128x8xf32>, vector<8x128xf32>, vector<128x128xf32> -> vector<128x128xf32>
    %110 = arith.addf %109, %83 : vector<128x128xf32>
    %cst_40 = arith.constant dense<0xFF800000> : vector<128xf32>
    %111 = vector.multi_reduction <maximumf>, %110, %cst_40 [1] : vector<128x128xf32> to vector<128xf32>
    %112 = vector.shape_cast %111 : vector<128xf32> to vector<128x1xf32>
    %113 = vector.broadcast %112 : vector<128x1xf32> to vector<128x128xf32>
    %114 = arith.subf %110, %113 : vector<128x128xf32>
    %115 = math.exp %114 : vector<128x128xf32>
    %cst_41 = arith.constant dense<0.000000e+00> : vector<128xf32>
    %116 = vector.multi_reduction <add>, %115, %cst_41 [1] : vector<128x128xf32> to vector<128xf32>
    %117 = vector.shape_cast %116 : vector<128xf32> to vector<128x1xf32>
    %118 = tpu.reciprocal %117 {approx = true} : vector<128x1xf32> -> vector<128x1xf32>
    %119 = vector.broadcast %118 : vector<128x1xf32> to vector<128x128xf32>
    %120 = arith.mulf %115, %119 : vector<128x128xf32>
    %121 = vector.extract_strided_slice %87 {offsets = [0, 8], sizes = [128, 8], strides = [1, 1]} : vector<128x16xf32> to vector<128x8xf32>
    %cst_42 = arith.constant dense<0.000000e+00> : vector<128x8xf32>
    %122 = tpu.matmul %120, %121, %cst_42 {dimension_numbers = #tpu.dot_dimension_numbers<[1], [0], [0], [1], [0, 0, 1, 1], [], []>} : vector<128x128xf32>, vector<128x8xf32>, vector<128x8xf32> -> vector<128x8xf32>
    %123 = tpu.transpose %122, [1, 0] : vector<128x8xf32> -> vector<8x128xf32>
    %124 = vector.extract_strided_slice %56 {offsets = [8, 0], sizes = [8, 128], strides = [1, 1]} : vector<16x128xf32> to vector<8x128xf32>
    %125 = arith.addf %123, %124 : vector<8x128xf32>
    %c1_43 = arith.constant 1 : index
    %c0_44 = arith.constant 0 : index
    %c0_45 = arith.constant 0 : index
    %126 = vector.load %arg2[%c1_43, %c0_44, %c0_45] : memref<2x128x128xf32, #tpu.memory_space<vmem>>, vector<1x128x128xf32>
    %127 = vector.shape_cast %126 : vector<1x128x128xf32> to vector<128x128xf32>
    %128 = vector.extract_strided_slice %29 {offsets = [16, 0], sizes = [16, 128], strides = [1, 1]} : vector<32x128xf32> to vector<16x128xf32>
    %129 = tpu.transpose %128, [1, 0] : vector<16x128xf32> -> vector<128x16xf32>
    %130 = vector.extract_strided_slice %31 {offsets = [16, 0], sizes = [16, 128], strides = [1, 1]} : vector<32x128xf32> to vector<16x128xf32>
    %131 = tpu.transpose %130, [1, 0] : vector<16x128xf32> -> vector<128x16xf32>
    %132 = vector.extract_strided_slice %129 {offsets = [0, 0], sizes = [128, 8], strides = [1, 1]} : vector<128x16xf32> to vector<128x8xf32>
    %133 = vector.extract_strided_slice %30 {offsets = [16, 0], sizes = [8, 128], strides = [1, 1]} : vector<32x128xf32> to vector<8x128xf32>
    %cst_46 = arith.constant dense<0.000000e+00> : vector<128x128xf32>
    %134 = tpu.matmul %132, %133, %cst_46 {dimension_numbers = #tpu.dot_dimension_numbers<[1], [0], [0], [1], [0, 0, 1, 1], [], []>} : vector<128x8xf32>, vector<8x128xf32>, vector<128x128xf32> -> vector<128x128xf32>
    %135 = arith.addf %134, %127 : vector<128x128xf32>
    %cst_47 = arith.constant dense<0xFF800000> : vector<128xf32>
    %136 = vector.multi_reduction <maximumf>, %135, %cst_47 [1] : vector<128x128xf32> to vector<128xf32>
    %137 = vector.shape_cast %136 : vector<128xf32> to vector<128x1xf32>
    %138 = vector.broadcast %137 : vector<128x1xf32> to vector<128x128xf32>
    %139 = arith.subf %135, %138 : vector<128x128xf32>
    %140 = math.exp %139 : vector<128x128xf32>
    %cst_48 = arith.constant dense<0.000000e+00> : vector<128xf32>
    %141 = vector.multi_reduction <add>, %140, %cst_48 [1] : vector<128x128xf32> to vector<128xf32>
    %142 = vector.shape_cast %141 : vector<128xf32> to vector<128x1xf32>
    %143 = tpu.reciprocal %142 {approx = true} : vector<128x1xf32> -> vector<128x1xf32>
    %144 = vector.broadcast %143 : vector<128x1xf32> to vector<128x128xf32>
    %145 = arith.mulf %140, %144 : vector<128x128xf32>
    %146 = vector.extract_strided_slice %131 {offsets = [0, 0], sizes = [128, 8], strides = [1, 1]} : vector<128x16xf32> to vector<128x8xf32>
    %cst_49 = arith.constant dense<0.000000e+00> : vector<128x8xf32>
    %147 = tpu.matmul %145, %146, %cst_49 {dimension_numbers = #tpu.dot_dimension_numbers<[1], [0], [0], [1], [0, 0, 1, 1], [], []>} : vector<128x128xf32>, vector<128x8xf32>, vector<128x8xf32> -> vector<128x8xf32>
    %148 = tpu.transpose %147, [1, 0] : vector<128x8xf32> -> vector<8x128xf32>
    %149 = vector.extract_strided_slice %81 {offsets = [0, 0], sizes = [8, 128], strides = [1, 1]} : vector<16x128xf32> to vector<8x128xf32>
    %150 = arith.addf %148, %149 : vector<8x128xf32>
    %151 = vector.extract_strided_slice %129 {offsets = [0, 8], sizes = [128, 8], strides = [1, 1]} : vector<128x16xf32> to vector<128x8xf32>
    %152 = vector.extract_strided_slice %30 {offsets = [24, 0], sizes = [8, 128], strides = [1, 1]} : vector<32x128xf32> to vector<8x128xf32>
    %cst_50 = arith.constant dense<0.000000e+00> : vector<128x128xf32>
    %153 = tpu.matmul %151, %152, %cst_50 {dimension_numbers = #tpu.dot_dimension_numbers<[1], [0], [0], [1], [0, 0, 1, 1], [], []>} : vector<128x8xf32>, vector<8x128xf32>, vector<128x128xf32> -> vector<128x128xf32>
    %154 = arith.addf %153, %127 : vector<128x128xf32>
    %cst_51 = arith.constant dense<0xFF800000> : vector<128xf32>
    %155 = vector.multi_reduction <maximumf>, %154, %cst_51 [1] : vector<128x128xf32> to vector<128xf32>
    %156 = vector.shape_cast %155 : vector<128xf32> to vector<128x1xf32>
    %157 = vector.broadcast %156 : vector<128x1xf32> to vector<128x128xf32>
    %158 = arith.subf %154, %157 : vector<128x128xf32>
    %159 = math.exp %158 : vector<128x128xf32>
    %cst_52 = arith.constant dense<0.000000e+00> : vector<128xf32>
    %160 = vector.multi_reduction <add>, %159, %cst_52 [1] : vector<128x128xf32> to vector<128xf32>
    %161 = vector.shape_cast %160 : vector<128xf32> to vector<128x1xf32>
    %162 = tpu.reciprocal %161 {approx = true} : vector<128x1xf32> -> vector<128x1xf32>
    %163 = vector.broadcast %162 : vector<128x1xf32> to vector<128x128xf32>
    %164 = arith.mulf %159, %163 : vector<128x128xf32>
    %165 = vector.extract_strided_slice %131 {offsets = [0, 8], sizes = [128, 8], strides = [1, 1]} : vector<128x16xf32> to vector<128x8xf32>
    %cst_53 = arith.constant dense<0.000000e+00> : vector<128x8xf32>
    %166 = tpu.matmul %164, %165, %cst_53 {dimension_numbers = #tpu.dot_dimension_numbers<[1], [0], [0], [1], [0, 0, 1, 1], [], []>} : vector<128x128xf32>, vector<128x8xf32>, vector<128x8xf32> -> vector<128x8xf32>
    %167 = tpu.transpose %166, [1, 0] : vector<128x8xf32> -> vector<8x128xf32>
    %168 = vector.extract_strided_slice %81 {offsets = [8, 0], sizes = [8, 128], strides = [1, 1]} : vector<16x128xf32> to vector<8x128xf32>
    %169 = arith.addf %167, %168 : vector<8x128xf32>
    %170 = tpu.concatenate %106, %125, %150, %169 in 0 : vector<8x128xf32>, vector<8x128xf32>, vector<8x128xf32>, vector<8x128xf32> -> vector<32x128xf32>
    %c96 = arith.constant 96 : index
    %c0_54 = arith.constant 0 : index
    %171 = vector.load %arg4[%c96, %c0_54] : memref<304x32xf32, #tpu.memory_space<vmem>>, vector<32x32xf32>
    %cst_55 = arith.constant dense<0.000000e+00> : vector<32x128xf32>
    %172 = tpu.matmul %171, %170, %cst_55 {dimension_numbers = #tpu.dot_dimension_numbers<[1], [0], [0], [1], [0, 0, 1, 1], [], []>} : vector<32x32xf32>, vector<32x128xf32>, vector<32x128xf32> -> vector<32x128xf32>
    %173 = arith.addf %1, %172 : vector<32x128xf32>
    %c224 = arith.constant 224 : index
    %c0_56 = arith.constant 0 : index
    %174 = vector.load %arg6[%c224, %c0_56] : memref<672x1xf32, #tpu.memory_space<vmem>>, vector<32x1xf32>
    %175 = vector.broadcast %174 : vector<32x1xf32> to vector<32x128xf32>
    %176 = arith.addf %173, %175 : vector<32x128xf32>
    %c64 = arith.constant 64 : index
    %c0_57 = arith.constant 0 : index
    %177 = vector.load %arg6[%c64, %c0_57] : memref<672x1xf32, #tpu.memory_space<vmem>>, vector<32x1xf32>
    %c96_58 = arith.constant 96 : index
    %c0_59 = arith.constant 0 : index
    %178 = vector.load %arg6[%c96_58, %c0_59] : memref<672x1xf32, #tpu.memory_space<vmem>>, vector<32x1xf32>
    %cst_60 = arith.constant dense<0.000000e+00> : vector<128xf32>
    %179 = vector.multi_reduction <add>, %176, %cst_60 [0] : vector<32x128xf32> to vector<128xf32>
    %180 = vector.shape_cast %179 : vector<128xf32> to vector<1x128xf32>
    %cst_61 = arith.constant 3.200000e+01 : f32
    %181 = vector.broadcast %cst_61 : f32 to vector<1x128xf32>
    %182 = arith.divf %180, %181 : vector<1x128xf32>
    %183 = vector.broadcast %182 : vector<1x128xf32> to vector<32x128xf32>
    %184 = arith.subf %176, %183 : vector<32x128xf32>
    %185 = arith.mulf %184, %184 : vector<32x128xf32>
    %cst_62 = arith.constant dense<0.000000e+00> : vector<128xf32>
    %186 = vector.multi_reduction <add>, %185, %cst_62 [0] : vector<32x128xf32> to vector<128xf32>
    %187 = vector.shape_cast %186 : vector<128xf32> to vector<1x128xf32>
    %cst_63 = arith.constant 3.200000e+01 : f32
    %188 = vector.broadcast %cst_63 : f32 to vector<1x128xf32>
    %189 = arith.divf %187, %188 : vector<1x128xf32>
    %cst_64 = arith.constant 9.99999974E-6 : f32
    %190 = vector.broadcast %cst_64 : f32 to vector<1x128xf32>
    %191 = arith.addf %189, %190 : vector<1x128xf32>
    %192 = math.rsqrt %191 : vector<1x128xf32>
    %193 = vector.broadcast %192 : vector<1x128xf32> to vector<32x128xf32>
    %194 = arith.mulf %184, %193 : vector<32x128xf32>
    %195 = vector.broadcast %177 : vector<32x1xf32> to vector<32x128xf32>
    %196 = arith.mulf %194, %195 : vector<32x128xf32>
    %197 = vector.broadcast %178 : vector<32x1xf32> to vector<32x128xf32>
    %198 = arith.addf %196, %197 : vector<32x128xf32>
    %c128_65 = arith.constant 128 : index
    %c0_66 = arith.constant 0 : index
    %199 = vector.load %arg4[%c128_65, %c0_66] : memref<304x32xf32, #tpu.memory_space<vmem>>, vector<176x32xf32>
    %cst_67 = arith.constant dense<0.000000e+00> : vector<176x128xf32>
    %200 = tpu.matmul %199, %198, %cst_67 {dimension_numbers = #tpu.dot_dimension_numbers<[1], [0], [0], [1], [0, 0, 1, 1], [], []>} : vector<176x32xf32>, vector<32x128xf32>, vector<176x128xf32> -> vector<176x128xf32>
    %c256 = arith.constant 256 : index
    %c0_68 = arith.constant 0 : index
    %201 = vector.load %arg6[%c256, %c0_68] : memref<672x1xf32, #tpu.memory_space<vmem>>, vector<176x1xf32>
    %202 = vector.broadcast %201 : vector<176x1xf32> to vector<176x128xf32>
    %203 = arith.addf %200, %202 : vector<176x128xf32>
    %cst_69 = arith.constant 0.000000e+00 : f32
    %204 = vector.broadcast %cst_69 : f32 to vector<176x128xf32>
    %c432 = arith.constant 432 : index
    %c0_70 = arith.constant 0 : index
    %205 = vector.load %arg6[%c432, %c0_70] : memref<672x1xf32, #tpu.memory_space<vmem>>, vector<176x1xf32>
    %206 = vector.broadcast %205 : vector<176x1xf32> to vector<176x128xf32>
    %207 = arith.addf %204, %206 : vector<176x128xf32>
    %c9_i32 = arith.constant 9 : i32
    %208 = tpu.dynamic_rotate %203 by %c9_i32 dim 1 : vector<176x128xf32>, i32 -> vector<176x128xf32>
    %c0_71 = arith.constant 0 : index
    %c0_72 = arith.constant 0 : index
    %209 = vector.load %arg8[%c0_71, %c0_72] : memref<176x9xf32, #tpu.memory_space<vmem>>, vector<176x1xf32>
    %210 = vector.broadcast %209 : vector<176x1xf32> to vector<176x128xf32>
    %211 = arith.mulf %208, %210 : vector<176x128xf32>
    %c6 = arith.constant 6 : index
    %c0_73 = arith.constant 0 : index
    %212 = vector.load %arg3[%c6, %c0_73] : memref<15x128xf32, #tpu.memory_space<vmem>>, vector<1x128xf32>
    %213 = vector.broadcast %212 : vector<1x128xf32> to vector<176x128xf32>
    %214 = arith.mulf %211, %213 : vector<176x128xf32>
    %215 = arith.addf %207, %214 : vector<176x128xf32>
    %c8_i32_74 = arith.constant 8 : i32
    %216 = tpu.dynamic_rotate %203 by %c8_i32_74 dim 1 : vector<176x128xf32>, i32 -> vector<176x128xf32>
    %c0_75 = arith.constant 0 : index
    %c1_76 = arith.constant 1 : index
    %217 = vector.load %arg8[%c0_75, %c1_76] : memref<176x9xf32, #tpu.memory_space<vmem>>, vector<176x1xf32>
    %218 = vector.broadcast %217 : vector<176x1xf32> to vector<176x128xf32>
    %219 = arith.mulf %216, %218 : vector<176x128xf32>
    %c7 = arith.constant 7 : index
    %c0_77 = arith.constant 0 : index
    %220 = vector.load %arg3[%c7, %c0_77] : memref<15x128xf32, #tpu.memory_space<vmem>>, vector<1x128xf32>
    %221 = vector.broadcast %220 : vector<1x128xf32> to vector<176x128xf32>
    %222 = arith.mulf %219, %221 : vector<176x128xf32>
    %223 = arith.addf %215, %222 : vector<176x128xf32>
    %c7_i32 = arith.constant 7 : i32
    %224 = tpu.dynamic_rotate %203 by %c7_i32 dim 1 : vector<176x128xf32>, i32 -> vector<176x128xf32>
    %c0_78 = arith.constant 0 : index
    %c2_79 = arith.constant 2 : index
    %225 = vector.load %arg8[%c0_78, %c2_79] : memref<176x9xf32, #tpu.memory_space<vmem>>, vector<176x1xf32>
    %226 = vector.broadcast %225 : vector<176x1xf32> to vector<176x128xf32>
    %227 = arith.mulf %224, %226 : vector<176x128xf32>
    %c8 = arith.constant 8 : index
    %c0_80 = arith.constant 0 : index
    %228 = vector.load %arg3[%c8, %c0_80] : memref<15x128xf32, #tpu.memory_space<vmem>>, vector<1x128xf32>
    %229 = vector.broadcast %228 : vector<1x128xf32> to vector<176x128xf32>
    %230 = arith.mulf %227, %229 : vector<176x128xf32>
    %231 = arith.addf %223, %230 : vector<176x128xf32>
    %c1_i32_81 = arith.constant 1 : i32
    %232 = tpu.dynamic_rotate %203 by %c1_i32_81 dim 1 : vector<176x128xf32>, i32 -> vector<176x128xf32>
    %c0_82 = arith.constant 0 : index
    %c3_83 = arith.constant 3 : index
    %233 = vector.load %arg8[%c0_82, %c3_83] : memref<176x9xf32, #tpu.memory_space<vmem>>, vector<176x1xf32>
    %234 = vector.broadcast %233 : vector<176x1xf32> to vector<176x128xf32>
    %235 = arith.mulf %232, %234 : vector<176x128xf32>
    %c9 = arith.constant 9 : index
    %c0_84 = arith.constant 0 : index
    %236 = vector.load %arg3[%c9, %c0_84] : memref<15x128xf32, #tpu.memory_space<vmem>>, vector<1x128xf32>
    %237 = vector.broadcast %236 : vector<1x128xf32> to vector<176x128xf32>
    %238 = arith.mulf %235, %237 : vector<176x128xf32>
    %239 = arith.addf %231, %238 : vector<176x128xf32>
    %c0_85 = arith.constant 0 : index
    %c4 = arith.constant 4 : index
    %240 = vector.load %arg8[%c0_85, %c4] : memref<176x9xf32, #tpu.memory_space<vmem>>, vector<176x1xf32>
    %241 = vector.broadcast %240 : vector<176x1xf32> to vector<176x128xf32>
    %242 = arith.mulf %203, %241 : vector<176x128xf32>
    %243 = arith.addf %239, %242 : vector<176x128xf32>
    %c127_i32_86 = arith.constant 127 : i32
    %244 = tpu.dynamic_rotate %203 by %c127_i32_86 dim 1 : vector<176x128xf32>, i32 -> vector<176x128xf32>
    %c0_87 = arith.constant 0 : index
    %c5_88 = arith.constant 5 : index
    %245 = vector.load %arg8[%c0_87, %c5_88] : memref<176x9xf32, #tpu.memory_space<vmem>>, vector<176x1xf32>
    %246 = vector.broadcast %245 : vector<176x1xf32> to vector<176x128xf32>
    %247 = arith.mulf %244, %246 : vector<176x128xf32>
    %c11 = arith.constant 11 : index
    %c0_89 = arith.constant 0 : index
    %248 = vector.load %arg3[%c11, %c0_89] : memref<15x128xf32, #tpu.memory_space<vmem>>, vector<1x128xf32>
    %249 = vector.broadcast %248 : vector<1x128xf32> to vector<176x128xf32>
    %250 = arith.mulf %247, %249 : vector<176x128xf32>
    %251 = arith.addf %243, %250 : vector<176x128xf32>
    %c121_i32 = arith.constant 121 : i32
    %252 = tpu.dynamic_rotate %203 by %c121_i32 dim 1 : vector<176x128xf32>, i32 -> vector<176x128xf32>
    %c0_90 = arith.constant 0 : index
    %c6_91 = arith.constant 6 : index
    %253 = vector.load %arg8[%c0_90, %c6_91] : memref<176x9xf32, #tpu.memory_space<vmem>>, vector<176x1xf32>
    %254 = vector.broadcast %253 : vector<176x1xf32> to vector<176x128xf32>
    %255 = arith.mulf %252, %254 : vector<176x128xf32>
    %c12 = arith.constant 12 : index
    %c0_92 = arith.constant 0 : index
    %256 = vector.load %arg3[%c12, %c0_92] : memref<15x128xf32, #tpu.memory_space<vmem>>, vector<1x128xf32>
    %257 = vector.broadcast %256 : vector<1x128xf32> to vector<176x128xf32>
    %258 = arith.mulf %255, %257 : vector<176x128xf32>
    %259 = arith.addf %251, %258 : vector<176x128xf32>
    %c120_i32_93 = arith.constant 120 : i32
    %260 = tpu.dynamic_rotate %203 by %c120_i32_93 dim 1 : vector<176x128xf32>, i32 -> vector<176x128xf32>
    %c0_94 = arith.constant 0 : index
    %c7_95 = arith.constant 7 : index
    %261 = vector.load %arg8[%c0_94, %c7_95] : memref<176x9xf32, #tpu.memory_space<vmem>>, vector<176x1xf32>
    %262 = vector.broadcast %261 : vector<176x1xf32> to vector<176x128xf32>
    %263 = arith.mulf %260, %262 : vector<176x128xf32>
    %c13 = arith.constant 13 : index
    %c0_96 = arith.constant 0 : index
    %264 = vector.load %arg3[%c13, %c0_96] : memref<15x128xf32, #tpu.memory_space<vmem>>, vector<1x128xf32>
    %265 = vector.broadcast %264 : vector<1x128xf32> to vector<176x128xf32>
    %266 = arith.mulf %263, %265 : vector<176x128xf32>
    %267 = arith.addf %259, %266 : vector<176x128xf32>
    %c119_i32 = arith.constant 119 : i32
    %268 = tpu.dynamic_rotate %203 by %c119_i32 dim 1 : vector<176x128xf32>, i32 -> vector<176x128xf32>
    %c0_97 = arith.constant 0 : index
    %c8_98 = arith.constant 8 : index
    %269 = vector.load %arg8[%c0_97, %c8_98] : memref<176x9xf32, #tpu.memory_space<vmem>>, vector<176x1xf32>
    %270 = vector.broadcast %269 : vector<176x1xf32> to vector<176x128xf32>
    %271 = arith.mulf %268, %270 : vector<176x128xf32>
    %c14 = arith.constant 14 : index
    %c0_99 = arith.constant 0 : index
    %272 = vector.load %arg3[%c14, %c0_99] : memref<15x128xf32, #tpu.memory_space<vmem>>, vector<1x128xf32>
    %273 = vector.broadcast %272 : vector<1x128xf32> to vector<176x128xf32>
    %274 = arith.mulf %271, %273 : vector<176x128xf32>
    %275 = arith.addf %267, %274 : vector<176x128xf32>
    %276 = vector.extract_strided_slice %275 {offsets = [0, 0], sizes = [88, 128], strides = [1, 1]} : vector<176x128xf32> to vector<88x128xf32>
    %277 = vector.extract_strided_slice %275 {offsets = [88, 0], sizes = [88, 128], strides = [1, 1]} : vector<176x128xf32> to vector<88x128xf32>
    %cst_100 = arith.constant 5.000000e-01 : f32
    %278 = vector.broadcast %cst_100 : f32 to vector<88x128xf32>
    %279 = arith.mulf %278, %276 : vector<88x128xf32>
    %cst_101 = arith.constant 0.707106769 : f32
    %280 = vector.broadcast %cst_101 : f32 to vector<88x128xf32>
    %281 = arith.mulf %276, %280 : vector<88x128xf32>
    %cst_102 = arith.constant 0.000000e+00 : f32
    %282 = vector.broadcast %cst_102 : f32 to vector<88x128xf32>
    %283 = arith.cmpf oge, %281, %282 : vector<88x128xf32>
    %cst_103 = arith.constant 1.000000e+00 : f32
    %cst_104 = arith.constant -1.000000e+00 : f32
    %284 = vector.broadcast %cst_103 : f32 to vector<88x128xf32>
    %285 = vector.broadcast %cst_104 : f32 to vector<88x128xf32>
    %286 = arith.select %283, %284, %285 : vector<88x128xi1>, vector<88x128xf32>
    %287 = math.absf %281 : vector<88x128xf32>
    %cst_105 = arith.constant 0.327591091 : f32
    %288 = vector.broadcast %cst_105 : f32 to vector<88x128xf32>
    %289 = arith.mulf %288, %287 : vector<88x128xf32>
    %cst_106 = arith.constant 1.000000e+00 : f32
    %290 = vector.broadcast %cst_106 : f32 to vector<88x128xf32>
    %291 = arith.addf %290, %289 : vector<88x128xf32>
    %cst_107 = arith.constant 1.000000e+00 : f32
    %292 = vector.broadcast %cst_107 : f32 to vector<88x128xf32>
    %293 = arith.divf %292, %291 : vector<88x128xf32>
    %cst_108 = arith.constant 1.06140542 : f32
    %294 = vector.broadcast %cst_108 : f32 to vector<88x128xf32>
    %295 = arith.mulf %294, %293 : vector<88x128xf32>
    %cst_109 = arith.constant -1.45315206 : f32
    %296 = vector.broadcast %cst_109 : f32 to vector<88x128xf32>
    %297 = arith.addf %295, %296 : vector<88x128xf32>
    %298 = arith.mulf %297, %293 : vector<88x128xf32>
    %cst_110 = arith.constant 1.42141378 : f32
    %299 = vector.broadcast %cst_110 : f32 to vector<88x128xf32>
    %300 = arith.addf %298, %299 : vector<88x128xf32>
    %301 = arith.mulf %300, %293 : vector<88x128xf32>
    %cst_111 = arith.constant -0.284496725 : f32
    %302 = vector.broadcast %cst_111 : f32 to vector<88x128xf32>
    %303 = arith.addf %301, %302 : vector<88x128xf32>
    %304 = arith.mulf %303, %293 : vector<88x128xf32>
    %cst_112 = arith.constant 0.254829586 : f32
    %305 = vector.broadcast %cst_112 : f32 to vector<88x128xf32>
    %306 = arith.addf %304, %305 : vector<88x128xf32>
    %307 = arith.mulf %306, %293 : vector<88x128xf32>
    %cst_113 = arith.constant 0.000000e+00 : f32
    %308 = vector.broadcast %cst_113 : f32 to vector<88x128xf32>
    %309 = arith.subf %308, %287 : vector<88x128xf32>
    %310 = arith.mulf %309, %287 : vector<88x128xf32>
    %311 = math.exp %310 : vector<88x128xf32>
    %312 = arith.mulf %307, %311 : vector<88x128xf32>
    %cst_114 = arith.constant 1.000000e+00 : f32
    %313 = vector.broadcast %cst_114 : f32 to vector<88x128xf32>
    %314 = arith.subf %313, %312 : vector<88x128xf32>
    %315 = arith.mulf %286, %314 : vector<88x128xf32>
    %cst_115 = arith.constant 1.000000e+00 : f32
    %316 = vector.broadcast %cst_115 : f32 to vector<88x128xf32>
    %317 = arith.addf %316, %315 : vector<88x128xf32>
    %318 = arith.mulf %279, %317 : vector<88x128xf32>
    %319 = arith.mulf %318, %277 : vector<88x128xf32>
    %c0_116 = arith.constant 0 : index
    %c0_117 = arith.constant 0 : index
    %320 = vector.load %arg5[%c0_116, %c0_117] : memref<32x88xf32, #tpu.memory_space<vmem>>, vector<32x88xf32>
    %cst_118 = arith.constant dense<0.000000e+00> : vector<32x128xf32>
    %321 = tpu.matmul %320, %319, %cst_118 {dimension_numbers = #tpu.dot_dimension_numbers<[1], [0], [0], [1], [0, 0, 1, 1], [], []>} : vector<32x88xf32>, vector<88x128xf32>, vector<32x128xf32> -> vector<32x128xf32>
    %322 = arith.addf %176, %321 : vector<32x128xf32>
    %c608 = arith.constant 608 : index
    %c0_119 = arith.constant 0 : index
    %323 = vector.load %arg6[%c608, %c0_119] : memref<672x1xf32, #tpu.memory_space<vmem>>, vector<32x1xf32>
    %324 = vector.broadcast %323 : vector<32x1xf32> to vector<32x128xf32>
    %325 = arith.addf %322, %324 : vector<32x128xf32>
    %326 = vector.shape_cast %325 : vector<32x128xf32> to vector<1x32x128xf32>
    %c0_120 = arith.constant 0 : index
    %c0_121 = arith.constant 0 : index
    %c0_122 = arith.constant 0 : index
    %327 = vector.load %arg9[%c0_120, %c0_121, %c0_122] : memref<1x32x128xf32, #tpu.memory_space<vmem>>, vector<1x32x128xf32>
    tpu.vector_store %arg9[%c0_120, %c0_121, %c0_122], %326 {strides = array<i32>} : memref<1x32x128xf32, #tpu.memory_space<vmem>>, vector<1x32x128xf32>,
    return
  }
  func.func @transform_0(%arg0: i32) -> (i32, i32, i32) {
    %c0_i32 = arith.constant 0 : i32
    %c0_i32_0 = arith.constant 0 : i32
    %c0_i32_1 = arith.constant 0 : i32
    return %arg0, %c0_i32, %c0_i32_0 : i32, i32, i32
  }
  func.func @transform_1(%arg0: i32) -> (i32, i32, i32) {
    %c0_i32 = arith.constant 0 : i32
    %c0_i32_0 = arith.constant 0 : i32
    %c0_i32_1 = arith.constant 0 : i32
    %c0_i32_2 = arith.constant 0 : i32
    return %c0_i32, %c0_i32_0, %c0_i32_1 : i32, i32, i32
  }
  func.func @transform_2(%arg0: i32) -> (i32, i32) {
    %c0_i32 = arith.constant 0 : i32
    %c0_i32_0 = arith.constant 0 : i32
    %c0_i32_1 = arith.constant 0 : i32
    return %c0_i32, %c0_i32_0 : i32, i32
  }
  func.func @transform_3(%arg0: i32) -> (i32, i32) {
    %c0_i32 = arith.constant 0 : i32
    %c0_i32_0 = arith.constant 0 : i32
    %c0_i32_1 = arith.constant 0 : i32
    return %c0_i32, %c0_i32_0 : i32, i32
  }
  func.func @transform_4(%arg0: i32) -> (i32, i32) {
    %c0_i32 = arith.constant 0 : i32
    %c0_i32_0 = arith.constant 0 : i32
    %c0_i32_1 = arith.constant 0 : i32
    return %c0_i32, %c0_i32_0 : i32, i32
  }
  func.func @transform_5(%arg0: i32) -> (i32, i32) {
    %c0_i32 = arith.constant 0 : i32
    %c0_i32_0 = arith.constant 0 : i32
    %c0_i32_1 = arith.constant 0 : i32
    return %c0_i32, %c0_i32_0 : i32, i32
  }
  func.func @transform_6(%arg0: i32) -> (i32, i32) {
    %c0_i32 = arith.constant 0 : i32
    %c0_i32_0 = arith.constant 0 : i32
    %c0_i32_1 = arith.constant 0 : i32
    return %c0_i32, %c0_i32_0 : i32, i32
  }
  func.func @transform_7(%arg0: i32) -> (i32, i32) {
    %c0_i32 = arith.constant 0 : i32
    %c0_i32_0 = arith.constant 0 : i32
    %c0_i32_1 = arith.constant 0 : i32
    return %c0_i32, %c0_i32_0 : i32, i32
  }
  func.func @transform_8(%arg0: i32) -> (i32, i32, i32) {
    %c0_i32 = arith.constant 0 : i32
    %c0_i32_0 = arith.constant 0 : i32
    %c0_i32_1 = arith.constant 0 : i32
    return %arg0, %c0_i32, %c0_i32_0 : i32, i32, i32
  }
}

</mosaic_0001>

<bundles_post_ra>
// kernel: ssmtda_forward.1
= control target key start
LH: loop header
LB: loop body
LE: loop exit
PB: predicated region body
PF: predicated region fallthrough
CT: control target
= control target key end

     0   :  { %v11231_v0 = vmov 0   ;;  %vm208_vm0 = vcmask 261120   ;;  %v11235_v37 = vmov 1   ;;  %v11233_v40 = vmov 2   ;;  %s6858_s19 = smov 8   ;;  %s6859_s20 = smov 120   ;;  %s11222_s5 = inlined_call_operand.vmem [shape: f32[672,1], index: 5, kind: input, shape index: {}]   ;;  %s11223_s3 = inlined_call_operand.vmem [shape: f32[304,32], index: 3, kind: input, shape index: {}]   ;;  %s11224_s0 = inlined_call_operand.vmem [shape: f32[1,32,128], index: 0, kind: input, shape index: {}]   ;;  %s11225_s6 = inlined_call_operand.vmem [shape: f32[32,3], index: 6, kind: input, shape index: {}]   ;;  %s11226_s7 = inlined_call_operand.vmem [shape: f32[176,9], index: 7, kind: input, shape index: {}]   ;;  %s11227_s1 = inlined_call_operand.vmem [shape: f32[2,128,128], index: 1, kind: input, shape index: {}]   ;;  %s11228_s2 = inlined_call_operand.vmem [shape: f32[15,128], index: 2, kind: input, shape index: {}]   ;;  %s11229_s4 = inlined_call_operand.vmem [shape: f32[32,88], index: 4, kind: input, shape index: {}]   ;;  %s11230_s8 = inlined_call_operand.vmem [shape: f32[1,32,128], index: 8, kind: output, shape index: {}]  }
   0x1   :  { %6452 = vset.pattern.permute.xlu1 %v11231_v0  ;;  %6451 = vset.pattern.permute.xlu0 %v11231_v0  ;;  %v35_v1 = vld [vmem:[%s11222_s5 + $0x10] sm:$0xff]  ;;  %v33_v2 = vld [vmem:[%s11222_s5] sm:$0xff]  ;;  %v36_v3 = vld [vmem:[%s11222_s5 + $0x18] sm:$0xff]  ;;  %s6860_s21 = smov 1   ;;  %s6861_s22 = smov 127   ;;  %vm570_vm1 = vcmask 64512  }
   0x2   :  { %88 = vperm.xlu1 %6452, %v35_v1   ;;  %78 = vperm.xlu0 %6451, %v33_v2   ;;  %v34_v4 = vld [vmem:[%s11222_s5 + $0x8] sm:$0xff]  ;;  %v37_v6 = vld [vmem:[%s11222_s5 + $0x20] sm:$0xff]  ;;  %v40_v7 = vld [vmem:[%s11222_s5 + $0x38] sm:$0xff]  ;;  %s6869_s15 = smov 9   ;;  %s6870_s16 = smov 121   ;;  %vm5596_vm6 = vcmask 719872  }
   0x3   :  { %v38_v5 = vld [vmem:[%s11222_s5 + $0x28] sm:$0xff]  ;;  %v39_v8 = vld [vmem:[%s11222_s5 + $0x30] sm:$0xff]  ;;  %v136_v10 = vld [vmem:[%s11222_s5 + $0x80] sm:$0xff]  ;;  %s6871_s17 = smov 119  }
   0x4   :  { %v137_v9 = vld [vmem:[%s11222_s5 + $0x88] sm:$0xff]  ;;  %v139_v11 = vld [vmem:[%s11222_s5 + $0x98] sm:$0xff]  ;;  %v138_v12 = vld [vmem:[%s11222_s5 + $0x90] sm:$0xff] }
   0x5   :  { %v124_v13 = vld [vmem:[%s11223_s3] sm:$0xff]  ;;  %v141_v14 = vld [vmem:[%s11222_s5 + $0xa8] sm:$0xff]  ;;  %v143_v18 = vld [vmem:[%s11222_s5 + $0xb8] sm:$0xff] }
   0x6   :  { %93 = vperm.xlu1 %6452, %v36_v3   ;;  %83 = vperm.xlu0 %6451, %v34_v4   ;;  %v140_v15 = vld [vmem:[%s11222_s5 + $0xa0] sm:$0xff]  ;;  %v30_v17 = vld [vmem:[%s11224_s0 + $0x8] sm:$0xff]  ;;  %v142_v19 = vld [vmem:[%s11222_s5 + $0xb0] sm:$0xff] }
   0x7   :  { %6077 = vmatprep.mubr.msk.f32.mxu0 %vm208_vm0, %v124_v13  ;;  %v29_v16 = vld [vmem:[%s11224_s0] sm:$0xff]  ;;  %v31_v21 = vld [vmem:[%s11224_s0 + $0x10] sm:$0xff]  ;;  %v145_v22 = vld [vmem:[%s11222_s5 + $0xc8] sm:$0xff] }
   0x8   :  { %v41_v20 = vadd.f32 %v30_v17, %v29_v16  ;;  %v144_v23 = vld [vmem:[%s11222_s5 + $0xc0] sm:$0xff]  ;;  %v32_v25 = vld [vmem:[%s11224_s0 + $0x18] sm:$0xff]  ;;  %v146_v27 = vld [vmem:[%s11222_s5 + $0xd0] sm:$0xff] }
   0x9   :  { %v147_v26 = vld [vmem:[%s11222_s5 + $0xd8] sm:$0xff]  ;;  %v371_v29 = vld [vmem:[%s11222_s5 + $0x288] sm:$0xff]  ;;  %v370_v30 = vld [vmem:[%s11222_s5 + $0x280] sm:$0xff] }
   0xa   :  { %107 = vperm.xlu1 %6452, %v38_v5   ;;  %102 = vperm.xlu0 %6451, %v37_v6   ;;  %v42_v24 = vadd.f32 %v41_v20, %v31_v21  ;;  %v389_v32 = vld [vmem:[%s11225_s6 + $0x8] sm:$0xff]  ;;  %v388_v33 = vld [vmem:[%s11225_s6] sm:$0xff]  ;;  %v464_v35 = vld [vmem:[%s11225_s6 + $0x10] sm:$0xff] }
   0xb   :  { %v446_v41 = vld [vmem:[%s11222_s5 + $0x290] sm:$0xff]  ;;  %v447_v43 = vld [vmem:[%s11222_s5 + $0x298] sm:$0xff]  ;;  %v2817_v56 = vld [vmem:[%s11222_s5 + $0xe0] sm:$0xff] }
   0xc   :  { %v43_v28 = vadd.f32 %v42_v24, %v32_v25  ;;  %v465_v45 = vld [vmem:[%s11225_s6 + $0x18] sm:$0xff]  ;;  %v2818_v58 = vld [vmem:[%s11222_s5 + $0xe8] sm:$0xff]  ;;  %v2819_v60 = vld [vmem:[%s11222_s5 + $0xf0] sm:$0xff] }
   0xd   :  { %v2820_v62 = vld [vmem:[%s11222_s5 + $0xf8] sm:$0xff]  ;;  %v2845_v1 = vld [vmem:[%s11222_s5 + $0x40] sm:$0xff]  ;;  %v2846_v3 = vld [vmem:[%s11222_s5 + $0x48] sm:$0xff] }
   0xe   :  { %117 = vperm.xlu1 %6452, %v40_v7   ;;  %112 = vperm.xlu0 %6451, %v39_v8   ;;  %v44_v31 = vrot.slane %v43_v28, 4  ;;  %v2847_v5 = vld [vmem:[%s11222_s5 + $0x50] sm:$0xff]  ;;  %v2848_v7 = vld [vmem:[%s11222_s5 + $0x58] sm:$0xff] }
   0xf   :  { %v2852_v13 = vld [vmem:[%s11222_s5 + $0x78] sm:$0xff] }
  0x10   :  { %v45_v34 = vadd.f32 %v44_v31, %v43_v28 }
  0x12   :  { %155 = vperm.xlu1 %6452, %v137_v9   ;;  %150 = vperm.xlu0 %6451, %v136_v10   ;;  %v46_v36 = vrot.slane %v45_v34, 2  ;;  %v2849_v9 = vld [vmem:[%s11222_s5 + $0x60] sm:$0xff] }
  0x14   :  { %v47_v38 = vadd.f32 %v46_v36, %v45_v34 }
  0x16   :  { %165 = vperm.xlu1 %6452, %v139_v11   ;;  %160 = vperm.xlu0 %6451, %v138_v12   ;;  %v48_v39 = vrot.slane %v47_v38, 1  ;;  %v2850_v11 = vld [vmem:[%s11222_s5 + $0x68] sm:$0xff]  ;;  %v2851_v12 = vld [vmem:[%s11222_s5 + $0x70] sm:$0xff] }
  0x18   :  { %v49_v42 = vadd.f32 %v48_v39, %v47_v38  ;;  %v2960_v38 = vld [vmem:[%s11222_s5 + $0x118] sm:$0xff] }
  0x1a   :  { %175 = vperm.xlu1 %6452, %v141_v14   ;;  %170 = vperm.xlu0 %6451, %v140_v15   ;;  %v51_v44 = vmul.f32 0.03125, %v49_v42 }
  0x1c   :  { %v52_v46 = vsub.f32 %v29_v16, %v51_v44  ;;  %v53_v47 = vsub.f32 %v30_v17, %v51_v44  ;;  %v54_v48 = vsub.f32 %v31_v21, %v51_v44  ;;  %v55_v51 = vsub.f32 %v32_v25, %v51_v44  ;;  %v2957_v17 = vld [vmem:[%s11222_s5 + $0x100] sm:$0xff]  ;;  %v125_v44 = vld [vmem:[%s11223_s3 + $0x8] sm:$0xff] }
  0x1e   :  { %185 = vperm.xlu1 %6452, %v143_v18   ;;  %180 = vperm.xlu0 %6451, %v142_v19   ;;  %v56_v49 = vmul.f32 %v52_v46, %v52_v46  ;;  %v57_v50 = vmul.f32 %v53_v47, %v53_v47  ;;  %v58_v52 = vmul.f32 %v54_v48, %v54_v48 }
  0x1f   :  { %v59_v54 = vmul.f32 %v55_v51, %v55_v51 }
  0x20   :  { %v60_v53 = vadd.f32 %v57_v50, %v56_v49  ;;  %v129_v49 = vld [vmem:[%s11223_s3 + $0x28] sm:$0xff]  ;;  %v130_v50 = vld [vmem:[%s11223_s3 + $0x30] sm:$0xff] }
  0x22   :  { %195 = vperm.xlu1 %6452, %v145_v22   ;;  %190 = vperm.xlu0 %6451, %v144_v23   ;;  %v61_v55 = vadd.f32 %v60_v53, %v58_v52  ;;  %v2958_v22 = vld [vmem:[%s11222_s5 + $0x108] sm:$0xff]  ;;  %v132_v52 = vld [vmem:[%s11223_s3 + $0x40] sm:$0xff] }
  0x23   :  { %v133_v53 = vld [vmem:[%s11223_s3 + $0x48] sm:$0xff] }
  0x24   :  { %v62_v57 = vadd.f32 %v61_v55, %v59_v54  ;;  %v134_v54 = vld [vmem:[%s11223_s3 + $0x50] sm:$0xff]  ;;  %v135_v55 = vld [vmem:[%s11223_s3 + $0x58] sm:$0xff] }
  0x26   :  { %205 = vperm.xlu1 %6452, %v147_v26   ;;  %200 = vperm.xlu0 %6451, %v146_v27   ;;  %v63_v59 = vrot.slane %v62_v57, 4 }
  0x28   :  { %v64_v61 = vadd.f32 %v63_v59, %v62_v57 }
  0x2a   :  { %379 = vperm.xlu1 %6452, %v371_v29   ;;  %374 = vperm.xlu0 %6451, %v370_v30   ;;  %v65_v63 = vrot.slane %v64_v61, 2  ;;  %v2959_v29 = vld [vmem:[%s11222_s5 + $0x110] sm:$0xff] }
  0x2c   :  { %v66_v2 = vadd.f32 %v65_v63, %v64_v61 }
  0x2e   :  { %397 = vperm.xlu1 %6452, %v389_v32   ;;  %392 = vperm.xlu0 %6451, %v388_v33   ;;  %v67_v4 = vrot.slane %v66_v2, 1 }
  0x30   :  { %v68_v6 = vadd.f32 %v67_v4, %v66_v2 }
  0x32   :  { %468 = vperm.xlu0 %6451, %v464_v35   ;;  %6453 = vset.pattern.permute.xlu1 %v11235_v37  ;;  %v69_v8 = vmul.f32 0.03125, %v68_v6 }
  0x33   :  { %416 = vperm.xlu1 %6453, %v389_v32  }
  0x34   :  { %v70_v10 = vadd.f32 1e-05, %v69_v8 }
  0x36   :  { %6504 = vrsqrt.f32 %v70_v10 }
  0x37   :  { %6454 = vset.pattern.permute.xlu1 %v11233_v40 }
  0x38   :  { %428 = vperm.xlu1 %6454, %v388_v33  }
  0x3c   :  { %6455 = vset.pattern.permute.xlu1 %v11231_v0 }
  0x3d   :  { %450 = vperm.xlu1 %6455, %v446_v41  }
  0x40   :  { %v6505_v14 = vpop.eup %6504 }
  0x41   :  { %455 = vperm.xlu1 %6455, %v447_v43   ;;  %v72_v18 = vmul.f32 %v6505_v14, %v52_v46  ;;  %v73_v19 = vmul.f32 %v6505_v14, %v53_v47  ;;  %v74_v23 = vmul.f32 %v6505_v14, %v54_v48  ;;  %v75_v25 = vmul.f32 %v6505_v14, %v55_v51  ;;  %v2961_v43 = vld [vmem:[%s11222_s5 + $0x120] sm:$0xff]  ;;  %v2962_v46 = vld [vmem:[%s11222_s5 + $0x128] sm:$0xff]  ;;  %v127_v47 = vld [vmem:[%s11223_s3 + $0x18] sm:$0xff] }
  0x42   :  { %v128_v48 = vld [vmem:[%s11223_s3 + $0x20] sm:$0xff]  ;;  %v131_v51 = vld [vmem:[%s11223_s3 + $0x38] sm:$0xff] }
  0x45   :  { %473 = vperm.xlu1 %6455, %v465_v45  }
  0x49   :  { %6456 = vset.pattern.permute.xlu1 %v11235_v37  ;;  %v2976_v37 = vld [vmem:[%s11222_s5 + $0x198] sm:$0xff] }
  0x4a   :  { %488 = vperm.xlu1 %6456, %v464_v35  }
  0x4e   :  { %6457 = vset.pattern.permute.xlu1 %v11233_v40  ;;  %v2975_v40 = vld [vmem:[%s11222_s5 + $0x190] sm:$0xff] }
  0x4f   :  { %508 = vperm.xlu1 %6457, %v465_v45   ;;  %v126_v45 = vld [vmem:[%s11223_s3 + $0x10] sm:$0xff] }
  0x53   :  { %6458 = vset.pattern.permute.xlu1 %v11231_v0 }
  0x54   :  { %2823 = vperm.xlu1 %6458, %v2817_v56  }
  0x58   :  { %2828 = vperm.xlu1 %6458, %v2818_v58  }
  0x5c   :  { %2833 = vperm.xlu1 %6458, %v2819_v60  }
  0x60   :  { %2838 = vperm.xlu1 %6458, %v2820_v62  }
  0x64   :  { %2889 = vperm.xlu1 %6458, %v2845_v1  }
  0x68   :  { %2894 = vperm.xlu1 %6458, %v2846_v3  }
  0x6c   :  { %2899 = vperm.xlu1 %6458, %v2847_v5  }
  0x70   :  { %2904 = vperm.xlu1 %6458, %v2848_v7  }
  0x74   :  { %2913 = vperm.xlu1 %6458, %v2849_v9  }
  0x78   :  { %2918 = vperm.xlu1 %6458, %v2850_v11  }
  0x7c   :  { %2923 = vperm.xlu1 %6458, %v2851_v12  }
  0x80   :  { %2928 = vperm.xlu1 %6458, %v2852_v13  }
  0x81   :  { %v89_v15 = vpop.permute.xlu1 %88  ;;  %v79_v16 = vpop.permute.xlu0 %78 }
  0x82   :  { %v96_v24 = vmul.f32 %v79_v16, %v72_v18  ;;  %v98_v32 = vmul.f32 %v89_v15, %v74_v23 }
  0x84   :  { %2981 = vperm.xlu1 %6458, %v2957_v17  }
  0x85   :  { %v94_v20 = vpop.permute.xlu1 %93  ;;  %v84_v21 = vpop.permute.xlu0 %83 }
  0x86   :  { %v97_v26 = vmul.f32 %v84_v21, %v73_v19  ;;  %v99_v33 = vmul.f32 %v94_v20, %v75_v25 }
  0x88   :  { %2986 = vperm.xlu1 %6458, %v2958_v22  }
  0x89   :  { %v108_v27 = vpop.permute.xlu1 %107  ;;  %v103_v28 = vpop.permute.xlu0 %102 }
  0x8a   :  { %v121_v30 = vadd.f32 %v108_v27, %v97_v26  ;;  %v120_v31 = vadd.f32 %v103_v28, %v96_v24 }
  0x8c   :  { %v6386_v34 = vpack.c.bf16 %v121_v30, %v120_v31  ;;  %2991 = vperm.xlu1 %6458, %v2959_v29  }
  0x8d   :  { %v118_v35 = vpop.permute.xlu1 %117  ;;  %v113_v36 = vpop.permute.xlu0 %112 }
  0x8e   :  { %v123_v39 = vadd.f32 %v118_v35, %v99_v33  ;;  %v122_v41 = vadd.f32 %v113_v36, %v98_v32  ;;  %6387 = vmatprep.subr.bf16.mxu0 %v6386_v34 }
  0x8f   :  { %6389 = vmatpush3.bf16.msra.mxu0 %v6386_v34 }
  0x90   :  { %v6390_v42 = vpack.c.bf16 %v123_v39, %v122_v41  ;;  %2996 = vperm.xlu1 %6458, %v2960_v38  }
  0x91   :  { %v156_v56 = vpop.permute.xlu1 %155  ;;  %v151_v3 = vpop.permute.xlu0 %150 }
  0x92   :  { %6391 = vmatprep.subr.bf16.mxu0 %v6390_v42 }
  0x93   :  { %6393 = vmatpush3.bf16.msra.mxu0 %v6390_v42 }
  0x94   :  { %3001 = vperm.xlu1 %6458, %v2961_v43  }
  0x95   :  { %v166_v57 = vpop.permute.xlu1 %165  ;;  %v161_v5 = vpop.permute.xlu0 %160 }
  0x96   :  { %6078 = vmatmul.mubr.msk.f32.vlgmr.msra.gmra.mrb[0].mxu0 %vm208_vm0, %v125_v44 }
  0x97   :  { %6080 = vmatprep.mubr.msk.f32.mxu0 %vm208_vm0, %v126_v45 }
  0x98   :  { %3006 = vperm.xlu1 %6458, %v2962_v46  }
  0x99   :  { %v176_v58 = vpop.permute.xlu1 %175  ;;  %v171_v11 = vpop.permute.xlu0 %170 }
  0x9a   :  { %6081 = vmatmul.mubr.msk.f32.gmra.mrb[2].mxu0 %vm208_vm0, %v127_v47 }
  0x9b   :  { %6083 = vmatprep.mubr.msk.f32.mxu0 %vm208_vm0, %v128_v48 }
  0x9d   :  { %v7124_v59 = vpop.permute.xlu1 %185  ;;  %v7140_v19 = vpop.permute.xlu0 %180 }
  0x9e   :  { %6084 = vmatmul.mubr.msk.f32.gmra.mrb[4].mxu0 %vm208_vm0, %v129_v49 }
  0x9f   :  { %6086 = vmatprep.mubr.msk.f32.mxu0 %vm208_vm0, %v130_v50 }
  0xa1   :  { %v196_v60 = vpop.permute.xlu1 %195  ;;  %v191_v26 = vpop.permute.xlu0 %190 }
  0xa2   :  { %6087 = vmatmul.mubr.msk.f32.gmra.mrb[6].mxu0 %vm208_vm0, %v131_v51 }
  0xa3   :  { %6089 = vmatprep.mubr.msk.f32.mxu0 %vm208_vm0, %v132_v52 }
  0xa5   :  { %v206_v61 = vpop.permute.xlu1 %205  ;;  %v201_v50 = vpop.permute.xlu0 %200 }
  0xa6   :  { %6090 = vmatmul.mubr.msk.f32.gmra.mrb[8].mxu0 %vm208_vm0, %v133_v53 }
  0xa7   :  { %6092 = vmatprep.mubr.msk.f32.mxu0 %vm208_vm0, %v134_v54 }
  0xa9   :  { %v7126_v62 = vpop.permute.xlu1 %379  ;;  %v7210_v54 = vpop.permute.xlu0 %374 }
  0xaa   :  { %6093 = vmatmul.mubr.msk.f32.gmra.mrb[10].mxu0 %vm208_vm0, %v135_v55  ;;  %11301 = vst [vmem:[#allocation2_spill] sm:$0xff] %v7126_v62  ;;  %11329 = vst [vmem:[#allocation30_spill] sm:$0xff] %v7210_v54 }
  0xad   :  { %v7128_v63 = vpop.permute.xlu1 %397 }
  0xae   :  { %11302 = vst [vmem:[#allocation3_spill] sm:$0xff] %v7128_v63 }
  0xb2   :  { %v7130_v1 = vpop.permute.xlu1 %416 }
  0xb3   :  { %11303 = vst [vmem:[#allocation4_spill] sm:$0xff] %v7130_v1 }
  0xb7   :  { %v7132_v2 = vpop.permute.xlu1 %428 }
  0xb8   :  { %11304 = vst [vmem:[#allocation5_spill] sm:$0xff] %v7132_v2 }
  0xbc   :  { %v7134_v4 = vpop.permute.xlu1 %450 }
  0xbd   :  { %11305 = vst [vmem:[#allocation6_spill] sm:$0xff] %v7134_v4 }
  0xc0   :  { %v7136_v8 = vpop.permute.xlu1 %455 }
  0xc1   :  { %11306 = vst [vmem:[#allocation7_spill] sm:$0xff] %v7136_v8 }
  0xc4   :  { %v7138_v15 = vpop.permute.xlu1 %473 }
  0xc5   :  { %11307 = vst [vmem:[#allocation8_spill] sm:$0xff] %v7138_v15 }
  0xc9   :  { %v7148_v24 = vpop.permute.xlu1 %488 }
  0xca   :  { %11308 = vst [vmem:[#allocation9_spill] sm:$0xff] %v7148_v24 }
  0xce   :  { %v7153_v29 = vpop.permute.xlu1 %508 }
  0xcf   :  { %11310 = vst [vmem:[#allocation11_spill] sm:$0xff] %v7153_v29 }
  0xd3   :  { %v7156_v32 = vpop.permute.xlu1 %2823 }
  0xd4   :  { %11311 = vst [vmem:[#allocation12_spill] sm:$0xff] %v7156_v32 }
  0xd7   :  { %v7158_v33 = vpop.permute.xlu1 %2828 }
  0xd8   :  { %11312 = vst [vmem:[#allocation13_spill] sm:$0xff] %v7158_v33 }
  0xdb   :  { %v7160_v34 = vpop.permute.xlu1 %2833 }
  0xdc   :  { %11313 = vst [vmem:[#allocation14_spill] sm:$0xff] %v7160_v34 }
  0xdf   :  { %v7162_v35 = vpop.permute.xlu1 %2838 }
  0xe0   :  { %11314 = vst [vmem:[#allocation15_spill] sm:$0xff] %v7162_v35 }
  0xe3   :  { %v7164_v36 = vpop.permute.xlu1 %2889 }
  0xe4   :  { %11315 = vst [vmem:[#allocation16_spill] sm:$0xff] %v7164_v36 }
  0xe7   :  { %v7166_v38 = vpop.permute.xlu1 %2894 }
  0xe8   :  { %11316 = vst [vmem:[#allocation17_spill] sm:$0xff] %v7166_v38 }
  0xeb   :  { %v7168_v39 = vpop.permute.xlu1 %2899 }
  0xec   :  { %11317 = vst [vmem:[#allocation18_spill] sm:$0xff] %v7168_v39 }
  0xef   :  { %v7170_v41 = vpop.permute.xlu1 %2904 }
  0xf0   :  { %11318 = vst [vmem:[#allocation19_spill] sm:$0xff] %v7170_v41 }
  0xf3   :  { %v7172_v42 = vpop.permute.xlu1 %2913 }
  0xf4   :  { %11319 = vst [vmem:[#allocation20_spill] sm:$0xff] %v7172_v42 }
  0xf7   :  { %v7174_v43 = vpop.permute.xlu1 %2918 }
  0xf8   :  { %11320 = vst [vmem:[#allocation21_spill] sm:$0xff] %v7174_v43 }
  0xfb   :  { %v7176_v44 = vpop.permute.xlu1 %2923 }
  0xfc   :  { %11321 = vst [vmem:[#allocation22_spill] sm:$0xff] %v7176_v44 }
  0xff   :  { %v7178_v45 = vpop.permute.xlu1 %2928 }
 0x100   :  { %11322 = vst [vmem:[#allocation23_spill] sm:$0xff] %v7178_v45 }
 0x103   :  { %v7184_v47 = vpop.permute.xlu1 %2981 }
 0x104   :  { %11324 = vst [vmem:[#allocation25_spill] sm:$0xff] %v7184_v47 }
 0x107   :  { %v7192_v49 = vpop.permute.xlu1 %2986 }
 0x108   :  { %11326 = vst [vmem:[#allocation27_spill] sm:$0xff] %v7192_v49 }
 0x10b   :  { %v7198_v52 = vpop.permute.xlu1 %2991 }
 0x10c   :  { %11327 = vst [vmem:[#allocation28_spill] sm:$0xff] %v7198_v52  ;;  %v3530_v52 = vld [vmem:[%s11226_s7 + $0x10] sm:$0xff] }
 0x10f   :  { %v7206_v53 = vpop.permute.xlu1 %2996 }
 0x110   :  { %11328 = vst [vmem:[#allocation29_spill] sm:$0xff] %v7206_v53 }
 0x113   :  { %v7212_v55 = vpop.permute.xlu1 %3001 }
 0x114   :  { %11330 = vst [vmem:[#allocation31_spill] sm:$0xff] %v7212_v55 }
 0x169   :  { %v6079_v6 = vpop.f32.mrb[0].mxu0 }
 0x16a   :  { %v311_v7 = vpop.f32.mrb[1].mxu0  ;;  %v317_v13 = vadd.f32 %v6079_v6, %v156_v56  ;;  %v7214_v56 = vpop.permute.xlu0 %392 }
 0x16b   :  { %v312_v9 = vadd.f32 %v311_v7, %v151_v3  ;;  %11331 = vst [vmem:[#allocation32_spill] sm:$0xff] %v7214_v56 }
 0x16d   :  { %v6082_v10 = vpop.f32.mrb[2].mxu0  ;;  %538 = vxpose.xlu1.b32.start [1/2] (short) %v312_v9, 128 }
 0x16e   :  { %v321_v12 = vpop.f32.mrb[3].mxu0  ;;  %v327_v20 = vadd.f32 %v6082_v10, %v166_v57  ;;  %v7216_v57 = vpop.permute.xlu1 %3006 }
 0x16f   :  { %v322_v14 = vadd.f32 %v321_v12, %v161_v5  ;;  %11332 = vst [vmem:[#allocation33_spill] sm:$0xff] %v7216_v57 }
 0x171   :  { %v6085_v16 = vpop.f32.mrb[4].mxu0  ;;  %1634 = vxpose.xlu0.b32.start [1/2] (short) %v322_v14, 128  ;;  %539 = vxpose.xlu1.b32.end [2/2] (short) %v317_v13, 128 }
 0x172   :  { %v331_v17 = vpop.f32.mrb[5].mxu0  ;;  %v7144_v22 = vadd.f32 %v6085_v16, %v176_v58 }
 0x173   :  { %v332_v18 = vadd.f32 %v331_v17, %v171_v11 }
 0x175   :  { %v7142_v21 = vpop.f32.mrb[6].mxu0  ;;  %6095 = vmatprep.subr.mxu0 %v332_v18  ;;  %6430 = vmatprep.subr.mxu1 %v332_v18 }
 0x176   :  { %1635 = vxpose.xlu0.b32.end [2/2] (short) %v327_v20, 128  ;;  %v7146_v23 = vpop.f32.mrb[7].mxu0  ;;  %6096 = vmatpush3.msra.mxu0 %v332_v18  ;;  %v7430_v53 = vadd.f32 %v7142_v21, %v7124_v59  ;;  %v3532_v59 = vld [vmem:[%s11226_s7 + $0x20] sm:$0xff] }
 0x177   :  { %6431 = vmatpush3.msra.mxu1 %v332_v18  ;;  %v7238_v9 = vadd.f32 %v7146_v23, %v7140_v19 }
 0x178   :  { %6147 = vmatprep.subr.mxu1 %v7144_v22 }
 0x179   :  { %v6091_v25 = vpop.f32.mrb[8].mxu0 }
 0x17a   :  { %v351_v27 = vpop.f32.mrb[9].mxu0  ;;  %v7180_v46 = vadd.f32 %v6091_v25, %v196_v60  ;;  %v7218_v60 = vpop.permute.xlu0 %468 }
 0x17b   :  { %v7151_v28 = vadd.f32 %v351_v27, %v191_v26  ;;  %11333 = vst [vmem:[#allocation34_spill] sm:$0xff] %v7218_v60 }
 0x17c   :  { %11323 = vst [vmem:[#allocation24_spill] sm:$0xff] %v7180_v46 }
 0x17d   :  { %11309 = vst [vmem:[#allocation10_spill] sm:$0xff] %v7151_v28  ;;  %v6094_v30 = vpop.f32.mrb[10].mxu0  ;;  %6121 = vmatprep.subr.mxu0 %v7151_v28 }
 0x17e   :  { %v361_v31 = vpop.f32.mrb[11].mxu0  ;;  %v7188_v48 = vadd.f32 %v6094_v30, %v206_v61 }
 0x17f   :  { %v7196_v51 = vadd.f32 %v361_v31, %v201_v50 }
 0x180   :  { %11325 = vst [vmem:[#allocation26_spill] sm:$0xff] %v7188_v48 }
 0x1c7   :  { %386 = vrot.lane.b32.xlu1 %v7180_v46, %s6858_s19 }
 0x1cb   :  { %423 = vrot.lane.b32.xlu1 %v7151_v28, %s6859_s20 }
 0x1cf   :  { %462 = vrot.lane.b32.xlu1 %v7188_v48, %s6860_s21 }
 0x1d3   :  { %501 = vrot.lane.b32.xlu1 %v7188_v48, %s6861_s22 }
 0x1d7   :  { %425 = vrot.lane.b32.xlu0 %v7180_v46, %s6859_s20  ;;  %499 = vrot.lane.b32.xlu1 %v7196_v51, %s6861_s22 }
 0x1db   :  { %384 = vrot.lane.b32.xlu0 %v7151_v28, %s6858_s19 }
 0x1df   :  { %460 = vrot.lane.b32.xlu0 %v7196_v51, %s6860_s21 }
 0x1ed   :  { %v554_v58 = vpop.trf.xlu1 }
 0x1ee   :  { %6097 = vmatprep.mubr.msk.f32.mxu0 %vm570_vm1, %v554_v58  ;;  %1086 = vrot.lane.b32.xlu1 %v554_v58, %s6859_s20 }
 0x1f1   :  { %v555_v61 = vpop.trf.xlu1 }
 0x1f2   :  { %v7222_v3 = vpop.trf.xlu0  ;;  %6098 = vmatmul.mubr.msk.f32.vlgmr.msra.gmra.mrb[12].mxu0 %vm570_vm1, %v555_v61  ;;  %1088 = vrot.lane.b32.xlu1 %v555_v61, %s6859_s20 }
 0x1f3   :  { %2181 = vrot.lane.b32.xlu0 %v7222_v3, %s6859_s20  ;;  %6122 = vmatpush3.xpose.msra.mxu0 %v7151_v28 }
 0x1f4   :  { %6173 = vmatprep.subr.mxu0 %v7180_v46 }
 0x1f5   :  { %v556_v5 = vpop.trf.xlu1 }
 0x1f6   :  { %v7230_v6 = vpop.trf.xlu0  ;;  %6100 = vmatprep.mubr.msk.f32.mxu1 %vm570_vm1, %v556_v5  ;;  %1090 = vrot.lane.b32.xlu1 %v556_v5, %s6859_s20 }
 0x1f7   :  { %2183 = vrot.lane.b32.xlu0 %v7230_v6, %s6859_s20 }
 0x1f9   :  { %v557_v7 = vpop.trf.xlu1 }
 0x1fa   :  { %v7240_v10 = vpop.trf.xlu0  ;;  %6101 = vmatmul.mubr.msk.f32.vlgmr.msra.gmra.mrb[0].mxu1 %vm570_vm1, %v557_v7  ;;  %1092 = vrot.lane.b32.xlu1 %v557_v7, %s6859_s20 }
 0x1fb   :  { %2185 = vrot.lane.b32.xlu0 %v7240_v10, %s6859_s20  ;;  %6148 = vmatpush3.msra.mxu1 %v7144_v22 }
 0x1fc   :  { %6199 = vmatprep.subr.mxu1 %v7238_v9 }
 0x1fd   :  { %v558_v11 = vpop.trf.xlu1 }
 0x1fe   :  { %v7248_v12 = vpop.trf.xlu0  ;;  %6103 = vmatprep.mubr.msk.f32.mxu1 %vm570_vm1, %v558_v11  ;;  %1094 = vrot.lane.b32.xlu1 %v558_v11, %s6859_s20 }
 0x1ff   :  { %2187 = vrot.lane.b32.xlu0 %v7248_v12, %s6859_s20 }
 0x201   :  { %v559_v13 = vpop.trf.xlu1 }
 0x202   :  { %v7254_v14 = vpop.trf.xlu0  ;;  %6104 = vmatmul.mubr.msk.f32.gmra.mrb[2].mxu1 %vm570_vm1, %v559_v13  ;;  %1096 = vrot.lane.b32.xlu1 %v559_v13, %s6859_s20  ;;  %v2968_v13 = vld [vmem:[%s11222_s5 + $0x158] sm:$0xff] }
 0x203   :  { %2189 = vrot.lane.b32.xlu0 %v7254_v14, %s6859_s20 }
 0x205   :  { %v560_v16 = vpop.trf.xlu1 }
 0x206   :  { %v7260_v17 = vpop.trf.xlu0  ;;  %6106 = vmatprep.mubr.msk.f32.mxu1 %vm570_vm1, %v560_v16  ;;  %1098 = vrot.lane.b32.xlu1 %v560_v16, %s6859_s20 }
 0x207   :  { %2191 = vrot.lane.b32.xlu0 %v7260_v17, %s6859_s20 }
 0x209   :  { %v561_v18 = vpop.trf.xlu1 }
 0x20a   :  { %v7266_v19 = vpop.trf.xlu0  ;;  %6107 = vmatmul.mubr.msk.f32.gmra.mrb[4].mxu1 %vm570_vm1, %v561_v18  ;;  %1100 = vrot.lane.b32.xlu1 %v561_v18, %s6859_s20  ;;  %v2963_v18 = vld [vmem:[%s11222_s5 + $0x130] sm:$0xff] }
 0x20b   :  { %2193 = vrot.lane.b32.xlu0 %v7266_v19, %s6859_s20 }
 0x20d   :  { %v562_v20 = vpop.trf.xlu1 }
 0x20e   :  { %v7272_v22 = vpop.trf.xlu0  ;;  %6109 = vmatprep.mubr.msk.f32.mxu1 %vm570_vm1, %v562_v20  ;;  %1102 = vrot.lane.b32.xlu1 %v562_v20, %s6859_s20  ;;  %v3330_v20 = vld [vmem:[%s11222_s5 + $0x1b0] sm:$0xff] }
 0x20f   :  { %2195 = vrot.lane.b32.xlu0 %v7272_v22, %s6859_s20 }
 0x211   :  { %v563_v23 = vpop.trf.xlu1 }
 0x212   :  { %v7278_v25 = vpop.trf.xlu0  ;;  %6110 = vmatmul.mubr.msk.f32.gmra.mrb[6].mxu1 %vm570_vm1, %v563_v23  ;;  %1104 = vrot.lane.b32.xlu1 %v563_v23, %s6859_s20  ;;  %v2964_v23 = vld [vmem:[%s11222_s5 + $0x138] sm:$0xff] }
 0x213   :  { %2197 = vrot.lane.b32.xlu0 %v7278_v25, %s6859_s20 }
 0x215   :  { %v564_v26 = vpop.trf.xlu1 }
 0x216   :  { %v7284_v27 = vpop.trf.xlu0  ;;  %6112 = vmatprep.mubr.msk.f32.mxu1 %vm570_vm1, %v564_v26  ;;  %1106 = vrot.lane.b32.xlu1 %v564_v26, %s6859_s20  ;;  %v3332_v26 = vld [vmem:[%s11222_s5 + $0x1c0] sm:$0xff] }
 0x217   :  { %2199 = vrot.lane.b32.xlu0 %v7284_v27, %s6859_s20 }
 0x219   :  { %v565_v30 = vpop.trf.xlu1 }
 0x21a   :  { %v7290_v31 = vpop.trf.xlu0  ;;  %6113 = vmatmul.mubr.msk.f32.gmra.mrb[8].mxu1 %vm570_vm1, %v565_v30  ;;  %1108 = vrot.lane.b32.xlu1 %v565_v30, %s6859_s20  ;;  %v2965_v30 = vld [vmem:[%s11222_s5 + $0x140] sm:$0xff] }
 0x21b   :  { %2201 = vrot.lane.b32.xlu0 %v7290_v31, %s6859_s20 }
 0x21d   :  { %v566_v50 = vpop.trf.xlu1 }
 0x21e   :  { %v7296_v58 = vpop.trf.xlu0  ;;  %1110 = vrot.lane.b32.xlu1 %v566_v50, %s6859_s20  ;;  %6115 = vmatprep.mubr.msk.f32.mxu1 %vm570_vm1, %v566_v50  ;;  %v3334_v50 = vld [vmem:[%s11222_s5 + $0x1d0] sm:$0xff] }
 0x21f   :  { %2203 = vrot.lane.b32.xlu0 %v7296_v58, %s6859_s20 }
 0x221   :  { %v567_v61 = vpop.trf.xlu1 }
 0x222   :  { %v7302_v5 = vpop.trf.xlu0  ;;  %6116 = vmatmul.mubr.msk.f32.gmra.mrb[10].mxu1 %vm570_vm1, %v567_v61  ;;  %1112 = vrot.lane.b32.xlu1 %v567_v61, %s6859_s20  ;;  %v2966_v61 = vld [vmem:[%s11222_s5 + $0x148] sm:$0xff] }
 0x223   :  { %2205 = vrot.lane.b32.xlu0 %v7302_v5, %s6859_s20 }
 0x225   :  { %v568_v7 = vpop.trf.xlu1 }
 0x226   :  { %v7308_v11 = vpop.trf.xlu0  ;;  %1114 = vrot.lane.b32.xlu1 %v568_v7, %s6859_s20  ;;  %6118 = vmatprep.mubr.msk.f32.mxu1 %vm570_vm1, %v568_v7  ;;  %v3336_v7 = vld [vmem:[%s11222_s5 + $0x1e0] sm:$0xff] }
 0x227   :  { %2207 = vrot.lane.b32.xlu0 %v7308_v11, %s6859_s20 }
 0x229   :  { %v569_v16 = vpop.trf.xlu1 }
 0x22a   :  { %6119 = vmatmul.mubr.msk.f32.gmra.mrb[12].mxu1 %vm570_vm1, %v569_v16  ;;  %1116 = vrot.lane.b32.xlu1 %v569_v16, %s6859_s20  ;;  %v3338_v16 = vld [vmem:[%s11222_s5 + $0x1f0] sm:$0xff] }
 0x22b   :  { %3036 = vperm.xlu0 %6451, %v2968_v13   ;;  %v2967_v13 = vld [vmem:[%s11222_s5 + $0x150] sm:$0xff] }
 0x22e   :  { %3011 = vperm.xlu1 %6458, %v2963_v18   ;;  %v2969_v18 = vld [vmem:[%s11222_s5 + $0x160] sm:$0xff] }
 0x22f   :  { %3354 = vperm.xlu0 %6451, %v3330_v20   ;;  %v3340_v20 = vld [vmem:[%s11222_s5 + $0x200] sm:$0xff] }
 0x232   :  { %3016 = vperm.xlu1 %6458, %v2964_v23   ;;  %v2970_v23 = vld [vmem:[%s11222_s5 + $0x168] sm:$0xff] }
 0x233   :  { %3364 = vperm.xlu0 %6451, %v3332_v26  }
 0x236   :  { %3021 = vperm.xlu1 %6458, %v2965_v30   ;;  %v7360_v30 = vpop.trf.xlu0 }
 0x237   :  { %3374 = vperm.xlu0 %6451, %v3334_v50   ;;  %v2971_v50 = vld [vmem:[%s11222_s5 + $0x170] sm:$0xff] }
 0x239   :  { %v7358_v26 = vpop.permute.xlu1 %386 }
 0x23a   :  { %3026 = vperm.xlu1 %6458, %v2966_v61   ;;  %11334 = vst [vmem:[#allocation35_spill] sm:$0xff] %v7358_v26 }
 0x23b   :  { %3384 = vperm.xlu0 %6451, %v3336_v7   ;;  %v7369_v7 = vpop.trf.xlu0 }
 0x23d   :  { %v7367_v61 = vpop.permute.xlu1 %423 }
 0x23e   :  { %3031 = vperm.xlu1 %6458, %v2967_v13   ;;  %11335 = vst [vmem:[#allocation36_spill] sm:$0xff] %v7367_v61  ;;  %v2972_v13 = vld [vmem:[%s11222_s5 + $0x178] sm:$0xff] }
 0x23f   :  { %3394 = vperm.xlu0 %6451, %v3338_v16   ;;  %v3342_v16 = vld [vmem:[%s11222_s5 + $0x210] sm:$0xff] }
 0x242   :  { %3041 = vperm.xlu1 %6458, %v2969_v18   ;;  %v2973_v18 = vld [vmem:[%s11222_s5 + $0x180] sm:$0xff] }
 0x243   :  { %3404 = vperm.xlu0 %6451, %v3340_v20   ;;  %v7382_v20 = vpop.permute.xlu1 %462 }
 0x244   :  { %11336 = vst [vmem:[#allocation37_spill] sm:$0xff] %v7382_v20 }
 0x246   :  { %3046 = vperm.xlu1 %6458, %v2970_v23   ;;  %v3344_v23 = vld [vmem:[%s11222_s5 + $0x220] sm:$0xff] }
 0x247   :  { %2209 = vrot.lane.b32.xlu0 %v7360_v30, %s6859_s20  ;;  %v7395_v0 = vpop.permute.xlu1 %501 }
 0x248   :  { %11338 = vst [vmem:[#allocation39_spill] sm:$0xff] %v7395_v0 }
 0x24a   :  { %3051 = vperm.xlu1 %6458, %v2971_v50   ;;  %v2974_v50 = vld [vmem:[%s11222_s5 + $0x188] sm:$0xff] }
 0x24b   :  { %2211 = vrot.lane.b32.xlu0 %v7369_v7, %s6859_s20  ;;  %v7408_v55 = vpop.permute.xlu1 %499 }
 0x24c   :  { %11340 = vst [vmem:[#allocation41_spill] sm:$0xff] %v7408_v55 }
 0x24e   :  { %3056 = vperm.xlu1 %6458, %v2972_v13   ;;  %v3346_v13 = vld [vmem:[%s11222_s5 + $0x230] sm:$0xff] }
 0x24f   :  { %3414 = vperm.xlu0 %6451, %v3342_v16   ;;  %v7393_v16 = vpop.permute.xlu0 %425 }
 0x250   :  { %11337 = vst [vmem:[#allocation38_spill] sm:$0xff] %v7393_v16 }
 0x252   :  { %3061 = vperm.xlu1 %6458, %v2973_v18   ;;  %v3348_v18 = vld [vmem:[%s11222_s5 + $0x240] sm:$0xff] }
 0x253   :  { %3424 = vperm.xlu0 %6451, %v3344_v23   ;;  %v7403_v23 = vpop.permute.xlu0 %384 }
 0x254   :  { %11339 = vst [vmem:[#allocation40_spill] sm:$0xff] %v7403_v23 }
 0x256   :  { %3066 = vperm.xlu1 %6458, %v2974_v50   ;;  %v3350_v50 = vld [vmem:[%s11222_s5 + $0x250] sm:$0xff] }
 0x257   :  { %3434 = vperm.xlu0 %6451, %v3346_v13   ;;  %v2977_v13 = vld [vmem:[%s11222_s5 + $0x1a0] sm:$0xff]  ;;  %v7419_v57 = vpop.permute.xlu0 %460 }
 0x258   :  { %11341 = vst [vmem:[#allocation42_spill] sm:$0xff] %v7419_v57  ;;  %v7950_v57 = vld [vmem:[%s11227_s1 + $0xb0] sm:$0xff] }
 0x25a   :  { %3071 = vperm.xlu1 %6458, %v2975_v40  }
 0x25b   :  { %3444 = vperm.xlu0 %6451, %v3348_v18   ;;  %v3528_v18 = vld [vmem:[%s11226_s7] sm:$0xff] }
 0x25e   :  { %3076 = vperm.xlu1 %6458, %v2976_v37   ;;  %v2978_v37 = vld [vmem:[%s11222_s5 + $0x1a8] sm:$0xff] }
 0x25f   :  { %3454 = vperm.xlu0 %6451, %v3350_v50  }
 0x260   :  { %v1087_v40 = vpop.permute.xlu1 %1086 }
 0x261   :  { %6149 = vmatprep.mubr.msk.f32.mxu1 %vm570_vm1, %v1087_v40 }
 0x262   :  { %3081 = vperm.xlu1 %6458, %v2977_v13   ;;  %v3331_v13 = vld [vmem:[%s11222_s5 + $0x1b8] sm:$0xff] }
 0x263   :  { %3552 = vperm.xlu0 %6451, %v3528_v18   ;;  %v3534_v18 = vld [vmem:[%s11226_s7 + $0x30] sm:$0xff] }
 0x264   :  { %v1089_v50 = vpop.permute.xlu1 %1088 }
 0x265   :  { %6150 = vmatmul.mubr.msk.f32.vlgmr.msra.gmra.mrb[14].mxu1 %vm570_vm1, %v1089_v50  ;;  %v7433_v47 = vpop.permute.xlu0 %2181  ;;  %v3335_v50 = vld [vmem:[%s11222_s5 + $0x1d8] sm:$0xff] }
 0x266   :  { %6200 = vmatpush3.msra.mxu1 %v7238_v9  ;;  %3086 = vperm.xlu1 %6458, %v2978_v37  }
 0x267   :  { %3562 = vperm.xlu0 %6451, %v3530_v52   ;;  %6251 = vmatprep.subr.mxu1 %v7430_v53  ;;  %v3333_v52 = vld [vmem:[%s11222_s5 + $0x1c8] sm:$0xff] }
 0x268   :  { %v1091_v40 = vpop.permute.xlu1 %1090 }
 0x269   :  { %6152 = vmatprep.mubr.msk.f32.mxu1 %vm570_vm1, %v1091_v40  ;;  %v7444_v21 = vpop.permute.xlu0 %2183 }
 0x26a   :  { %3359 = vperm.xlu1 %6458, %v3331_v13  }
 0x26b   :  { %3572 = vperm.xlu0 %6451, %v3532_v59   ;;  %v3337_v59 = vld [vmem:[%s11222_s5 + $0x1e8] sm:$0xff] }
 0x26c   :  { %v1093_v9 = vpop.permute.xlu1 %1092 }
 0x26d   :  { %6153 = vmatmul.mubr.msk.f32.gmra.mrb[16].mxu1 %vm570_vm1, %v1093_v9  ;;  %v7453_v37 = vpop.permute.xlu0 %2185 }
 0x26e   :  { %3369 = vperm.xlu1 %6458, %v3333_v52   ;;  %v3339_v52 = vld [vmem:[%s11222_s5 + $0x1f8] sm:$0xff] }
 0x26f   :  { %3582 = vperm.xlu0 %6451, %v3534_v18  }
 0x270   :  { %v1095_v13 = vpop.permute.xlu1 %1094 }
 0x271   :  { %6155 = vmatprep.mubr.msk.f32.mxu1 %vm570_vm1, %v1095_v13  ;;  %v7459_v40 = vpop.permute.xlu0 %2187 }
 0x272   :  { %3379 = vperm.xlu1 %6458, %v3335_v50   ;;  %v3341_v50 = vld [vmem:[%s11222_s5 + $0x208] sm:$0xff] }
 0x274   :  { %v1097_v49 = vpop.permute.xlu1 %1096 }
 0x275   :  { %6156 = vmatmul.mubr.msk.f32.gmra.mrb[18].mxu1 %vm570_vm1, %v1097_v49  ;;  %v7465_v9 = vpop.permute.xlu0 %2189 }
 0x276   :  { %3389 = vperm.xlu1 %6458, %v3337_v59   ;;  %v3343_v59 = vld [vmem:[%s11222_s5 + $0x218] sm:$0xff] }
 0x278   :  { %v1099_v18 = vpop.permute.xlu1 %1098 }
 0x279   :  { %6158 = vmatprep.mubr.msk.f32.mxu1 %vm570_vm1, %v1099_v18  ;;  %v7471_v13 = vpop.permute.xlu0 %2191 }
 0x27a   :  { %3399 = vperm.xlu1 %6458, %v3339_v52   ;;  %v3345_v52 = vld [vmem:[%s11222_s5 + $0x228] sm:$0xff] }
 0x27c   :  { %v1101_v45 = vpop.permute.xlu1 %1100 }
 0x27d   :  { %6159 = vmatmul.mubr.msk.f32.gmra.mrb[20].mxu1 %vm570_vm1, %v1101_v45  ;;  %v7477_v49 = vpop.permute.xlu0 %2193  ;;  %v3347_v45 = vld [vmem:[%s11222_s5 + $0x238] sm:$0xff] }
 0x27e   :  { %3409 = vperm.xlu1 %6458, %v3341_v50  }
 0x280   :  { %v1103_v44 = vpop.permute.xlu1 %1102 }
 0x281   :  { %6161 = vmatprep.mubr.msk.f32.mxu1 %vm570_vm1, %v1103_v44  ;;  %v7483_v18 = vpop.permute.xlu0 %2195  ;;  %v3349_v44 = vld [vmem:[%s11222_s5 + $0x248] sm:$0xff] }
 0x282   :  { %3419 = vperm.xlu1 %6458, %v3343_v59  }
 0x284   :  { %v1105_v43 = vpop.permute.xlu1 %1104 }
 0x285   :  { %6162 = vmatmul.mubr.msk.f32.gmra.mrb[22].mxu1 %vm570_vm1, %v1105_v43  ;;  %v7492_v42 = vpop.permute.xlu0 %2197 }
 0x286   :  { %3429 = vperm.xlu1 %6458, %v3345_v52   ;;  %v3351_v52 = vld [vmem:[%s11222_s5 + $0x258] sm:$0xff] }
 0x288   :  { %v1107_v50 = vpop.permute.xlu1 %1106 }
 0x289   :  { %6164 = vmatprep.mubr.msk.f32.mxu1 %vm570_vm1, %v1107_v50  ;;  %v7499_v43 = vpop.permute.xlu0 %2199 }
 0x28a   :  { %3439 = vperm.xlu1 %6458, %v3347_v45   ;;  %v3529_v45 = vld [vmem:[%s11226_s7 + $0x8] sm:$0xff] }
 0x28c   :  { %v1109_v59 = vpop.permute.xlu1 %1108 }
 0x28d   :  { %6165 = vmatmul.mubr.msk.f32.gmra.mrb[24].mxu1 %vm570_vm1, %v1109_v59  ;;  %v7508_v39 = vpop.permute.xlu0 %2201 }
 0x28e   :  { %3449 = vperm.xlu1 %6458, %v3349_v44   ;;  %v3531_v44 = vld [vmem:[%s11226_s7 + $0x18] sm:$0xff] }
 0x290   :  { %v1111_v41 = vpop.permute.xlu1 %1110 }
 0x291   :  { %6167 = vmatprep.mubr.msk.f32.mxu1 %vm570_vm1, %v1111_v41  ;;  %v7515_v41 = vpop.permute.xlu0 %2203 }
 0x292   :  { %3459 = vperm.xlu1 %6458, %v3351_v52   ;;  %v3533_v52 = vld [vmem:[%s11226_s7 + $0x28] sm:$0xff] }
 0x294   :  { %v1113_v50 = vpop.permute.xlu1 %1112 }
 0x295   :  { %6168 = vmatmul.mubr.msk.f32.gmra.mrb[26].mxu1 %vm570_vm1, %v1113_v50  ;;  %v7526_v50 = vpop.permute.xlu0 %2205 }
 0x296   :  { %3557 = vperm.xlu1 %6458, %v3529_v45   ;;  %v3535_v45 = vld [vmem:[%s11226_s7 + $0x38] sm:$0xff] }
 0x298   :  { %v1115_v59 = vpop.permute.xlu1 %1114 }
 0x299   :  { %6170 = vmatprep.mubr.msk.f32.mxu1 %vm570_vm1, %v1115_v59 }
 0x29a   :  { %3567 = vperm.xlu1 %6458, %v3531_v44  }
 0x29c   :  { %v1117_v38 = vpop.permute.xlu1 %1116 }
 0x29d   :  { %6171 = vmatmul.mubr.msk.f32.gmra.mrb[28].mxu1 %vm570_vm1, %v1117_v38  ;;  %v7535_v38 = vpop.permute.xlu0 %2207 }
 0x29e   :  { %3577 = vperm.xlu1 %6458, %v3533_v52   ;;  %6201 = vmatprep.mubr.msk.f32.mxu1 %vm570_vm1, %v7222_v3 }
 0x2a1   :  { %6202 = vmatmul.mubr.msk.f32.vlgmr.msra.gmra.mrb[30].mxu1 %vm570_vm1, %v7230_v6 }
 0x2a2   :  { %6252 = vmatpush3.msra.mxu1 %v7430_v53  ;;  %3587 = vperm.xlu1 %6458, %v3535_v45  }
 0x2a3   :  { %6204 = vmatprep.mubr.msk.f32.mxu1 %vm570_vm1, %v7240_v10 }
 0x2a5   :  { %6205 = vmatmul.mubr.msk.f32.gmra.mrb[32].mxu1 %vm570_vm1, %v7248_v12 }
 0x2a6   :  { %6207 = vmatprep.mubr.msk.f32.mxu1 %vm570_vm1, %v7254_v14 }
 0x2a9   :  { %6208 = vmatmul.mubr.msk.f32.gmra.mrb[34].mxu1 %vm570_vm1, %v7260_v17  ;;  %v7582_v17 = vld [vmem:[%s11227_s1 + $0x8] sm:$0xff] }
 0x2aa   :  { %6210 = vmatprep.mubr.msk.f32.mxu1 %vm570_vm1, %v7266_v19  ;;  %v7543_v3 = vpop.permute.xlu0 %3036 }
 0x2ab   :  { %11342 = vst [vmem:[#allocation43_spill] sm:$0xff] %v7543_v3 }
 0x2ad   :  { %6211 = vmatmul.mubr.msk.f32.gmra.mrb[36].mxu1 %vm570_vm1, %v7272_v22  ;;  %v7563_v10 = vpop.permute.xlu1 %3011 }
 0x2ae   :  { %6213 = vmatprep.mubr.msk.f32.mxu1 %vm570_vm1, %v7278_v25  ;;  %v7551_v53 = vpop.permute.xlu0 %3354  ;;  %11345 = vst [vmem:[#allocation46_spill] sm:$0xff] %v7563_v10 }
 0x2af   :  { %11343 = vst [vmem:[#allocation44_spill] sm:$0xff] %v7551_v53 }
 0x2b1   :  { %6214 = vmatmul.mubr.msk.f32.gmra.mrb[38].mxu1 %vm570_vm1, %v7284_v27  ;;  %v7573_v14 = vpop.permute.xlu1 %3016 }
 0x2b2   :  { %6216 = vmatprep.mubr.msk.f32.mxu1 %vm570_vm1, %v7290_v31  ;;  %v7559_v6 = vpop.permute.xlu0 %3364  ;;  %11347 = vst [vmem:[#allocation48_spill] sm:$0xff] %v7573_v14  ;;  %v7598_v31 = vld [vmem:[%s11227_s1] sm:$0xff] }
 0x2b3   :  { %11344 = vst [vmem:[#allocation45_spill] sm:$0xff] %v7559_v6 }
 0x2b5   :  { %6217 = vmatmul.mubr.msk.f32.gmra.mrb[40].mxu1 %vm570_vm1, %v7296_v58 }
 0x2b6   :  { %6219 = vmatprep.mubr.msk.f32.mxu1 %vm570_vm1, %v7302_v5  ;;  %v7569_v12 = vpop.permute.xlu0 %3374 }
 0x2b7   :  { %11346 = vst [vmem:[#allocation47_spill] sm:$0xff] %v7569_v12  ;;  %v7704_v12 = vld [vmem:[%s11227_s1 + $0x40] sm:$0xff] }
 0x2b9   :  { %6220 = vmatmul.mubr.msk.f32.gmra.mrb[42].mxu1 %vm570_vm1, %v7308_v11  ;;  %v7613_v11 = vld [vmem:[%s11227_s1 + $0x18] sm:$0xff] }
 0x2ba   :  { %6222 = vmatprep.mubr.msk.f32.mxu1 %vm570_vm1, %v7360_v30  ;;  %v7584_v19 = vpop.permute.xlu0 %3384 }
 0x2bb   :  { %11348 = vst [vmem:[#allocation49_spill] sm:$0xff] %v7584_v19 }
 0x2bd   :  { %6223 = vmatmul.mubr.msk.f32.gmra.mrb[44].mxu1 %vm570_vm1, %v7369_v7 }
 0x2be   :  { %6253 = vmatprep.mubr.msk.f32.mxu1 %vm570_vm1, %v7433_v47  ;;  %v7588_v47 = vpop.permute.xlu1 %3021  ;;  %v7603_v58 = vpop.permute.xlu0 %3394 }
 0x2bf   :  { %11349 = vst [vmem:[#allocation50_spill] sm:$0xff] %v7588_v47  ;;  %11350 = vst [vmem:[#allocation51_spill] sm:$0xff] %v7603_v58  ;;  %v7755_v47 = vld [vmem:[%s11227_s1 + $0x78] sm:$0xff] }
 0x2c1   :  { %6254 = vmatmul.mubr.msk.f32.vlgmr.msra.gmra.mrb[46].mxu1 %vm570_vm1, %v7444_v21 }
 0x2c2   :  { %6256 = vmatprep.mubr.msk.f32.mxu1 %vm570_vm1, %v7453_v37  ;;  %v7615_v30 = vpop.permute.xlu1 %3026 }
 0x2c3   :  { %11351 = vst [vmem:[#allocation52_spill] sm:$0xff] %v7615_v30 }
 0x2c5   :  { %v6099_v22 = vpop.f32.mrb[12].mxu0  ;;  %6257 = vmatmul.mubr.msk.f32.gmra.mrb[48].mxu1 %vm570_vm1, %v7459_v40  ;;  %v7628_v40 = vld [vmem:[%s11227_s1 + $0x10] sm:$0xff] }
 0x2c6   :  { %v7591_v25 = vadd.f32 %v6099_v22, %v7582_v17  ;;  %v685_v27 = vpop.f32.mrb[13].mxu0  ;;  %6259 = vmatprep.mubr.msk.f32.mxu1 %vm570_vm1, %v7465_v9  ;;  %v7630_v9 = vpop.permute.xlu0 %3404 }
 0x2c7   :  { %v7606_v5 = vadd.f32 %v685_v27, %v7598_v31  ;;  %11352 = vst [vmem:[#allocation53_spill] sm:$0xff] %v7630_v9  ;;  %v7715_v9 = vld [vmem:[%s11227_s1 + $0x58] sm:$0xff] }
 0x2c8   :  { %766 = vmax.xlane.f32.xlu0 %v7591_v25 }
 0x2c9   :  { %6260 = vmatmul.mubr.msk.f32.gmra.mrb[50].mxu1 %vm570_vm1, %v7471_v13  ;;  %v7635_v13 = vpop.permute.xlu1 %3031 }
 0x2ca   :  { %6262 = vmatprep.mubr.msk.f32.mxu1 %vm570_vm1, %v7477_v49  ;;  %11353 = vst [vmem:[#allocation54_spill] sm:$0xff] %v7635_v13  ;;  %v2210_v44 = vpop.permute.xlu0 %2209 }
 0x2cc   :  { %764 = vmax.xlane.f32.xlu0 %v7606_v5 }
 0x2cd   :  { %v6102_v7 = vpop.f32.mrb[0].mxu1  ;;  %6263 = vmatmul.mubr.msk.f32.gmra.mrb[52].mxu1 %vm570_vm1, %v7483_v18  ;;  %v7651_v18 = vld [vmem:[%s11227_s1 + $0x20] sm:$0xff]  ;;  %v7663_v45 = vpop.permute.xlu1 %3041 }
 0x2ce   :  { %v7621_v21 = vadd.f32 %v6102_v7, %v7613_v11  ;;  %v695_v37 = vpop.f32.mrb[1].mxu1  ;;  %6265 = vmatprep.mubr.msk.f32.mxu1 %vm570_vm1, %v7492_v42  ;;  %v7645_v42 = vld [vmem:[%s11227_s1 + $0x28] sm:$0xff]  ;;  %11354 = vst [vmem:[#allocation55_spill] sm:$0xff] %v7663_v45 }
 0x2cf   :  { %v7638_v49 = vadd.f32 %v695_v37, %v7628_v40  ;;  %v7735_v45 = vld [vmem:[%s11227_s1 + $0x68] sm:$0xff] }
 0x2d0   :  { %770 = vmax.xlane.f32.xlu0 %v7621_v21 }
 0x2d1   :  { %6266 = vmatmul.mubr.msk.f32.gmra.mrb[54].mxu1 %vm570_vm1, %v7499_v43  ;;  %v7676_v27 = vpop.permute.xlu1 %3046 }
 0x2d2   :  { %6268 = vmatprep.mubr.msk.f32.mxu1 %vm570_vm1, %v7508_v39  ;;  %11355 = vst [vmem:[#allocation56_spill] sm:$0xff] %v7676_v27  ;;  %v7741_v27 = vld [vmem:[%s11227_s1 + $0x60] sm:$0xff] }
 0x2d4   :  { %768 = vmax.xlane.f32.xlu0 %v7638_v49 }
 0x2d5   :  { %v6105_v43 = vpop.f32.mrb[2].mxu1  ;;  %6269 = vmatmul.mubr.msk.f32.gmra.mrb[56].mxu1 %vm570_vm1, %v7515_v41  ;;  %v7673_v41 = vld [vmem:[%s11227_s1 + $0x38] sm:$0xff] }
 0x2d6   :  { %v7656_v59 = vadd.f32 %v6105_v43, %v7645_v42  ;;  %v705_v39 = vpop.f32.mrb[3].mxu1  ;;  %6271 = vmatprep.mubr.msk.f32.mxu1 %vm570_vm1, %v7526_v50  ;;  %v2212_v50 = vpop.permute.xlu0 %2211 }
 0x2d7   :  { %v7661_v52 = vadd.f32 %v705_v39, %v7651_v18  ;;  %v7695_v39 = vpop.permute.xlu1 %3051 }
 0x2d8   :  { %774 = vmax.xlane.f32.xlu0 %v7656_v59  ;;  %11356 = vst [vmem:[#allocation57_spill] sm:$0xff] %v7695_v39  ;;  %v7724_v39 = vld [vmem:[%s11227_s1 + $0x50] sm:$0xff] }
 0x2d9   :  { %772 = vmax.xlane.f32.xlu1 %v7661_v52  ;;  %6272 = vmatmul.mubr.msk.f32.gmra.mrb[58].mxu1 %vm570_vm1, %v7535_v38  ;;  %v7684_v38 = vld [vmem:[%s11227_s1 + $0x30] sm:$0xff] }
 0x2da   :  { %6274 = vmatprep.mubr.msk.f32.mxu1 %vm570_vm1, %v2210_v44  ;;  %v7693_v44 = vld [vmem:[%s11227_s1 + $0x48] sm:$0xff]  ;;  %v7785_v33 = vpop.permute.xlu0 %3414 }
 0x2db   :  { %11367 = vst [vmem:[#allocation68_spill] sm:$0xff] %v7785_v33 }
 0x2dd   :  { %v6108_v22 = vpop.f32.mrb[4].mxu1  ;;  %6275 = vmatmul.mubr.msk.f32.gmra.mrb[60].mxu1 %vm570_vm1, %v2212_v50 }
 0x2de   :  { %v7679_v7 = vadd.f32 %v6108_v22, %v7673_v41  ;;  %v715_v37 = vpop.f32.mrb[5].mxu1 }
 0x2df   :  { %v7688_v43 = vadd.f32 %v715_v37, %v7684_v38  ;;  %v7707_v37 = vpop.permute.xlu1 %3056 }
 0x2e0   :  { %778 = vmax.xlane.f32.xlu0 %v7679_v7  ;;  %11357 = vst [vmem:[#allocation58_spill] sm:$0xff] %v7707_v37 }
 0x2e3   :  { %v7726_v37 = vpop.permute.xlu1 %3061 }
 0x2e4   :  { %776 = vmax.xlane.f32.xlu0 %v7688_v43  ;;  %11358 = vst [vmem:[#allocation59_spill] sm:$0xff] %v7726_v37 }
 0x2e5   :  { %v6111_v50 = vpop.f32.mrb[6].mxu1 }
 0x2e6   :  { %v7699_v22 = vadd.f32 %v6111_v50, %v7693_v44  ;;  %v725_v19 = vpop.f32.mrb[7].mxu1 }
 0x2e7   :  { %v7710_v6 = vadd.f32 %v725_v19, %v7704_v12  ;;  %v7743_v13 = vpop.permute.xlu1 %3066 }
 0x2e8   :  { %782 = vmax.xlane.f32.xlu0 %v7699_v22  ;;  %11359 = vst [vmem:[#allocation60_spill] sm:$0xff] %v7743_v13 }
 0x2eb   :  { %v7757_v30 = vpop.permute.xlu1 %3071 }
 0x2ec   :  { %780 = vmax.xlane.f32.xlu0 %v7710_v6  ;;  %11360 = vst [vmem:[#allocation61_spill] sm:$0xff] %v7757_v30 }
 0x2ed   :  { %v6114_v50 = vpop.f32.mrb[8].mxu1 }
 0x2ee   :  { %v7719_v53 = vadd.f32 %v6114_v50, %v7715_v9  ;;  %v735_v58 = vpop.f32.mrb[9].mxu1 }
 0x2ef   :  { %v7730_v19 = vadd.f32 %v735_v58, %v7724_v39  ;;  %v7772_v36 = vpop.permute.xlu1 %3076 }
 0x2f0   :  { %786 = vmax.xlane.f32.xlu0 %v7719_v53  ;;  %11361 = vst [vmem:[#allocation62_spill] sm:$0xff] %v7772_v36 }
 0x2f3   :  { %v7775_v30 = vpop.permute.xlu1 %3081 }
 0x2f4   :  { %784 = vmax.xlane.f32.xlu0 %v7730_v19  ;;  %11362 = vst [vmem:[#allocation63_spill] sm:$0xff] %v7775_v30 }
 0x2f5   :  { %v6117_v50 = vpop.f32.mrb[10].mxu1 }
 0x2f6   :  { %v7746_v37 = vadd.f32 %v6117_v50, %v7735_v45  ;;  %v745_v58 = vpop.f32.mrb[11].mxu1  ;;  %v7763_v50 = vld [vmem:[%s11227_s1 + $0x70] sm:$0xff] }
 0x2f7   :  { %v7750_v3 = vadd.f32 %v745_v58, %v7741_v27  ;;  %v7777_v35 = vpop.permute.xlu1 %3086 }
 0x2f8   :  { %790 = vmax.xlane.f32.xlu0 %v7746_v37  ;;  %11363 = vst [vmem:[#allocation64_spill] sm:$0xff] %v7777_v35 }
 0x2fb   :  { %v7779_v34 = vpop.permute.xlu1 %3359 }
 0x2fc   :  { %788 = vmax.xlane.f32.xlu0 %v7750_v3  ;;  %11364 = vst [vmem:[#allocation65_spill] sm:$0xff] %v7779_v34 }
 0x2fd   :  { %v6120_v10 = vpop.f32.mrb[12].mxu1 }
 0x2fe   :  { %v7766_v13 = vadd.f32 %v6120_v10, %v7755_v47  ;;  %v755_v58 = vpop.f32.mrb[13].mxu1 }
 0x2ff   :  { %v7770_v14 = vadd.f32 %v755_v58, %v7763_v50  ;;  %v7781_v32 = vpop.permute.xlu1 %3369  ;;  %v7789_v58 = vpop.permute.xlu0 %3424 }
 0x300   :  { %794 = vmax.xlane.f32.xlu0 %v7766_v13  ;;  %11365 = vst [vmem:[#allocation66_spill] sm:$0xff] %v7781_v32  ;;  %11369 = vst [vmem:[#allocation70_spill] sm:$0xff] %v7789_v58 }
 0x303   :  { %v7783_v10 = vpop.permute.xlu1 %3379  ;;  %v7793_v36 = vpop.permute.xlu0 %3434 }
 0x304   :  { %792 = vmax.xlane.f32.xlu0 %v7770_v14  ;;  %11366 = vst [vmem:[#allocation67_spill] sm:$0xff] %v7783_v10  ;;  %11371 = vst [vmem:[#allocation72_spill] sm:$0xff] %v7793_v36 }
 0x307   :  { %v7787_v24 = vpop.permute.xlu1 %3389  ;;  %v7797_v30 = vpop.permute.xlu0 %3444 }
 0x308   :  { %11368 = vst [vmem:[#allocation69_spill] sm:$0xff] %v7787_v24  ;;  %11373 = vst [vmem:[#allocation74_spill] sm:$0xff] %v7797_v30 }
 0x30b   :  { %v7791_v8 = vpop.permute.xlu1 %3399  ;;  %v7801_v32 = vpop.permute.xlu0 %3454 }
 0x30c   :  { %11370 = vst [vmem:[#allocation71_spill] sm:$0xff] %v7791_v8  ;;  %11375 = vst [vmem:[#allocation76_spill] sm:$0xff] %v7801_v32 }
 0x30f   :  { %v7795_v4 = vpop.permute.xlu1 %3409  ;;  %v7813_v8 = vpop.permute.xlu0 %3552 }
 0x310   :  { %11372 = vst [vmem:[#allocation73_spill] sm:$0xff] %v7795_v4  ;;  %11377 = vst [vmem:[#allocation78_spill] sm:$0xff] %v7813_v8 }
 0x313   :  { %v7799_v35 = vpop.permute.xlu1 %3419 }
 0x314   :  { %11374 = vst [vmem:[#allocation75_spill] sm:$0xff] %v7799_v35 }
 0x317   :  { %v7811_v36 = vpop.permute.xlu1 %3429 }
 0x318   :  { %11376 = vst [vmem:[#allocation77_spill] sm:$0xff] %v7811_v36 }
 0x338   :  { %v6151_v34 = vpop.f32.mrb[14].mxu1 }
 0x339   :  { %v7804_v10 = vadd.f32 %v6151_v34, %v7582_v17  ;;  %v1216_v33 = vpop.f32.mrb[15].mxu1  ;;  %v7819_v34 = vpop.permute.xlu1 %3439 }
 0x33a   :  { %v7807_v24 = vadd.f32 %v1216_v33, %v7598_v31  ;;  %11378 = vst [vmem:[#allocation79_spill] sm:$0xff] %v7819_v34  ;;  %v7821_v17 = vpop.permute.xlu0 %3562 }
 0x33b   :  { %1297 = vmax.xlane.f32.xlu0 %v7804_v10  ;;  %11379 = vst [vmem:[#allocation80_spill] sm:$0xff] %v7821_v17 }
 0x33c   :  { %1295 = vmax.xlane.f32.xlu1 %v7807_v24 }
 0x33d   :  { %v7830_v4 = vpop.permute.xlu1 %3449 }
 0x33e   :  { %11380 = vst [vmem:[#allocation81_spill] sm:$0xff] %v7830_v4 }
 0x340   :  { %v6154_v30 = vpop.f32.mrb[16].mxu1 }
 0x341   :  { %v7816_v58 = vadd.f32 %v6154_v30, %v7613_v11  ;;  %v1226_v32 = vpop.f32.mrb[17].mxu1  ;;  %v7832_v11 = vpop.permute.xlu0 %3572 }
 0x342   :  { %v7824_v33 = vadd.f32 %v1226_v32, %v7628_v40  ;;  %11381 = vst [vmem:[#allocation82_spill] sm:$0xff] %v7832_v11  ;;  %v7839_v32 = vpop.permute.xlu1 %3459 }
 0x343   :  { %1301 = vmax.xlane.f32.xlu1 %v7816_v58  ;;  %11382 = vst [vmem:[#allocation83_spill] sm:$0xff] %v7839_v32 }
 0x345   :  { %v7841_v34 = vpop.permute.xlu0 %3582 }
 0x346   :  { %11383 = vst [vmem:[#allocation84_spill] sm:$0xff] %v7841_v34  ;;  %v7850_v17 = vpop.permute.xlu1 %3557 }
 0x347   :  { %1299 = vmax.xlane.f32.xlu1 %v7824_v33  ;;  %11384 = vst [vmem:[#allocation85_spill] sm:$0xff] %v7850_v17 }
 0x348   :  { %v6157_v31 = vpop.f32.mrb[18].mxu1 }
 0x349   :  { %v7828_v36 = vadd.f32 %v6157_v31, %v7645_v42  ;;  %v1236_v35 = vpop.f32.mrb[19].mxu1 }
 0x34a   :  { %v7836_v30 = vadd.f32 %v1236_v35, %v7651_v18 }
 0x34b   :  { %1305 = vmax.xlane.f32.xlu1 %v7828_v36 }
 0x34f   :  { %1303 = vmax.xlane.f32.xlu1 %v7836_v30 }
 0x350   :  { %v6160_v40 = vpop.f32.mrb[20].mxu1 }
 0x351   :  { %v7844_v42 = vadd.f32 %v6160_v40, %v7673_v41  ;;  %v1246_v31 = vpop.f32.mrb[21].mxu1 }
 0x352   :  { %v7848_v4 = vadd.f32 %v1246_v31, %v7684_v38  ;;  %v7859_v38 = vpop.permute.xlu1 %3567 }
 0x353   :  { %1309 = vmax.xlane.f32.xlu1 %v7844_v42  ;;  %11385 = vst [vmem:[#allocation86_spill] sm:$0xff] %v7859_v38 }
 0x355   :  { %v767_v11 = vpop.xlane.xlu0 %766 }
 0x356   :  { %v797_v35 = vsub.f32 %v7591_v25, %v767_v11 }
 0x357   :  { %1307 = vmax.xlane.f32.xlu1 %v7848_v4 }
 0x358   :  { %v814_v18 = vmul.f32 1.442695, %v797_v35  ;;  %v6163_v32 = vpop.f32.mrb[22].mxu1 }
 0x359   :  { %v7855_v34 = vadd.f32 %v6163_v32, %v7693_v44  ;;  %v765_v41 = vpop.xlane.xlu0 %764  ;;  %v1256_v40 = vpop.f32.mrb[23].mxu1 }
 0x35a   :  { %v796_v8 = vsub.f32 %v7606_v5, %v765_v41  ;;  %6506 = vpow2.f32 %v814_v18  ;;  %v7862_v17 = vadd.f32 %v1256_v40, %v7704_v12  ;;  %v7869_v41 = vpop.permute.xlu1 %3577 }
 0x35b   :  { %1313 = vmax.xlane.f32.xlu1 %v7855_v34  ;;  %11386 = vst [vmem:[#allocation87_spill] sm:$0xff] %v7869_v41 }
 0x35c   :  { %v812_v31 = vmul.f32 1.442695, %v796_v8 }
 0x35d   :  { %v771_v25 = vpop.xlane.xlu0 %770 }
 0x35e   :  { %6508 = vpow2.f32 %v812_v31  ;;  %v799_v44 = vsub.f32 %v7621_v21, %v771_v25  ;;  %v7880_v21 = vpop.permute.xlu1 %3587 }
 0x35f   :  { %1311 = vmax.xlane.f32.xlu1 %v7862_v17  ;;  %11387 = vst [vmem:[#allocation88_spill] sm:$0xff] %v7880_v21 }
 0x360   :  { %v6166_v11 = vpop.f32.mrb[24].mxu1  ;;  %v818_v8 = vmul.f32 1.442695, %v799_v44 }
 0x361   :  { %v7867_v32 = vadd.f32 %v6166_v11, %v7715_v9  ;;  %v769_v5 = vpop.xlane.xlu0 %768  ;;  %v1266_v35 = vpop.f32.mrb[25].mxu1 }
 0x362   :  { %v7872_v18 = vadd.f32 %v1266_v35, %v7724_v39  ;;  %v798_v12 = vsub.f32 %v7638_v49, %v769_v5  ;;  %6510 = vpow2.f32 %v818_v8 }
 0x363   :  { %1317 = vmax.xlane.f32.xlu0 %v7867_v32 }
 0x364   :  { %1315 = vmax.xlane.f32.xlu1 %v7872_v18  ;;  %v7877_v40 = vpop.eup %6506  ;;  %v816_v9 = vmul.f32 1.442695, %v798_v12 }
 0x365   :  { %v775_v25 = vpop.xlane.xlu0 %774 }
 0x366   :  { %6512 = vpow2.f32 %v816_v9  ;;  %v801_v44 = vsub.f32 %v7656_v59, %v775_v25  ;;  %v773_v5 = vpop.xlane.xlu1 %772  ;;  %v7903_v59 = vld [vmem:[%s11227_s1 + $0x88] sm:$0xff] }
 0x367   :  { %846 = vadd.xlane.f32.xlu0 %v7877_v40  ;;  %v800_v21 = vsub.f32 %v7661_v52, %v773_v5 }
 0x368   :  { %v6169_v31 = vpop.f32.mrb[26].mxu1  ;;  %v7882_v39 = vpop.eup %6508  ;;  %v822_v12 = vmul.f32 1.442695, %v801_v44 }
 0x369   :  { %v1276_v11 = vpop.f32.mrb[27].mxu1  ;;  %v7888_v49 = vadd.f32 %v6169_v31, %v7735_v45  ;;  %v820_v9 = vmul.f32 1.442695, %v800_v21  ;;  %v7921_v21 = vld [vmem:[%s11227_s1 + $0x90] sm:$0xff] }
 0x36a   :  { %v7885_v35 = vadd.f32 %v1276_v11, %v7741_v27  ;;  %6514 = vpow2.f32 %v822_v12 }
 0x36b   :  { %844 = vadd.xlane.f32.xlu0 %v7882_v39  ;;  %6516 = vpow2.f32 %v820_v9 }
 0x36c   :  { %1319 = vmax.xlane.f32.xlu1 %v7885_v35  ;;  %v7895_v38 = vpop.eup %6510 }
 0x36d   :  { %v779_v8 = vpop.xlane.xlu0 %778 }
 0x36f   :  { %1321 = vmax.xlane.f32.xlu0 %v7888_v49 }
 0x370   :  { %v6172_v41 = vpop.f32.mrb[28].mxu1 }
 0x371   :  { %v777_v27 = vpop.xlane.xlu0 %776  ;;  %v1286_v11 = vpop.f32.mrb[29].mxu1  ;;  %v7915_v5 = vadd.f32 %v6172_v41, %v7755_v47  ;;  %v7933_v47 = vld [vmem:[%s11227_s1 + $0xa0] sm:$0xff]  ;;  %v803_v41 = vsub.f32 %v7679_v7, %v779_v8 }
 0x372   :  { %v7898_v45 = vadd.f32 %v1286_v11, %v7763_v50  ;;  %v7912_v50 = vpop.eup %6512  ;;  %v802_v8 = vsub.f32 %v7688_v43, %v777_v27  ;;  %v7972_v43 = vld [vmem:[%s11227_s1 + $0xc0] sm:$0xff] }
 0x373   :  { %850 = vadd.xlane.f32.xlu0 %v7895_v38  ;;  %v826_v7 = vmul.f32 1.442695, %v803_v41 }
 0x374   :  { %v6203_v31 = vpop.f32.mrb[30].mxu1  ;;  %1323 = vmax.xlane.f32.xlu1 %v7898_v45  ;;  %v7941_v60 = vpop.eup %6514  ;;  %v824_v27 = vmul.f32 1.442695, %v802_v8 }
 0x375   :  { %v7908_v52 = vadd.f32 %v6203_v31, %v7903_v59  ;;  %v7910_v25 = vpop.xlane.xlu0 %782  ;;  %v1780_v44 = vpop.f32.mrb[31].mxu1  ;;  %11388 = vst [vmem:[#allocation89_spill] sm:$0xff] %v7941_v60  ;;  %6518 = vpow2.f32 %v826_v7  ;;  %v7993_v7 = vld [vmem:[%s11227_s1 + $0xd0] sm:$0xff] }
 0x376   :  { %v7958_v54 = vpop.eup %6516  ;;  %6520 = vpow2.f32 %v824_v27  ;;  %v8010_v27 = vld [vmem:[%s11227_s1 + $0xe0] sm:$0xff]  ;;  %v805_v63 = vsub.f32 %v7699_v22, %v7910_v25  ;;  %v8027_v22 = vld [vmem:[%s11227_s1 + $0xf0] sm:$0xff] }
 0x377   :  { %848 = vadd.xlane.f32.xlu0 %v7912_v50 }
 0x378   :  { %v6206_v12 = vpop.f32.mrb[32].mxu1  ;;  %1861 = vmax.xlane.f32.xlu1 %v7908_v52  ;;  %v830_v25 = vmul.f32 1.442695, %v805_v63 }
 0x379   :  { %v7924_v11 = vpop.xlane.xlu0 %780  ;;  %v1790_v31 = vpop.f32.mrb[33].mxu1 }
 0x37a   :  { %v7927_v29 = vadd.f32 %v7921_v21, %v1790_v31 }
 0x37b   :  { %1325 = vmax.xlane.f32.xlu0 %v7915_v5 }
 0x37c   :  { %v7936_v0 = vpop.f32.mrb[34].mxu1  ;;  %1863 = vmax.xlane.f32.xlu1 %v7927_v29 }
 0x37d   :  { %v7939_v9 = vpop.xlane.xlu0 %786  ;;  %v1800_v55 = vpop.f32.mrb[35].mxu1 }
 0x37e   :  { %v7944_v31 = vadd.f32 %v7933_v47, %v1800_v55  ;;  %v7963_v55 = vld [vmem:[%s11227_s1 + $0x80] sm:$0xff] }
 0x37f   :  { %854 = vadd.xlane.f32.xlu0 %v7941_v60  ;;  %v7978_v61 = vadd.f32 %v7963_v55, %v1780_v44  ;;  %v8017_v48 = vpop.eup %6518 }
 0x380   :  { %v7953_v15 = vpop.f32.mrb[36].mxu1  ;;  %1867 = vmax.xlane.f32.xlu1 %v7944_v31  ;;  %11391 = vst [vmem:[#allocation92_spill] sm:$0xff] %v8017_v48 }
 0x381   :  { %v7956_v20 = vpop.xlane.xlu0 %784  ;;  %v1810_v1 = vpop.f32.mrb[37].mxu1 }
 0x382   :  { %v7966_v2 = vadd.f32 %v7950_v57, %v1810_v1  ;;  %v7983_v1 = vld [vmem:[%s11227_s1 + $0x98] sm:$0xff] }
 0x383   :  { %852 = vadd.xlane.f32.xlu0 %v7958_v54  ;;  %v7999_v8 = vadd.f32 %v6206_v12, %v7983_v1 }
 0x384   :  { %v7974_v41 = vpop.f32.mrb[38].mxu1  ;;  %1871 = vmax.xlane.f32.xlu1 %v7966_v2 }
 0x385   :  { %v791_v62 = vpop.xlane.xlu0 %790  ;;  %v1820_v16 = vpop.f32.mrb[39].mxu1 }
 0x386   :  { %v809_v28 = vsub.f32 %v7746_v37, %v791_v62  ;;  %v7987_v56 = vadd.f32 %v7972_v43, %v1820_v16 }
 0x387   :  { %1859 = vmax.xlane.f32.xlu0 %v7978_v61 }
 0x388   :  { %11389 = vst [vmem:[#allocation90_spill] sm:$0xff] %v7987_v56  ;;  %v7995_v44 = vpop.f32.mrb[40].mxu1  ;;  %1875 = vmax.xlane.f32.xlu1 %v7987_v56  ;;  %v838_v23 = vmul.f32 1.442695, %v809_v28 }
 0x389   :  { %v8001_v62 = vpop.xlane.xlu0 %788  ;;  %v1830_v16 = vpop.f32.mrb[41].mxu1 }
 0x38a   :  { %v8004_v37 = vadd.f32 %v7993_v7, %v1830_v16  ;;  %6522 = vpow2.f32 %v838_v23  ;;  %v804_v23 = vsub.f32 %v7710_v6, %v7924_v11 }
 0x38b   :  { %1865 = vmax.xlane.f32.xlu0 %v7999_v8  ;;  %6524 = vpow2.f32 %v830_v25 }
 0x38c   :  { %11390 = vst [vmem:[#allocation91_spill] sm:$0xff] %v8004_v37  ;;  %v8014_v26 = vpop.f32.mrb[42].mxu1  ;;  %1879 = vmax.xlane.f32.xlu1 %v8004_v37  ;;  %v828_v63 = vmul.f32 1.442695, %v804_v23 }
 0x38d   :  { %v795_v28 = vpop.xlane.xlu0 %794  ;;  %v1840_v12 = vpop.f32.mrb[43].mxu1 }
 0x38e   :  { %v811_v16 = vsub.f32 %v7766_v13, %v795_v28  ;;  %v8021_v56 = vadd.f32 %v8010_v27, %v1840_v12  ;;  %v8034_v28 = vpop.eup %6520  ;;  %v8039_v12 = vld [vmem:[%s11227_s1 + $0xa8] sm:$0xff] }
 0x38f   :  { %858 = vadd.xlane.f32.xlu0 %v8017_v48  ;;  %11393 = vst [vmem:[#allocation94_spill] sm:$0xff] %v8034_v28  ;;  %v8048_v11 = vadd.f32 %v7936_v0, %v8039_v12 }
 0x390   :  { %11392 = vst [vmem:[#allocation93_spill] sm:$0xff] %v8021_v56  ;;  %v8031_v37 = vpop.f32.mrb[44].mxu1  ;;  %1883 = vmax.xlane.f32.xlu1 %v8021_v56  ;;  %v842_v60 = vmul.f32 1.442695, %v811_v16  ;;  %v5789_v56 = vld [vmem:[%s11227_s1 + $0xb8] sm:$0xff] }
 0x391   :  { %v1850_v13 = vpop.f32.mrb[45].mxu1  ;;  %11395 = vst [vmem:[#allocation96_spill] sm:$0xff] %v8048_v11  ;;  %v8062_v23 = vadd.f32 %v7953_v15, %v5789_v56 }
 0x392   :  { %v8042_v48 = vadd.f32 %v8027_v22, %v1850_v13  ;;  %6526 = vpow2.f32 %v842_v60 }
 0x393   :  { %856 = vadd.xlane.f32.xlu0 %v8034_v28  ;;  %6528 = vpow2.f32 %v828_v63  ;;  %v807_v28 = vsub.f32 %v7719_v53, %v7939_v9 }
 0x394   :  { %11394 = vst [vmem:[#allocation95_spill] sm:$0xff] %v8042_v48  ;;  %v6255_v6 = vpop.f32.mrb[46].mxu1  ;;  %1887 = vmax.xlane.f32.xlu1 %v8042_v48  ;;  %v8055_v13 = vpop.eup %6522 }
 0x395   :  { %v8050_v16 = vpop.f32.mrb[47].mxu1  ;;  %11396 = vst [vmem:[#allocation97_spill] sm:$0xff] %v8055_v13  ;;  %v8065_v60 = vadd.f32 %v6255_v6, %v7903_v59  ;;  %v806_v6 = vsub.f32 %v7730_v19, %v7956_v20 }
 0x397   :  { %1869 = vmax.xlane.f32.xlu0 %v8048_v11  ;;  %11397 = vst [vmem:[#allocation98_spill] sm:$0xff] %v8065_v60  ;;  %v8076_v11 = vpop.eup %6524  ;;  %v832_v20 = vmul.f32 1.442695, %v806_v6 }
 0x398   :  { %v8058_v25 = vpop.f32.mrb[48].mxu1  ;;  %870 = vadd.xlane.f32.xlu1 %v8055_v13  ;;  %11398 = vst [vmem:[#allocation99_spill] sm:$0xff] %v8076_v11 }
 0x399   :  { %v2321_v0 = vpop.f32.mrb[49].mxu1 }
 0x39a   :  { %v8068_v48 = vadd.f32 %v7921_v21, %v2321_v0  ;;  %v834_v21 = vmul.f32 1.442695, %v807_v28 }
 0x39b   :  { %1873 = vmax.xlane.f32.xlu0 %v8062_v23 }
 0x39c   :  { %v8073_v63 = vpop.f32.mrb[50].mxu1  ;;  %2392 = vmax.xlane.f32.xlu1 %v8065_v60  ;;  %v8081_v59 = vpop.eup %6526  ;;  %6530 = vpow2.f32 %v834_v21 }
 0x39d   :  { %v2331_v13 = vpop.f32.mrb[51].mxu1  ;;  %11399 = vst [vmem:[#allocation100_spill] sm:$0xff] %v8081_v59  ;;  %v8089_v60 = vpop.eup %6528  ;;  %6532 = vpow2.f32 %v832_v20  ;;  %v5795_v20 = vld [vmem:[%s11227_s1 + $0xe8] sm:$0xff] }
 0x39e   :  { %v8079_v15 = vadd.f32 %v7933_v47, %v2331_v13  ;;  %11400 = vst [vmem:[#allocation101_spill] sm:$0xff] %v8089_v60  ;;  %v8094_v47 = vld [vmem:[%s11227_s1 + $0xc8] sm:$0xff] }
 0x39f   :  { %862 = vadd.xlane.f32.xlu0 %v8076_v11 }
 0x3a0   :  { %v6264_v0 = vpop.f32.mrb[52].mxu1  ;;  %874 = vadd.xlane.f32.xlu1 %v8081_v59 }
 0x3a1   :  { %v8087_v53 = vadd.f32 %v6264_v0, %v5789_v56  ;;  %v2341_v9 = vpop.f32.mrb[53].mxu1  ;;  %v8104_v56 = vadd.f32 %v7974_v41, %v8094_v47  ;;  %v5793_v0 = vld [vmem:[%s11227_s1 + $0xd8] sm:$0xff] }
 0x3a2   :  { %v8097_v13 = vadd.f32 %v7950_v57, %v2341_v9  ;;  %v8114_v21 = vadd.f32 %v7995_v44, %v5793_v0 }
 0x3a3   :  { %860 = vadd.xlane.f32.xlu0 %v8089_v60 }
 0x3a4   :  { %v8100_v19 = vpop.f32.mrb[54].mxu1 }
 0x3a5   :  { %v2351_v28 = vpop.f32.mrb[55].mxu1 }
 0x3a6   :  { %v8110_v59 = vadd.f32 %v7972_v43, %v2351_v28  ;;  %v808_v43 = vsub.f32 %v7750_v3, %v8001_v62  ;;  %v5797_v3 = vld [vmem:[%s11227_s1 + $0xf8] sm:$0xff] }
 0x3a7   :  { %1877 = vmax.xlane.f32.xlu0 %v8104_v56 }
 0x3a8   :  { %v6270_v57 = vpop.f32.mrb[56].mxu1 }
 0x3a9   :  { %v8116_v6 = vadd.f32 %v6270_v57, %v5793_v0  ;;  %v2361_v9 = vpop.f32.mrb[57].mxu1  ;;  %v8130_v57 = vpop.eup %6530 }
 0x3aa   :  { %v8119_v41 = vadd.f32 %v7993_v7, %v2361_v9  ;;  %v836_v9 = vmul.f32 1.442695, %v808_v43  ;;  %v8142_v11 = vpop.eup %6532  ;;  %v8154_v43 = vadd.f32 %v8031_v37, %v5797_v3 }
 0x3ab   :  { %11401 = vst [vmem:[#allocation102_spill] sm:$0xff] %v8116_v6  ;;  %2412 = vmax.xlane.f32.xlu1 %v8116_v6  ;;  %1881 = vmax.xlane.f32.xlu0 %v8114_v21 }
 0x3ac   :  { %v6273_v28 = vpop.f32.mrb[58].mxu1  ;;  %6534 = vpow2.f32 %v836_v9  ;;  %v8163_v9 = vadd.f32 %v7963_v55, %v8050_v16  ;;  %v8178_v16 = vadd.f32 %v8073_v63, %v8039_v12 }
 0x3ad   :  { %v8128_v44 = vadd.f32 %v6273_v28, %v5795_v20  ;;  %v2371_v0 = vpop.f32.mrb[59].mxu1 }
 0x3ae   :  { %v8133_v7 = vadd.f32 %v8010_v27, %v2371_v0  ;;  %v8150_v27 = vadd.f32 %v8014_v26, %v5795_v20  ;;  %v793_v0 = vpop.xlane.xlu0 %792  ;;  %v8168_v26 = vadd.f32 %v8058_v25, %v7983_v1 }
 0x3af   :  { %2416 = vmax.xlane.f32.xlu1 %v8128_v44  ;;  %866 = vadd.xlane.f32.xlu0 %v8130_v57 }
 0x3b0   :  { %v6276_v62 = vpop.f32.mrb[60].mxu1 }
 0x3b1   :  { %v8140_v6 = vadd.f32 %v6276_v62, %v5797_v3  ;;  %v2381_v28 = vpop.f32.mrb[61].mxu1  ;;  %v810_v62 = vsub.f32 %v7770_v14, %v793_v0 }
 0x3b2   :  { %v8145_v60 = vadd.f32 %v8027_v22, %v2381_v28 }
 0x3b3   :  { %2420 = vmax.xlane.f32.xlu1 %v8140_v6  ;;  %864 = vadd.xlane.f32.xlu0 %v8142_v11  ;;  %v840_v28 = vmul.f32 1.442695, %v810_v62 }
 0x3b5   :  { %6536 = vpow2.f32 %v840_v28 }
 0x3b6   :  { %v8158_v22 = vpop.eup %6534 }
 0x3b7   :  { %1885 = vmax.xlane.f32.xlu0 %v8150_v27 }
 0x3bb   :  { %1889 = vmax.xlane.f32.xlu0 %v8154_v43 }
 0x3bf   :  { %868 = vadd.xlane.f32.xlu0 %v8158_v22  ;;  %v8173_v3 = vpop.eup %6536 }
 0x3c3   :  { %2390 = vmax.xlane.f32.xlu0 %v8163_v9 }
 0x3c7   :  { %2396 = vmax.xlane.f32.xlu0 %v8168_v26 }
 0x3c9   :  { %v1296_v37 = vpop.xlane.xlu1 %1295 }
 0x3ca   :  { %v1327_v14 = vsub.f32 %v7807_v24, %v1296_v37 }
 0x3cb   :  { %2394 = vmax.xlane.f32.xlu0 %v8068_v48 }
 0x3cc   :  { %v1343_v20 = vmul.f32 1.442695, %v1327_v14  ;;  %v1298_v14 = vpop.xlane.xlu0 %1297 }
 0x3ce   :  { %6538 = vpow2.f32 %v1343_v20 }
 0x3cf   :  { %872 = vadd.xlane.f32.xlu0 %v8173_v3 }
 0x3d0   :  { %v1302_v55 = vpop.xlane.xlu1 %1301 }
 0x3d3   :  { %2400 = vmax.xlane.f32.xlu0 %v8178_v16 }
 0x3d4   :  { %v1300_v1 = vpop.xlane.xlu1 %1299 }
 0x3d5   :  { %v1329_v25 = vsub.f32 %v7824_v33, %v1300_v1  ;;  %v8191_v33 = vadd.f32 %v8100_v19, %v8094_v47  ;;  %v1328_v1 = vsub.f32 %v7804_v10, %v1298_v14  ;;  %v1330_v47 = vsub.f32 %v7816_v58, %v1302_v55 }
 0x3d7   :  { %v1347_v0 = vmul.f32 1.442695, %v1329_v25  ;;  %2398 = vmax.xlane.f32.xlu0 %v8079_v15 }
 0x3d8   :  { %v8183_v24 = vpop.eup %6538  ;;  %v1306_v62 = vpop.xlane.xlu1 %1305 }
 0x3d9   :  { %6540 = vpow2.f32 %v1347_v0  ;;  %1375 = vadd.xlane.f32.xlu1 %v8183_v24  ;;  %v1332_v10 = vsub.f32 %v7828_v36, %v1306_v62 }
 0x3db   :  { %2404 = vmax.xlane.f32.xlu0 %v8087_v53  ;;  %v1353_v58 = vmul.f32 1.442695, %v1332_v10 }
 0x3dc   :  { %v1304_v28 = vpop.xlane.xlu1 %1303 }
 0x3dd   :  { %v1331_v12 = vsub.f32 %v7836_v30, %v1304_v28  ;;  %v1345_v28 = vmul.f32 1.442695, %v1328_v1 }
 0x3df   :  { %v1351_v63 = vmul.f32 1.442695, %v1331_v12  ;;  %2402 = vmax.xlane.f32.xlu0 %v8097_v13 }
 0x3e0   :  { %v1310_v37 = vpop.xlane.xlu1 %1309 }
 0x3e1   :  { %6542 = vpow2.f32 %v1351_v63  ;;  %v1349_v63 = vmul.f32 1.442695, %v1330_v47 }
 0x3e3   :  { %v8193_v20 = vpop.eup %6540  ;;  %2408 = vmax.xlane.f32.xlu0 %v8191_v33 }
 0x3e4   :  { %1379 = vadd.xlane.f32.xlu1 %v8193_v20  ;;  %v1308_v25 = vpop.xlane.xlu1 %1307 }
 0x3e5   :  { %v1333_v30 = vsub.f32 %v7848_v4, %v1308_v25  ;;  %v1334_v25 = vsub.f32 %v7844_v42, %v1310_v37 }
 0x3e7   :  { %v1355_v0 = vmul.f32 1.442695, %v1333_v30  ;;  %2406 = vmax.xlane.f32.xlu0 %v8110_v59  ;;  %v1357_v36 = vmul.f32 1.442695, %v1334_v25 }
 0x3e8   :  { %v1314_v19 = vpop.xlane.xlu1 %1313 }
 0x3e9   :  { %6544 = vpow2.f32 %v1355_v0 }
 0x3ea   :  { %6546 = vpow2.f32 %v1345_v28 }
 0x3eb   :  { %v8201_v12 = vpop.eup %6542  ;;  %2410 = vmax.xlane.f32.xlu0 %v8119_v41  ;;  %6548 = vpow2.f32 %v1349_v63 }
 0x3ec   :  { %1383 = vadd.xlane.f32.xlu1 %v8201_v12  ;;  %v1312_v14 = vpop.xlane.xlu1 %1311 }
 0x3ed   :  { %v1335_v4 = vsub.f32 %v7862_v17, %v1312_v14  ;;  %v1336_v17 = vsub.f32 %v7855_v34, %v1314_v19 }
 0x3ef   :  { %v1359_v1 = vmul.f32 1.442695, %v1335_v4  ;;  %2414 = vmax.xlane.f32.xlu0 %v8133_v7  ;;  %v1361_v47 = vmul.f32 1.442695, %v1336_v17 }
 0x3f0   :  { %v1318_v55 = vpop.xlane.xlu0 %1317 }
 0x3f1   :  { %6550 = vpow2.f32 %v1359_v1  ;;  %v1316_v30 = vpop.xlane.xlu1 %1315 }
 0x3f2   :  { %v1337_v0 = vsub.f32 %v7872_v18, %v1316_v30  ;;  %6552 = vpow2.f32 %v1353_v58  ;;  %v1338_v18 = vsub.f32 %v7867_v32, %v1318_v55 }
 0x3f3   :  { %v8210_v28 = vpop.eup %6544  ;;  %2418 = vmax.xlane.f32.xlu0 %v8145_v60 }
 0x3f4   :  { %v1363_v62 = vmul.f32 1.442695, %v1337_v0  ;;  %v847_v42 = vpop.xlane.xlu0 %846  ;;  %1387 = vadd.xlane.f32.xlu1 %v8210_v28  ;;  %v8215_v37 = vpop.eup %6546  ;;  %v1365_v4 = vmul.f32 1.442695, %v1338_v18 }
 0x3f5   :  { %v8219_v14 = vpop.eup %6548 }
 0x3f6   :  { %6554 = vpow2.f32 %v1363_v62 }
 0x3f7   :  { %6556 = vpow2.f32 %v1357_v36  ;;  %1377 = vadd.xlane.f32.xlu0 %v8215_v37 }
 0x3f8   :  { %6558 = vrcp.f32 %v847_v42  ;;  %v845_v63 = vpop.xlane.xlu0 %844 }
 0x3f9   :  { %6560 = vrcp.f32 %v845_v63  ;;  %v1320_v10 = vpop.xlane.xlu1 %1319 }
 0x3fa   :  { %v1339_v34 = vsub.f32 %v7885_v35, %v1320_v10  ;;  %6562 = vpow2.f32 %v1361_v47 }
 0x3fb   :  { %v8222_v19 = vpop.eup %6550  ;;  %1381 = vadd.xlane.f32.xlu0 %v8219_v14 }
 0x3fc   :  { %v1367_v25 = vmul.f32 1.442695, %v1339_v34  ;;  %v1322_v1 = vpop.xlane.xlu0 %1321  ;;  %1391 = vadd.xlane.f32.xlu1 %v8222_v19  ;;  %v8227_v58 = vpop.eup %6552 }
 0x3fd   :  { %v1340_v32 = vsub.f32 %v7888_v49, %v1322_v1 }
 0x3fe   :  { %6564 = vpow2.f32 %v1367_v25 }
 0x3ff   :  { %v1369_v55 = vmul.f32 1.442695, %v1340_v32  ;;  %1385 = vadd.xlane.f32.xlu0 %v8227_v58  ;;  %6566 = vpow2.f32 %v1365_v4 }
 0x400   :  { %v8230_v30 = vpop.eup %6554  ;;  %v851_v35 = vpop.xlane.xlu0 %850 }
 0x401   :  { %v8232_v0 = vpop.eup %6556  ;;  %1395 = vadd.xlane.f32.xlu1 %v8230_v30  ;;  %v1324_v36 = vpop.xlane.xlu1 %1323  ;;  %6568 = vpow2.f32 %v1369_v55 }
 0x402   :  { %v6559_v17 = vpop.eup %6558  ;;  %v1341_v62 = vsub.f32 %v7898_v45, %v1324_v36  ;;  %6570 = vrcp.f32 %v851_v35 }
 0x403   :  { %v6561_v42 = vpop.eup %6560  ;;  %1389 = vadd.xlane.f32.xlu0 %v8232_v0  ;;  %v893_v10 = vmul.f32 %v6559_v17, %v7877_v40 }
 0x404   :  { %v1371_v49 = vmul.f32 1.442695, %v1341_v62  ;;  %v849_v47 = vpop.xlane.xlu0 %848  ;;  %v892_v18 = vmul.f32 %v6561_v42, %v7882_v39  ;;  %v8239_v34 = vpop.eup %6562 }
 0x405   :  { %6572 = vrcp.f32 %v849_v47  ;;  %v1862_v63 = vpop.xlane.xlu1 %1861 }
 0x406   :  { %6574 = vpow2.f32 %v1371_v49  ;;  %6123 = vmatprep.mubr.f32.mxu0 %v892_v18  ;;  %v1892_v4 = vsub.f32 %v7908_v52, %v1862_v63 }
 0x407   :  { %6124 = vmatmul.mubr.f32.vlgmr.msra.gmra.mrb[14].mxu0 %v893_v10  ;;  %1393 = vadd.xlane.f32.xlu0 %v8239_v34 }
 0x408   :  { %v8243_v45 = vpop.eup %6564  ;;  %6174 = vmatpush3.xpose.msra.mxu0 %v7180_v46  ;;  %v1326_v25 = vpop.xlane.xlu0 %1325  ;;  %v1909_v32 = vmul.f32 1.442695, %v1892_v4 }
 0x409   :  { %6225 = vmatprep.subr.mxu0 %v7196_v51  ;;  %v1342_v39 = vsub.f32 %v7915_v5, %v1326_v25  ;;  %1399 = vadd.xlane.f32.xlu1 %v8243_v45  ;;  %v1864_v40 = vpop.xlane.xlu1 %1863  ;;  %v8249_v1 = vpop.eup %6566 }
 0x40a   :  { %v1893_v63 = vsub.f32 %v7927_v29, %v1864_v40 }
 0x40b   :  { %v1373_v55 = vmul.f32 1.442695, %v1342_v39  ;;  %1397 = vadd.xlane.f32.xlu0 %v8249_v1  ;;  %v8252_v35 = vpop.eup %6568 }
 0x40c   :  { %v855_v52 = vpop.xlane.xlu0 %854  ;;  %v6571_v17 = vpop.eup %6570 }
 0x40d   :  { %6576 = vpow2.f32 %v1373_v55  ;;  %v1868_v36 = vpop.xlane.xlu1 %1867  ;;  %v895_v18 = vmul.f32 %v6571_v17, %v7895_v38 }
 0x40e   :  { %6578 = vpow2.f32 %v1909_v32  ;;  %v1895_v32 = vsub.f32 %v7944_v31, %v1868_v36 }
 0x40f   :  { %v6573_v62 = vpop.eup %6572  ;;  %1401 = vadd.xlane.f32.xlu0 %v8252_v35  ;;  %6580 = vrcp.f32 %v855_v52 }
 0x410   :  { %v8255_v5 = vpop.eup %6574  ;;  %v853_v42 = vpop.xlane.xlu0 %852  ;;  %v894_v49 = vmul.f32 %v6573_v62, %v7912_v50  ;;  %v1911_v50 = vmul.f32 1.442695, %v1893_v63  ;;  %v11402_v63 = vld [vmem:[#allocation89_spill] sm:$0xff] }
 0x411   :  { %6582 = vrcp.f32 %v853_v42  ;;  %1403 = vadd.xlane.f32.xlu1 %v8255_v5  ;;  %v1872_v47 = vpop.xlane.xlu1 %1871  ;;  %v1915_v42 = vmul.f32 1.442695, %v1895_v32 }
 0x412   :  { %6126 = vmatprep.mubr.f32.mxu0 %v894_v49  ;;  %v1897_v36 = vsub.f32 %v7966_v2, %v1872_v47  ;;  %v11405_v47 = vld [vmem:[#allocation96_spill] sm:$0xff] }
 0x413   :  { %6127 = vmatmul.mubr.f32.gmra.mrb[16].mxu0 %v895_v18 }
 0x414   :  { %v1860_v10 = vpop.xlane.xlu0 %1859 }
 0x415   :  { %v1891_v4 = vsub.f32 %v7978_v61, %v1860_v10  ;;  %v1876_v25 = vpop.xlane.xlu1 %1875 }
 0x417   :  { %v8262_v39 = vpop.eup %6576  ;;  %v1907_v55 = vmul.f32 1.442695, %v1891_v4 }
 0x418   :  { %v1866_v52 = vpop.xlane.xlu0 %1865  ;;  %1405 = vadd.xlane.f32.xlu0 %v8262_v39  ;;  %v8266_v62 = vpop.eup %6578 }
 0x419   :  { %6584 = vpow2.f32 %v1907_v55  ;;  %v1894_v38 = vsub.f32 %v7999_v8, %v1866_v52  ;;  %v1880_v17 = vpop.xlane.xlu1 %1879  ;;  %v6581_v29 = vpop.eup %6580  ;;  %v11403_v8 = vld [vmem:[#allocation90_spill] sm:$0xff]  ;;  %v1919_v55 = vmul.f32 1.442695, %v1897_v36 }
 0x41a   :  { %6586 = vpow2.f32 %v1911_v50  ;;  %v897_v10 = vmul.f32 %v6581_v29, %v11402_v63  ;;  %v1899_v4 = vsub.f32 %v11403_v8, %v1876_v25  ;;  %v11406_v25 = vld [vmem:[#allocation93_spill] sm:$0xff] }
 0x41b   :  { %v6583_v40 = vpop.eup %6582  ;;  %v1913_v61 = vmul.f32 1.442695, %v1894_v38 }
 0x41c   :  { %v859_v49 = vpop.xlane.xlu0 %858  ;;  %1941 = vadd.xlane.f32.xlu0 %v8266_v62  ;;  %v896_v31 = vmul.f32 %v6583_v40, %v7958_v54  ;;  %v1923_v38 = vmul.f32 1.442695, %v1899_v4  ;;  %v11404_v54 = vld [vmem:[#allocation91_spill] sm:$0xff] }
 0x41d   :  { %6588 = vpow2.f32 %v1913_v61  ;;  %v1884_v18 = vpop.xlane.xlu1 %1883  ;;  %v1901_v40 = vsub.f32 %v11404_v54, %v1880_v17 }
 0x41e   :  { %6129 = vmatprep.mubr.f32.mxu0 %v896_v31  ;;  %6590 = vpow2.f32 %v1915_v42 }
 0x41f   :  { %6130 = vmatmul.mubr.f32.gmra.mrb[18].mxu0 %v897_v10  ;;  %6592 = vrcp.f32 %v859_v49  ;;  %v1903_v49 = vsub.f32 %v11406_v25, %v1884_v18  ;;  %v1927_v63 = vmul.f32 1.442695, %v1901_v40  ;;  %v11409_v25 = vld [vmem:[#allocation92_spill] sm:$0xff] }
 0x420   :  { %v857_v32 = vpop.xlane.xlu0 %856 }
 0x421   :  { %6594 = vrcp.f32 %v857_v32  ;;  %v1888_v50 = vpop.xlane.xlu1 %1887 }
 0x422   :  { %6596 = vpow2.f32 %v1919_v55  ;;  %v1931_v55 = vmul.f32 1.442695, %v1903_v49 }
 0x423   :  { %v8274_v52 = vpop.eup %6584  ;;  %6598 = vpow2.f32 %v1923_v38  ;;  %v11407_v38 = vld [vmem:[#allocation94_spill] sm:$0xff] }
 0x424   :  { %v1870_v2 = vpop.xlane.xlu0 %1869  ;;  %1939 = vadd.xlane.f32.xlu1 %v8274_v52  ;;  %v8279_v42 = vpop.eup %6586 }
 0x425   :  { %v1896_v29 = vsub.f32 %v11405_v47, %v1870_v2  ;;  %v8284_v36 = vpop.xlane.xlu1 %870  ;;  %v11408_v2 = vld [vmem:[#allocation95_spill] sm:$0xff] }
 0x426   :  { %v1905_v47 = vsub.f32 %v11408_v2, %v1888_v50 }
 0x427   :  { %v8281_v61 = vpop.eup %6588  ;;  %v1917_v31 = vmul.f32 1.442695, %v1896_v29 }
 0x428   :  { %v1874_v10 = vpop.xlane.xlu0 %1873  ;;  %1945 = vadd.xlane.f32.xlu0 %v8281_v61  ;;  %1943 = vadd.xlane.f32.xlu1 %v8279_v42  ;;  %v8288_v17 = vpop.eup %6590 }
 0x429   :  { %6600 = vpow2.f32 %v1917_v31  ;;  %v1898_v8 = vsub.f32 %v8062_v23, %v1874_v10  ;;  %v6593_v4 = vpop.eup %6592  ;;  %v2393_v29 = vpop.xlane.xlu1 %2392  ;;  %v11410_v23 = vld [vmem:[#allocation98_spill] sm:$0xff]  ;;  %v1935_v10 = vmul.f32 1.442695, %v1905_v47 }
 0x42a   :  { %6602 = vpow2.f32 %v1927_v63  ;;  %v899_v46 = vmul.f32 %v6593_v4, %v11409_v25  ;;  %v2423_v49 = vsub.f32 %v11410_v23, %v2393_v29  ;;  %v11411_v23 = vld [vmem:[#allocation101_spill] sm:$0xff] }
 0x42b   :  { %v6595_v32 = vpop.eup %6594  ;;  %v1921_v54 = vmul.f32 1.442695, %v1898_v8 }
 0x42c   :  { %v863_v18 = vpop.xlane.xlu0 %862  ;;  %1947 = vadd.xlane.f32.xlu1 %v8288_v17  ;;  %v898_v40 = vmul.f32 %v6595_v32, %v11407_v38  ;;  %v8295_v31 = vpop.eup %6596  ;;  %v2440_v32 = vmul.f32 1.442695, %v2423_v49 }
 0x42d   :  { %6604 = vpow2.f32 %v1921_v54  ;;  %v8299_v8 = vpop.eup %6598 }
 0x42e   :  { %6132 = vmatprep.mubr.f32.mxu0 %v898_v40  ;;  %6606 = vpow2.f32 %v1931_v55 }
 0x42f   :  { %6133 = vmatmul.mubr.f32.gmra.mrb[20].mxu0 %v899_v46  ;;  %6608 = vrcp.f32 %v863_v18 }
 0x430   :  { %v861_v63 = vpop.xlane.xlu0 %860  ;;  %1951 = vadd.xlane.f32.xlu1 %v8295_v31 }
 0x431   :  { %6610 = vrcp.f32 %v861_v63  ;;  %v11412_v63 = vld [vmem:[#allocation99_spill] sm:$0xff] }
 0x432   :  { %6612 = vpow2.f32 %v1935_v10 }
 0x433   :  { %v8301_v50 = vpop.eup %6600  ;;  %6614 = vpow2.f32 %v2440_v32 }
 0x434   :  { %v1878_v54 = vpop.xlane.xlu0 %1877  ;;  %1949 = vadd.xlane.f32.xlu0 %v8301_v50  ;;  %1955 = vadd.xlane.f32.xlu1 %v8299_v8  ;;  %v8306_v4 = vpop.eup %6602 }
 0x435   :  { %v1900_v46 = vsub.f32 %v8104_v56, %v1878_v54 }
 0x437   :  { %v8308_v55 = vpop.eup %6604  ;;  %v1925_v18 = vmul.f32 1.442695, %v1900_v46 }
 0x438   :  { %v1882_v38 = vpop.xlane.xlu0 %1881  ;;  %1953 = vadd.xlane.f32.xlu0 %v8308_v55  ;;  %1959 = vadd.xlane.f32.xlu1 %v8306_v4  ;;  %v8312_v40 = vpop.eup %6606 }
 0x439   :  { %6616 = vpow2.f32 %v1925_v18  ;;  %v1902_v2 = vsub.f32 %v8114_v21, %v1882_v38  ;;  %v6609_v47 = vpop.eup %6608 }
 0x43a   :  { %v901_v10 = vmul.f32 %v6609_v47, %v11412_v63 }
 0x43b   :  { %v6611_v29 = vpop.eup %6610  ;;  %v1929_v25 = vmul.f32 1.442695, %v1902_v2 }
 0x43c   :  { %v867_v56 = vpop.xlane.xlu0 %866  ;;  %1963 = vadd.xlane.f32.xlu1 %v8312_v40  ;;  %v900_v49 = vmul.f32 %v6611_v29, %v11411_v23  ;;  %v8318_v32 = vpop.eup %6612 }
 0x43d   :  { %6618 = vpow2.f32 %v1929_v25  ;;  %v8321_v21 = vpop.eup %6614 }
 0x43e   :  { %6135 = vmatprep.mubr.f32.mxu0 %v900_v49  ;;  %6620 = vrcp.f32 %v867_v56 }
 0x43f   :  { %6136 = vmatmul.mubr.f32.gmra.mrb[22].mxu0 %v901_v10 }
 0x440   :  { %v865_v54 = vpop.xlane.xlu0 %864  ;;  %1967 = vadd.xlane.f32.xlu1 %v8318_v32 }
 0x441   :  { %6622 = vrcp.f32 %v865_v54 }
 0x443   :  { %v8323_v46 = vpop.eup %6616 }
 0x444   :  { %v1886_v18 = vpop.xlane.xlu0 %1885  ;;  %1957 = vadd.xlane.f32.xlu0 %v8323_v46  ;;  %2472 = vadd.xlane.f32.xlu1 %v8321_v21 }
 0x445   :  { %v1904_v38 = vsub.f32 %v8150_v27, %v1886_v18 }
 0x447   :  { %v8328_v2 = vpop.eup %6618  ;;  %v1933_v47 = vmul.f32 1.442695, %v1904_v38  ;;  %v875_v38 = vpop.xlane.xlu1 %874 }
 0x448   :  { %v1890_v29 = vpop.xlane.xlu0 %1889  ;;  %1961 = vadd.xlane.f32.xlu0 %v8328_v2  ;;  %v6621_v56 = vpop.eup %6620 }
 0x449   :  { %6624 = vpow2.f32 %v1933_v47  ;;  %v1906_v25 = vsub.f32 %v8154_v43, %v1890_v29  ;;  %v903_v27 = vmul.f32 %v6621_v56, %v8130_v57 }
 0x44a   :  { %6626 = vrcp.f32 %v8284_v36 }
 0x44b   :  { %v1937_v23 = vmul.f32 1.442695, %v1906_v25  ;;  %v6623_v49 = vpop.eup %6622 }
 0x44c   :  { %v869_v63 = vpop.xlane.xlu0 %868  ;;  %v902_v10 = vmul.f32 %v6623_v49, %v8142_v11  ;;  %v2413_v11 = vpop.xlane.xlu1 %2412 }
 0x44d   :  { %6628 = vpow2.f32 %v1937_v23 }
 0x44e   :  { %6630 = vrcp.f32 %v869_v63  ;;  %6138 = vmatprep.mubr.f32.mxu0 %v902_v10  ;;  %v11413_v10 = vld [vmem:[#allocation97_spill] sm:$0xff] }
 0x44f   :  { %6139 = vmatmul.mubr.f32.gmra.mrb[24].mxu0 %v903_v27 }
 0x450   :  { %v2391_v54 = vpop.xlane.xlu0 %2390 }
 0x451   :  { %v2422_v18 = vsub.f32 %v8163_v9, %v2391_v54 }
 0x453   :  { %v8336_v47 = vpop.eup %6624  ;;  %v2438_v43 = vmul.f32 1.442695, %v2422_v18 }
 0x454   :  { %v2397_v29 = vpop.xlane.xlu0 %2396  ;;  %1965 = vadd.xlane.f32.xlu0 %v8336_v47  ;;  %v6627_v25 = vpop.eup %6626 }
 0x455   :  { %6632 = vpow2.f32 %v2438_v43  ;;  %v2425_v36 = vsub.f32 %v8168_v26, %v2397_v29  ;;  %v905_v27 = vmul.f32 %v6627_v25, %v11413_v10  ;;  %v2417_v26 = vpop.xlane.xlu1 %2416 }
 0x457   :  { %v8340_v23 = vpop.eup %6628  ;;  %v2444_v57 = vmul.f32 1.442695, %v2425_v36 }
 0x458   :  { %v6631_v56 = vpop.eup %6630  ;;  %v2395_v49 = vpop.xlane.xlu0 %2394  ;;  %1969 = vadd.xlane.f32.xlu0 %v8340_v23 }
 0x459   :  { %6634 = vpow2.f32 %v2444_v57  ;;  %v2424_v9 = vsub.f32 %v8068_v48, %v2395_v49  ;;  %v904_v63 = vmul.f32 %v6631_v56, %v8158_v22  ;;  %v2421_v48 = vpop.xlane.xlu1 %2420 }
 0x45a   :  { %6636 = vrcp.f32 %v875_v38 }
 0x45b   :  { %v2442_v54 = vmul.f32 1.442695, %v2424_v9  ;;  %6141 = vmatprep.mubr.f32.mxu0 %v904_v63 }
 0x45c   :  { %6142 = vmatmul.mubr.f32.gmra.mrb[26].mxu0 %v905_v27  ;;  %v873_v18 = vpop.xlane.xlu0 %872 }
 0x45d   :  { %6638 = vpow2.f32 %v2442_v54 }
 0x45e   :  { %6640 = vrcp.f32 %v873_v18  ;;  %v11416_v18 = vld [vmem:[#allocation100_spill] sm:$0xff] }
 0x45f   :  { %v8346_v43 = vpop.eup %6632 }
 0x460   :  { %v2401_v29 = vpop.xlane.xlu0 %2400  ;;  %2470 = vadd.xlane.f32.xlu0 %v8346_v43 }
 0x461   :  { %v2427_v36 = vsub.f32 %v8178_v16, %v2401_v29 }
 0x463   :  { %v8350_v57 = vpop.eup %6634  ;;  %v2448_v22 = vmul.f32 1.442695, %v2427_v36 }
 0x464   :  { %11414 = vst [vmem:[#allocation89_spill] sm:$0xff] %v8350_v57  ;;  %v2399_v25 = vpop.xlane.xlu0 %2398  ;;  %2476 = vadd.xlane.f32.xlu1 %v8350_v57  ;;  %v6637_v56 = vpop.eup %6636 }
 0x465   :  { %6642 = vpow2.f32 %v2448_v22  ;;  %v2426_v38 = vsub.f32 %v8079_v15, %v2399_v25  ;;  %v907_v29 = vmul.f32 %v6637_v56, %v11416_v18 }
 0x466   :  { %v1376_v49 = vpop.xlane.xlu1 %1375 }
 0x467   :  { %v8354_v9 = vpop.eup %6638  ;;  %v2446_v63 = vmul.f32 1.442695, %v2426_v38  ;;  %6644 = vrcp.f32 %v1376_v49  ;;  %v11417_v49 = vld [vmem:[#allocation102_spill] sm:$0xff] }
 0x468   :  { %11415 = vst [vmem:[#allocation90_spill] sm:$0xff] %v8354_v9  ;;  %v6641_v10 = vpop.eup %6640  ;;  %v2405_v27 = vpop.xlane.xlu0 %2404  ;;  %2474 = vadd.xlane.f32.xlu0 %v8354_v9  ;;  %v2433_v57 = vsub.f32 %v11417_v49, %v2413_v11 }
 0x469   :  { %6646 = vpow2.f32 %v2446_v63  ;;  %v2429_v16 = vsub.f32 %v8087_v53, %v2405_v27  ;;  %v906_v54 = vmul.f32 %v6641_v10, %v8173_v3 }
 0x46a   :  { %v2460_v27 = vmul.f32 1.442695, %v2433_v57 }
 0x46b   :  { %v2452_v36 = vmul.f32 1.442695, %v2429_v16  ;;  %6144 = vmatprep.mubr.f32.mxu0 %v906_v54 }
 0x46c   :  { %6145 = vmatmul.mubr.f32.gmra.mrb[28].mxu0 %v907_v29  ;;  %v2403_v15 = vpop.xlane.xlu0 %2402 }
 0x46d   :  { %6648 = vpow2.f32 %v2452_v36  ;;  %v2428_v22 = vsub.f32 %v8097_v13, %v2403_v15  ;;  %v2435_v13 = vsub.f32 %v8128_v44, %v2417_v26 }
 0x46f   :  { %v8361_v25 = vpop.eup %6642  ;;  %v2450_v38 = vmul.f32 1.442695, %v2428_v22 }
 0x470   :  { %v2409_v9 = vpop.xlane.xlu0 %2408  ;;  %2480 = vadd.xlane.f32.xlu1 %v8361_v25 }
 0x471   :  { %v6645_v53 = vpop.eup %6644  ;;  %6650 = vpow2.f32 %v2450_v38  ;;  %v2431_v3 = vsub.f32 %v8191_v33, %v2409_v9  ;;  %v2464_v33 = vmul.f32 1.442695, %v2435_v13 }
 0x472   :  { %v1423_v56 = vmul.f32 %v6645_v53, %v8183_v24  ;;  %v2437_v24 = vsub.f32 %v8140_v6, %v2421_v48  ;;  %v1380_v6 = vpop.xlane.xlu1 %1379 }
 0x473   :  { %v8367_v63 = vpop.eup %6646  ;;  %v2456_v10 = vmul.f32 1.442695, %v2431_v3 }
 0x474   :  { %v2407_v16 = vpop.xlane.xlu0 %2406  ;;  %2478 = vadd.xlane.f32.xlu0 %v8367_v63  ;;  %6175 = vmatprep.mubr.f32.mxu0 %v1423_v56  ;;  %v2468_v29 = vmul.f32 1.442695, %v2437_v24 }
 0x475   :  { %6652 = vpow2.f32 %v2456_v10  ;;  %v2430_v11 = vsub.f32 %v8110_v59, %v2407_v16 }
 0x476   :  { %6654 = vpow2.f32 %v2460_v27 }
 0x477   :  { %v8372_v54 = vpop.eup %6648  ;;  %v2454_v18 = vmul.f32 1.442695, %v2430_v11 }
 0x478   :  { %v2411_v9 = vpop.xlane.xlu0 %2410  ;;  %2484 = vadd.xlane.f32.xlu1 %v8372_v54 }
 0x479   :  { %6656 = vpow2.f32 %v2454_v18  ;;  %v2432_v44 = vsub.f32 %v8119_v41, %v2411_v9  ;;  %v1384_v53 = vpop.xlane.xlu1 %1383 }
 0x47a   :  { %6658 = vpow2.f32 %v2464_v33 }
 0x47b   :  { %v8377_v26 = vpop.eup %6650  ;;  %v2458_v57 = vmul.f32 1.442695, %v2432_v44 }
 0x47c   :  { %v2415_v36 = vpop.xlane.xlu0 %2414  ;;  %2482 = vadd.xlane.f32.xlu0 %v8377_v26 }
 0x47d   :  { %6660 = vpow2.f32 %v2458_v57  ;;  %v2434_v59 = vsub.f32 %v8133_v7, %v2415_v36 }
 0x47e   :  { %6662 = vpow2.f32 %v2468_v29 }
 0x47f   :  { %v8381_v15 = vpop.eup %6652  ;;  %v2462_v48 = vmul.f32 1.442695, %v2434_v59 }
 0x480   :  { %v2419_v22 = vpop.xlane.xlu0 %2418  ;;  %2488 = vadd.xlane.f32.xlu1 %v8381_v15  ;;  %v8385_v38 = vpop.eup %6654 }
 0x481   :  { %6664 = vpow2.f32 %v2462_v48  ;;  %v2436_v41 = vsub.f32 %v8145_v60, %v2419_v22  ;;  %v1388_v27 = vpop.xlane.xlu1 %1387 }
 0x482   :  { %6666 = vrcp.f32 %v1380_v6 }
 0x483   :  { %v8387_v49 = vpop.eup %6656  ;;  %v2466_v3 = vmul.f32 1.442695, %v2436_v41  ;;  %v11418_v41 = vld [vmem:[#allocation26_spill] sm:$0xff] }
 0x484   :  { %v1378_v56 = vpop.xlane.xlu0 %1377  ;;  %2486 = vadd.xlane.f32.xlu0 %v8387_v49  ;;  %2492 = vadd.xlane.f32.xlu1 %v8385_v38  ;;  %v8391_v7 = vpop.eup %6658 }
 0x485   :  { %6668 = vpow2.f32 %v2466_v3 }
 0x486   :  { %6670 = vrcp.f32 %v1378_v56 }
 0x487   :  { %v8393_v10 = vpop.eup %6660  ;;  %6672 = vrcp.f32 %v1384_v53 }
 0x488   :  { %v1382_v60 = vpop.xlane.xlu0 %1381  ;;  %2490 = vadd.xlane.f32.xlu0 %v8393_v10  ;;  %2496 = vadd.xlane.f32.xlu1 %v8391_v7  ;;  %v8397_v13 = vpop.eup %6662 }
 0x489   :  { %6674 = vrcp.f32 %v1382_v60  ;;  %v1392_v11 = vpop.xlane.xlu1 %1391 }
 0x48a   :  { %6676 = vrcp.f32 %v1388_v27 }
 0x48b   :  { %v8399_v16 = vpop.eup %6664 }
 0x48c   :  { %v1386_v18 = vpop.xlane.xlu0 %1385  ;;  %2494 = vadd.xlane.f32.xlu0 %v8399_v16  ;;  %2500 = vadd.xlane.f32.xlu1 %v8397_v13  ;;  %v6667_v33 = vpop.eup %6666 }
 0x48d   :  { %6678 = vrcp.f32 %v1386_v18  ;;  %v1425_v59 = vmul.f32 %v6667_v33, %v8193_v20 }
 0x48e   :  { %6680 = vrcp.f32 %v1392_v11  ;;  %v1396_v57 = vpop.xlane.xlu1 %1395 }
 0x48f   :  { %v8403_v24 = vpop.eup %6668 }
 0x490   :  { %v6671_v9 = vpop.eup %6670  ;;  %v1390_v44 = vpop.xlane.xlu0 %1389  ;;  %2498 = vadd.xlane.f32.xlu0 %v8403_v24 }
 0x491   :  { %6682 = vrcp.f32 %v1390_v44  ;;  %v1424_v29 = vmul.f32 %v6671_v9, %v8215_v37  ;;  %v6673_v36 = vpop.eup %6672 }
 0x492   :  { %6684 = vrcp.f32 %v1396_v57  ;;  %v1427_v56 = vmul.f32 %v6673_v36, %v8201_v12 }
 0x493   :  { %v6675_v6 = vpop.eup %6674  ;;  %6176 = vmatmul.mubr.f32.vlgmr.msra.gmra.mrb[30].mxu0 %v1424_v29 }
 0x494   :  { %6226 = vmatpush3.xpose.msra.mxu0 %v7196_v51  ;;  %6178 = vmatprep.mubr.f32.mxu0 %v1425_v59  ;;  %v1394_v48 = vpop.xlane.xlu0 %1393  ;;  %v1426_v22 = vmul.f32 %v6675_v6, %v8219_v14  ;;  %v6677_v53 = vpop.eup %6676  ;;  %v8417_v14 = vld [vmem:[%s11226_s7 + $0x48] sm:$0xff]  ;;  %v8438_v6 = vld [vmem:[%s11226_s7 + $0x40] sm:$0xff] }
 0x495   :  { %6277 = vmatprep.subr.mxu0 %v11418_v41  ;;  %6686 = vrcp.f32 %v1394_v48  ;;  %v1429_v11 = vmul.f32 %v6677_v53, %v8210_v28  ;;  %v8425_v28 = vld [vmem:[%s11226_s7 + $0x58] sm:$0xff] }
 0x496   :  { %v1400_v3 = vpop.xlane.xlu1 %1399 }
 0x497   :  { %v6679_v37 = vpop.eup %6678  ;;  %6179 = vmatmul.mubr.f32.gmra.mrb[32].mxu0 %v1426_v22  ;;  %6688 = vrcp.f32 %v1400_v3  ;;  %v8447_v22 = vld [vmem:[%s11226_s7 + $0x78] sm:$0xff]  ;;  %v8452_v3 = vld [vmem:[%s11226_s7 + $0x50] sm:$0xff] }
 0x498   :  { %6181 = vmatprep.mubr.f32.mxu0 %v1427_v56  ;;  %v1398_v20 = vpop.xlane.xlu0 %1397  ;;  %v1428_v27 = vmul.f32 %v6679_v37, %v8227_v58  ;;  %v6681_v60 = vpop.eup %6680  ;;  %v8461_v37 = vld [vmem:[%s11226_s7 + $0x88] sm:$0xff] }
 0x499   :  { %6690 = vrcp.f32 %v1398_v20  ;;  %v1431_v44 = vmul.f32 %v6681_v60, %v8222_v19  ;;  %v8433_v19 = vld [vmem:[%s11226_s7 + $0x68] sm:$0xff]  ;;  %v8466_v20 = vld [vmem:[%s11226_s7 + $0x60] sm:$0xff] }
 0x49b   :  { %v6683_v18 = vpop.eup %6682  ;;  %6182 = vmatmul.mubr.f32.gmra.mrb[34].mxu0 %v1428_v27  ;;  %v8478_v27 = vld [vmem:[%s11226_s7 + $0x70] sm:$0xff] }
 0x49c   :  { %6184 = vmatprep.mubr.f32.mxu0 %v1429_v11  ;;  %v1402_v12 = vpop.xlane.xlu0 %1401  ;;  %v1430_v33 = vmul.f32 %v6683_v18, %v8232_v0  ;;  %v6685_v9 = vpop.eup %6684 }
 0x49d   :  { %6692 = vrcp.f32 %v1402_v12  ;;  %3597 = vperm.xlu1 %6458, %v8417_v14   ;;  %v1433_v36 = vmul.f32 %v6685_v9, %v8230_v30  ;;  %v8486_v12 = vld [vmem:[%s11226_s7 + $0xa8] sm:$0xff] }
 0x49e   :  { %v1404_v58 = vpop.xlane.xlu1 %1403 }
 0x49f   :  { %v6687_v57 = vpop.eup %6686  ;;  %6185 = vmatmul.mubr.f32.gmra.mrb[36].mxu0 %v1430_v33  ;;  %6694 = vrcp.f32 %v1404_v58  ;;  %v8491_v33 = vld [vmem:[%s11226_s7 + $0x80] sm:$0xff] }
 0x4a0   :  { %6187 = vmatprep.mubr.f32.mxu0 %v1431_v44  ;;  %v1432_v29 = vmul.f32 %v6687_v57, %v8239_v34  ;;  %v11419_v57 = vmov 1  }
 0x4a1   :  { %3607 = vperm.xlu1 %6458, %v8425_v28   ;;  %v6689_v0 = vpop.eup %6688 }
 0x4a2   :  { %v1435_v30 = vmul.f32 %v6689_v0, %v8243_v45 }
 0x4a3   :  { %v6691_v59 = vpop.eup %6690  ;;  %6188 = vmatmul.mubr.f32.gmra.mrb[38].mxu0 %v1432_v29  ;;  %v8505_v29 = vld [vmem:[%s11226_s7 + $0x8] sm:$0xff] }
 0x4a4   :  { %6190 = vmatprep.mubr.f32.mxu0 %v1433_v36  ;;  %v1434_v34 = vmul.f32 %v6691_v59, %v8249_v1  ;;  %v8511_v36 = vld [vmem:[%s11226_s7 + $0xa0] sm:$0xff] }
 0x4a5   :  { %v1406_v48 = vpop.xlane.xlu0 %1405  ;;  %3617 = vperm.xlu1 %6458, %v8433_v19  }
 0x4a6   :  { %6696 = vrcp.f32 %v1406_v48  ;;  %3592 = vperm.xlu0 %6451, %v8438_v6  }
 0x4a7   :  { %v6693_v53 = vpop.eup %6692  ;;  %6191 = vmatmul.mubr.f32.gmra.mrb[40].mxu0 %v1434_v34 }
 0x4a8   :  { %6193 = vmatprep.mubr.f32.mxu0 %v1435_v30  ;;  %v1436_v1 = vmul.f32 %v6693_v53, %v8252_v35  ;;  %v8519_v53 = vld [vmem:[%s11226_s7 + $0x10] sm:$0xff] }
 0x4a9   :  { %v6695_v56 = vpop.eup %6694  ;;  %3627 = vperm.xlu1 %6458, %v8447_v22   ;;  %v1942_v35 = vpop.xlane.xlu0 %1941 }
 0x4aa   :  { %3602 = vperm.xlu0 %6451, %v8452_v3   ;;  %v1437_v45 = vmul.f32 %v6695_v56, %v8255_v5  ;;  %v8473_v5 = vld [vmem:[%s11226_s7 + $0x98] sm:$0xff]  ;;  %6698 = vrcp.f32 %v1942_v35 }
 0x4ab   :  { %6194 = vmatmul.mubr.f32.gmra.mrb[42].mxu0 %v1436_v1 }
 0x4ac   :  { %6196 = vmatprep.mubr.f32.mxu0 %v1437_v45 }
 0x4ad   :  { %3637 = vperm.xlu1 %6458, %v8461_v37  }
 0x4ae   :  { %3612 = vperm.xlu0 %6451, %v8466_v20  }
 0x4b0   :  { %v6697_v60 = vpop.eup %6696 }
 0x4b1   :  { %3647 = vperm.xlu1 %6458, %v8473_v5   ;;  %v1940_v11 = vpop.xlane.xlu1 %1939  ;;  %v1438_v18 = vmul.f32 %v6697_v60, %v8262_v39  ;;  %v8498_v39 = vld [vmem:[%s11226_s7 + $0x90] sm:$0xff]  ;;  %v8529_v60 = vld [vmem:[%s11226_s7 + $0x20] sm:$0xff] }
 0x4b2   :  { %6700 = vrcp.f32 %v1940_v11  ;;  %3622 = vperm.xlu0 %6451, %v8478_v27   ;;  %v6811_v11 = vld [vmem:[%s11225_s6] sm:$0xff] }
 0x4b3   :  { %6197 = vmatmul.mubr.f32.gmra.mrb[44].mxu0 %v1438_v18 }
 0x4b4   :  { %v6699_v0 = vpop.eup %6698 }
 0x4b5   :  { %v1946_v9 = vpop.xlane.xlu0 %1945  ;;  %3657 = vperm.xlu1 %6458, %v8486_v12   ;;  %v1944_v58 = vpop.xlane.xlu1 %1943  ;;  %v1988_v30 = vmul.f32 %v6699_v0, %v8266_v62 }
 0x4b6   :  { %6702 = vrcp.f32 %v1946_v9  ;;  %3632 = vperm.xlu0 %6451, %v8491_v33  }
 0x4b7   :  { %6704 = vrcp.f32 %v1944_v58  ;;  %v6813_v58 = vld [vmem:[%s11225_s6 + $0x18] sm:$0xff] }
 0x4b9   :  { %v1948_v44 = vpop.xlane.xlu1 %1947  ;;  %6460 = vset.pattern.permute.xlu1 %v11419_v57 }
 0x4ba   :  { %6706 = vrcp.f32 %v1948_v44  ;;  %3642 = vperm.xlu0 %6451, %v8498_v39   ;;  %3780 = vperm.xlu1 %6460, %v8505_v29  }
 0x4bc   :  { %v6701_v59 = vpop.eup %6700 }
 0x4bd   :  { %v1952_v34 = vpop.xlane.xlu1 %1951  ;;  %v1987_v48 = vmul.f32 %v6701_v59, %v8274_v52 }
 0x4be   :  { %3652 = vperm.xlu0 %6451, %v8511_v36   ;;  %3784 = vperm.xlu1 %6460, %v8519_v53   ;;  %6708 = vrcp.f32 %v1952_v34 }
 0x4bf   :  { %6227 = vmatprep.mubr.f32.mxu0 %v1987_v48 }
 0x4c0   :  { %v6703_v1 = vpop.eup %6702  ;;  %6228 = vmatmul.mubr.f32.vlgmr.msra.gmra.mrb[46].mxu0 %v1988_v30  ;;  %v8558_v30 = vld [vmem:[%s11226_s7 + $0x18] sm:$0xff] }
 0x4c1   :  { %v6705_v56 = vpop.eup %6704  ;;  %6278 = vmatpush3.xpose.msra.mxu0 %v11418_v41  ;;  %v1950_v45 = vpop.xlane.xlu0 %1949  ;;  %v1990_v52 = vmul.f32 %v6703_v1, %v8281_v61 }
 0x4c2   :  { %6710 = vrcp.f32 %v1950_v45  ;;  %v1956_v35 = vpop.xlane.xlu1 %1955  ;;  %6459 = vset.pattern.permute.xlu0 %v11419_v57  ;;  %v1989_v62 = vmul.f32 %v6705_v56, %v8279_v42  ;;  %3792 = vperm.xlu1 %6460, %v8529_v60   ;;  %v8539_v42 = vld [vmem:[%s11226_s7 + $0x30] sm:$0xff] }
 0x4c3   :  { %412 = vperm.xlu0 %6459, %v6811_v11   ;;  %6712 = vrcp.f32 %v1956_v35 }
 0x4c4   :  { %v6707_v18 = vpop.eup %6706  ;;  %6230 = vmatprep.mubr.f32.mxu0 %v1989_v62 }
 0x4c5   :  { %6231 = vmatmul.mubr.f32.gmra.mrb[48].mxu0 %v1990_v52  ;;  %v1954_v61 = vpop.xlane.xlu0 %1953  ;;  %v1991_v9 = vmul.f32 %v6707_v18, %v8288_v17  ;;  %v8549_v17 = vld [vmem:[%s11226_s7] sm:$0xff]  ;;  %v8567_v52 = vld [vmem:[%s11226_s7 + $0x28] sm:$0xff] }
 0x4c6   :  { %6714 = vrcp.f32 %v1954_v61  ;;  %3800 = vperm.xlu1 %6460, %v8539_v42   ;;  %v1960_v0 = vpop.xlane.xlu1 %1959 }
 0x4c7   :  { %492 = vperm.xlu0 %6459, %v6813_v58   ;;  %6233 = vmatprep.mubr.f32.mxu0 %v1991_v9  ;;  %6716 = vrcp.f32 %v1960_v0 }
 0x4c8   :  { %v6709_v44 = vpop.eup %6708 }
 0x4c9   :  { %v1993_v34 = vmul.f32 %v6709_v44, %v8295_v31 }
 0x4ca   :  { %3808 = vperm.xlu1 %6460, %v8438_v6  }
 0x4cb   :  { %3776 = vperm.xlu0 %6459, %v8549_v17  }
 0x4cc   :  { %v6711_v57 = vpop.eup %6710 }
 0x4cd   :  { %v1992_v59 = vmul.f32 %v6711_v57, %v8301_v50  ;;  %v6713_v48 = vpop.eup %6712  ;;  %v1964_v50 = vpop.xlane.xlu1 %1963 }
 0x4ce   :  { %3816 = vperm.xlu1 %6460, %v8452_v3   ;;  %v1995_v31 = vmul.f32 %v6713_v48, %v8299_v8  ;;  %v8574_v8 = vld [vmem:[%s11226_s7 + $0x38] sm:$0xff]  ;;  %v11420_v48 = vmov 2  }
 0x4cf   :  { %3788 = vperm.xlu0 %6459, %v8558_v30   ;;  %6234 = vmatmul.mubr.f32.gmra.mrb[50].mxu0 %v1992_v59 }
 0x4d0   :  { %v6715_v1 = vpop.eup %6714  ;;  %6236 = vmatprep.mubr.f32.mxu0 %v1993_v34 }
 0x4d1   :  { %v1958_v56 = vpop.xlane.xlu0 %1957  ;;  %v1994_v45 = vmul.f32 %v6715_v1, %v8308_v55  ;;  %v6717_v62 = vpop.eup %6716 }
 0x4d2   :  { %6718 = vrcp.f32 %v1958_v56  ;;  %3824 = vperm.xlu1 %6460, %v8466_v20   ;;  %v1968_v9 = vpop.xlane.xlu1 %1967  ;;  %v1997_v58 = vmul.f32 %v6717_v62, %v8306_v4 }
 0x4d3   :  { %3796 = vperm.xlu0 %6459, %v8567_v52   ;;  %6237 = vmatmul.mubr.f32.gmra.mrb[52].mxu0 %v1994_v45  ;;  %6720 = vrcp.f32 %v1964_v50 }
 0x4d4   :  { %6239 = vmatprep.mubr.f32.mxu0 %v1995_v31 }
 0x4d5   :  { %v1962_v35 = vpop.xlane.xlu0 %1961 }
 0x4d6   :  { %6722 = vrcp.f32 %v1962_v35  ;;  %3832 = vperm.xlu1 %6460, %v8478_v27  }
 0x4d7   :  { %3804 = vperm.xlu0 %6459, %v8574_v8   ;;  %6724 = vrcp.f32 %v1968_v9 }
 0x4da   :  { %v8577_v55 = vpop.f32.mrb[14].mxu0  ;;  %3840 = vperm.xlu1 %6460, %v8491_v33  }
 0x4db   :  { %v8580_v11 = vpop.f32.mrb[15].mxu0  ;;  %3812 = vperm.xlu0 %6459, %v8417_v14  }
 0x4dc   :  { %v6719_v18 = vpop.eup %6718 }
 0x4dd   :  { %v1996_v61 = vmul.f32 %v6719_v18, %v8323_v46  ;;  %v6721_v44 = vpop.eup %6720 }
 0x4de   :  { %3848 = vperm.xlu1 %6460, %v8498_v39   ;;  %v1999_v34 = vmul.f32 %v6721_v44, %v8312_v40 }
 0x4df   :  { %3820 = vperm.xlu0 %6459, %v8425_v28   ;;  %6240 = vmatmul.mubr.f32.gmra.mrb[54].mxu0 %v1996_v61 }
 0x4e0   :  { %v6723_v57 = vpop.eup %6722  ;;  %6242 = vmatprep.mubr.f32.mxu0 %v1997_v58 }
 0x4e1   :  { %v1966_v0 = vpop.xlane.xlu0 %1965  ;;  %v1998_v59 = vmul.f32 %v6723_v57, %v8328_v2  ;;  %v2473_v2 = vpop.xlane.xlu1 %2472 }
 0x4e2   :  { %6726 = vrcp.f32 %v1966_v0  ;;  %3856 = vperm.xlu1 %6460, %v8511_v36   ;;  %v6725_v40 = vpop.eup %6724  ;;  %v6819_v0 = vld [vmem:[%s11225_s6 + $0x10] sm:$0xff] }
 0x4e3   :  { %3828 = vperm.xlu0 %6459, %v8433_v19   ;;  %6243 = vmatmul.mubr.f32.gmra.mrb[56].mxu0 %v1998_v59  ;;  %v2001_v31 = vmul.f32 %v6725_v40, %v8318_v32  ;;  %v11422_v40 = vld [vmem:[#allocation89_spill] sm:$0xff] }
 0x4e4   :  { %6245 = vmatprep.mubr.f32.mxu0 %v1999_v34 }
 0x4e5   :  { %v1970_v4 = vpop.xlane.xlu0 %1969 }
 0x4e6   :  { %6728 = vrcp.f32 %v1970_v4  ;;  %v8591_v46 = vpop.f32.mrb[16].mxu0  ;;  %6462 = vset.pattern.permute.xlu1 %v11420_v48 }
 0x4e7   :  { %v8594_v1 = vpop.f32.mrb[17].mxu0  ;;  %3836 = vperm.xlu0 %6459, %v8447_v22   ;;  %3979 = vperm.xlu1 %6462, %v8549_v17   ;;  %6730 = vrcp.f32 %v2473_v2  ;;  %v11421_v2 = vld [vmem:[#allocation90_spill] sm:$0xff] }
 0x4eb   :  { %3844 = vperm.xlu0 %6459, %v8461_v37   ;;  %3987 = vperm.xlu1 %6462, %v8519_v53  }
 0x4ec   :  { %v6727_v56 = vpop.eup %6726 }
 0x4ed   :  { %v2471_v45 = vpop.xlane.xlu0 %2470  ;;  %v2000_v50 = vmul.f32 %v6727_v56, %v8336_v47 }
 0x4ee   :  { %6732 = vrcp.f32 %v2471_v45 }
 0x4ef   :  { %3852 = vperm.xlu0 %6459, %v8473_v5   ;;  %6246 = vmatmul.mubr.f32.gmra.mrb[58].mxu0 %v2000_v50 }
 0x4f0   :  { %v6729_v35 = vpop.eup %6728  ;;  %6248 = vmatprep.mubr.f32.mxu0 %v2001_v31  ;;  %3991 = vperm.xlu1 %6462, %v8558_v30  }
 0x4f1   :  { %v2002_v62 = vmul.f32 %v6729_v35, %v8340_v23  ;;  %v2477_v18 = vpop.xlane.xlu1 %2476  ;;  %v6731_v47 = vpop.eup %6730  ;;  %v6818_v23 = vld [vmem:[%s11225_s6 + $0x8] sm:$0xff] }
 0x4f2   :  { %v8605_v61 = vpop.f32.mrb[18].mxu0  ;;  %6734 = vrcp.f32 %v2477_v18  ;;  %v2519_v57 = vmul.f32 %v6731_v47, %v8321_v21 }
 0x4f3   :  { %v8607_v9 = vpop.f32.mrb[19].mxu0  ;;  %3860 = vperm.xlu0 %6459, %v8486_v12   ;;  %6249 = vmatmul.mubr.f32.gmra.mrb[60].mxu0 %v2002_v62 }
 0x4f4   :  { %3999 = vperm.xlu1 %6462, %v8567_v52  }
 0x4f5   :  { %v2475_v32 = vpop.xlane.xlu0 %2474 }
 0x4f6   :  { %6736 = vrcp.f32 %v2475_v32 }
 0x4f7   :  { %6461 = vset.pattern.permute.xlu0 %v11420_v48 }
 0x4f8   :  { %v6733_v58 = vpop.eup %6732  ;;  %432 = vperm.xlu0 %6461, %v6818_v23   ;;  %4007 = vperm.xlu1 %6462, %v8574_v8  }
 0x4f9   :  { %v2518_v44 = vmul.f32 %v6733_v58, %v8346_v43 }
 0x4fb   :  { %6279 = vmatprep.mubr.f32.mxu0 %v2518_v44 }
 0x4fc   :  { %504 = vperm.xlu0 %6461, %v6819_v0   ;;  %6280 = vmatmul.mubr.f32.vlgmr.msra.gmra.mrb[62].mxu0 %v2519_v57  ;;  %v6735_v34 = vpop.eup %6734 }
 0x4fd   :  { %4015 = vperm.xlu1 %6462, %v8417_v14   ;;  %v2481_v59 = vpop.xlane.xlu1 %2480  ;;  %v2521_v56 = vmul.f32 %v6735_v34, %v11422_v40 }
 0x4fe   :  { %6738 = vrcp.f32 %v2481_v59 }
 0x500   :  { %v6737_v4 = vpop.eup %6736  ;;  %3983 = vperm.xlu0 %6461, %v8505_v29  }
 0x501   :  { %v2479_v48 = vpop.xlane.xlu0 %2478  ;;  %v2520_v43 = vmul.f32 %v6737_v4, %v11421_v2  ;;  %4023 = vperm.xlu1 %6462, %v8425_v28  }
 0x502   :  { %6740 = vrcp.f32 %v2479_v48  ;;  %v8625_v21 = vpop.f32.mrb[20].mxu0 }
 0x503   :  { %v8628_v45 = vpop.f32.mrb[21].mxu0  ;;  %6282 = vmatprep.mubr.f32.mxu0 %v2520_v43 }
 0x504   :  { %3995 = vperm.xlu0 %6461, %v8529_v60   ;;  %6283 = vmatmul.mubr.f32.gmra.mrb[64].mxu0 %v2521_v56 }
 0x505   :  { %4031 = vperm.xlu1 %6462, %v8433_v19   ;;  %v2485_v14 = vpop.xlane.xlu1 %2484 }
 0x506   :  { %6742 = vrcp.f32 %v2485_v14 }
 0x508   :  { %4003 = vperm.xlu0 %6461, %v8539_v42   ;;  %v6739_v28 = vpop.eup %6738 }
 0x509   :  { %v2483_v50 = vpop.xlane.xlu0 %2482  ;;  %v2523_v18 = vmul.f32 %v6739_v28, %v8361_v25 }
 0x50a   :  { %6744 = vrcp.f32 %v2483_v50 }
 0x50c   :  { %v6741_v31 = vpop.eup %6740  ;;  %4011 = vperm.xlu0 %6461, %v8438_v6  }
 0x50d   :  { %v2489_v35 = vpop.xlane.xlu1 %2488  ;;  %v2522_v62 = vmul.f32 %v6741_v31, %v8367_v63 }
 0x50e   :  { %6746 = vrcp.f32 %v2489_v35 }
 0x50f   :  { %6285 = vmatprep.mubr.f32.mxu0 %v2522_v62 }
 0x510   :  { %4019 = vperm.xlu0 %6461, %v8452_v3   ;;  %6286 = vmatmul.mubr.f32.gmra.mrb[66].mxu0 %v2523_v18  ;;  %v6743_v58 = vpop.eup %6742 }
 0x511   :  { %v2487_v19 = vpop.xlane.xlu0 %2486  ;;  %v2493_v32 = vpop.xlane.xlu1 %2492  ;;  %v2525_v0 = vmul.f32 %v6743_v58, %v8372_v54 }
 0x512   :  { %6748 = vrcp.f32 %v2487_v19  ;;  %v8637_v47 = vpop.f32.mrb[22].mxu0 }
 0x513   :  { %v1014_v23 = vpop.f32.mrb[23].mxu0  ;;  %6750 = vrcp.f32 %v2493_v32 }
 0x514   :  { %v6745_v44 = vpop.eup %6744  ;;  %4027 = vperm.xlu0 %6461, %v8466_v20  }
 0x515   :  { %v2491_v57 = vpop.xlane.xlu0 %2490  ;;  %v2497_v63 = vpop.xlane.xlu1 %2496  ;;  %v2524_v25 = vmul.f32 %v6745_v44, %v8377_v26 }
 0x516   :  { %6752 = vrcp.f32 %v2491_v57 }
 0x517   :  { %6288 = vmatprep.mubr.f32.mxu0 %v2524_v25  ;;  %6754 = vrcp.f32 %v2497_v63 }
 0x518   :  { %6289 = vmatmul.mubr.f32.gmra.mrb[68].mxu0 %v2525_v0  ;;  %v6747_v4 = vpop.eup %6746 }
 0x519   :  { %v2495_v59 = vpop.xlane.xlu0 %2494  ;;  %v2501_v34 = vpop.xlane.xlu1 %2500  ;;  %v2527_v40 = vmul.f32 %v6747_v4, %v8381_v15 }
 0x51a   :  { %6756 = vrcp.f32 %v2495_v59 }
 0x51b   :  { %6758 = vrcp.f32 %v2501_v34 }
 0x51c   :  { %v6749_v48 = vpop.eup %6748 }
 0x51d   :  { %v2499_v2 = vpop.xlane.xlu0 %2498  ;;  %v2526_v43 = vmul.f32 %v6749_v48, %v8387_v49  ;;  %v6751_v56 = vpop.eup %6750 }
 0x51e   :  { %6760 = vrcp.f32 %v2499_v2  ;;  %v2529_v14 = vmul.f32 %v6751_v56, %v8385_v38 }
 0x51f   :  { %6291 = vmatprep.mubr.f32.mxu0 %v2526_v43 }
 0x520   :  { %v6753_v26 = vpop.eup %6752  ;;  %6292 = vmatmul.mubr.f32.gmra.mrb[70].mxu0 %v2527_v40 }
 0x521   :  { %v2528_v54 = vmul.f32 %v6753_v26, %v8393_v10  ;;  %v6755_v50 = vpop.eup %6754 }
 0x522   :  { %v6140_v28 = vpop.f32.mrb[24].mxu0  ;;  %v2531_v49 = vmul.f32 %v6755_v50, %v8391_v7 }
 0x523   :  { %6294 = vmatprep.mubr.f32.mxu0 %v2528_v54  ;;  %v1024_v35 = vpop.f32.mrb[25].mxu0 }
 0x524   :  { %v6757_v31 = vpop.eup %6756  ;;  %6295 = vmatmul.mubr.f32.gmra.mrb[72].mxu0 %v2529_v14 }
 0x525   :  { %v2530_v62 = vmul.f32 %v6757_v31, %v8399_v16  ;;  %v6759_v18 = vpop.eup %6758  ;;  %v8654_v16 = vpop.permute.xlu0 %3592 }
 0x526   :  { %v2533_v10 = vmul.f32 %v6759_v18, %v8397_v13 }
 0x527   :  { %6297 = vmatprep.mubr.f32.mxu0 %v2530_v62 }
 0x528   :  { %v6761_v15 = vpop.eup %6760  ;;  %6298 = vmatmul.mubr.f32.gmra.mrb[74].mxu0 %v2531_v49 }
 0x529   :  { %v2532_v19 = vmul.f32 %v6761_v15, %v8403_v24  ;;  %v8657_v24 = vpop.permute.xlu0 %3602 }
 0x52b   :  { %6300 = vmatprep.mubr.f32.mxu0 %v2532_v19 }
 0x52c   :  { %6301 = vmatmul.mubr.f32.gmra.mrb[76].mxu0 %v2533_v10 }
 0x52d   :  { %v8661_v13 = vpop.permute.xlu0 %3612 }
 0x52e   :  { %11423 = vst [vmem:[#allocation91_spill] sm:$0xff] %v8661_v13 }
 0x52f   :  { %v6143_v38 = vpop.f32.mrb[26].mxu0 }
 0x530   :  { %v1034_v32 = vpop.f32.mrb[27].mxu0 }
 0x532   :  { %1053 = vxpose.xlu0.b32.start [1/16] (narrow) %v8580_v11, 8  ;;  %v8666_v11 = vpop.permute.xlu0 %3622 }
 0x533   :  { %11425 = vst [vmem:[#allocation93_spill] sm:$0xff] %v8666_v11 }
 0x536   :  { %1054 = vxpose.xlu0.b32.cont [2/16] (narrow) %v8577_v55, 8  ;;  %v8664_v55 = vpop.permute.xlu1 %3597 }
 0x537   :  { %11424 = vst [vmem:[#allocation96_spill] sm:$0xff] %v8664_v55 }
 0x53a   :  { %1055 = vxpose.xlu0.b32.cont [3/16] (narrow) %v8594_v1, 8  ;;  %v8671_v1 = vpop.permute.xlu0 %3632 }
 0x53b   :  { %11427 = vst [vmem:[#allocation95_spill] sm:$0xff] %v8671_v1 }
 0x53e   :  { %1056 = vxpose.xlu0.b32.cont [4/16] (narrow) %v8591_v46, 8  ;;  %v8669_v46 = vpop.permute.xlu1 %3607 }
 0x53f   :  { %v6146_v7 = vpop.f32.mrb[28].mxu0  ;;  %11426 = vst [vmem:[#allocation94_spill] sm:$0xff] %v8669_v46  ;;  %v11471_v46 = vld [vmem:[#allocation30_spill] sm:$0xff] }
 0x540   :  { %v1044_v58 = vpop.f32.mrb[29].mxu0 }
 0x542   :  { %1057 = vxpose.xlu0.b32.cont [5/16] (narrow) %v8607_v9, 8  ;;  %v8673_v9 = vpop.permute.xlu1 %3617 }
 0x543   :  { %11428 = vst [vmem:[#allocation92_spill] sm:$0xff] %v8673_v9  ;;  %v11460_v9 = vld [vmem:[#allocation3_spill] sm:$0xff] }
 0x546   :  { %1058 = vxpose.xlu0.b32.cont [6/16] (narrow) %v8605_v61, 8  ;;  %v8675_v61 = vpop.permute.xlu0 %3642 }
 0x547   :  { %11429 = vst [vmem:[#allocation98_spill] sm:$0xff] %v8675_v61 }
 0x54a   :  { %1059 = vxpose.xlu0.b32.cont [7/16] (narrow) %v8628_v45, 8  ;;  %v8677_v45 = vpop.permute.xlu1 %3627 }
 0x54b   :  { %11430 = vst [vmem:[#allocation101_spill] sm:$0xff] %v8677_v45 }
 0x54e   :  { %1060 = vxpose.xlu0.b32.cont [8/16] (narrow) %v8625_v21, 8  ;;  %v8679_v21 = vpop.permute.xlu0 %3652 }
 0x54f   :  { %11431 = vst [vmem:[#allocation99_spill] sm:$0xff] %v8679_v21 }
 0x552   :  { %1061 = vxpose.xlu0.b32.cont [9/16] (narrow) %v1014_v23, 8  ;;  %v8683_v57 = vpop.permute.xlu0 %412 }
 0x556   :  { %1062 = vxpose.xlu0.b32.cont [10/16] (narrow) %v8637_v47, 8  ;;  %v8681_v47 = vpop.permute.xlu1 %3637  ;;  %v8687_v4 = vpop.permute.xlu0 %492 }
 0x557   :  { %11432 = vst [vmem:[#allocation97_spill] sm:$0xff] %v8681_v47 }
 0x55a   :  { %1063 = vxpose.xlu0.b32.cont [11/16] (narrow) %v1024_v35, 8  ;;  %v8685_v59 = vpop.permute.xlu1 %3647  ;;  %v8691_v40 = vpop.permute.xlu0 %3776 }
 0x55b   :  { %11433 = vst [vmem:[#allocation100_spill] sm:$0xff] %v8685_v59 }
 0x55e   :  { %1064 = vxpose.xlu0.b32.cont [12/16] (narrow) %v6140_v28, 8  ;;  %v8689_v43 = vpop.permute.xlu1 %3657  ;;  %v8695_v28 = vpop.permute.xlu0 %3788 }
 0x55f   :  { %11434 = vst [vmem:[#allocation102_spill] sm:$0xff] %v8689_v43 }
 0x562   :  { %1065 = vxpose.xlu0.b32.cont [13/16] (narrow) %v1034_v32, 8  ;;  %v8693_v14 = vpop.permute.xlu1 %3780  ;;  %v8699_v49 = vpop.permute.xlu0 %3796 }
 0x563   :  { %11436 = vst [vmem:[#allocation90_spill] sm:$0xff] %v8699_v49 }
 0x566   :  { %v6177_v44 = vpop.f32.mrb[30].mxu0  ;;  %1066 = vxpose.xlu0.b32.cont [14/16] (narrow) %v6143_v38, 8  ;;  %v8697_v62 = vpop.permute.xlu1 %3784 }
 0x567   :  { %v1505_v23 = vpop.f32.mrb[31].mxu0  ;;  %11435 = vst [vmem:[#allocation26_spill] sm:$0xff] %v8697_v62  ;;  %v8703_v10 = vpop.permute.xlu0 %3804 }
 0x568   :  { %1584 = vxpose.xlu1.b32.start [1/16] (narrow) %v1505_v23, 8  ;;  %11438 = vst [vmem:[#allocation103_spill] sm:$0xff] %v8703_v10  ;;  %v11469_v10 = vld [vmem:[#allocation36_spill] sm:$0xff] }
 0x56a   :  { %v6180_v63 = vpop.f32.mrb[32].mxu0  ;;  %1067 = vxpose.xlu0.b32.cont [15/16] (narrow) %v1044_v58, 8  ;;  %v8701_v18 = vpop.permute.xlu1 %3792 }
 0x56b   :  { %v1515_v25 = vpop.f32.mrb[33].mxu0  ;;  %11437 = vst [vmem:[#allocation89_spill] sm:$0xff] %v8701_v18  ;;  %v8707_v32 = vpop.permute.xlu0 %3812 }
 0x56c   :  { %1585 = vxpose.xlu1.b32.cont [2/16] (narrow) %v6177_v44, 8  ;;  %11440 = vst [vmem:[#allocation105_spill] sm:$0xff] %v8707_v32 }
 0x56e   :  { %v6183_v0 = vpop.f32.mrb[34].mxu0  ;;  %1068 = vxpose.xlu0.b32.end [16/16] (narrow) %v6146_v7, 8  ;;  %v8705_v38 = vpop.permute.xlu1 %3800 }
 0x56f   :  { %v1525_v34 = vpop.f32.mrb[35].mxu0  ;;  %11439 = vst [vmem:[#allocation104_spill] sm:$0xff] %v8705_v38  ;;  %v8711_v44 = vpop.permute.xlu0 %3820  ;;  %v11461_v38 = vld [vmem:[#allocation40_spill] sm:$0xff] }
 0x570   :  { %1586 = vxpose.xlu1.b32.cont [3/16] (narrow) %v1515_v25, 8  ;;  %11441 = vst [vmem:[#allocation106_spill] sm:$0xff] %v8711_v44  ;;  %v11470_v44 = vld [vmem:[#allocation5_spill] sm:$0xff] }
 0x572   :  { %v6186_v48 = vpop.f32.mrb[36].mxu0  ;;  %v8709_v7 = vpop.permute.xlu1 %3808 }
 0x573   :  { %v1535_v2 = vpop.f32.mrb[37].mxu0 }
 0x574   :  { %1587 = vxpose.xlu1.b32.cont [4/16] (narrow) %v6180_v63, 8 }
 0x576   :  { %v6189_v56 = vpop.f32.mrb[38].mxu0  ;;  %v8713_v63 = vpop.permute.xlu1 %3816 }
 0x577   :  { %v1545_v26 = vpop.f32.mrb[39].mxu0 }
 0x578   :  { %1588 = vxpose.xlu1.b32.cont [5/16] (narrow) %v1525_v34, 8  ;;  %v8715_v34 = vpop.permute.xlu0 %3828 }
 0x579   :  { %11442 = vst [vmem:[#allocation107_spill] sm:$0xff] %v8715_v34  ;;  %v11459_v34 = vld [vmem:[#allocation35_spill] sm:$0xff] }
 0x57a   :  { %v6192_v54 = vpop.f32.mrb[40].mxu0 }
 0x57b   :  { %v1555_v50 = vpop.f32.mrb[41].mxu0 }
 0x57c   :  { %1589 = vxpose.xlu1.b32.cont [6/16] (narrow) %v6183_v0, 8 }
 0x57e   :  { %v6195_v31 = vpop.f32.mrb[42].mxu0 }
 0x57f   :  { %v1565_v35 = vpop.f32.mrb[43].mxu0 }
 0x580   :  { %1590 = vxpose.xlu1.b32.cont [7/16] (narrow) %v1535_v2, 8  ;;  %v8719_v2 = vpop.permute.xlu0 %3836 }
 0x581   :  { %11444 = vst [vmem:[#allocation109_spill] sm:$0xff] %v8719_v2 }
 0x584   :  { %1591 = vxpose.xlu1.b32.cont [8/16] (narrow) %v6186_v48, 8  ;;  %v8717_v48 = vpop.permute.xlu1 %3824 }
 0x585   :  { %11443 = vst [vmem:[#allocation108_spill] sm:$0xff] %v8717_v48 }
 0x586   :  { %v6198_v15 = vpop.f32.mrb[44].mxu0 }
 0x587   :  { %v1575_v19 = vpop.f32.mrb[45].mxu0 }
 0x588   :  { %1592 = vxpose.xlu1.b32.cont [9/16] (narrow) %v1545_v26, 8 }
 0x58c   :  { %1593 = vxpose.xlu1.b32.cont [10/16] (narrow) %v6189_v56, 8 }
 0x590   :  { %1594 = vxpose.xlu1.b32.cont [11/16] (narrow) %v1555_v50, 8  ;;  %v8721_v50 = vpop.permute.xlu1 %3832 }
 0x591   :  { %11445 = vst [vmem:[#allocation110_spill] sm:$0xff] %v8721_v50 }
 0x593   :  { %v6229_v58 = vpop.f32.mrb[46].mxu0 }
 0x594   :  { %1595 = vxpose.xlu1.b32.cont [12/16] (narrow) %v6192_v54, 8  ;;  %v2069_v23 = vpop.f32.mrb[47].mxu0  ;;  %v8723_v54 = vpop.permute.xlu0 %3844 }
 0x595   :  { %11446 = vst [vmem:[#allocation111_spill] sm:$0xff] %v8723_v54 }
 0x598   :  { %1596 = vxpose.xlu1.b32.cont [13/16] (narrow) %v1565_v35, 8  ;;  %v6232_v25 = vpop.f32.mrb[48].mxu0  ;;  %v8725_v35 = vpop.permute.xlu1 %3840 }
 0x599   :  { %v2079_v0 = vpop.f32.mrb[49].mxu0  ;;  %11447 = vst [vmem:[#allocation112_spill] sm:$0xff] %v8725_v35  ;;  %v8727_v59 = vpop.permute.xlu0 %3852 }
 0x59a   :  { %11448 = vst [vmem:[#allocation113_spill] sm:$0xff] %v8727_v59 }
 0x59c   :  { %1597 = vxpose.xlu1.b32.cont [14/16] (narrow) %v6195_v31, 8  ;;  %v8729_v31 = vpop.permute.xlu1 %3848 }
 0x59d   :  { %11449 = vst [vmem:[#allocation114_spill] sm:$0xff] %v8729_v31  ;;  %v8731_v61 = vpop.permute.xlu0 %3860 }
 0x59e   :  { %11450 = vst [vmem:[#allocation115_spill] sm:$0xff] %v8731_v61 }
 0x5a0   :  { %1598 = vxpose.xlu1.b32.cont [15/16] (narrow) %v1575_v19, 8  ;;  %v8733_v1 = vpop.permute.xlu1 %3856 }
 0x5a1   :  { %11451 = vst [vmem:[#allocation116_spill] sm:$0xff] %v8733_v1  ;;  %v433_v2 = vpop.permute.xlu0 %432 }
 0x5a2   :  { %v6235_v56 = vpop.f32.mrb[50].mxu0 }
 0x5a3   :  { %v2089_v26 = vpop.f32.mrb[51].mxu0 }
 0x5a4   :  { %1599 = vxpose.xlu1.b32.end [16/16] (narrow) %v6198_v15, 8 }
 0x5a5   :  { %v8737_v35 = vpop.permute.xlu0 %504 }
 0x5a6   :  { %v6238_v21 = vpop.f32.mrb[52].mxu0 }
 0x5a7   :  { %v2099_v43 = vpop.f32.mrb[53].mxu0 }
 0x5a8   :  { %2148 = vxpose.xlu1.b32.start [1/16] (narrow) %v2069_v23, 8  ;;  %v8735_v23 = vpop.permute.xlu1 %3979 }
 0x5ac   :  { %2149 = vxpose.xlu1.b32.cont [2/16] (narrow) %v6229_v58, 8  ;;  %v8739_v58 = vpop.permute.xlu1 %3987 }
 0x5ad   :  { %11452 = vst [vmem:[#allocation117_spill] sm:$0xff] %v8739_v58 }
 0x5b0   :  { %2150 = vxpose.xlu1.b32.cont [3/16] (narrow) %v2079_v0, 8  ;;  %v8741_v0 = vpop.permute.xlu0 %3983 }
 0x5b2   :  { %v6241_v19 = vpop.f32.mrb[54].mxu0 }
 0x5b3   :  { %v2109_v47 = vpop.f32.mrb[55].mxu0 }
 0x5b4   :  { %2151 = vxpose.xlu1.b32.cont [4/16] (narrow) %v6232_v25, 8  ;;  %v8743_v25 = vpop.permute.xlu1 %3991  ;;  %v8745_v45 = vpop.permute.xlu0 %3995 }
 0x5b5   :  { %11453 = vst [vmem:[#allocation118_spill] sm:$0xff] %v8745_v45 }
 0x5b6   :  { %v6244_v15 = vpop.f32.mrb[56].mxu0 }
 0x5b7   :  { %v2119_v54 = vpop.f32.mrb[57].mxu0 }
 0x5b8   :  { %2152 = vxpose.xlu1.b32.cont [5/16] (narrow) %v2089_v26, 8  ;;  %v8747_v26 = vpop.permute.xlu1 %3999 }
 0x5b9   :  { %11454 = vst [vmem:[#allocation119_spill] sm:$0xff] %v8747_v26  ;;  %v11612_v26 = vld [vmem:[#allocation28_spill] sm:$0xff] }
 0x5bc   :  { %2153 = vxpose.xlu1.b32.cont [6/16] (narrow) %v6235_v56, 8  ;;  %v8749_v56 = vpop.permute.xlu0 %4003  ;;  %v8751_v55 = vpop.permute.xlu1 %4007 }
 0x5bd   :  { %11455 = vst [vmem:[#allocation120_spill] sm:$0xff] %v8749_v56  ;;  %11456 = vst [vmem:[#allocation121_spill] sm:$0xff] %v8751_v55  ;;  %v11462_v56 = vld [vmem:[#allocation32_spill] sm:$0xff]  ;;  %v11468_v55 = vld [vmem:[#allocation2_spill] sm:$0xff] }
 0x5be   :  { %v400_v48 = vmul.f32 %v11462_v56, %v11461_v38  ;;  %v11465_v38 = vld [vmem:[#allocation10_spill] sm:$0xff] }
 0x5bf   :  { %v11466_v56 = vld [vmem:[#allocation38_spill] sm:$0xff] }
 0x5c0   :  { %2154 = vxpose.xlu1.b32.cont [7/16] (narrow) %v2099_v43, 8  ;;  %v8753_v50 = vpop.permute.xlu0 %4011  ;;  %v8755_v11 = vpop.permute.xlu1 %4015 }
 0x5c1   :  { %11457 = vst [vmem:[#allocation122_spill] sm:$0xff] %v8753_v50  ;;  %11458 = vst [vmem:[#allocation123_spill] sm:$0xff] %v8755_v11 }
 0x5c2   :  { %v6247_v61 = vpop.f32.mrb[58].mxu0 }
 0x5c3   :  { %v2129_v59 = vpop.f32.mrb[59].mxu0 }
 0x5c4   :  { %2155 = vxpose.xlu1.b32.cont [8/16] (narrow) %v6238_v21, 8 }
 0x5c6   :  { %v6250_v1 = vpop.f32.mrb[60].mxu0 }
 0x5c7   :  { %v2139_v31 = vpop.f32.mrb[61].mxu0 }
 0x5c8   :  { %2156 = vxpose.xlu1.b32.cont [9/16] (narrow) %v2109_v47, 8 }
 0x5cc   :  { %2157 = vxpose.xlu1.b32.cont [10/16] (narrow) %v6241_v19, 8  ;;  %v401_v19 = vmul.f32 %v11460_v9, %v11459_v34  ;;  %v8770_v9 = vpop.permute.xlu1 %4023  ;;  %v419_v34 = vmul.f32 %v8683_v57, %v11465_v38  ;;  %v11472_v57 = vld [vmem:[#allocation24_spill] sm:$0xff] }
 0x5cd   :  { %11464 = vst [vmem:[#allocation3_spill] sm:$0xff] %v8770_v9  ;;  %v11473_v38 = vld [vmem:[#allocation4_spill] sm:$0xff] }
 0x5cf   :  { %v6281_v32 = vpop.f32.mrb[62].mxu0 }
 0x5d0   :  { %2158 = vxpose.xlu1.b32.cont [11/16] (narrow) %v2119_v54, 8  ;;  %v2600_v43 = vpop.f32.mrb[63].mxu0  ;;  %v5746_v54 = vld [vmem:[%s11228_s2] ss:$0 sm:$0xff] }
 0x5d1   :  { %2679 = vxpose.xlu0.b32.start [1/16] (narrow) %v2600_v43, 8  ;;  %v8764_v43 = vpop.permute.xlu0 %4019 }
 0x5d2   :  { %11463 = vst [vmem:[#allocation35_spill] sm:$0xff] %v8764_v43 }
 0x5d4   :  { %2159 = vxpose.xlu1.b32.cont [12/16] (narrow) %v6244_v15, 8  ;;  %v407_v15 = vmul.f32 %v5746_v54, %v400_v48  ;;  %v5747_v48 = vld [vmem:[%s11228_s2 + $0x2] ss:$0 sm:$0xff] }
 0x5d5   :  { %2680 = vxpose.xlu0.b32.cont [2/16] (narrow) %v6281_v32, 8  ;;  %v2712_v32 = vld [vmem:[%s11223_s3 + $0x60] sm:$0xff]  ;;  %v8775_v11 = vpop.permute.xlu0 %4027 }
 0x5d6   :  { %6311 = vmatprep.mubr.msk.f32.mxu1 %vm208_vm0, %v2712_v32  ;;  %11467 = vst [vmem:[#allocation40_spill] sm:$0xff] %v8775_v11  ;;  %v409_v32 = vadd.f32 %v407_v15, %v11471_v46 }
 0x5d7   :  { %v6284_v21 = vpop.f32.mrb[64].mxu0 }
 0x5d8   :  { %2160 = vxpose.xlu1.b32.cont [13/16] (narrow) %v2129_v59, 8  ;;  %v2610_v47 = vpop.f32.mrb[65].mxu0  ;;  %v408_v59 = vmul.f32 %v5746_v54, %v401_v19 }
 0x5d9   :  { %2681 = vxpose.xlu0.b32.cont [3/16] (narrow) %v2610_v47, 8  ;;  %v436_v47 = vmul.f32 %v433_v2, %v11466_v56  ;;  %v420_v2 = vmul.f32 %v11473_v38, %v11472_v57  ;;  %v8786_v56 = vpop.permute.xlu1 %4031 }
 0x5da   :  { %v410_v13 = vadd.f32 %v408_v59, %v11468_v55  ;;  %11474 = vst [vmem:[#allocation32_spill] sm:$0xff] %v8786_v56 }
 0x5db   :  { %v443_v19 = vmul.f32 %v5747_v48, %v436_v47 }
 0x5dc   :  { %2161 = vxpose.xlu1.b32.cont [14/16] (narrow) %v6247_v61, 8  ;;  %v435_v61 = vmul.f32 %v11470_v44, %v11469_v10  ;;  %v422_v59 = vadd.f32 %v420_v2, %v410_v13  ;;  %v1069_v10 = vpop.trf.xlu0  ;;  %v11477_v2 = vld [vmem:[#allocation42_spill] sm:$0xff] }
 0x5dd   :  { %2682 = vxpose.xlu0.b32.cont [4/16] (narrow) %v6284_v21, 8  ;;  %v421_v21 = vadd.f32 %v419_v34, %v409_v32 }
 0x5de   :  { %v442_v55 = vmul.f32 %v5747_v48, %v435_v61  ;;  %v445_v46 = vadd.f32 %v443_v19, %v422_v59  ;;  %v6862_v59 = vmov 3  }
 0x5e0   :  { %2162 = vxpose.xlu1.b32.cont [15/16] (narrow) %v2139_v31, 8  ;;  %v444_v44 = vadd.f32 %v442_v55, %v421_v21 }
 0x5e2   :  { %v1085_v11 = vadd.f32 %v1069_v10, %v444_v44  ;;  %v5748_v10 = vld [vmem:[%s11228_s2 + $0x3] ss:$0 sm:$0xff] }
 0x5e3   :  { %v6287_v54 = vpop.f32.mrb[66].mxu0 }
 0x5e4   :  { %2163 = vxpose.xlu1.b32.end [16/16] (narrow) %v6250_v1, 8  ;;  %v2620_v31 = vpop.f32.mrb[67].mxu0 }
 0x5e5   :  { %2683 = vxpose.xlu0.b32.cont [5/16] (narrow) %v2620_v31, 8  ;;  %v11478_v31 = vld [vmem:[#allocation34_spill] sm:$0xff] }
 0x5e6   :  { %v476_v55 = vmul.f32 %v11478_v31, %v11477_v2 }
 0x5e8   :  { %v1600_v15 = vpop.trf.xlu1 }
 0x5e9   :  { %v1616_v9 = vadd.f32 %v1600_v15, %v445_v46  ;;  %2684 = vxpose.xlu0.b32.cont [6/16] (narrow) %v6287_v54, 8  ;;  %v483_v46 = vmul.f32 %v5748_v10, %v476_v55  ;;  %v496_v15 = vmul.f32 %v8687_v4, %v11418_v41  ;;  %v11484_v4 = vld [vmem:[#allocation9_spill] sm:$0xff] }
 0x5eb   :  { %v6394_v34 = vpack.c.bf16 %v1616_v9, %v1085_v11  ;;  %v6290_v47 = vpop.f32.mrb[68].mxu0  ;;  %v11475_v11 = vld [vmem:[#allocation37_spill] sm:$0xff]  ;;  %v11476_v9 = vld [vmem:[#allocation8_spill] sm:$0xff] }
 0x5ec   :  { %v2630_v32 = vpop.f32.mrb[69].mxu0  ;;  %v477_v54 = vmul.f32 %v11476_v9, %v11475_v11 }
 0x5ed   :  { %6395 = vmatprep.subr.bf16.mxu1 %v6394_v34  ;;  %2685 = vxpose.xlu0.b32.cont [7/16] (narrow) %v2630_v32, 8  ;;  %v11480_v32 = vld [vmem:[#allocation39_spill] sm:$0xff] }
 0x5ee   :  { %6397 = vmatpush3.bf16.msra.mxu1 %v6394_v34  ;;  %v484_v44 = vmul.f32 %v5748_v10, %v477_v54  ;;  %v11479_v34 = vld [vmem:[#allocation41_spill] sm:$0xff] }
 0x5f1   :  { %2686 = vxpose.xlu0.b32.cont [8/16] (narrow) %v6290_v47, 8  ;;  %v511_v47 = vmul.f32 %v8737_v35, %v11479_v34  ;;  %v495_v35 = vmul.f32 %v11484_v4, %v7196_v51  ;;  %v2713_v51 = vld [vmem:[%s11223_s3 + $0x68] sm:$0xff] }
 0x5f2   :  { %v8855_v34 = vld [vmem:[%s11226_s7 + $0x68] sm:$0xff] }
 0x5f3   :  { %v6293_v57 = vpop.f32.mrb[70].mxu0 }
 0x5f4   :  { %v2640_v1 = vpop.f32.mrb[71].mxu0 }
 0x5f5   :  { %2687 = vxpose.xlu0.b32.cont [9/16] (narrow) %v2640_v1, 8 }
 0x5f7   :  { %v6296_v61 = vpop.f32.mrb[72].mxu0 }
 0x5f8   :  { %v2650_v48 = vpop.f32.mrb[73].mxu0 }
 0x5f9   :  { %2688 = vxpose.xlu0.b32.cont [10/16] (narrow) %v6293_v57, 8  ;;  %v11481_v57 = vld [vmem:[#allocation11_spill] sm:$0xff] }
 0x5fa   :  { %v512_v1 = vmul.f32 %v11481_v57, %v11480_v32  ;;  %v8905_v32 = vld [vmem:[%s11226_s7 + $0x88] sm:$0xff] }
 0x5fb   :  { %v6299_v13 = vpop.f32.mrb[74].mxu0 }
 0x5fc   :  { %v2660_v21 = vpop.f32.mrb[75].mxu0 }
 0x5fd   :  { %2689 = vxpose.xlu0.b32.cont [11/16] (narrow) %v2650_v48, 8 }
 0x5ff   :  { %v6302_v19 = vpop.f32.mrb[76].mxu0 }
 0x600   :  { %v2670_v38 = vpop.f32.mrb[77].mxu0 }
 0x601   :  { %2690 = vxpose.xlu0.b32.cont [12/16] (narrow) %v6296_v61, 8  ;;  %v11482_v61 = vld [vmem:[#allocation6_spill] sm:$0xff] }
 0x602   :  { %4039 = vperm.xlu1 %6462, %v8447_v22   ;;  %v485_v48 = vadd.f32 %v483_v46, %v11482_v61  ;;  %v2714_v46 = vld [vmem:[%s11223_s3 + $0x70] sm:$0xff] }
 0x603   :  { %v8980_v61 = vld [vmem:[%s11226_s7 + $0x10] sm:$0xff] }
 0x604   :  { %v497_v9 = vadd.f32 %v495_v35, %v485_v48  ;;  %v11489_v35 = vld [vmem:[#allocation13_spill] sm:$0xff] }
 0x605   :  { %2691 = vxpose.xlu0.b32.cont [13/16] (narrow) %v2660_v21, 8 }
 0x606   :  { %4047 = vperm.xlu1 %6462, %v8461_v37  }
 0x609   :  { %2692 = vxpose.xlu0.b32.cont [14/16] (narrow) %v6299_v13, 8  ;;  %v11483_v13 = vld [vmem:[#allocation7_spill] sm:$0xff] }
 0x60a   :  { %4055 = vperm.xlu1 %6462, %v8473_v5   ;;  %v486_v21 = vadd.f32 %v484_v44, %v11483_v13 }
 0x60d   :  { %2693 = vxpose.xlu0.b32.cont [15/16] (narrow) %v2670_v38, 8  ;;  %v498_v38 = vadd.f32 %v496_v15, %v486_v21  ;;  %v8835_v15 = vld [vmem:[%s11226_s7 + $0x48] sm:$0xff]  ;;  %v11265_v21 = vmov 8  }
 0x60e   :  { %4063 = vperm.xlu1 %6462, %v8486_v12  }
 0x611   :  { %2694 = vxpose.xlu0.b32.end [16/16] (narrow) %v6302_v19, 8  ;;  %v5749_v19 = vld [vmem:[%s11228_s2 + $0x5] ss:$0 sm:$0xff] }
 0x612   :  { %6464 = vset.pattern.permute.xlu1 %v6862_v59  ;;  %v518_v41 = vmul.f32 %v5749_v19, %v511_v47  ;;  %v519_v11 = vmul.f32 %v5749_v19, %v512_v1  ;;  %v8898_v47 = vld [vmem:[%s11226_s7 + $0x78] sm:$0xff]  ;;  %v11259_v1 = vmov 7   ;;  %v6836_v19 = vld [vmem:[%s11224_s0 + $0x8] sm:$0xff] }
 0x613   :  { %4186 = vperm.xlu1 %6464, %v8505_v29  }
 0x614   :  { %v520_v2 = vadd.f32 %v518_v41, %v497_v9  ;;  %v521_v31 = vadd.f32 %v519_v11, %v498_v38  ;;  %v11491_v9 = vld [vmem:[#allocation12_spill] sm:$0xff] }
 0x617   :  { %4190 = vperm.xlu1 %6464, %v8519_v53  }
 0x61b   :  { %4198 = vperm.xlu1 %6464, %v8529_v60  }
 0x61f   :  { %4206 = vperm.xlu1 %6464, %v8539_v42  }
 0x623   :  { %4214 = vperm.xlu1 %6464, %v8438_v6   ;;  %v2715_v6 = vld [vmem:[%s11223_s3 + $0x78] sm:$0xff] }
 0x627   :  { %4222 = vperm.xlu1 %6464, %v8452_v3   ;;  %v8847_v3 = vld [vmem:[%s11226_s7 + $0x58] sm:$0xff] }
 0x628   :  { %v2164_v54 = vpop.trf.xlu1 }
 0x62b   :  { %4230 = vperm.xlu1 %6464, %v8466_v20   ;;  %v6863_v20 = vmov 4  }
 0x62f   :  { %4238 = vperm.xlu1 %6464, %v8478_v27  }
 0x633   :  { %4246 = vperm.xlu1 %6464, %v8491_v33  }
 0x637   :  { %4254 = vperm.xlu1 %6464, %v8498_v39  }
 0x63a   :  { %4035 = vperm.xlu0 %6461, %v8478_v27  }
 0x63b   :  { %4262 = vperm.xlu1 %6464, %v8511_v36  }
 0x63e   :  { %4043 = vperm.xlu0 %6461, %v8491_v33  }
 0x63f   :  { %6465 = vset.pattern.permute.xlu1 %v6863_v20 }
 0x640   :  { %4341 = vperm.xlu1 %6465, %v8549_v17  }
 0x642   :  { %4051 = vperm.xlu0 %6461, %v8498_v39  }
 0x644   :  { %4349 = vperm.xlu1 %6465, %v8519_v53  }
 0x646   :  { %4059 = vperm.xlu0 %6461, %v8511_v36  }
 0x648   :  { %4353 = vperm.xlu1 %6465, %v8558_v30  }
 0x64a   :  { %6463 = vset.pattern.permute.xlu0 %v6862_v59  ;;  %v2180_v59 = vadd.f32 %v2164_v54, %v520_v2 }
 0x64b   :  { %4182 = vperm.xlu0 %6463, %v8549_v17  }
 0x64c   :  { %4361 = vperm.xlu1 %6465, %v8567_v52  }
 0x64f   :  { %4194 = vperm.xlu0 %6463, %v8558_v30  }
 0x650   :  { %4369 = vperm.xlu1 %6465, %v8574_v8  }
 0x653   :  { %4202 = vperm.xlu0 %6463, %v8567_v52  }
 0x654   :  { %4377 = vperm.xlu1 %6465, %v8835_v15  }
 0x655   :  { %v2695_v55 = vpop.trf.xlu0 }
 0x656   :  { %v2711_v10 = vadd.f32 %v2695_v55, %v521_v31 }
 0x657   :  { %4210 = vperm.xlu0 %6463, %v8574_v8  }
 0x658   :  { %v6398_v44 = vpack.c.bf16 %v2711_v10, %v2180_v59  ;;  %4385 = vperm.xlu1 %6465, %v8847_v3   ;;  %v6838_v59 = vld [vmem:[%s11224_s0 + $0x18] sm:$0xff] }
 0x65a   :  { %6399 = vmatprep.subr.bf16.mxu1 %v6398_v44 }
 0x65b   :  { %6401 = vmatpush3.bf16.msra.mxu1 %v6398_v44  ;;  %4218 = vperm.xlu0 %6463, %v8835_v15   ;;  %v6839_v44 = vld [vmem:[%s11224_s0 + $0x10] sm:$0xff] }
 0x65c   :  { %4393 = vperm.xlu1 %6465, %v8855_v34  }
 0x65e   :  { %6312 = vmatmul.mubr.msk.f32.vlgmr.msra.gmra.mrb[62].mxu1 %vm208_vm0, %v2713_v51 }
 0x65f   :  { %6314 = vmatprep.mubr.msk.f32.mxu1 %vm208_vm0, %v2714_v46  ;;  %4226 = vperm.xlu0 %6463, %v8847_v3  }
 0x660   :  { %4401 = vperm.xlu1 %6465, %v8898_v47  }
 0x662   :  { %6315 = vmatmul.mubr.msk.f32.gmra.mrb[64].mxu1 %vm208_vm0, %v2715_v6 }
 0x663   :  { %4234 = vperm.xlu0 %6463, %v8855_v34  }
 0x664   :  { %4409 = vperm.xlu1 %6465, %v8905_v32  }
 0x667   :  { %4242 = vperm.xlu0 %6463, %v8447_v22   ;;  %v8876_v22 = vld [vmem:[%s11226_s7 + $0x40] sm:$0xff] }
 0x66b   :  { %4250 = vperm.xlu0 %6463, %v8461_v37   ;;  %v8883_v37 = vld [vmem:[%s11226_s7 + $0x50] sm:$0xff] }
 0x66f   :  { %4258 = vperm.xlu0 %6463, %v8473_v5   ;;  %v8890_v5 = vld [vmem:[%s11226_s7 + $0x60] sm:$0xff] }
 0x673   :  { %4266 = vperm.xlu0 %6463, %v8486_v12  }
 0x677   :  { %6466 = vset.pattern.permute.xlu0 %v6863_v20  ;;  %v11494_v20 = vld [vmem:[#allocation14_spill] sm:$0xff] }
 0x678   :  { %4345 = vperm.xlu0 %6466, %v8505_v29  }
 0x67c   :  { %4357 = vperm.xlu0 %6466, %v8529_v60  }
 0x680   :  { %4365 = vperm.xlu0 %6466, %v8539_v42  }
 0x681   :  { %v8974_v57 = vpop.permute.xlu1 %4039 }
 0x682   :  { %11485 = vst [vmem:[#allocation10_spill] sm:$0xff] %v8974_v57 }
 0x684   :  { %4373 = vperm.xlu0 %6466, %v8876_v22  }
 0x685   :  { %v8985_v48 = vpop.permute.xlu1 %4047 }
 0x686   :  { %11486 = vst [vmem:[#allocation38_spill] sm:$0xff] %v8985_v48  ;;  %v11506_v48 = vmov 7  }
 0x688   :  { %4381 = vperm.xlu0 %6466, %v8883_v37  }
 0x689   :  { %v8990_v13 = vpop.permute.xlu1 %4055 }
 0x68a   :  { %11487 = vst [vmem:[#allocation2_spill] sm:$0xff] %v8990_v13 }
 0x68c   :  { %4389 = vperm.xlu0 %6466, %v8890_v5  }
 0x690   :  { %4397 = vperm.xlu0 %6466, %v8478_v27   ;;  %v8912_v27 = vld [vmem:[%s11226_s7 + $0x98] sm:$0xff] }
 0x691   :  { %4417 = vperm.xlu1 %6465, %v8912_v27  }
 0x694   :  { %4405 = vperm.xlu0 %6466, %v8491_v33   ;;  %v6864_v33 = vmov 5  }
 0x695   :  { %4425 = vperm.xlu1 %6465, %v8486_v12   ;;  %v8934_v12 = vld [vmem:[%s11226_s7 + $0x70] sm:$0xff] }
 0x698   :  { %4413 = vperm.xlu0 %6466, %v8498_v39   ;;  %v8941_v39 = vld [vmem:[%s11226_s7 + $0x80] sm:$0xff] }
 0x699   :  { %6468 = vset.pattern.permute.xlu1 %v6864_v33 }
 0x69a   :  { %4521 = vperm.xlu1 %6468, %v8505_v29   ;;  %v8948_v29 = vld [vmem:[%s11226_s7 + $0x90] sm:$0xff] }
 0x69c   :  { %4421 = vperm.xlu0 %6466, %v8511_v36   ;;  %v8955_v36 = vld [vmem:[%s11226_s7 + $0xa0] sm:$0xff] }
 0x69e   :  { %4525 = vperm.xlu1 %6468, %v8519_v53   ;;  %v8961_v53 = vld [vmem:[%s11226_s7 + $0xa8] sm:$0xff] }
 0x6a0   :  { %6467 = vset.pattern.permute.xlu0 %v6864_v33 }
 0x6a1   :  { %4517 = vperm.xlu0 %6467, %v8549_v17  }
 0x6a2   :  { %4533 = vperm.xlu1 %6468, %v8529_v60   ;;  %v2935_v60 = vld [vmem:[%s11223_s3 + $0x80] sm:$0xff] }
 0x6a3   :  { %6325 = vmatprep.mubr.msk.f32.mxu1 %vm208_vm0, %v2935_v60  ;;  %v6840_v60 = vld [vmem:[%s11226_s7 + $0x20] sm:$0xff] }
 0x6a5   :  { %4529 = vperm.xlu0 %6467, %v8558_v30  }
 0x6a6   :  { %4541 = vperm.xlu1 %6468, %v8539_v42  }
 0x6a9   :  { %4537 = vperm.xlu0 %6467, %v8567_v52   ;;  %v11257_v52 = vmov 6  }
 0x6aa   :  { %4549 = vperm.xlu1 %6468, %v8876_v22  }
 0x6ad   :  { %4545 = vperm.xlu0 %6467, %v8574_v8   ;;  %v6834_v8 = vld [vmem:[%s11226_s7 + $0x8] sm:$0xff] }
 0x6ae   :  { %4557 = vperm.xlu1 %6468, %v8883_v37  }
 0x6b1   :  { %4553 = vperm.xlu0 %6467, %v8835_v15  }
 0x6b2   :  { %4565 = vperm.xlu1 %6468, %v8890_v5  }
 0x6b5   :  { %4561 = vperm.xlu0 %6467, %v8847_v3  }
 0x6b6   :  { %4573 = vperm.xlu1 %6468, %v8934_v12  }
 0x6b9   :  { %4569 = vperm.xlu0 %6467, %v8855_v34   ;;  %v9020_v46 = vpop.permute.xlu0 %4035 }
 0x6ba   :  { %4581 = vperm.xlu1 %6468, %v8941_v39   ;;  %11493 = vst [vmem:[#allocation24_spill] sm:$0xff] %v9020_v46 }
 0x6bd   :  { %4577 = vperm.xlu0 %6467, %v8898_v47  }
 0x6be   :  { %4589 = vperm.xlu1 %6468, %v8948_v29  }
 0x6c1   :  { %4585 = vperm.xlu0 %6467, %v8905_v32  }
 0x6c2   :  { %4597 = vperm.xlu1 %6468, %v8955_v36  }
 0x6c5   :  { %4593 = vperm.xlu0 %6467, %v8912_v27  }
 0x6c6   :  { %6469 = vset.pattern.permute.xlu1 %v11257_v52 }
 0x6c7   :  { %4720 = vperm.xlu1 %6469, %v8549_v17  }
 0x6c9   :  { %4601 = vperm.xlu0 %6467, %v8961_v53  }
 0x6cb   :  { %6471 = vset.pattern.permute.xlu1 %v11259_v1 }
 0x6cc   :  { %4923 = vperm.xlu1 %6471, %v8549_v17  }
 0x6cd   :  { %6470 = vset.pattern.permute.xlu0 %v11257_v52 }
 0x6ce   :  { %4724 = vperm.xlu0 %6470, %v6834_v8  }
 0x6d0   :  { %4927 = vperm.xlu1 %6471, %v6834_v8  }
 0x6d2   :  { %4728 = vperm.xlu0 %6470, %v8980_v61  }
 0x6d4   :  { %6472 = vset.pattern.permute.xlu1 %v11257_v52 }
 0x6d5   :  { %4732 = vperm.xlu1 %6472, %v8558_v30   ;;  %v6837_v30 = vld [vmem:[%s11224_s0] sm:$0xff] }
 0x6d6   :  { %4744 = vperm.xlu0 %6470, %v8539_v42   ;;  %v8995_v42 = vpop.permute.xlu1 %4063 }
 0x6d7   :  { %11488 = vst [vmem:[#allocation36_spill] sm:$0xff] %v8995_v42 }
 0x6d9   :  { %6473 = vset.pattern.permute.xlu1 %v11265_v21 }
 0x6da   :  { %4756 = vperm.xlu0 %6470, %v8835_v15   ;;  %5130 = vperm.xlu1 %6473, %v6834_v8   ;;  %v9012_v31 = vpop.permute.xlu1 %4186  ;;  %v11496_v8 = vld [vmem:[#allocation15_spill] sm:$0xff] }
 0x6de   :  { %4760 = vperm.xlu0 %6470, %v8883_v37   ;;  %6474 = vset.pattern.permute.xlu1 %v11259_v1 }
 0x6df   :  { %4931 = vperm.xlu1 %6474, %v8980_v61  }
 0x6e2   :  { %4764 = vperm.xlu0 %6470, %v8847_v3  }
 0x6e3   :  { %6475 = vset.pattern.permute.xlu1 %v11257_v52 }
 0x6e4   :  { %4736 = vperm.xlu1 %6475, %v6840_v60  }
 0x6e6   :  { %4788 = vperm.xlu0 %6470, %v8905_v32  }
 0x6ea   :  { %4800 = vperm.xlu0 %6470, %v8955_v36  }
 0x6ee   :  { %4804 = vperm.xlu0 %6470, %v8961_v53  }
 0x6f2   :  { %6500 = vset.pattern.permute.xlu0 %v11259_v1 }
 0x731   :  { %v6313_v17 = vpop.f32.mrb[62].mxu1 }
 0x732   :  { %v2814_v38 = vadd.f32 %v6836_v19, %v6313_v17  ;;  %v2794_v41 = vpop.f32.mrb[63].mxu1 }
 0x733   :  { %v2813_v4 = vadd.f32 %v6837_v30, %v2794_v41  ;;  %v9043_v30 = vld [vmem:[%s11226_s7 + $0x28] sm:$0xff] }
 0x734   :  { %v9007_v11 = vadd.f32 %v11489_v35, %v2814_v38  ;;  %v9036_v38 = vpop.permute.xlu1 %4190  ;;  %4740 = vperm.xlu1 %6475, %v9043_v30  }
 0x735   :  { %v9010_v54 = vadd.f32 %v11491_v9, %v2813_v4  ;;  %v6316_v2 = vpop.f32.mrb[64].mxu1  ;;  %11498 = vst [vmem:[#allocation8_spill] sm:$0xff] %v9036_v38  ;;  %v9046_v4 = vpop.permute.xlu0 %4043 }
 0x736   :  { %11490 = vst [vmem:[#allocation5_spill] sm:$0xff] %v9007_v11  ;;  %v2804_v55 = vpop.f32.mrb[65].mxu1  ;;  %v2816_v10 = vadd.f32 %v6838_v59, %v6316_v2  ;;  %11499 = vst [vmem:[#allocation42_spill] sm:$0xff] %v9046_v4 }
 0x737   :  { %11492 = vst [vmem:[#allocation30_spill] sm:$0xff] %v9010_v54  ;;  %v2815_v51 = vadd.f32 %v6839_v44, %v2804_v55  ;;  %v2853_v6 = vadd.f32 %v9007_v11, %v9010_v54  ;;  %v6842_v55 = vld [vmem:[%s11226_s7 + $0x18] sm:$0xff] }
 0x738   :  { %v9033_v17 = vadd.f32 %v11496_v8, %v2816_v10  ;;  %v9049_v2 = vpop.permute.xlu1 %4198  ;;  %6476 = vset.pattern.permute.xlu1 %v11265_v21  ;;  %4935 = vperm.xlu0 %6500, %v6842_v55   ;;  %v6843_v8 = vld [vmem:[%s11226_s7 + $0x30] sm:$0xff] }
 0x739   :  { %v9027_v33 = vadd.f32 %v11494_v20, %v2815_v51  ;;  %11500 = vst [vmem:[#allocation34_spill] sm:$0xff] %v9049_v2  ;;  %5138 = vperm.xlu1 %6476, %v6842_v55   ;;  %v9055_v10 = vpop.permute.xlu0 %4051 }
 0x73a   :  { %11497 = vst [vmem:[#allocation37_spill] sm:$0xff] %v9033_v17  ;;  %11501 = vst [vmem:[#allocation41_spill] sm:$0xff] %v9055_v10 }
 0x73b   :  { %11495 = vst [vmem:[#allocation4_spill] sm:$0xff] %v9027_v33  ;;  %v2854_v19 = vadd.f32 %v2853_v6, %v9027_v33 }
 0x73c   :  { %4943 = vperm.xlu0 %6500, %v9043_v30   ;;  %v9059_v6 = vpop.permute.xlu1 %4206 }
 0x73d   :  { %v2855_v41 = vadd.f32 %v2854_v19, %v9033_v17  ;;  %6477 = vset.pattern.permute.xlu1 %v11259_v1  ;;  %11502 = vst [vmem:[#allocation39_spill] sm:$0xff] %v9059_v6  ;;  %v9064_v19 = vpop.permute.xlu0 %4059  ;;  %v11522_v6 = vld [vmem:[#allocation19_spill] sm:$0xff] }
 0x73e   :  { %4939 = vperm.xlu1 %6477, %v6840_v60   ;;  %11503 = vst [vmem:[#allocation11_spill] sm:$0xff] %v9064_v19 }
 0x73f   :  { %v2856_v35 = vrot.slane %v2855_v41, 4 }
 0x740   :  { %4947 = vperm.xlu0 %6500, %v6843_v8  }
 0x741   :  { %v2857_v9 = vadd.f32 %v2856_v35, %v2855_v41  ;;  %v6844_v35 = vld [vmem:[%s11226_s7 + $0x38] sm:$0xff] }
 0x742   :  { %6478 = vset.pattern.permute.xlu1 %v11257_v52 }
 0x743   :  { %v2858_v59 = vrot.slane %v2857_v9, 2  ;;  %4748 = vperm.xlu1 %6478, %v6844_v35  }
 0x744   :  { %4955 = vperm.xlu0 %6500, %v8876_v22  }
 0x745   :  { %v2859_v44 = vadd.f32 %v2858_v59, %v2857_v9 }
 0x747   :  { %v2860_v51 = vrot.slane %v2859_v44, 1  ;;  %6479 = vset.pattern.permute.xlu1 %v11265_v21 }
 0x748   :  { %5142 = vperm.xlu1 %6479, %v6840_v60   ;;  %4963 = vperm.xlu0 %6500, %v8883_v37  }
 0x749   :  { %v2861_v20 = vadd.f32 %v2860_v51, %v2859_v44  ;;  %v9073_v44 = vpop.permute.xlu1 %4214  ;;  %v9076_v51 = vpop.permute.xlu0 %4182 }
 0x74a   :  { %11504 = vst [vmem:[#allocation6_spill] sm:$0xff] %v9073_v44 }
 0x74b   :  { %v2862_v41 = vmul.f32 0.03125, %v2861_v20 }
 0x74c   :  { %6480 = vset.pattern.permute.xlu1 %v11506_v48  ;;  %4971 = vperm.xlu0 %6500, %v8890_v5  }
 0x74d   :  { %v2863_v9 = vsub.f32 %v9010_v54, %v2862_v41  ;;  %v2864_v55 = vsub.f32 %v9007_v11, %v2862_v41  ;;  %v2865_v59 = vsub.f32 %v9027_v33, %v2862_v41  ;;  %v2866_v20 = vsub.f32 %v9033_v17, %v2862_v41  ;;  %v9081_v33 = vpop.permute.xlu1 %4222  ;;  %v9083_v13 = vpop.permute.xlu0 %4194  ;;  %4951 = vperm.xlu1 %6480, %v6844_v35  }
 0x74e   :  { %11505 = vst [vmem:[#allocation7_spill] sm:$0xff] %v9081_v33  ;;  %v11605_v33 = vld [vmem:[#allocation29_spill] sm:$0xff] }
 0x74f   :  { %v2867_v52 = vmul.f32 %v2863_v9, %v2863_v9  ;;  %v2868_v1 = vmul.f32 %v2864_v55, %v2864_v55  ;;  %v2869_v19 = vmul.f32 %v2865_v59, %v2865_v59  ;;  %v2870_v54 = vmul.f32 %v2866_v20, %v2866_v20 }
 0x750   :  { %4979 = vperm.xlu0 %6500, %v8934_v12  }
 0x751   :  { %v2871_v42 = vadd.f32 %v2868_v1, %v2867_v52  ;;  %v9087_v21 = vpop.permute.xlu1 %4230  ;;  %v11508_v52 = vmov 6   ;;  %v9091_v1 = vpop.permute.xlu0 %4202 }
 0x752   :  { %11507 = vst [vmem:[#allocation9_spill] sm:$0xff] %v9087_v21  ;;  %6481 = vset.pattern.permute.xlu1 %v11508_v52  ;;  %11509 = vst [vmem:[#allocation13_spill] sm:$0xff] %v9091_v1 }
 0x753   :  { %v2872_v11 = vadd.f32 %v2871_v42, %v2869_v19  ;;  %4752 = vperm.xlu1 %6481, %v8876_v22   ;;  %v11511_v19 = vmov 8  }
 0x754   :  { %4987 = vperm.xlu0 %6500, %v8941_v39  }
 0x755   :  { %v2873_v10 = vadd.f32 %v2872_v11, %v2870_v54  ;;  %v9095_v54 = vpop.permute.xlu1 %4238 }
 0x756   :  { %11510 = vst [vmem:[#allocation12_spill] sm:$0xff] %v9095_v54 }
 0x757   :  { %v2874_v41 = vrot.slane %v2873_v10, 4  ;;  %6482 = vset.pattern.permute.xlu1 %v11511_v19 }
 0x758   :  { %5150 = vperm.xlu1 %6482, %v6843_v8   ;;  %4991 = vperm.xlu0 %6500, %v8905_v32  }
 0x759   :  { %v2875_v17 = vadd.f32 %v2874_v41, %v2873_v10  ;;  %v9098_v10 = vpop.permute.xlu0 %4210  ;;  %v9101_v46 = vpop.permute.xlu1 %4246 }
 0x75a   :  { %11512 = vst [vmem:[#allocation14_spill] sm:$0xff] %v9098_v10  ;;  %11513 = vst [vmem:[#allocation15_spill] sm:$0xff] %v9101_v46  ;;  %v11526_v10 = vld [vmem:[#allocation23_spill] sm:$0xff] }
 0x75b   :  { %v2876_v42 = vrot.slane %v2875_v17, 2 }
 0x75c   :  { %5154 = vperm.xlu1 %6482, %v6844_v35   ;;  %4999 = vperm.xlu0 %6500, %v8912_v27  }
 0x75d   :  { %v2877_v60 = vadd.f32 %v2876_v42, %v2875_v17  ;;  %v9104_v17 = vpop.permute.xlu0 %4218  ;;  %v9109_v8 = vpop.permute.xlu1 %4254 }
 0x75e   :  { %11514 = vst [vmem:[#allocation124_spill] sm:$0xff] %v9104_v17  ;;  %11515 = vst [vmem:[#allocation125_spill] sm:$0xff] %v9109_v8  ;;  %v11520_v17 = vld [vmem:[#allocation17_spill] sm:$0xff] }
 0x75f   :  { %v2878_v11 = vrot.slane %v2877_v60, 1 }
 0x760   :  { %6483 = vset.pattern.permute.xlu1 %v11506_v48  ;;  %5007 = vperm.xlu0 %6500, %v8961_v53  }
 0x761   :  { %v2879_v41 = vadd.f32 %v2878_v11, %v2877_v60  ;;  %4959 = vperm.xlu1 %6483, %v8835_v15   ;;  %v9111_v42 = vpop.permute.xlu0 %4226  ;;  %v9119_v35 = vpop.permute.xlu1 %4262 }
 0x762   :  { %11516 = vst [vmem:[#allocation126_spill] sm:$0xff] %v9111_v42  ;;  %11517 = vst [vmem:[#allocation127_spill] sm:$0xff] %v9119_v35 }
 0x763   :  { %v2880_v4 = vmul.f32 0.03125, %v2879_v41 }
 0x764   :  { %6501 = vset.pattern.permute.xlu0 %v11511_v19 }
 0x765   :  { %v2881_v57 = vadd.f32 1e-05, %v2880_v4  ;;  %6484 = vset.pattern.permute.xlu1 %v11511_v19  ;;  %v9121_v8 = vpop.permute.xlu0 %4234  ;;  %v9134_v42 = vpop.permute.xlu1 %4341 }
 0x766   :  { %5158 = vperm.xlu1 %6484, %v8876_v22   ;;  %11518 = vst [vmem:[#allocation128_spill] sm:$0xff] %v9121_v8  ;;  %v11519_v22 = vld [vmem:[#allocation16_spill] sm:$0xff] }
 0x767   :  { %6762 = vrsqrt.f32 %v2881_v57  ;;  %v6845_v57 = vld [vmem:[%s11226_s7] sm:$0xff] }
 0x768   :  { %5126 = vperm.xlu0 %6501, %v6845_v57   ;;  %v11521_v57 = vld [vmem:[#allocation18_spill] sm:$0xff] }
 0x76a   :  { %6485 = vset.pattern.permute.xlu1 %v11508_v52 }
 0x76b   :  { %4768 = vperm.xlu1 %6485, %v8890_v5  }
 0x76c   :  { %5134 = vperm.xlu0 %6501, %v8980_v61  }
 0x76f   :  { %6486 = vset.pattern.permute.xlu1 %v11506_v48 }
 0x770   :  { %5146 = vperm.xlu0 %6501, %v9043_v30   ;;  %4967 = vperm.xlu1 %6486, %v8847_v3   ;;  %v2936_v30 = vld [vmem:[%s11223_s3 + $0x88] sm:$0xff] }
 0x771   :  { %v6763_v4 = vpop.eup %6762 }
 0x772   :  { %v2885_v60 = vmul.f32 %v6763_v4, %v2865_v59  ;;  %v2883_v53 = vmul.f32 %v6763_v4, %v2863_v9  ;;  %v2884_v11 = vmul.f32 %v6763_v4, %v2864_v55  ;;  %v2886_v41 = vmul.f32 %v6763_v4, %v2866_v20  ;;  %v11523_v59 = vld [vmem:[#allocation20_spill] sm:$0xff]  ;;  %v11524_v55 = vld [vmem:[#allocation21_spill] sm:$0xff]  ;;  %v11525_v4 = vld [vmem:[#allocation22_spill] sm:$0xff] }
 0x774   :  { %v2907_v46 = vmul.f32 %v11519_v22, %v2883_v53  ;;  %v2908_v54 = vmul.f32 %v11520_v17, %v2884_v11  ;;  %v2909_v56 = vmul.f32 %v11521_v57, %v2885_v60  ;;  %v2910_v35 = vmul.f32 %v11522_v6, %v2886_v41  ;;  %v9138_v17 = vpop.permute.xlu0 %4242  ;;  %5162 = vperm.xlu0 %6501, %v8835_v15   ;;  %v2937_v15 = vld [vmem:[%s11223_s3 + $0x90] sm:$0xff]  ;;  %v2943_v53 = vld [vmem:[%s11223_s3 + $0xc0] sm:$0xff]  ;;  %v2944_v11 = vld [vmem:[%s11223_s3 + $0xc8] sm:$0xff] }
 0x775   :  { %11527 = vst [vmem:[#allocation16_spill] sm:$0xff] %v9138_v17  ;;  %6487 = vset.pattern.permute.xlu1 %v11508_v52  ;;  %v2946_v57 = vld [vmem:[%s11223_s3 + $0xd8] sm:$0xff] }
 0x776   :  { %v2931_v9 = vadd.f32 %v11523_v59, %v2907_v46  ;;  %v2932_v20 = vadd.f32 %v11524_v55, %v2908_v54  ;;  %v2933_v8 = vadd.f32 %v11525_v4, %v2909_v56  ;;  %v2934_v21 = vadd.f32 %v11526_v10, %v2910_v35  ;;  %v9143_v56 = vpop.permute.xlu1 %4349  ;;  %4772 = vperm.xlu1 %6487, %v8855_v34   ;;  %v2947_v59 = vld [vmem:[%s11223_s3 + $0xe0] sm:$0xff]  ;;  %v2948_v55 = vld [vmem:[%s11223_s3 + $0xe8] sm:$0xff] }
 0x777   :  { %11528 = vst [vmem:[#allocation17_spill] sm:$0xff] %v9143_v56 }
 0x778   :  { %v6402_v61 = vpack.c.bf16 %v2932_v20, %v2931_v9  ;;  %v6406_v6 = vpack.c.bf16 %v2934_v21, %v2933_v8  ;;  %v9146_v46 = vpop.permute.xlu0 %4250  ;;  %5166 = vperm.xlu0 %6501, %v8883_v37   ;;  %v2938_v21 = vld [vmem:[%s11223_s3 + $0x98] sm:$0xff]  ;;  %v2939_v37 = vld [vmem:[%s11223_s3 + $0xa0] sm:$0xff]  ;;  %v2940_v8 = vld [vmem:[%s11223_s3 + $0xa8] sm:$0xff] }
 0x779   :  { %11529 = vst [vmem:[#allocation18_spill] sm:$0xff] %v9146_v46  ;;  %v2949_v20 = vld [vmem:[%s11223_s3 + $0xf0] sm:$0xff] }
 0x77a   :  { %6403 = vmatprep.subr.bf16.mxu1 %v6402_v61  ;;  %4776 = vperm.xlu1 %6487, %v8934_v12   ;;  %v9161_v54 = vpop.permute.xlu1 %4353 }
 0x77b   :  { %6405 = vmatpush3.bf16.msra.mxu1 %v6402_v61  ;;  %11530 = vst [vmem:[#allocation19_spill] sm:$0xff] %v9161_v54  ;;  %v2951_v61 = vld [vmem:[%s11223_s3 + $0x100] sm:$0xff] }
 0x77c   :  { %6407 = vmatprep.subr.bf16.mxu1 %v6406_v6  ;;  %5170 = vperm.xlu0 %6501, %v8847_v3   ;;  %v9167_v10 = vpop.permute.xlu0 %4258  ;;  %v2941_v3 = vld [vmem:[%s11223_s3 + $0xb0] sm:$0xff] }
 0x77d   :  { %11531 = vst [vmem:[#allocation20_spill] sm:$0xff] %v9167_v10 }
 0x77e   :  { %6488 = vset.pattern.permute.xlu1 %v11511_v19  ;;  %v9180_v35 = vpop.permute.xlu1 %4361 }
 0x77f   :  { %6409 = vmatpush3.bf16.msra.mxu1 %v6406_v6  ;;  %5174 = vperm.xlu1 %6488, %v8890_v5   ;;  %11532 = vst [vmem:[#allocation21_spill] sm:$0xff] %v9180_v35  ;;  %v2942_v5 = vld [vmem:[%s11223_s3 + $0xb8] sm:$0xff]  ;;  %v2953_v6 = vld [vmem:[%s11223_s3 + $0x110] sm:$0xff] }
 0x780   :  { %5178 = vperm.xlu0 %6501, %v8855_v34   ;;  %v9183_v60 = vpop.permute.xlu0 %4266 }
 0x781   :  { %11533 = vst [vmem:[#allocation22_spill] sm:$0xff] %v9183_v60 }
 0x782   :  { %6326 = vmatmul.mubr.msk.f32.vlgmr.msra.gmra.mrb[66].mxu1 %vm208_vm0, %v2936_v30  ;;  %v9200_v41 = vpop.permute.xlu1 %4369 }
 0x783   :  { %6328 = vmatprep.mubr.msk.f32.mxu1 %vm208_vm0, %v2937_v15  ;;  %6489 = vset.pattern.permute.xlu1 %v11506_v48  ;;  %11534 = vst [vmem:[#allocation23_spill] sm:$0xff] %v9200_v41  ;;  %v2954_v15 = vld [vmem:[%s11223_s3 + $0x118] sm:$0xff] }
 0x784   :  { %4975 = vperm.xlu1 %6489, %v8855_v34   ;;  %5190 = vperm.xlu0 %6501, %v8941_v39   ;;  %v2945_v34 = vld [vmem:[%s11223_s3 + $0xd0] sm:$0xff]  ;;  %v9206_v22 = vpop.permute.xlu0 %4345 }
 0x786   :  { %6329 = vmatmul.mubr.msk.f32.gmra.mrb[68].mxu1 %vm208_vm0, %v2938_v21  ;;  %v9219_v9 = vpop.permute.xlu1 %4377  ;;  %v2955_v21 = vld [vmem:[%s11223_s3 + $0x120] sm:$0xff] }
 0x787   :  { %6331 = vmatprep.mubr.msk.f32.mxu1 %vm208_vm0, %v2939_v37  ;;  %11535 = vst [vmem:[#allocation129_spill] sm:$0xff] %v9219_v9 }
 0x788   :  { %6490 = vset.pattern.permute.xlu1 %v11508_v52  ;;  %5206 = vperm.xlu0 %6501, %v8955_v36   ;;  %v9263_v37 = vpop.permute.xlu0 %4357 }
 0x789   :  { %4780 = vperm.xlu1 %6490, %v8898_v47   ;;  %11538 = vst [vmem:[#allocation132_spill] sm:$0xff] %v9263_v37 }
 0x78a   :  { %6332 = vmatmul.mubr.msk.f32.gmra.mrb[70].mxu1 %vm208_vm0, %v2940_v8  ;;  %v9236_v4 = vpop.permute.xlu1 %4385  ;;  %v2956_v8 = vld [vmem:[%s11223_s3 + $0x128] sm:$0xff] }
 0x78b   :  { %6334 = vmatprep.mubr.msk.f32.mxu1 %vm208_vm0, %v2941_v3  ;;  %11536 = vst [vmem:[#allocation130_spill] sm:$0xff] %v9236_v4 }
 0x78d   :  { %4784 = vperm.xlu1 %6490, %v8941_v39   ;;  %v2950_v39 = vld [vmem:[%s11223_s3 + $0xf8] sm:$0xff] }
 0x78e   :  { %6335 = vmatmul.mubr.msk.f32.gmra.mrb[72].mxu1 %vm208_vm0, %v2942_v5  ;;  %v9251_v30 = vpop.permute.xlu1 %4393  ;;  %v9275_v5 = vpop.permute.xlu0 %4365 }
 0x78f   :  { %6337 = vmatprep.mubr.msk.f32.mxu1 %vm208_vm0, %v2943_v53  ;;  %11537 = vst [vmem:[#allocation131_spill] sm:$0xff] %v9251_v30  ;;  %11540 = vst [vmem:[#allocation134_spill] sm:$0xff] %v9275_v5 }
 0x791   :  { %6491 = vset.pattern.permute.xlu1 %v11511_v19 }
 0x792   :  { %6338 = vmatmul.mubr.msk.f32.gmra.mrb[74].mxu1 %vm208_vm0, %v2944_v11  ;;  %5182 = vperm.xlu1 %6491, %v8934_v12   ;;  %v2952_v12 = vld [vmem:[%s11223_s3 + $0x108] sm:$0xff]  ;;  %v9270_v3 = vpop.permute.xlu1 %4401  ;;  %v9281_v11 = vpop.permute.xlu0 %4373  ;;  %s6868_s3 = smov 7  }
 0x793   :  { %6340 = vmatprep.mubr.msk.f32.mxu1 %vm208_vm0, %v2945_v34  ;;  %11539 = vst [vmem:[#allocation133_spill] sm:$0xff] %v9270_v3  ;;  %11542 = vst [vmem:[#allocation136_spill] sm:$0xff] %v9281_v11 }
 0x796   :  { %6341 = vmatmul.mubr.msk.f32.gmra.mrb[76].mxu1 %vm208_vm0, %v2946_v57  ;;  %6492 = vset.pattern.permute.xlu1 %v11506_v48  ;;  %v9278_v53 = vpop.permute.xlu1 %4409  ;;  %v9287_v57 = vpop.permute.xlu0 %4381 }
 0x797   :  { %6343 = vmatprep.mubr.msk.f32.mxu1 %vm208_vm0, %v2947_v59  ;;  %4983 = vperm.xlu1 %6492, %v8898_v47   ;;  %11541 = vst [vmem:[#allocation135_spill] sm:$0xff] %v9278_v53  ;;  %11544 = vst [vmem:[#allocation138_spill] sm:$0xff] %v9287_v57 }
 0x79a   :  { %6344 = vmatmul.mubr.msk.f32.gmra.mrb[78].mxu1 %vm208_vm0, %v2948_v55  ;;  %v9285_v34 = vpop.permute.xlu1 %4417  ;;  %v9294_v59 = vpop.permute.xlu0 %4389 }
 0x79b   :  { %6346 = vmatprep.mubr.msk.f32.mxu1 %vm208_vm0, %v2949_v20  ;;  %6493 = vset.pattern.permute.xlu1 %v11508_v52  ;;  %11543 = vst [vmem:[#allocation137_spill] sm:$0xff] %v9285_v34  ;;  %11546 = vst [vmem:[#allocation140_spill] sm:$0xff] %v9294_v59 }
 0x79c   :  { %4792 = vperm.xlu1 %6493, %v8948_v29  }
 0x79e   :  { %6347 = vmatmul.mubr.msk.f32.gmra.mrb[80].mxu1 %vm208_vm0, %v2950_v39 }
 0x79f   :  { %6349 = vmatprep.mubr.msk.f32.mxu1 %vm208_vm0, %v2951_v61 }
 0x7a0   :  { %6494 = vset.pattern.permute.xlu1 %v11511_v19 }
 0x7a1   :  { %5186 = vperm.xlu1 %6494, %v8898_v47   ;;  %v9291_v47 = vpop.permute.xlu1 %4425 }
 0x7a2   :  { %6350 = vmatmul.mubr.msk.f32.gmra.mrb[82].mxu1 %vm208_vm0, %v2952_v12  ;;  %11545 = vst [vmem:[#allocation139_spill] sm:$0xff] %v9291_v47 }
 0x7a3   :  { %6352 = vmatprep.mubr.msk.f32.mxu1 %vm208_vm0, %v2953_v6 }
 0x7a5   :  { %6495 = vset.pattern.permute.xlu1 %v11506_v48  ;;  %v9296_v55 = vpop.permute.xlu1 %4521 }
 0x7a6   :  { %6353 = vmatmul.mubr.msk.f32.gmra.mrb[84].mxu1 %vm208_vm0, %v2954_v15  ;;  %4995 = vperm.xlu1 %6495, %v8948_v29  }
 0x7a7   :  { %6355 = vmatprep.mubr.msk.f32.mxu1 %vm208_vm0, %v2955_v21 }
 0x7a9   :  { %v9302_v20 = vpop.permute.xlu1 %4525 }
 0x7aa   :  { %6356 = vmatmul.mubr.msk.f32.gmra.mrb[86].mxu1 %vm208_vm0, %v2956_v8  ;;  %6496 = vset.pattern.permute.xlu1 %v11508_v52  ;;  %v9300_v52 = vpop.permute.xlu0 %4397  ;;  %11548 = vst [vmem:[#allocation142_spill] sm:$0xff] %v9302_v20 }
 0x7ab   :  { %4796 = vperm.xlu1 %6496, %v8912_v27   ;;  %11547 = vst [vmem:[#allocation141_spill] sm:$0xff] %v9300_v52 }
 0x7ad   :  { %v9308_v39 = vpop.permute.xlu1 %4533 }
 0x7ae   :  { %11550 = vst [vmem:[#allocation144_spill] sm:$0xff] %v9308_v39 }
 0x7af   :  { %6497 = vset.pattern.permute.xlu1 %v11511_v19 }
 0x7b0   :  { %5194 = vperm.xlu1 %6497, %v8905_v32   ;;  %v9306_v32 = vpop.permute.xlu0 %4405 }
 0x7b1   :  { %11549 = vst [vmem:[#allocation143_spill] sm:$0xff] %v9306_v32  ;;  %v9313_v12 = vpop.permute.xlu1 %4541 }
 0x7b2   :  { %11553 = vst [vmem:[#allocation146_spill] sm:$0xff] %v9313_v12 }
 0x7b4   :  { %5198 = vperm.xlu1 %6497, %v8948_v29   ;;  %v11551_v29 = vmov 0   ;;  %v9311_v61 = vpop.permute.xlu0 %4413 }
 0x7b5   :  { %11552 = vst [vmem:[#allocation145_spill] sm:$0xff] %v9311_v61 }
 0x7b8   :  { %6498 = vset.pattern.permute.xlu1 %v11506_v48  ;;  %v9315_v48 = vpop.permute.xlu0 %4421 }
 0x7b9   :  { %5003 = vperm.xlu1 %6498, %v8955_v36   ;;  %11554 = vst [vmem:[#allocation147_spill] sm:$0xff] %v9315_v48  ;;  %v9317_v36 = vpop.permute.xlu1 %4549 }
 0x7ba   :  { %11555 = vst [vmem:[#allocation148_spill] sm:$0xff] %v9317_v36 }
 0x7bc   :  { %v9319_v6 = vpop.permute.xlu0 %4517 }
 0x7bd   :  { %6499 = vset.pattern.permute.xlu1 %v11511_v19  ;;  %v9321_v15 = vpop.permute.xlu1 %4557 }
 0x7be   :  { %5202 = vperm.xlu1 %6499, %v8912_v27   ;;  %11556 = vst [vmem:[#allocation149_spill] sm:$0xff] %v9321_v15 }
 0x7c0   :  { %v9323_v19 = vpop.permute.xlu0 %4529 }
 0x7c1   :  { %11557 = vst [vmem:[#allocation150_spill] sm:$0xff] %v9323_v19  ;;  %v9325_v27 = vpop.permute.xlu1 %4565 }
 0x7c2   :  { %6503 = vset.pattern.permute.xlu1 %v11551_v29  ;;  %11558 = vst [vmem:[#allocation151_spill] sm:$0xff] %v9325_v27 }
 0x7c4   :  { %v9327_v21 = vpop.permute.xlu0 %4537 }
 0x7c5   :  { %11559 = vst [vmem:[#allocation152_spill] sm:$0xff] %v9327_v21  ;;  %v9329_v8 = vpop.permute.xlu1 %4573 }
 0x7c6   :  { %11560 = vst [vmem:[#allocation153_spill] sm:$0xff] %v9329_v8 }
 0x7c8   :  { %v9331_v47 = vpop.permute.xlu0 %4545 }
 0x7c9   :  { %11561 = vst [vmem:[#allocation154_spill] sm:$0xff] %v9331_v47  ;;  %v9333_v34 = vpop.permute.xlu1 %4581 }
 0x7ca   :  { %11562 = vst [vmem:[#allocation155_spill] sm:$0xff] %v9333_v34 }
 0x7cc   :  { %v9335_v60 = vpop.permute.xlu0 %4553 }
 0x7cd   :  { %11563 = vst [vmem:[#allocation156_spill] sm:$0xff] %v9335_v60  ;;  %v9337_v48 = vpop.permute.xlu1 %4589 }
 0x7ce   :  { %11564 = vst [vmem:[#allocation157_spill] sm:$0xff] %v9337_v48 }
 0x7d0   :  { %v9339_v10 = vpop.permute.xlu0 %4561 }
 0x7d1   :  { %11565 = vst [vmem:[#allocation158_spill] sm:$0xff] %v9339_v10  ;;  %v9341_v61 = vpop.permute.xlu1 %4597 }
 0x7d2   :  { %11566 = vst [vmem:[#allocation159_spill] sm:$0xff] %v9341_v61 }
 0x7d4   :  { %v9345_v46 = vpop.permute.xlu0 %4569 }
 0x7d5   :  { %v9343_v53 = vpop.permute.xlu1 %4720  ;;  %11567 = vst [vmem:[#allocation160_spill] sm:$0xff] %v9345_v46 }
 0x7d8   :  { %v9349_v3 = vpop.permute.xlu0 %4577 }
 0x7d9   :  { %v9347_v32 = vpop.permute.xlu1 %4923  ;;  %11568 = vst [vmem:[#allocation161_spill] sm:$0xff] %v9349_v3 }
 0x7dc   :  { %v9353_v8 = vpop.permute.xlu0 %4585 }
 0x7dd   :  { %v9351_v17 = vpop.permute.xlu1 %4927  ;;  %11569 = vst [vmem:[#allocation162_spill] sm:$0xff] %v9353_v8 }
 0x7e0   :  { %v9357_v60 = vpop.permute.xlu0 %4593 }
 0x7e1   :  { %v9355_v34 = vpop.permute.xlu1 %4732  ;;  %11571 = vst [vmem:[#allocation164_spill] sm:$0xff] %v9357_v60 }
 0x7e2   :  { %11570 = vst [vmem:[#allocation163_spill] sm:$0xff] %v9355_v34 }
 0x7e4   :  { %v9361_v52 = vpop.permute.xlu0 %4601 }
 0x7e5   :  { %v9359_v48 = vpop.permute.xlu1 %5130  ;;  %11572 = vst [vmem:[#allocation165_spill] sm:$0xff] %v9361_v52 }
 0x7e8   :  { %v9365_v12 = vpop.permute.xlu0 %4724 }
 0x7e9   :  { %v9363_v61 = vpop.permute.xlu1 %4931 }
 0x7ea   :  { %11573 = vst [vmem:[#allocation166_spill] sm:$0xff] %v9363_v61 }
 0x7ec   :  { %v9369_v47 = vpop.permute.xlu0 %4728 }
 0x7ed   :  { %v9367_v46 = vpop.permute.xlu1 %4736  ;;  %11575 = vst [vmem:[#allocation168_spill] sm:$0xff] %v9369_v47 }
 0x7ee   :  { %11574 = vst [vmem:[#allocation167_spill] sm:$0xff] %v9367_v46 }
 0x7f0   :  { %v9373_v27 = vpop.permute.xlu0 %4744 }
 0x7f1   :  { %v9371_v3 = vpop.permute.xlu1 %4740  ;;  %11577 = vst [vmem:[#allocation170_spill] sm:$0xff] %v9373_v27 }
 0x7f2   :  { %11576 = vst [vmem:[#allocation169_spill] sm:$0xff] %v9371_v3 }
 0x7f4   :  { %v9377_v10 = vpop.permute.xlu0 %4756 }
 0x7f5   :  { %v9375_v8 = vpop.permute.xlu1 %5138  ;;  %11579 = vst [vmem:[#allocation172_spill] sm:$0xff] %v9377_v10 }
 0x7f6   :  { %11578 = vst [vmem:[#allocation171_spill] sm:$0xff] %v9375_v8 }
 0x7f8   :  { %v9381_v59 = vpop.permute.xlu0 %4760 }
 0x7f9   :  { %v9379_v60 = vpop.permute.xlu1 %4939  ;;  %11581 = vst [vmem:[#allocation174_spill] sm:$0xff] %v9381_v59 }
 0x7fa   :  { %11580 = vst [vmem:[#allocation173_spill] sm:$0xff] %v9379_v60 }
 0x7fc   :  { %v9385_v30 = vpop.permute.xlu0 %4764 }
 0x7fd   :  { %v9383_v52 = vpop.permute.xlu1 %4748  ;;  %11583 = vst [vmem:[#allocation176_spill] sm:$0xff] %v9385_v30  ;;  %v11593_v30 = vld [vmem:[#allocation27_spill] sm:$0xff] }
 0x7fe   :  { %11582 = vst [vmem:[#allocation175_spill] sm:$0xff] %v9383_v52 }
 0x800   :  { %v9389_v46 = vpop.permute.xlu0 %4788 }
 0x801   :  { %v9387_v4 = vpop.permute.xlu1 %5142  ;;  %11585 = vst [vmem:[#allocation178_spill] sm:$0xff] %v9389_v46 }
 0x802   :  { %11584 = vst [vmem:[#allocation177_spill] sm:$0xff] %v9387_v4 }
 0x804   :  { %v9393_v3 = vpop.permute.xlu0 %4800 }
 0x805   :  { %v9391_v39 = vpop.permute.xlu1 %4951  ;;  %11587 = vst [vmem:[#allocation180_spill] sm:$0xff] %v9393_v3 }
 0x806   :  { %11586 = vst [vmem:[#allocation179_spill] sm:$0xff] %v9391_v39  ;;  %v11598_v39 = vld [vmem:[#allocation25_spill] sm:$0xff] }
 0x808   :  { %v9397_v57 = vpop.permute.xlu0 %4804 }
 0x809   :  { %v9395_v27 = vpop.permute.xlu1 %4752  ;;  %11589 = vst [vmem:[#allocation182_spill] sm:$0xff] %v9397_v57 }
 0x80a   :  { %11588 = vst [vmem:[#allocation181_spill] sm:$0xff] %v9395_v27 }
 0x80c   :  { %v9401_v60 = vpop.permute.xlu0 %4935 }
 0x80d   :  { %v9399_v10 = vpop.permute.xlu1 %5150  ;;  %11591 = vst [vmem:[#allocation184_spill] sm:$0xff] %v9401_v60 }
 0x80e   :  { %11590 = vst [vmem:[#allocation183_spill] sm:$0xff] %v9399_v10 }
 0x810   :  { %v9414_v57 = vpop.permute.xlu0 %4943 }
 0x811   :  { %v9403_v59 = vpop.permute.xlu1 %5154  ;;  %11595 = vst [vmem:[#allocation186_spill] sm:$0xff] %v9414_v57 }
 0x812   :  { %11592 = vst [vmem:[#allocation185_spill] sm:$0xff] %v9403_v59 }
 0x814   :  { %v9426_v10 = vpop.permute.xlu0 %4947 }
 0x815   :  { %v9408_v46 = vpop.permute.xlu1 %4959  ;;  %11597 = vst [vmem:[#allocation188_spill] sm:$0xff] %v9426_v10 }
 0x816   :  { %11594 = vst [vmem:[#allocation27_spill] sm:$0xff] %v9408_v46 }
 0x855   :  { %v6327_v52 = vpop.f32.mrb[66].mxu1 }
 0x856   :  { %v9406_v9 = vadd.f32 %v6327_v52, %v11593_v30  ;;  %v3221_v4 = vpop.f32.mrb[67].mxu1  ;;  %v9422_v52 = vpop.permute.xlu1 %5158 }
 0x857   :  { %11596 = vst [vmem:[#allocation187_spill] sm:$0xff] %v9422_v52  ;;  %v9435_v57 = vadd.f32 %v3221_v4, %v11598_v39  ;;  %v9445_v52 = vpop.permute.xlu0 %4955 }
 0x858   :  { %3936 = vrot.lane.b32.xlu0 %v9406_v9, %s6868_s3  ;;  %3486 = vrot.lane.b32.xlu1 %v9406_v9, %s6869_s15  ;;  %11600 = vst [vmem:[#allocation189_spill] sm:$0xff] %v9445_v52 }
 0x859   :  { %v6330_v3 = vpop.f32.mrb[68].mxu1 }
 0x85a   :  { %v3231_v27 = vpop.f32.mrb[69].mxu1  ;;  %v9439_v15 = vpop.permute.xlu1 %4768  ;;  %v9482_v37 = vadd.f32 %v6330_v3, %v11605_v33 }
 0x85b   :  { %11599 = vst [vmem:[#allocation25_spill] sm:$0xff] %v9439_v15  ;;  %v9461_v41 = vpop.permute.xlu0 %4963  ;;  %v9517_v49 = vadd.f32 %v3231_v27, %v11612_v26 }
 0x85c   :  { %4677 = vrot.lane.b32.xlu0 %v9406_v9, %s6870_s16  ;;  %3733 = vrot.lane.b32.xlu1 %v9406_v9, %s6858_s19  ;;  %11602 = vst [vmem:[#allocation191_spill] sm:$0xff] %v9461_v41  ;;  %11606 = vst [vmem:[#allocation29_spill] sm:$0xff] %v9482_v37 }
 0x85d   :  { %v9420_v30 = vpop.f32.mrb[70].mxu1  ;;  %11613 = vst [vmem:[#allocation28_spill] sm:$0xff] %v9517_v49 }
 0x85e   :  { %v9424_v46 = vpop.f32.mrb[71].mxu1  ;;  %v9457_v39 = vpop.permute.xlu1 %4967 }
 0x85f   :  { %11601 = vst [vmem:[#allocation190_spill] sm:$0xff] %v9457_v39  ;;  %v9477_v39 = vpop.permute.xlu0 %4971 }
 0x860   :  { %4880 = vrot.lane.b32.xlu0 %v9406_v9, %s6859_s20  ;;  %4139 = vrot.lane.b32.xlu1 %v9406_v9, %s6860_s21  ;;  %11604 = vst [vmem:[#allocation193_spill] sm:$0xff] %v9477_v39 }
 0x861   :  { %v9432_v59 = vpop.f32.mrb[72].mxu1 }
 0x862   :  { %v9437_v2 = vpop.f32.mrb[73].mxu1  ;;  %v9471_v43 = vpop.permute.xlu1 %4772 }
 0x863   :  { %11603 = vst [vmem:[#allocation192_spill] sm:$0xff] %v9471_v43  ;;  %v9496_v39 = vpop.permute.xlu0 %4979 }
 0x864   :  { %3484 = vrot.lane.b32.xlu0 %v9435_v57, %s6869_s15  ;;  %4474 = vrot.lane.b32.xlu1 %v9406_v9, %s6861_s22  ;;  %11608 = vst [vmem:[#allocation195_spill] sm:$0xff] %v9496_v39 }
 0x865   :  { %v9447_v10 = vpop.f32.mrb[74].mxu1 }
 0x866   :  { %v9449_v5 = vpop.f32.mrb[75].mxu1  ;;  %v9492_v35 = vpop.permute.xlu1 %4776 }
 0x867   :  { %11607 = vst [vmem:[#allocation194_spill] sm:$0xff] %v9492_v35  ;;  %v9512_v35 = vpop.permute.xlu0 %4987 }
 0x868   :  { %3731 = vrot.lane.b32.xlu0 %v9435_v57, %s6858_s19  ;;  %5083 = vrot.lane.b32.xlu1 %v9406_v9, %s6871_s17  ;;  %11610 = vst [vmem:[#allocation197_spill] sm:$0xff] %v9512_v35  ;;  %v11620_v35 = vld [vmem:[#allocation33_spill] sm:$0xff] }
 0x869   :  { %v9455_v4 = vpop.f32.mrb[76].mxu1 }
 0x86a   :  { %v9459_v15 = vpop.f32.mrb[77].mxu1  ;;  %v9506_v1 = vpop.permute.xlu1 %5174 }
 0x86b   :  { %11609 = vst [vmem:[#allocation196_spill] sm:$0xff] %v9506_v1  ;;  %v9527_v29 = vpop.permute.xlu0 %4991 }
 0x86c   :  { %4137 = vrot.lane.b32.xlu0 %v9435_v57, %s6860_s21  ;;  %3934 = vrot.lane.b32.xlu1 %v9435_v57, %s6868_s3  ;;  %11616 = vst [vmem:[#allocation201_spill] sm:$0xff] %v9527_v29 }
 0x86d   :  { %v9467_v52 = vpop.f32.mrb[78].mxu1 }
 0x86e   :  { %v9469_v21 = vpop.f32.mrb[79].mxu1  ;;  %v9525_v1 = vpop.permute.xlu1 %4975 }
 0x86f   :  { %11615 = vst [vmem:[#allocation200_spill] sm:$0xff] %v9525_v1  ;;  %v9539_v27 = vpop.permute.xlu0 %4999  ;;  %v9549_v1 = vadd.f32 %v9420_v30, %v11620_v35  ;;  %v11625_v30 = vld [vmem:[#allocation31_spill] sm:$0xff] }
 0x870   :  { %4472 = vrot.lane.b32.xlu0 %v9435_v57, %s6861_s22  ;;  %4675 = vrot.lane.b32.xlu1 %v9435_v57, %s6870_s16  ;;  %11618 = vst [vmem:[#allocation203_spill] sm:$0xff] %v9539_v27 }
 0x871   :  { %v9479_v41 = vpop.f32.mrb[80].mxu1  ;;  %11621 = vst [vmem:[#allocation33_spill] sm:$0xff] %v9549_v1 }
 0x872   :  { %v9484_v45 = vpop.f32.mrb[81].mxu1  ;;  %v9533_v26 = vpop.permute.xlu1 %4780 }
 0x873   :  { %11617 = vst [vmem:[#allocation202_spill] sm:$0xff] %v9533_v26  ;;  %v9551_v26 = vpop.permute.xlu0 %5007 }
 0x874   :  { %3940 = vrot.lane.b32.xlu0 %v9482_v37, %s6868_s3  ;;  %4878 = vrot.lane.b32.xlu1 %v9435_v57, %s6859_s20  ;;  %11622 = vst [vmem:[#allocation205_spill] sm:$0xff] %v9551_v26  ;;  %v9573_v26 = vadd.f32 %v9424_v46, %v11625_v30 }
 0x875   :  { %v9490_v43 = vpop.f32.mrb[82].mxu1 }
 0x876   :  { %v9494_v18 = vpop.f32.mrb[83].mxu1  ;;  %v9545_v29 = vpop.permute.xlu1 %4784  ;;  %11626 = vst [vmem:[#allocation31_spill] sm:$0xff] %v9573_v26 }
 0x877   :  { %11619 = vst [vmem:[#allocation204_spill] sm:$0xff] %v9545_v29  ;;  %v9563_v29 = vpop.permute.xlu0 %5126 }
 0x878   :  { %4681 = vrot.lane.b32.xlu0 %v9482_v37, %s6870_s16  ;;  %5081 = vrot.lane.b32.xlu1 %v9435_v57, %s6871_s17 }
 0x879   :  { %v9502_v33 = vpop.f32.mrb[84].mxu1 }
 0x87a   :  { %v9504_v3 = vpop.f32.mrb[85].mxu1  ;;  %v9557_v27 = vpop.permute.xlu1 %5182 }
 0x87b   :  { %11623 = vst [vmem:[#allocation206_spill] sm:$0xff] %v9557_v27  ;;  %v9575_v27 = vpop.permute.xlu0 %5134 }
 0x87c   :  { %5087 = vrot.lane.b32.xlu0 %v9482_v37, %s6871_s17  ;;  %3490 = vrot.lane.b32.xlu1 %v9482_v37, %s6869_s15  ;;  %11627 = vst [vmem:[#allocation208_spill] sm:$0xff] %v9575_v27 }
 0x87d   :  { %v9514_v39 = vpop.f32.mrb[86].mxu1 }
 0x87e   :  { %11611 = vst [vmem:[#allocation198_spill] sm:$0xff] %v9514_v39  ;;  %v9519_v61 = vpop.f32.mrb[87].mxu1  ;;  %v9565_v35 = vpop.permute.xlu1 %4983 }
 0x87f   :  { %11614 = vst [vmem:[#allocation199_spill] sm:$0xff] %v9519_v61  ;;  %11624 = vst [vmem:[#allocation207_spill] sm:$0xff] %v9565_v35  ;;  %v9587_v35 = vpop.permute.xlu0 %5146 }
 0x880   :  { %3488 = vrot.lane.b32.xlu0 %v9517_v49, %s6869_s15  ;;  %3737 = vrot.lane.b32.xlu1 %v9482_v37, %s6858_s19  ;;  %11629 = vst [vmem:[#allocation210_spill] sm:$0xff] %v9587_v35  ;;  %v11634_v35 = vld [vmem:[#allocation48_spill] sm:$0xff] }
 0x881   :  { %v9611_v27 = vadd.f32 %v9432_v59, %v11634_v35  ;;  %v11639_v59 = vld [vmem:[#allocation46_spill] sm:$0xff] }
 0x882   :  { %v9581_v47 = vpop.permute.xlu1 %4792  ;;  %v9629_v35 = vadd.f32 %v9437_v2, %v11639_v59 }
 0x883   :  { %11628 = vst [vmem:[#allocation209_spill] sm:$0xff] %v9581_v47  ;;  %v9595_v30 = vpop.permute.xlu0 %5162  ;;  %11635 = vst [vmem:[#allocation48_spill] sm:$0xff] %v9611_v27 }
 0x884   :  { %3735 = vrot.lane.b32.xlu0 %v9517_v49, %s6858_s19  ;;  %4143 = vrot.lane.b32.xlu1 %v9482_v37, %s6860_s21  ;;  %11631 = vst [vmem:[#allocation212_spill] sm:$0xff] %v9595_v30  ;;  %11640 = vst [vmem:[#allocation46_spill] sm:$0xff] %v9629_v35 }
 0x886   :  { %v9589_v46 = vpop.permute.xlu1 %5186 }
 0x887   :  { %11630 = vst [vmem:[#allocation211_spill] sm:$0xff] %v9589_v46  ;;  %v9607_v46 = vpop.permute.xlu0 %5166 }
 0x888   :  { %4141 = vrot.lane.b32.xlu0 %v9517_v49, %s6860_s21  ;;  %4478 = vrot.lane.b32.xlu1 %v9482_v37, %s6861_s22  ;;  %11633 = vst [vmem:[#allocation214_spill] sm:$0xff] %v9607_v46 }
 0x88a   :  { %v9601_v47 = vpop.permute.xlu1 %4995 }
 0x88b   :  { %11632 = vst [vmem:[#allocation213_spill] sm:$0xff] %v9601_v47  ;;  %v9619_v47 = vpop.permute.xlu0 %5170 }
 0x88c   :  { %4476 = vrot.lane.b32.xlu0 %v9517_v49, %s6861_s22  ;;  %4884 = vrot.lane.b32.xlu1 %v9482_v37, %s6859_s20  ;;  %11637 = vst [vmem:[#allocation216_spill] sm:$0xff] %v9619_v47 }
 0x88e   :  { %v9613_v30 = vpop.permute.xlu1 %4796 }
 0x88f   :  { %11636 = vst [vmem:[#allocation215_spill] sm:$0xff] %v9613_v30  ;;  %v9635_v30 = vpop.permute.xlu0 %5178 }
 0x890   :  { %3944 = vrot.lane.b32.xlu0 %v9549_v1, %s6868_s3  ;;  %3938 = vrot.lane.b32.xlu1 %v9517_v49, %s6868_s3  ;;  %11641 = vst [vmem:[#allocation218_spill] sm:$0xff] %v9635_v30  ;;  %v11647_v30 = vld [vmem:[#allocation52_spill] sm:$0xff] }
 0x892   :  { %v9625_v46 = vpop.permute.xlu1 %5194 }
 0x893   :  { %11638 = vst [vmem:[#allocation217_spill] sm:$0xff] %v9625_v46  ;;  %v9643_v46 = vpop.permute.xlu0 %5190 }
 0x894   :  { %4685 = vrot.lane.b32.xlu0 %v9549_v1, %s6870_s16  ;;  %4679 = vrot.lane.b32.xlu1 %v9517_v49, %s6870_s16  ;;  %11643 = vst [vmem:[#allocation220_spill] sm:$0xff] %v9643_v46  ;;  %v9661_v46 = vadd.f32 %v9447_v10, %v11647_v30 }
 0x896   :  { %v9637_v47 = vpop.permute.xlu1 %5198  ;;  %11648 = vst [vmem:[#allocation52_spill] sm:$0xff] %v9661_v46 }
 0x897   :  { %11642 = vst [vmem:[#allocation219_spill] sm:$0xff] %v9637_v47  ;;  %v9655_v59 = vpop.permute.xlu0 %5206 }
 0x898   :  { %5091 = vrot.lane.b32.xlu0 %v9549_v1, %s6871_s17  ;;  %4882 = vrot.lane.b32.xlu1 %v9517_v49, %s6859_s20  ;;  %11645 = vst [vmem:[#allocation222_spill] sm:$0xff] %v9655_v59  ;;  %v11649_v59 = vld [vmem:[#allocation50_spill] sm:$0xff] }
 0x899   :  { %v9677_v10 = vadd.f32 %v9449_v5, %v11649_v59 }
 0x89a   :  { %v9645_v2 = vpop.permute.xlu1 %5003 }
 0x89b   :  { %11644 = vst [vmem:[#allocation221_spill] sm:$0xff] %v9645_v2  ;;  %11650 = vst [vmem:[#allocation50_spill] sm:$0xff] %v9677_v10 }
 0x89c   :  { %3492 = vrot.lane.b32.xlu0 %v9573_v26, %s6869_s15  ;;  %5085 = vrot.lane.b32.xlu1 %v9517_v49, %s6871_s17 }
 0x89e   :  { %v9657_v47 = vpop.permute.xlu1 %5202 }
 0x89f   :  { %11646 = vst [vmem:[#allocation223_spill] sm:$0xff] %v9657_v47 }
 0x8a0   :  { %3739 = vrot.lane.b32.xlu0 %v9573_v26, %s6858_s19  ;;  %3494 = vrot.lane.b32.xlu1 %v9549_v1, %s6869_s15 }
 0x8a4   :  { %4145 = vrot.lane.b32.xlu0 %v9573_v26, %s6860_s21  ;;  %3741 = vrot.lane.b32.xlu1 %v9549_v1, %s6858_s19 }
 0x8a8   :  { %4480 = vrot.lane.b32.xlu0 %v9573_v26, %s6861_s22  ;;  %4147 = vrot.lane.b32.xlu1 %v9549_v1, %s6860_s21 }
 0x8ac   :  { %4886 = vrot.lane.b32.xlu0 %v9573_v26, %s6859_s20  ;;  %4482 = vrot.lane.b32.xlu1 %v9549_v1, %s6861_s22 }
 0x8b0   :  { %3948 = vrot.lane.b32.xlu0 %v9611_v27, %s6868_s3  ;;  %4888 = vrot.lane.b32.xlu1 %v9549_v1, %s6859_s20 }
 0x8b4   :  { %4689 = vrot.lane.b32.xlu0 %v9611_v27, %s6870_s16  ;;  %3942 = vrot.lane.b32.xlu1 %v9573_v26, %s6868_s3 }
 0x8b8   :  { %3496 = vrot.lane.b32.xlu0 %v9629_v35, %s6869_s15  ;;  %4683 = vrot.lane.b32.xlu1 %v9573_v26, %s6870_s16 }
 0x8bc   :  { %3743 = vrot.lane.b32.xlu0 %v9629_v35, %s6858_s19  ;;  %5089 = vrot.lane.b32.xlu1 %v9573_v26, %s6871_s17 }
 0x8c0   :  { %4149 = vrot.lane.b32.xlu0 %v9629_v35, %s6860_s21  ;;  %3498 = vrot.lane.b32.xlu1 %v9611_v27, %s6869_s15 }
 0x8c4   :  { %4484 = vrot.lane.b32.xlu0 %v9629_v35, %s6861_s22  ;;  %3745 = vrot.lane.b32.xlu1 %v9611_v27, %s6858_s19 }
 0x8c8   :  { %3952 = vrot.lane.b32.xlu0 %v9661_v46, %s6868_s3  ;;  %4151 = vrot.lane.b32.xlu1 %v9611_v27, %s6860_s21 }
 0x8ca   :  { %v9667_v2 = vpop.permute.xlu0 %3936  ;;  %v9669_v26 = vpop.permute.xlu1 %3486 }
 0x8cc   :  { %4693 = vrot.lane.b32.xlu0 %v9661_v46, %s6870_s16  ;;  %4486 = vrot.lane.b32.xlu1 %v9611_v27, %s6861_s22 }
 0x8ce   :  { %v9679_v30 = vpop.permute.xlu0 %4677  ;;  %v9681_v47 = vpop.permute.xlu1 %3733 }
 0x8d0   :  { %3500 = vrot.lane.b32.xlu0 %v9677_v10, %s6869_s15  ;;  %4892 = vrot.lane.b32.xlu1 %v9611_v27, %s6859_s20 }
 0x8d2   :  { %v9687_v1 = vpop.permute.xlu0 %4880  ;;  %v9689_v56 = vpop.permute.xlu1 %4139 }
 0x8d4   :  { %3747 = vrot.lane.b32.xlu0 %v9677_v10, %s6858_s19  ;;  %5095 = vrot.lane.b32.xlu1 %v9611_v27, %s6871_s17  ;;  %v11651_v27 = vld [vmem:[#allocation43_spill] sm:$0xff] }
 0x8d5   :  { %v9713_v38 = vadd.f32 %v9455_v4, %v11651_v27  ;;  %v11653_v4 = vld [vmem:[#allocation54_spill] sm:$0xff] }
 0x8d6   :  { %v9695_v5 = vpop.permute.xlu0 %3484  ;;  %v9697_v59 = vpop.permute.xlu1 %4474  ;;  %v9733_v27 = vadd.f32 %v9459_v15, %v11653_v4 }
 0x8d7   :  { %11652 = vst [vmem:[#allocation43_spill] sm:$0xff] %v9713_v38 }
 0x8d8   :  { %4153 = vrot.lane.b32.xlu0 %v9677_v10, %s6860_s21  ;;  %3946 = vrot.lane.b32.xlu1 %v9629_v35, %s6868_s3  ;;  %11654 = vst [vmem:[#allocation54_spill] sm:$0xff] %v9733_v27 }
 0x8da   :  { %v9703_v49 = vpop.permute.xlu0 %3731  ;;  %v9705_v20 = vpop.permute.xlu1 %5083 }
 0x8dc   :  { %4488 = vrot.lane.b32.xlu0 %v9677_v10, %s6861_s22  ;;  %4687 = vrot.lane.b32.xlu1 %v9629_v35, %s6870_s16 }
 0x8de   :  { %v9715_v11 = vpop.permute.xlu0 %4137  ;;  %v9717_v36 = vpop.permute.xlu1 %3934 }
 0x8e0   :  { %3956 = vrot.lane.b32.xlu0 %v9713_v38, %s6868_s3  ;;  %4890 = vrot.lane.b32.xlu1 %v9629_v35, %s6859_s20 }
 0x8e2   :  { %v9723_v8 = vpop.permute.xlu0 %4472  ;;  %v9725_v58 = vpop.permute.xlu1 %4675 }
 0x8e4   :  { %4697 = vrot.lane.b32.xlu0 %v9713_v38, %s6870_s16  ;;  %5093 = vrot.lane.b32.xlu1 %v9629_v35, %s6871_s17 }
 0x8e6   :  { %v9735_v50 = vpop.permute.xlu0 %3940  ;;  %v9737_v44 = vpop.permute.xlu1 %4878 }
 0x8e8   :  { %3504 = vrot.lane.b32.xlu0 %v9733_v27, %s6869_s15  ;;  %3502 = vrot.lane.b32.xlu1 %v9661_v46, %s6869_s15 }
 0x8ea   :  { %v9743_v62 = vpop.permute.xlu0 %4681  ;;  %v9745_v61 = vpop.permute.xlu1 %5081 }
 0x8eb   :  { %11655 = vst [vmem:[#allocation224_spill] sm:$0xff] %v9743_v62  ;;  %v11659_v62 = vld [vmem:[#allocation56_spill] sm:$0xff] }
 0x8ec   :  { %3751 = vrot.lane.b32.xlu0 %v9733_v27, %s6858_s19  ;;  %3749 = vrot.lane.b32.xlu1 %v9661_v46, %s6858_s19 }
 0x8ee   :  { %v9751_v15 = vpop.permute.xlu0 %5087  ;;  %v9753_v4 = vpop.permute.xlu1 %3490 }
 0x8ef   :  { %11656 = vst [vmem:[#allocation225_spill] sm:$0xff] %v9751_v15 }
 0x8f0   :  { %4157 = vrot.lane.b32.xlu0 %v9733_v27, %s6860_s21  ;;  %4155 = vrot.lane.b32.xlu1 %v9661_v46, %s6860_s21 }
 0x8f2   :  { %v9759_v35 = vpop.permute.xlu0 %3488  ;;  %v9761_v60 = vpop.permute.xlu1 %3737 }
 0x8f3   :  { %11657 = vst [vmem:[#allocation226_spill] sm:$0xff] %v9759_v35  ;;  %v9777_v35 = vadd.f32 %v9467_v52, %v11659_v62  ;;  %v11663_v62 = vld [vmem:[#allocation55_spill] sm:$0xff] }
 0x8f4   :  { %4492 = vrot.lane.b32.xlu0 %v9733_v27, %s6861_s22  ;;  %4490 = vrot.lane.b32.xlu1 %v9661_v46, %s6861_s22  ;;  %v9797_v52 = vadd.f32 %v9469_v21, %v11663_v62 }
 0x8f6   :  { %v9767_v34 = vpop.permute.xlu0 %3735  ;;  %v9769_v15 = vpop.permute.xlu1 %4143 }
 0x8f7   :  { %11658 = vst [vmem:[#allocation227_spill] sm:$0xff] %v9767_v34 }
 0x8f8   :  { %4898 = vrot.lane.b32.xlu0 %v9733_v27, %s6859_s20  ;;  %4896 = vrot.lane.b32.xlu1 %v9661_v46, %s6859_s20 }
 0x8fa   :  { %v9779_v54 = vpop.permute.xlu0 %4141  ;;  %v9781_v37 = vpop.permute.xlu1 %4478 }
 0x8fb   :  { %11660 = vst [vmem:[#allocation56_spill] sm:$0xff] %v9779_v54 }
 0x8fc   :  { %3960 = vrot.lane.b32.xlu0 %v9777_v35, %s6868_s3  ;;  %5099 = vrot.lane.b32.xlu1 %v9661_v46, %s6871_s17 }
 0x8fe   :  { %v9787_v34 = vpop.permute.xlu0 %4476  ;;  %v9789_v39 = vpop.permute.xlu1 %4884 }
 0x8ff   :  { %11661 = vst [vmem:[#allocation228_spill] sm:$0xff] %v9787_v34  ;;  %11662 = vst [vmem:[#allocation229_spill] sm:$0xff] %v9789_v39  ;;  %v4270_v39 = vmul.f32 %v9012_v31, %v9689_v56  ;;  %v11707_v56 = vld [vmem:[#allocation78_spill] sm:$0xff] }
 0x900   :  { %4701 = vrot.lane.b32.xlu0 %v9777_v35, %s6870_s16  ;;  %3950 = vrot.lane.b32.xlu1 %v9677_v10, %s6868_s3 }
 0x902   :  { %v9799_v54 = vpop.permute.xlu0 %3944  ;;  %v9801_v19 = vpop.permute.xlu1 %3938 }
 0x903   :  { %11664 = vst [vmem:[#allocation55_spill] sm:$0xff] %v9799_v54  ;;  %11665 = vst [vmem:[#allocation230_spill] sm:$0xff] %v9801_v19 }
 0x904   :  { %3508 = vrot.lane.b32.xlu0 %v9797_v52, %s6869_s15  ;;  %4691 = vrot.lane.b32.xlu1 %v9677_v10, %s6870_s16 }
 0x906   :  { %v9807_v46 = vpop.permute.xlu0 %4685  ;;  %v9809_v34 = vpop.permute.xlu1 %4679 }
 0x907   :  { %11666 = vst [vmem:[#allocation231_spill] sm:$0xff] %v9807_v46  ;;  %11667 = vst [vmem:[#allocation232_spill] sm:$0xff] %v9809_v34 }
 0x908   :  { %3755 = vrot.lane.b32.xlu0 %v9797_v52, %s6858_s19  ;;  %4894 = vrot.lane.b32.xlu1 %v9677_v10, %s6859_s20 }
 0x90a   :  { %v9815_v21 = vpop.permute.xlu0 %5091  ;;  %v9817_v62 = vpop.permute.xlu1 %4882 }
 0x90b   :  { %11668 = vst [vmem:[#allocation233_spill] sm:$0xff] %v9815_v21  ;;  %11669 = vst [vmem:[#allocation234_spill] sm:$0xff] %v9817_v62  ;;  %v11674_v62 = vld [vmem:[#allocation58_spill] sm:$0xff] }
 0x90c   :  { %4161 = vrot.lane.b32.xlu0 %v9797_v52, %s6860_s21  ;;  %5097 = vrot.lane.b32.xlu1 %v9677_v10, %s6871_s17 }
 0x90e   :  { %v9823_v54 = vpop.permute.xlu0 %3492  ;;  %v9825_v46 = vpop.permute.xlu1 %5085 }
 0x90f   :  { %11670 = vst [vmem:[#allocation235_spill] sm:$0xff] %v9823_v54  ;;  %11671 = vst [vmem:[#allocation236_spill] sm:$0xff] %v9825_v46  ;;  %v9841_v54 = vadd.f32 %v9479_v41, %v11674_v62 }
 0x910   :  { %4496 = vrot.lane.b32.xlu0 %v9797_v52, %s6861_s22  ;;  %3506 = vrot.lane.b32.xlu1 %v9713_v38, %s6869_s15 }
 0x911   :  { %11675 = vst [vmem:[#allocation58_spill] sm:$0xff] %v9841_v54 }
 0x912   :  { %v9831_v34 = vpop.permute.xlu0 %3739  ;;  %v9833_v21 = vpop.permute.xlu1 %3494 }
 0x913   :  { %11672 = vst [vmem:[#allocation237_spill] sm:$0xff] %v9831_v34  ;;  %11673 = vst [vmem:[#allocation238_spill] sm:$0xff] %v9833_v21 }
 0x914   :  { %4902 = vrot.lane.b32.xlu0 %v9797_v52, %s6859_s20  ;;  %3753 = vrot.lane.b32.xlu1 %v9713_v38, %s6858_s19 }
 0x916   :  { %v9843_v46 = vpop.permute.xlu0 %4145  ;;  %v9845_v10 = vpop.permute.xlu1 %3741 }
 0x917   :  { %11676 = vst [vmem:[#allocation239_spill] sm:$0xff] %v9843_v46  ;;  %11677 = vst [vmem:[#allocation240_spill] sm:$0xff] %v9845_v10  ;;  %v11682_v46 = vld [vmem:[#allocation57_spill] sm:$0xff] }
 0x918   :  { %3964 = vrot.lane.b32.xlu0 %v9841_v54, %s6868_s3  ;;  %4159 = vrot.lane.b32.xlu1 %v9713_v38, %s6860_s21 }
 0x91a   :  { %v9851_v34 = vpop.permute.xlu0 %4480  ;;  %v9853_v21 = vpop.permute.xlu1 %4147 }
 0x91b   :  { %11678 = vst [vmem:[#allocation241_spill] sm:$0xff] %v9851_v34  ;;  %11679 = vst [vmem:[#allocation242_spill] sm:$0xff] %v9853_v21  ;;  %v9869_v34 = vadd.f32 %v9484_v45, %v11682_v46 }
 0x91c   :  { %4705 = vrot.lane.b32.xlu0 %v9841_v54, %s6870_s16  ;;  %4494 = vrot.lane.b32.xlu1 %v9713_v38, %s6861_s22 }
 0x91d   :  { %11683 = vst [vmem:[#allocation57_spill] sm:$0xff] %v9869_v34 }
 0x91e   :  { %v9859_v41 = vpop.permute.xlu0 %4886  ;;  %v9861_v62 = vpop.permute.xlu1 %4482 }
 0x91f   :  { %11680 = vst [vmem:[#allocation243_spill] sm:$0xff] %v9859_v41  ;;  %11681 = vst [vmem:[#allocation244_spill] sm:$0xff] %v9861_v62 }
 0x920   :  { %4908 = vrot.lane.b32.xlu0 %v9841_v54, %s6859_s20  ;;  %4900 = vrot.lane.b32.xlu1 %v9713_v38, %s6859_s20 }
 0x922   :  { %v9871_v21 = vpop.permute.xlu0 %3948  ;;  %v9873_v10 = vpop.permute.xlu1 %4888 }
 0x923   :  { %11684 = vst [vmem:[#allocation245_spill] sm:$0xff] %v9871_v21  ;;  %11685 = vst [vmem:[#allocation246_spill] sm:$0xff] %v9873_v10 }
 0x924   :  { %3512 = vrot.lane.b32.xlu0 %v9869_v34, %s6869_s15  ;;  %5103 = vrot.lane.b32.xlu1 %v9713_v38, %s6871_s17 }
 0x926   :  { %v9879_v41 = vpop.permute.xlu0 %4689  ;;  %v9881_v62 = vpop.permute.xlu1 %3942 }
 0x927   :  { %11686 = vst [vmem:[#allocation247_spill] sm:$0xff] %v9879_v41  ;;  %11687 = vst [vmem:[#allocation248_spill] sm:$0xff] %v9881_v62 }
 0x928   :  { %3759 = vrot.lane.b32.xlu0 %v9869_v34, %s6858_s19  ;;  %3954 = vrot.lane.b32.xlu1 %v9733_v27, %s6868_s3 }
 0x92a   :  { %v9887_v45 = vpop.permute.xlu0 %3496  ;;  %v9889_v46 = vpop.permute.xlu1 %4683 }
 0x92b   :  { %11688 = vst [vmem:[#allocation249_spill] sm:$0xff] %v9887_v45  ;;  %11689 = vst [vmem:[#allocation250_spill] sm:$0xff] %v9889_v46  ;;  %v11694_v46 = vld [vmem:[#allocation60_spill] sm:$0xff] }
 0x92c   :  { %4165 = vrot.lane.b32.xlu0 %v9869_v34, %s6860_s21  ;;  %4695 = vrot.lane.b32.xlu1 %v9733_v27, %s6870_s16 }
 0x92e   :  { %v9895_v21 = vpop.permute.xlu0 %3743  ;;  %v9897_v41 = vpop.permute.xlu1 %5089 }
 0x92f   :  { %11690 = vst [vmem:[#allocation251_spill] sm:$0xff] %v9895_v21  ;;  %11691 = vst [vmem:[#allocation252_spill] sm:$0xff] %v9897_v41  ;;  %v9913_v21 = vadd.f32 %v9490_v43, %v11694_v46  ;;  %v11696_v41 = vld [vmem:[#allocation85_spill] sm:$0xff]  ;;  %v9935_v43 = vld [vmem:[%s11228_s2 + $0x7] ss:$0 sm:$0xff] }
 0x930   :  { %4500 = vrot.lane.b32.xlu0 %v9869_v34, %s6861_s22  ;;  %5101 = vrot.lane.b32.xlu1 %v9733_v27, %s6871_s17  ;;  %v3661_v10 = vmul.f32 %v11696_v41, %v9669_v26 }
 0x931   :  { %11695 = vst [vmem:[#allocation60_spill] sm:$0xff] %v9913_v21 }
 0x932   :  { %v9903_v38 = vpop.permute.xlu0 %4149  ;;  %v9905_v45 = vpop.permute.xlu1 %3498 }
 0x933   :  { %11692 = vst [vmem:[#allocation253_spill] sm:$0xff] %v9903_v38  ;;  %11693 = vst [vmem:[#allocation254_spill] sm:$0xff] %v9905_v45  ;;  %v9924_v38 = vld [vmem:[%s11228_s2 + $0x6] ss:$0 sm:$0xff]  ;;  %v3864_v45 = vmul.f32 %v8693_v14, %v9681_v47  ;;  %v11701_v14 = vld [vmem:[#allocation59_spill] sm:$0xff] }
 0x934   :  { %5109 = vrot.lane.b32.xlu0 %v9869_v34, %s6871_s17  ;;  %3510 = vrot.lane.b32.xlu1 %v9777_v35, %s6869_s15  ;;  %v3688_v26 = vmul.f32 %v9924_v38, %v3661_v10  ;;  %v9949_v47 = vadd.f32 %v9494_v18, %v11701_v14  ;;  %v11703_v10 = vld [vmem:[#allocation65_spill] sm:$0xff]  ;;  %v9972_v18 = vld [vmem:[%s11228_s2 + $0x9] ss:$0 sm:$0xff]  ;;  %v3660_v14 = vmul.f32 %v11707_v56, %v9695_v5 }
 0x935   :  { %v4297_v31 = vmul.f32 %v9972_v18, %v4270_v39 }
 0x936   :  { %v9917_v62 = vpop.permute.xlu0 %4484  ;;  %v9919_v27 = vpop.permute.xlu1 %3745  ;;  %11702 = vst [vmem:[#allocation59_spill] sm:$0xff] %v9949_v47  ;;  %v3710_v19 = vadd.f32 %v3688_v26, %v11703_v10  ;;  %v3687_v5 = vmul.f32 %v9924_v38, %v3660_v14 }
 0x937   :  { %11697 = vst [vmem:[#allocation85_spill] sm:$0xff] %v9917_v62  ;;  %11698 = vst [vmem:[#allocation255_spill] sm:$0xff] %v9919_v27  ;;  %v3891_v62 = vmul.f32 %v9935_v43, %v3864_v45  ;;  %v4067_v27 = vmul.f32 %v8741_v0, %v9667_v2  ;;  %v9961_v45 = vld [vmem:[%s11228_s2 + $0x8] ss:$0 sm:$0xff] }
 0x938   :  { %3968 = vrot.lane.b32.xlu0 %v9913_v21, %s6868_s3  ;;  %3757 = vrot.lane.b32.xlu1 %v9777_v35, %s6858_s19 }
 0x939   :  { %v4094_v0 = vmul.f32 %v9961_v45, %v4067_v27 }
 0x93a   :  { %v9938_v41 = vpop.permute.xlu0 %3952  ;;  %v9940_v46 = vpop.permute.xlu1 %4151 }
 0x93b   :  { %11699 = vst [vmem:[#allocation256_spill] sm:$0xff] %v9938_v41  ;;  %11700 = vst [vmem:[#allocation257_spill] sm:$0xff] %v9940_v46 }
 0x93c   :  { %4709 = vrot.lane.b32.xlu0 %v9913_v21, %s6870_s16  ;;  %4163 = vrot.lane.b32.xlu1 %v9777_v35, %s6860_s21  ;;  %v3913_v21 = vadd.f32 %v3891_v62, %v3710_v19 }
 0x93e   :  { %v9954_v41 = vpop.permute.xlu0 %4693  ;;  %v9956_v46 = vpop.permute.xlu1 %4486  ;;  %v4116_v62 = vadd.f32 %v4094_v0, %v3913_v21  ;;  %v4605_v0 = vmul.f32 %v9296_v55, %v9697_v59  ;;  %v4429_v59 = vmul.f32 %v9206_v22, %v9406_v9  ;;  %v4808_v9 = vmul.f32 %v9365_v12, %v9679_v30  ;;  %v11712_v30 = vld [vmem:[#allocation62_spill] sm:$0xff] }
 0x93f   :  { %11704 = vst [vmem:[#allocation65_spill] sm:$0xff] %v9954_v41  ;;  %11705 = vst [vmem:[#allocation258_spill] sm:$0xff] %v9956_v46  ;;  %v11806_v46 = vld [vmem:[#allocation23_spill] sm:$0xff] }
 0x940   :  { %3516 = vrot.lane.b32.xlu0 %v9949_v47, %s6869_s15  ;;  %4498 = vrot.lane.b32.xlu1 %v9777_v35, %s6861_s22  ;;  %v4319_v39 = vadd.f32 %v4297_v31, %v4116_v62 }
 0x942   :  { %v3501_v2 = vpop.permute.xlu0 %3500  ;;  %v9975_v26 = vpop.permute.xlu1 %4892  ;;  %v4451_v14 = vadd.f32 %v4429_v59, %v4319_v39 }
 0x943   :  { %11706 = vst [vmem:[#allocation259_spill] sm:$0xff] %v9975_v26  ;;  %v3668_v19 = vmul.f32 %v8654_v16, %v3501_v2  ;;  %v3863_v16 = vmul.f32 %v8691_v40, %v9703_v49  ;;  %v10001_v2 = vld [vmem:[%s11228_s2 + $0xb] ss:$0 sm:$0xff]  ;;  %v4066_v40 = vmul.f32 %v8735_v23, %v9717_v36  ;;  %v11710_v23 = vld [vmem:[#allocation44_spill] sm:$0xff] }
 0x944   :  { %3763 = vrot.lane.b32.xlu0 %v9949_v47, %s6858_s19  ;;  %4904 = vrot.lane.b32.xlu1 %v9777_v35, %s6859_s20  ;;  %v11709_v49 = vld [vmem:[#allocation51_spill] sm:$0xff]  ;;  %v3709_v36 = vadd.f32 %v3687_v5, %v11710_v23  ;;  %v10042_v5 = vadd.f32 %v9502_v33, %v11712_v30 }
 0x945   :  { %v3695_v10 = vmul.f32 %v9924_v38, %v3668_v19  ;;  %v3890_v31 = vmul.f32 %v9935_v43, %v3863_v16  ;;  %v4093_v22 = vmul.f32 %v9961_v45, %v4066_v40  ;;  %v10071_v23 = vld [vmem:[%s11228_s2 + $0xe] ss:$0 sm:$0xff] }
 0x946   :  { %v3748_v27 = vpop.permute.xlu0 %3747  ;;  %v9986_v41 = vpop.permute.xlu1 %5095  ;;  %11713 = vst [vmem:[#allocation44_spill] sm:$0xff] %v10042_v5 }
 0x947   :  { %11708 = vst [vmem:[#allocation78_spill] sm:$0xff] %v9986_v41  ;;  %v3871_v21 = vmul.f32 %v8709_v7, %v3748_v27  ;;  %v3717_v7 = vadd.f32 %v3695_v10, %v11709_v49  ;;  %v4632_v27 = vmul.f32 %v10001_v2, %v4605_v0  ;;  %v3912_v39 = vadd.f32 %v3890_v31, %v3709_v36 }
 0x948   :  { %4169 = vrot.lane.b32.xlu0 %v9949_v47, %s6860_s21  ;;  %5107 = vrot.lane.b32.xlu1 %v9777_v35, %s6871_s17  ;;  %v4269_v0 = vmul.f32 %v9076_v51, %v9715_v11  ;;  %v10054_v11 = vld [vmem:[%s11228_s2 + $0xd] ss:$0 sm:$0xff]  ;;  %v4428_v36 = vmul.f32 %v9134_v42, %v9435_v57 }
 0x949   :  { %v3898_v55 = vmul.f32 %v9935_v43, %v3871_v21  ;;  %v10032_v21 = vld [vmem:[%s11228_s2 + $0xc] ss:$0 sm:$0xff]  ;;  %v4654_v49 = vadd.f32 %v4632_v27, %v4451_v14  ;;  %v4115_v12 = vadd.f32 %v4093_v22, %v3912_v39  ;;  %v4604_v22 = vmul.f32 %v9319_v6, %v9723_v8 }
 0x94a   :  { %v10009_v19 = vpop.permute.xlu0 %4153  ;;  %v10011_v62 = vpop.permute.xlu1 %3946  ;;  %v4835_v40 = vmul.f32 %v10032_v21, %v4808_v9  ;;  %v4296_v59 = vmul.f32 %v9972_v18, %v4269_v0  ;;  %v11717_v9 = vld [vmem:[#allocation86_spill] sm:$0xff] }
 0x94b   :  { %v10014_v56 = vadd.f32 %v3898_v55, %v3717_v7  ;;  %v5011_v7 = vmul.f32 %v9351_v17, %v9687_v1  ;;  %v5214_v17 = vmul.f32 %v9359_v48, %v9705_v20  ;;  %v3663_v39 = vmul.f32 %v11717_v9, %v9753_v4 }
 0x94c   :  { %4504 = vrot.lane.b32.xlu0 %v9949_v47, %s6861_s22  ;;  %3958 = vrot.lane.b32.xlu1 %v9797_v52, %s6868_s3  ;;  %v4857_v31 = vadd.f32 %v4835_v40, %v4654_v49  ;;  %v4318_v33 = vadd.f32 %v4296_v59, %v4115_v12  ;;  %v3866_v48 = vmul.f32 %v8695_v28, %v9761_v60  ;;  %v11718_v49 = vld [vmem:[#allocation61_spill] sm:$0xff] }
 0x94d   :  { %v5038_v1 = vmul.f32 %v10054_v11, %v5011_v7  ;;  %v10087_v42 = vadd.f32 %v9504_v3, %v11718_v49  ;;  %v5241_v57 = vmul.f32 %v10071_v23, %v5214_v17  ;;  %v4631_v4 = vmul.f32 %v10001_v2, %v4604_v22 }
 0x94e   :  { %v10025_v10 = vpop.permute.xlu0 %4488  ;;  %v10027_v16 = vpop.permute.xlu1 %4687  ;;  %v4450_v20 = vadd.f32 %v4428_v36, %v4318_v33  ;;  %v4807_v12 = vmul.f32 %v9343_v53, %v9725_v58  ;;  %v3690_v30 = vmul.f32 %v9924_v38, %v3663_v39  ;;  %v3893_v60 = vmul.f32 %v9935_v43, %v3866_v48  ;;  %v11722_v33 = vld [vmem:[#allocation66_spill] sm:$0xff] }
 0x94f   :  { %11711 = vst [vmem:[#allocation51_spill] sm:$0xff] %v10027_v16  ;;  %v5060_v0 = vadd.f32 %v5038_v1, %v4857_v31  ;;  %11719 = vst [vmem:[#allocation86_spill] sm:$0xff] %v10087_v42  ;;  %v5010_v53 = vmul.f32 %v9347_v32, %v9737_v44  ;;  %v4272_v44 = vmul.f32 %v9083_v13, %v9769_v15  ;;  %v11723_v32 = vld [vmem:[#allocation53_spill] sm:$0xff]  ;;  %v11805_v16 = vld [vmem:[#allocation48_spill] sm:$0xff] }
 0x950   :  { %5113 = vrot.lane.b32.xlu0 %v9949_v47, %s6871_s17  ;;  %4699 = vrot.lane.b32.xlu1 %v9797_v52, %s6870_s16  ;;  %v4653_v28 = vadd.f32 %v4631_v4, %v4450_v20  ;;  %v4834_v58 = vmul.f32 %v10032_v21, %v4807_v12  ;;  %v3712_v1 = vadd.f32 %v3690_v30, %v11722_v33  ;;  %v11726_v30 = vld [vmem:[#allocation150_spill] sm:$0xff] }
 0x951   :  { %v10097_v7 = vadd.f32 %v5241_v57, %v5060_v0  ;;  %v5037_v20 = vmul.f32 %v10054_v11, %v5010_v53  ;;  %v4299_v15 = vmul.f32 %v9972_v18, %v4272_v44  ;;  %v11735_v44 = vld [vmem:[#allocation163_spill] sm:$0xff] }
 0x952   :  { %v10047_v55 = vpop.permute.xlu0 %3956  ;;  %v10049_v51 = vpop.permute.xlu1 %4890  ;;  %v4856_v22 = vadd.f32 %v4834_v58, %v4653_v28  ;;  %v11727_v28 = vld [vmem:[#allocation64_spill] sm:$0xff]  ;;  %v11731_v58 = vld [vmem:[#allocation29_spill] sm:$0xff] }
 0x953   :  { %11714 = vst [vmem:[#allocation62_spill] sm:$0xff] %v10049_v51  ;;  %v10114_v17 = vmul.f32 0.70710677, %v10097_v7 }
 0x954   :  { %3972 = vrot.lane.b32.xlu0 %v10042_v5, %s6868_s3  ;;  %5105 = vrot.lane.b32.xlu1 %v9797_v52, %s6871_s17  ;;  %v5059_v13 = vadd.f32 %v5037_v20, %v4856_v22 }
 0x955   :  { %v10132_v48 = vand.u32 2147483647, %v10114_v17  ;;  %vm5307_vm2 = vcmp.ge.f32.partialorder %v10114_v17, 0.0 }
 0x956   :  { %v10064_v14 = vpop.permute.xlu0 %4697  ;;  %v10066_v27 = vpop.permute.xlu1 %5093 }
 0x957   :  { %11715 = vst [vmem:[#allocation260_spill] sm:$0xff] %v10064_v14  ;;  %11716 = vst [vmem:[#allocation261_spill] sm:$0xff] %v10066_v27  ;;  %v11822_v14 = vld [vmem:[#allocation169_spill] sm:$0xff] }
 0x958   :  { %4713 = vrot.lane.b32.xlu0 %v10042_v5, %s6870_s16  ;;  %3514 = vrot.lane.b32.xlu1 %v9841_v54, %s6869_s15 }
 0x95a   :  { %v3505_v6 = vpop.permute.xlu0 %3504  ;;  %v10090_v8 = vpop.permute.xlu1 %3502 }
 0x95b   :  { %11720 = vst [vmem:[#allocation61_spill] sm:$0xff] %v10090_v8  ;;  %v3670_v40 = vmul.f32 %v8657_v24, %v3505_v6  ;;  %v4069_v24 = vmul.f32 %v8743_v25, %v9735_v50  ;;  %v5213_v50 = vmul.f32 %v9563_v29, %v9745_v61  ;;  %v3915_v25 = vadd.f32 %v3893_v60, %v3712_v1  ;;  %v11728_v60 = vld [vmem:[#allocation198_spill] sm:$0xff]  ;;  %v11778_v8 = vld [vmem:[#allocation240_spill] sm:$0xff] }
 0x95c   :  { %3520 = vrot.lane.b32.xlu0 %v10087_v42, %s6869_s15  ;;  %3761 = vrot.lane.b32.xlu1 %v9841_v54, %s6858_s19  ;;  %v5340_v6 = vmul.f32 0.3275911, %v10132_v48 }
 0x95d   :  { %v3697_v3 = vmul.f32 %v9924_v38, %v3670_v40  ;;  %v5240_v29 = vmul.f32 %v10071_v23, %v5213_v50  ;;  %v4607_v40 = vmul.f32 %v11726_v30, %v9781_v37 }
 0x95e   :  { %v3752_v59 = vpop.permute.xlu0 %3751  ;;  %v10105_v31 = vpop.permute.xlu1 %3749  ;;  %v5351_v33 = vadd.f32 1.0, %v5340_v6  ;;  %v11740_v6 = vld [vmem:[#allocation63_spill] sm:$0xff] }
 0x95f   :  { %11721 = vst [vmem:[#allocation262_spill] sm:$0xff] %v10105_v31  ;;  %v3873_v36 = vmul.f32 %v8713_v63, %v3752_v59  ;;  %v3719_v9 = vadd.f32 %v3697_v3, %v11723_v32  ;;  %v4096_v63 = vmul.f32 %v9961_v45, %v4069_v24  ;;  %v10149_v4 = vadd.f32 %v5240_v29, %v5059_v13  ;;  %v11732_v24 = vld [vmem:[#allocation19_spill] sm:$0xff]  ;;  %v11738_v29 = vld [vmem:[#allocation229_spill] sm:$0xff]  ;;  %v11777_v31 = vld [vmem:[#allocation208_spill] sm:$0xff] }
 0x960   :  { %3767 = vrot.lane.b32.xlu0 %v10087_v42, %s6858_s19  ;;  %4167 = vrot.lane.b32.xlu1 %v9841_v54, %s6860_s21  ;;  %v10155_v3 = vadd.f32 %v11728_v60, %v11727_v28  ;;  %v4431_v53 = vmul.f32 %v11732_v24, %v11731_v58  ;;  %6764 = vrcp.f32 %v5351_v33  ;;  %v11744_v28 = vld [vmem:[#allocation26_spill] sm:$0xff] }
 0x961   :  { %v3900_v39 = vmul.f32 %v9935_v43, %v3873_v36  ;;  %v4118_v61 = vadd.f32 %v4096_v63, %v3915_v25  ;;  %v10166_v1 = vmul.f32 0.70710677, %v10149_v4  ;;  %v4634_v36 = vmul.f32 %v10001_v2, %v4607_v40  ;;  %v11734_v25 = vld [vmem:[#allocation224_spill] sm:$0xff]  ;;  %v11743_v40 = vld [vmem:[#allocation227_spill] sm:$0xff] }
 0x962   :  { %v10127_v0 = vpop.permute.xlu1 %4155  ;;  %11729 = vst [vmem:[#allocation150_spill] sm:$0xff] %v10155_v3  ;;  %v10169_v22 = vpop.permute.xlu0 %4157  ;;  %v4810_v32 = vmul.f32 %v11735_v44, %v11734_v25  ;;  %v3865_v60 = vmul.f32 %v11744_v28, %v11743_v40  ;;  %v11746_v25 = vld [vmem:[#allocation122_spill] sm:$0xff]  ;;  %v11750_v40 = vld [vmem:[#allocation225_spill] sm:$0xff]  ;;  %v11751_v28 = vld [vmem:[#allocation171_spill] sm:$0xff] }
 0x963   :  { %11724 = vst [vmem:[#allocation66_spill] sm:$0xff] %v10127_v0  ;;  %v10134_v49 = vadd.f32 %v3900_v39, %v3719_v9  ;;  %v4321_v12 = vadd.f32 %v4299_v15, %v4118_v61  ;;  %v11736_v9 = vld [vmem:[#allocation226_spill] sm:$0xff]  ;;  %v11737_v39 = vld [vmem:[#allocation80_spill] sm:$0xff]  ;;  %v10182_v20 = vand.u32 2147483647, %v10166_v1  ;;  %vm5306_vm3 = vcmp.ge.f32.partialorder %v10166_v1, 0.0 }
 0x964   :  { %4173 = vrot.lane.b32.xlu0 %v10087_v42, %s6860_s21  ;;  %4502 = vrot.lane.b32.xlu1 %v9841_v54, %s6861_s22  ;;  %v3662_v63 = vmul.f32 %v11737_v39, %v11736_v9  ;;  %v11739_v61 = vld [vmem:[#allocation184_spill] sm:$0xff]  ;;  %v4837_v24 = vmul.f32 %v10032_v21, %v4810_v32  ;;  %v11748_v9 = vld [vmem:[#allocation117_spill] sm:$0xff] }
 0x965   :  { %v4453_v37 = vadd.f32 %v4431_v53, %v4321_v12  ;;  %v5013_v15 = vmul.f32 %v11739_v61, %v11738_v29  ;;  %v11741_v12 = vld [vmem:[#allocation199_spill] sm:$0xff]  ;;  %v11745_v53 = vld [vmem:[#allocation6_spill] sm:$0xff]  ;;  %v5339_v32 = vmul.f32 0.3275911, %v10182_v20 }
 0x966   :  { %v10142_v57 = vpop.permute.xlu1 %4490  ;;  %v10188_v30 = vadd.f32 %v11741_v12, %v11740_v6  ;;  %v4277_v33 = vmul.f32 %v11745_v53, %v10009_v19  ;;  %v10199_v29 = vpop.permute.xlu0 %4492 }
 0x967   :  { %11725 = vst [vmem:[#allocation53_spill] sm:$0xff] %v10142_v57  ;;  %v4656_v13 = vadd.f32 %v4634_v36, %v4453_v37  ;;  %v3689_v37 = vmul.f32 %v9924_v38, %v3662_v63  ;;  %v11747_v36 = vld [vmem:[#allocation230_spill] sm:$0xff]  ;;  %v5040_v19 = vmul.f32 %v10054_v11, %v5013_v15  ;;  %v3892_v63 = vmul.f32 %v9935_v43, %v3865_v60  ;;  %v11754_v60 = vld [vmem:[#allocation60_spill] sm:$0xff] }
 0x968   :  { %4508 = vrot.lane.b32.xlu0 %v10087_v42, %s6861_s22  ;;  %5111 = vrot.lane.b32.xlu1 %v9841_v54, %s6871_s17  ;;  %11742 = vst [vmem:[#allocation29_spill] sm:$0xff] %v10188_v30  ;;  %v4068_v39 = vmul.f32 %v11748_v9, %v11747_v36  ;;  %v4304_v53 = vmul.f32 %v9972_v18, %v4277_v33  ;;  %v11753_v54 = vld [vmem:[#allocation45_spill] sm:$0xff]  ;;  %v11756_v33 = vld [vmem:[#allocation136_spill] sm:$0xff]  ;;  %v5483_v57 = vsub.f32 0.0, %v10132_v48 }
 0x969   :  { %v4859_v61 = vadd.f32 %v4837_v24, %v4656_v13  ;;  %v3711_v13 = vadd.f32 %v3689_v37, %v11753_v54  ;;  %v5350_v24 = vadd.f32 1.0, %v5339_v32 }
 0x96a   :  { %v10157_v59 = vpop.permute.xlu1 %4896  ;;  %v4095_v15 = vmul.f32 %v9961_v45, %v4068_v39  ;;  %v10229_v37 = vpop.permute.xlu0 %4898 }
 0x96b   :  { %11730 = vst [vmem:[#allocation64_spill] sm:$0xff] %v10157_v59  ;;  %v10225_v59 = vpop.eup %6764  ;;  %6766 = vrcp.f32 %v5350_v24  ;;  %v11765_v24 = vld [vmem:[#allocation142_spill] sm:$0xff] }
 0x96c   :  { %3976 = vrot.lane.b32.xlu0 %v10155_v3, %s6868_s3  ;;  %3962 = vrot.lane.b32.xlu1 %v9869_v34, %s6868_s3 }
 0x96e   :  { %v10171_v50 = vpop.permute.xlu1 %5099 }
 0x96f   :  { %11733 = vst [vmem:[#allocation198_spill] sm:$0xff] %v10171_v50 }
 0x970   :  { %4717 = vrot.lane.b32.xlu0 %v10155_v3, %s6870_s16  ;;  %4703 = vrot.lane.b32.xlu1 %v9869_v34, %s6870_s16 }
 0x972   :  { %v3951_v58 = vpop.permute.xlu1 %3950 }
 0x973   :  { %v4074_v44 = vmul.f32 %v11746_v25, %v3951_v58  ;;  %v5216_v58 = vmul.f32 %v11751_v28, %v11750_v40  ;;  %v11752_v25 = vld [vmem:[#allocation148_spill] sm:$0xff]  ;;  %v11755_v28 = vld [vmem:[#allocation50_spill] sm:$0xff] }
 0x974   :  { %3524 = vrot.lane.b32.xlu0 %v10188_v30, %s6869_s15  ;;  %4906 = vrot.lane.b32.xlu1 %v9869_v34, %s6859_s20  ;;  %v4612_v36 = vmul.f32 %v11752_v25, %v10025_v10  ;;  %v4436_v50 = vmul.f32 %v11756_v33, %v11755_v28  ;;  %v3914_v10 = vadd.f32 %v3892_v63, %v3711_v13  ;;  %v11767_v28 = vld [vmem:[#allocation17_spill] sm:$0xff] }
 0x975   :  { %v4101_v6 = vmul.f32 %v9961_v45, %v4074_v44  ;;  %v5062_v44 = vadd.f32 %v5040_v19, %v4859_v61  ;;  %v5243_v25 = vmul.f32 %v10071_v23, %v5216_v58 }
 0x976   :  { %v10209_v12 = vpop.permute.xlu1 %4691  ;;  %v4117_v61 = vadd.f32 %v4095_v15, %v3914_v10  ;;  %v11764_v15 = vld [vmem:[#allocation228_spill] sm:$0xff] }
 0x977   :  { %11749 = vst [vmem:[#allocation19_spill] sm:$0xff] %v10209_v12  ;;  %v4123_v9 = vadd.f32 %v4101_v6, %v10014_v56  ;;  %v11757_v56 = vld [vmem:[#allocation56_spill] sm:$0xff]  ;;  %v4639_v12 = vmul.f32 %v10001_v2, %v4612_v36  ;;  %v10239_v19 = vadd.f32 %v5243_v25, %v5062_v44  ;;  %v4606_v44 = vmul.f32 %v11765_v24, %v11764_v15  ;;  %v10278_v24 = vpop.eup %6766 }
 0x978   :  { %3771 = vrot.lane.b32.xlu0 %v10188_v30, %s6858_s19  ;;  %3518 = vrot.lane.b32.xlu1 %v11754_v60, %s6869_s15  ;;  %v11758_v6 = vld [vmem:[#allocation8_spill] sm:$0xff] }
 0x979   :  { %v4326_v40 = vadd.f32 %v4304_v53, %v4123_v9  ;;  %v4271_v54 = vmul.f32 %v11758_v6, %v11757_v56  ;;  %11760 = vst [vmem:[#allocation163_spill] sm:$0xff] %v10239_v19  ;;  %v5384_v53 = vmul.f32 1.0614054, %v10225_v59  ;;  %v10254_v13 = vmul.f32 0.70710677, %v10239_v19  ;;  %v6846_v6 = vld [vmem:[%s11226_s7 + $0xa8] sm:$0xff] }
 0x97a   :  { %v10231_v39 = vpop.permute.xlu1 %4894 }
 0x97b   :  { %11759 = vst [vmem:[#allocation224_spill] sm:$0xff] %v10231_v39  ;;  %v4458_v32 = vadd.f32 %v4436_v50, %v4326_v40  ;;  %v4298_v9 = vmul.f32 %v9972_v18, %v4271_v54  ;;  %v10247_v50 = vpop.permute.xlu0 %3960  ;;  %v11766_v40 = vld [vmem:[#allocation28_spill] sm:$0xff]  ;;  %v10268_v54 = vand.u32 2147483647, %v10254_v13  ;;  %vm5309_vm4 = vcmp.ge.f32.partialorder %v10254_v13, 0.0 }
 0x97c   :  { %4177 = vrot.lane.b32.xlu0 %v10188_v30, %s6860_s21  ;;  %3765 = vrot.lane.b32.xlu1 %v11754_v60, %s6858_s19  ;;  %11763 = vst [vmem:[#allocation229_spill] sm:$0xff] %v10247_v50  ;;  %v4430_v33 = vmul.f32 %v11767_v28, %v11766_v40  ;;  %v11848_v13 = vld [vmem:[#allocation88_spill] sm:$0xff] }
 0x97d   :  { %v10241_v63 = vadd.f32 %v4639_v12, %v4458_v32  ;;  %v4320_v36 = vadd.f32 %v4298_v9, %v4117_v61  ;;  %v5395_v12 = vadd.f32 -1.4531521, %v5384_v53  ;;  %v4633_v32 = vmul.f32 %v10001_v2, %v4606_v44  ;;  %v11768_v61 = vld [vmem:[#allocation232_spill] sm:$0xff] }
 0x97e   :  { %v10245_v58 = vpop.permute.xlu1 %5097  ;;  %v11769_v53 = vld [vmem:[#allocation168_spill] sm:$0xff]  ;;  %v11771_v44 = vmov 0  }
 0x97f   :  { %11761 = vst [vmem:[#allocation226_spill] sm:$0xff] %v10241_v63  ;;  %11762 = vst [vmem:[#allocation80_spill] sm:$0xff] %v10245_v58  ;;  %v4452_v56 = vadd.f32 %v4430_v33, %v4320_v36  ;;  %v5406_v25 = vmul.f32 %v10225_v59, %v5395_v12  ;;  %v4809_v9 = vmul.f32 %v11769_v53, %v11768_v61  ;;  %v10274_v15 = vpop.permute.xlu0 %4701  ;;  %v5342_v12 = vmul.f32 0.3275911, %v10268_v54  ;;  %v11773_v61 = vld [vmem:[#allocation166_spill] sm:$0xff]  ;;  %v11775_v63 = vld [vmem:[#allocation87_spill] sm:$0xff] }
 0x980   :  { %4512 = vrot.lane.b32.xlu0 %v10188_v30, %s6861_s22  ;;  %4171 = vrot.lane.b32.xlu1 %v11754_v60, %s6860_s21  ;;  %11770 = vst [vmem:[#allocation184_spill] sm:$0xff] %v10274_v15  ;;  %v11774_v58 = vld [vmem:[#allocation238_spill] sm:$0xff]  ;;  %v11776_v15 = vld [vmem:[#allocation236_spill] sm:$0xff]  ;;  %v11799_v30 = vld [vmem:[#allocation31_spill] sm:$0xff] }
 0x981   :  { %v4655_v40 = vadd.f32 %v4633_v32, %v4452_v56  ;;  %v5417_v28 = vadd.f32 1.4214138, %v5406_v25  ;;  %v4836_v33 = vmul.f32 %v10032_v21, %v4809_v9  ;;  %v3665_v39 = vmul.f32 %v11775_v63, %v11774_v58 }
 0x982   :  { %v10260_v10 = vpop.permute.xlu1 %3506  ;;  %v5383_v32 = vmul.f32 1.0614054, %v10278_v24  ;;  %v5215_v25 = vmul.f32 %v11777_v31, %v11776_v15  ;;  %v5494_v31 = vmul.f32 %v5483_v57, %v10132_v48 }
 0x983   :  { %v4858_v0 = vadd.f32 %v4836_v33, %v4655_v40  ;;  %v10299_v9 = vpop.permute.xlu0 %3508  ;;  %v3692_v58 = vmul.f32 %v9924_v38, %v3665_v39  ;;  %v5428_v40 = vmul.f32 %v10225_v59, %v5417_v28  ;;  %v11783_v39 = vld [vmem:[#allocation67_spill] sm:$0xff] }
 0x984   :  { %5210 = vperm.xlu0 %6501, %v6846_v6   ;;  %4506 = vrot.lane.b32.xlu1 %v11754_v60, %s6861_s22  ;;  %v11772_v6 = vld [vmem:[#allocation234_spill] sm:$0xff]  ;;  %v5394_v34 = vadd.f32 -1.4531521, %v5383_v32  ;;  %v5506_v57 = vmul.f32 1.442695, %v5494_v31  ;;  %v11792_v31 = vld [vmem:[#allocation89_spill] sm:$0xff] }
 0x985   :  { %v5012_v53 = vmul.f32 %v11773_v61, %v11772_v6  ;;  %v5353_v6 = vadd.f32 1.0, %v5342_v12  ;;  %v11781_v12 = vld [vmem:[#allocation55_spill] sm:$0xff] }
 0x986   :  { %v10276_v36 = vpop.permute.xlu1 %3753  ;;  %v5405_v48 = vmul.f32 %v10278_v24, %v5394_v34 }
 0x987   :  { %v5039_v63 = vmul.f32 %v10054_v11, %v5012_v53  ;;  %6768 = vrcp.f32 %v5353_v6  ;;  %v11782_v53 = vld [vmem:[#allocation119_spill] sm:$0xff]  ;;  %v10316_v27 = vpop.permute.xlu0 %3755  ;;  %v5482_v6 = vsub.f32 0.0, %v10182_v20 }
 0x988   :  { %4920 = vrot.lane.b32.xlu0 %v10155_v3, %s6859_s20  ;;  %4912 = vrot.lane.b32.xlu1 %v11754_v60, %s6859_s20  ;;  %v5416_v34 = vadd.f32 1.4214138, %v5405_v48  ;;  %6770 = vpow2.f32 %v5506_v57  ;;  %v11796_v57 = vld [vmem:[#allocation21_spill] sm:$0xff] }
 0x989   :  { %6502 = vset.pattern.permute.xlu0 %v11771_v44  ;;  %v11779_v44 = vld [vmem:[#allocation90_spill] sm:$0xff]  ;;  %v5061_v15 = vadd.f32 %v5039_v63, %v4858_v0  ;;  %v5439_v0 = vadd.f32 -0.28449672, %v5428_v40  ;;  %v11787_v63 = vld [vmem:[#allocation13_spill] sm:$0xff] }
 0x98a   :  { %v10291_v56 = vpop.permute.xlu1 %4159  ;;  %v3868_v19 = vmul.f32 %v11779_v44, %v11778_v8  ;;  %v5242_v8 = vmul.f32 %v10071_v23, %v5215_v25  ;;  %v4071_v44 = vmul.f32 %v11782_v53, %v11781_v12  ;;  %v11786_v25 = vld [vmem:[#allocation242_spill] sm:$0xff] }
 0x98b   :  { %v4274_v51 = vmul.f32 %v11787_v63, %v11786_v25  ;;  %v11789_v12 = vld [vmem:[#allocation82_spill] sm:$0xff]  ;;  %v5450_v40 = vmul.f32 %v10225_v59, %v5439_v0  ;;  %v10340_v63 = vpop.permute.xlu0 %4161  ;;  %v11795_v0 = vld [vmem:[#allocation33_spill] sm:$0xff] }
 0x98c   :  { %5115 = vrot.lane.b32.xlu1 %v11754_v60, %s6871_s17  ;;  %v3895_v33 = vmul.f32 %v9935_v43, %v3868_v19  ;;  %v3714_v60 = vadd.f32 %v3692_v58, %v11783_v39  ;;  %v10321_v28 = vadd.f32 %v5242_v8, %v5061_v15  ;;  %v11788_v58 = vld [vmem:[#allocation235_spill] sm:$0xff]  ;;  %v4098_v39 = vmul.f32 %v9961_v45, %v4071_v44 }
 0x98d   :  { %v3664_v53 = vmul.f32 %v11789_v12, %v11788_v58  ;;  %v4301_v25 = vmul.f32 %v9972_v18, %v4274_v51  ;;  %11794 = vst [vmem:[#allocation122_spill] sm:$0xff] %v10340_v63  ;;  %v5493_v44 = vmul.f32 %v5482_v6, %v10182_v20  ;;  %v4433_v58 = vmul.f32 %v11796_v57, %v11795_v0  ;;  %v11797_v12 = vld [vmem:[#allocation248_spill] sm:$0xff]  ;;  %v11801_v20 = vld [vmem:[#allocation7_spill] sm:$0xff] }
 0x98e   :  { %v10305_v61 = vpop.permute.xlu1 %4494  ;;  %11785 = vst [vmem:[#allocation227_spill] sm:$0xff] %v10321_v28  ;;  %v3917_v19 = vadd.f32 %v3895_v33, %v3714_v60  ;;  %v11791_v60 = vld [vmem:[#allocation237_spill] sm:$0xff]  ;;  %v10337_v8 = vmul.f32 0.70710677, %v10321_v28  ;;  %v4279_v6 = vmul.f32 %v11801_v20, %v10169_v22  ;;  %v11809_v22 = vld [vmem:[#allocation46_spill] sm:$0xff]  ;;  %v11823_v63 = vld [vmem:[#allocation191_spill] sm:$0xff] }
 0x98f   :  { %11780 = vst [vmem:[#allocation63_spill] sm:$0xff] %v10305_v61  ;;  %v3867_v15 = vmul.f32 %v11792_v31, %v11791_v60  ;;  %v3691_v48 = vmul.f32 %v9924_v38, %v3664_v53  ;;  %v11798_v60 = vld [vmem:[#allocation118_spill] sm:$0xff]  ;;  %v11802_v53 = vld [vmem:[#allocation35_spill] sm:$0xff]  ;;  %v5020_v61 = vmul.f32 %v11823_v63, %v10229_v37 }
 0x990   :  { %3966 = vrot.lane.b32.xlu1 %v9949_v47, %s6868_s3  ;;  %11793 = vst [vmem:[#allocation6_spill] sm:$0xff] %v10337_v8  ;;  %v4120_v33 = vadd.f32 %v4098_v39, %v3917_v19  ;;  %v4070_v31 = vmul.f32 %v11798_v60, %v11797_v12  ;;  %v5427_v19 = vmul.f32 %v10278_v24, %v5416_v34  ;;  %v5461_v39 = vadd.f32 0.2548296, %v5450_v40  ;;  %v11803_v60 = vld [vmem:[#allocation244_spill] sm:$0xff]  ;;  %v11810_v20 = vld [vmem:[#allocation134_spill] sm:$0xff] }
 0x991   :  { %v10351_v51 = vpop.eup %6768  ;;  %v3894_v50 = vmul.f32 %v9935_v43, %v3867_v15  ;;  %v10362_v57 = vand.u32 2147483647, %v10337_v8  ;;  %v11804_v34 = vld [vmem:[#allocation152_spill] sm:$0xff]  ;;  %v11826_v37 = vld [vmem:[#allocation214_spill] sm:$0xff] }
 0x992   :  { %v10318_v32 = vpop.permute.xlu1 %4900  ;;  %v4323_v12 = vadd.f32 %v4301_v25, %v4120_v33  ;;  %v4609_v40 = vmul.f32 %v11804_v34, %v11803_v60  ;;  %v4097_v33 = vmul.f32 %v9961_v45, %v4070_v31  ;;  %v10379_v25 = vpop.permute.xlu0 %4496  ;;  %v5438_v34 = vadd.f32 -0.28449672, %v5427_v19  ;;  %v11815_v31 = vld [vmem:[#allocation34_spill] sm:$0xff] }
 0x993   :  { %11784 = vst [vmem:[#allocation199_spill] sm:$0xff] %v10318_v32  ;;  %11812 = vst [vmem:[#allocation225_spill] sm:$0xff] %v10379_v25  ;;  %v11821_v25 = vld [vmem:[#allocation231_spill] sm:$0xff] }
 0x994   :  { %4707 = vrot.lane.b32.xlu1 %v9949_v47, %s6870_s16  ;;  %v4636_v19 = vmul.f32 %v10001_v2, %v4609_v40 }
 0x996   :  { %v10331_v41 = vpop.permute.xlu1 %5103 }
 0x997   :  { %11790 = vst [vmem:[#allocation26_spill] sm:$0xff] %v10331_v41  ;;  %v10368_v41 = vmul.f32 %v11806_v46, %v11805_v16  ;;  %v5472_v46 = vmul.f32 %v10225_v59, %v5461_v39  ;;  %v5386_v16 = vmul.f32 1.0614054, %v10351_v51  ;;  %v6771_v59 = vpop.eup %6770  ;;  %v11817_v39 = vld [vmem:[#allocation129_spill] sm:$0xff] }
 0x998   :  { %4910 = vrot.lane.b32.xlu1 %v9949_v47, %s6859_s20  ;;  %v11800_v47 = vld [vmem:[#allocation132_spill] sm:$0xff] }
 0x999   :  { %v10356_v26 = vmul.f32 %v11800_v47, %v11799_v30  ;;  %11807 = vst [vmem:[#allocation230_spill] sm:$0xff] %v10368_v41  ;;  %v5504_v47 = vmul.f32 1.442695, %v5493_v44  ;;  %v11808_v30 = vld [vmem:[#allocation47_spill] sm:$0xff]  ;;  %v4306_v44 = vmul.f32 %v9972_v18, %v4279_v6  ;;  %v4455_v41 = vadd.f32 %v4433_v58, %v4323_v12 }
 0x99a   :  { %v3955_v28 = vpop.permute.xlu1 %3954  ;;  %v3713_v15 = vadd.f32 %v3691_v48, %v11808_v30  ;;  %v11813_v48 = vld [vmem:[#allocation149_spill] sm:$0xff]  ;;  %v5527_v40 = vmul.f32 %v6771_v59, %v5472_v46  ;;  %v11828_v59 = vld [vmem:[#allocation144_spill] sm:$0xff] }
 0x99b   :  { %v4076_v0 = vmul.f32 %v11802_v53, %v3955_v28  ;;  %v10375_v28 = vmul.f32 %v11810_v20, %v11809_v22  ;;  %v4614_v30 = vmul.f32 %v11813_v48, %v10199_v29  ;;  %v11814_v20 = vld [vmem:[#allocation239_spill] sm:$0xff]  ;;  %v11818_v29 = vld [vmem:[#allocation54_spill] sm:$0xff]  ;;  %6772 = vpow2.f32 %v5504_v47 }
 0x99c   :  { %3522 = vrot.lane.b32.xlu1 %v10042_v5, %s6869_s15  ;;  %v3916_v8 = vadd.f32 %v3894_v50, %v3713_v15  ;;  %v11816_v50 = vld [vmem:[#allocation52_spill] sm:$0xff]  ;;  %v11819_v48 = vld [vmem:[#allocation138_spill] sm:$0xff] }
 0x99d   :  { %11811 = vst [vmem:[#allocation117_spill] sm:$0xff] %v10375_v28  ;;  %v4103_v53 = vmul.f32 %v9961_v45, %v4076_v0  ;;  %v5341_v0 = vmul.f32 0.3275911, %v10362_v57  ;;  %v4273_v28 = vmul.f32 %v11815_v31, %v11814_v20  ;;  %v10395_v6 = vmul.f32 %v11817_v39, %v11816_v50 }
 0x99e   :  { %v4696_v60 = vpop.permute.xlu1 %4695  ;;  %v4812_v20 = vmul.f32 %v11822_v14, %v11821_v25  ;;  %v4119_v58 = vadd.f32 %v4097_v33, %v3916_v8  ;;  %v5397_v31 = vadd.f32 -1.4531521, %v5386_v16  ;;  %v4641_v3 = vmul.f32 %v10001_v2, %v4614_v30  ;;  %v11824_v14 = vld [vmem:[#allocation246_spill] sm:$0xff] }
 0x99f   :  { %v4125_v22 = vadd.f32 %v4103_v53, %v10134_v49  ;;  %v4438_v49 = vmul.f32 %v11819_v48, %v11818_v29  ;;  %v11820_v53 = vld [vmem:[#allocation174_spill] sm:$0xff]  ;;  %v4300_v39 = vmul.f32 %v9972_v18, %v4273_v28  ;;  %v10407_v29 = vpop.permute.xlu0 %4902  ;;  %v5047_v16 = vmul.f32 %v10054_v11, %v5020_v61  ;;  %v11829_v48 = vld [vmem:[#allocation43_spill] sm:$0xff] }
 0x9a0   :  { %3769 = vrot.lane.b32.xlu1 %v10042_v5, %s6858_s19  ;;  %v4817_v32 = vmul.f32 %v11820_v53, %v4696_v60  ;;  %v4658_v60 = vadd.f32 %v4636_v19, %v4455_v41  ;;  %v11825_v8 = vld [vmem:[#allocation186_spill] sm:$0xff]  ;;  %v4839_v47 = vmul.f32 %v10032_v21, %v4812_v20  ;;  %v5408_v41 = vmul.f32 %v10351_v51, %v5397_v31 }
 0x9a1   :  { %v4328_v15 = vadd.f32 %v4306_v44, %v4125_v22  ;;  %v5449_v44 = vmul.f32 %v10278_v24, %v5438_v34  ;;  %v5352_v22 = vadd.f32 1.0, %v5341_v0  ;;  %v5015_v33 = vmul.f32 %v11825_v8, %v11824_v14  ;;  %v11832_v8 = vld [vmem:[#allocation233_spill] sm:$0xff] }
 0x9a2   :  { %v5102_v12 = vpop.permute.xlu1 %5101  ;;  %v4844_v46 = vmul.f32 %v10032_v21, %v4817_v32  ;;  %v4322_v34 = vadd.f32 %v4300_v39, %v4119_v58  ;;  %v5538_v19 = vsub.f32 1.0, %v5527_v40  ;;  %v11827_v32 = vld [vmem:[#allocation241_spill] sm:$0xff]  ;;  %v4861_v20 = vadd.f32 %v4839_v47, %v4658_v60  ;;  %v11835_v47 = vld [vmem:[#allocation250_spill] sm:$0xff] }
 0x9a3   :  { %v4460_v50 = vadd.f32 %v4438_v49, %v4328_v15  ;;  %v5223_v63 = vmul.f32 %v11826_v37, %v5102_v12  ;;  %v5460_v0 = vadd.f32 0.2548296, %v5449_v44  ;;  %6774 = vrcp.f32 %v5352_v22  ;;  %v11830_v49 = vld [vmem:[#allocation130_spill] sm:$0xff]  ;;  %v10438_v39 = vpop.permute.xlu0 %3964 }
 0x9a4   :  { %4175 = vrot.lane.b32.xlu1 %v10042_v5, %s6860_s21  ;;  %v4608_v15 = vmul.f32 %v11828_v59, %v11827_v32  ;;  %v10426_v53 = vmul.f32 %v11830_v49, %v11829_v48  ;;  %v5042_v58 = vmul.f32 %v10054_v11, %v5015_v33  ;;  %v11291_v40 = vmov -1.0   ;;  %v11831_v44 = vld [vmem:[#allocation94_spill] sm:$0xff] }
 0x9a5   :  { %v4663_v25 = vadd.f32 %v4641_v3, %v4460_v50  ;;  %v5485_v3 = vsub.f32 0.0, %v10268_v54  ;;  %v5250_v12 = vmul.f32 %v10071_v23, %v5223_v63  ;;  %v5318_v31 = vsel %vm5307_vm2, 1.0, %v11291_v40  ;;  %v11833_v33 = vld [vmem:[#allocation210_spill] sm:$0xff] }
 0x9a6   :  { %v10417_v28 = vpop.permute.xlu1 %3510  ;;  %v4454_v50 = vadd.f32 %v10356_v26, %v4322_v34  ;;  %v3671_v22 = vmul.f32 %v11831_v44, %v10260_v10  ;;  %v5419_v60 = vadd.f32 1.4214138, %v5408_v41  ;;  %v5471_v37 = vmul.f32 %v10278_v24, %v5460_v0  ;;  %v11836_v26 = vld [vmem:[#allocation167_spill] sm:$0xff]  ;;  %v11837_v10 = vld [vmem:[#allocation106_spill] sm:$0xff] }
 0x9a7   :  { %v4866_v30 = vadd.f32 %v4844_v46, %v4663_v25  ;;  %v5218_v25 = vmul.f32 %v11833_v33, %v11832_v8  ;;  %v5549_v63 = vmul.f32 %v5538_v19, %v5318_v31  ;;  %v4635_v17 = vmul.f32 %v10001_v2, %v4608_v15  ;;  %v11838_v41 = vld [vmem:[#allocation131_spill] sm:$0xff]  ;;  %v11839_v19 = vld [vmem:[#allocation140_spill] sm:$0xff]  ;;  %v6773_v15 = vpop.eup %6772 }
 0x9a8   :  { %4510 = vrot.lane.b32.xlu1 %v10042_v5, %s6861_s22  ;;  %v4811_v34 = vmul.f32 %v11836_v26, %v11835_v47  ;;  %v5285_v32 = vmul.f32 0.5, %v10097_v7  ;;  %v5496_v24 = vmul.f32 %v5485_v3, %v10268_v54  ;;  %v5064_v0 = vadd.f32 %v5042_v58, %v4861_v20  ;;  %v11841_v20 = vld [vmem:[#allocation173_spill] sm:$0xff] }
 0x9a9   :  { %v5069_v61 = vadd.f32 %v5047_v16, %v4866_v30  ;;  %v3874_v16 = vmul.f32 %v11837_v10, %v10276_v36  ;;  %v10456_v30 = vmul.f32 %v11838_v41, %v9777_v35  ;;  %v10462_v59 = vmul.f32 %v11839_v19, %v9797_v52  ;;  %v11840_v52 = vld [vmem:[#allocation243_spill] sm:$0xff] }
 0x9aa   :  { %v10440_v14 = vpop.permute.xlu1 %3757  ;;  %v4657_v36 = vadd.f32 %v4635_v17, %v4454_v50  ;;  %v3698_v48 = vmul.f32 %v9924_v38, %v3671_v22  ;;  %v5430_v35 = vmul.f32 %v10351_v51, %v5419_v60  ;;  %v5484_v7 = vsub.f32 0.0, %v10362_v57  ;;  %v10476_v50 = vpop.permute.xlu0 %4705  ;;  %v11843_v17 = vld [vmem:[#allocation73_spill] sm:$0xff] }
 0x9ab   :  { %v10444_v46 = vadd.f32 %v5250_v12, %v5069_v61  ;;  %v5245_v61 = vmul.f32 %v10071_v23, %v5218_v25  ;;  %v5526_v54 = vmul.f32 %v6773_v15, %v5471_v37  ;;  %v5560_v3 = vadd.f32 1.0, %v5549_v63  ;;  %v11842_v37 = vld [vmem:[#allocation3_spill] sm:$0xff]  ;;  %v11846_v15 = vld [vmem:[#allocation126_spill] sm:$0xff] }
 0x9ac   :  { %4916 = vrot.lane.b32.xlu1 %v10042_v5, %s6859_s20  ;;  %v5014_v58 = vmul.f32 %v11841_v20, %v11840_v52  ;;  %v4838_v12 = vmul.f32 %v10032_v21, %v4811_v34  ;;  %v3901_v31 = vmul.f32 %v9935_v43, %v3874_v16  ;;  %v10481_v44 = vmul.f32 0.5, %v10149_v4 }
 0x9ad   :  { %11834 = vst [vmem:[#allocation171_spill] sm:$0xff] %v10444_v46  ;;  %v5317_v22 = vsel %vm5306_vm3, 1.0, %v11291_v40  ;;  %v5510_v60 = vmul.f32 1.442695, %v5496_v24  ;;  %v10486_v8 = vadd.f32 %v5245_v61, %v5064_v0  ;;  %v10488_v33 = vpop.eup %6774  ;;  %v4077_v63 = vmul.f32 %v11842_v37, %v10047_v55  ;;  %v11844_v24 = vld [vmem:[#allocation252_spill] sm:$0xff]  ;;  %v11845_v0 = vld [vmem:[#allocation177_spill] sm:$0xff] }
 0x9ae   :  { %v10466_v49 = vpop.permute.xlu1 %4163  ;;  %v4860_v25 = vadd.f32 %v4838_v12, %v4657_v36  ;;  %v3720_v47 = vadd.f32 %v3698_v48, %v11843_v17  ;;  %v5441_v34 = vadd.f32 -0.28449672, %v5430_v35  ;;  %v5495_v4 = vmul.f32 %v5484_v7, %v10362_v57  ;;  %v11849_v61 = vld [vmem:[#allocation249_spill] sm:$0xff]  ;;  %v11850_v7 = vld [vmem:[#allocation84_spill] sm:$0xff]  ;;  %v10519_v20 = vpop.permute.xlu0 %4908  ;;  %v11854_v17 = vld [vmem:[#allocation91_spill] sm:$0xff] }
 0x9af   :  { %v5537_v10 = vsub.f32 1.0, %v5526_v54  ;;  %v10496_v16 = vmul.f32 %v5560_v3, %v5285_v32  ;;  %v10501_v1 = vsel %vm5309_vm4, 1.0, %v11291_v40  ;;  %v5041_v41 = vmul.f32 %v10054_v11, %v5014_v58  ;;  %v11847_v32 = vld [vmem:[#allocation254_spill] sm:$0xff]  ;;  %11851 = vst [vmem:[#allocation148_spill] sm:$0xff] %v10519_v20  ;;  %v11878_v46 = vld [vmem:[#allocation199_spill] sm:$0xff] }
 0x9b0   :  { %3970 = vrot.lane.b32.xlu1 %v10087_v42, %s6868_s3  ;;  %v5217_v55 = vmul.f32 %v11845_v0, %v11844_v24  ;;  %v3923_v19 = vadd.f32 %v3901_v31, %v3720_v47  ;;  %v4280_v36 = vmul.f32 %v11846_v15, %v10291_v56  ;;  %6776 = vpow2.f32 %v5510_v60  ;;  %v11852_v31 = vld [vmem:[#allocation255_spill] sm:$0xff]  ;;  %v11855_v0 = vld [vmem:[#allocation245_spill] sm:$0xff]  ;;  %v11879_v20 = vld [vmem:[#allocation190_spill] sm:$0xff] }
 0x9b1   :  { %v10511_v57 = vmul.f32 0.70710677, %v10486_v8  ;;  %v3667_v48 = vmul.f32 %v11848_v13, %v11847_v32  ;;  %v5385_v35 = vmul.f32 1.0614054, %v10488_v33  ;;  %v3666_v54 = vmul.f32 %v11850_v7, %v11849_v61  ;;  %v11853_v60 = vld [vmem:[#allocation103_spill] sm:$0xff]  ;;  %v11856_v15 = vld [vmem:[#allocation121_spill] sm:$0xff] }
 0x9b2   :  { %v10493_v26 = vpop.permute.xlu1 %4498  ;;  %v5063_v3 = vadd.f32 %v5041_v41, %v4860_v25  ;;  %v4104_v52 = vmul.f32 %v9961_v45, %v4077_v63  ;;  %v5452_v58 = vmul.f32 %v10351_v51, %v5441_v34  ;;  %v5508_v12 = vmul.f32 1.442695, %v5495_v4  ;;  %v11857_v13 = vld [vmem:[#allocation108_spill] sm:$0xff]  ;;  %v11858_v61 = vld [vmem:[#allocation251_spill] sm:$0xff] }
 0x9b3   :  { %v3870_v37 = vmul.f32 %v11853_v60, %v11852_v31  ;;  %v3672_v47 = vmul.f32 %v11854_v17, %v10299_v9  ;;  %v5548_v24 = vmul.f32 %v5537_v10, %v5317_v22  ;;  %v4073_v32 = vmul.f32 %v11856_v15, %v11855_v0  ;;  %v11859_v7 = vld [vmem:[#allocation104_spill] sm:$0xff]  ;;  %v11861_v0 = vld [vmem:[#allocation63_spill] sm:$0xff]  ;;  %v11862_v15 = vld [vmem:[#allocation158_spill] sm:$0xff] }
 0x9b4   :  { %4711 = vrot.lane.b32.xlu1 %v10087_v42, %s6870_s16  ;;  %v5244_v25 = vmul.f32 %v10071_v23, %v5217_v55  ;;  %v4126_v63 = vadd.f32 %v4104_v52, %v3923_v19  ;;  %v4307_v41 = vmul.f32 %v9972_v18, %v4280_v36  ;;  %v10535_v34 = vand.u32 2147483647, %v10511_v57 }
 0x9b5   :  { %v3694_v4 = vmul.f32 %v9924_v38, %v3667_v48  ;;  %v3875_v9 = vmul.f32 %v11857_v13, %v10316_v27  ;;  %v5396_v22 = vadd.f32 -1.4531521, %v5385_v35  ;;  %v3693_v10 = vmul.f32 %v9924_v38, %v3666_v54  ;;  %v11860_v35 = vld [vmem:[#allocation120_spill] sm:$0xff] }
 0x9b6   :  { %v10521_v56 = vpop.permute.xlu1 %4904  ;;  %v3869_v55 = vmul.f32 %v11859_v7, %v11858_v61  ;;  %v10543_v19 = vadd.f32 %v5244_v25, %v5063_v3  ;;  %v5463_v52 = vadd.f32 0.2548296, %v5452_v58  ;;  %6778 = vpow2.f32 %v5508_v12  ;;  %v10556_v25 = vpop.permute.xlu0 %3512  ;;  %v11863_v12 = vld [vmem:[#allocation69_spill] sm:$0xff] }
 0x9b7   :  { %v3897_v31 = vmul.f32 %v9935_v43, %v3870_v37  ;;  %v3699_v60 = vmul.f32 %v9924_v38, %v3672_v47  ;;  %v10549_v48 = vadd.f32 1.0, %v5548_v24  ;;  %v4100_v27 = vmul.f32 %v9961_v45, %v4073_v32  ;;  %v11864_v24 = vld [vmem:[#allocation49_spill] sm:$0xff] }
 0x9b8   :  { %4914 = vrot.lane.b32.xlu1 %v10087_v42, %s6859_s20  ;;  %v4072_v54 = vmul.f32 %v11860_v35, %v10011_v62  ;;  %v4329_v17 = vadd.f32 %v4307_v41, %v4126_v63  ;;  %v4615_v3 = vmul.f32 %v11862_v15, %v11861_v0  ;;  %v5344_v58 = vmul.f32 0.3275911, %v10535_v34  ;;  %v11865_v35 = vld [vmem:[#allocation68_spill] sm:$0xff]  ;;  %v11866_v0 = vld [vmem:[#allocation122_spill] sm:$0xff] }
 0x9b9   :  { %v3716_v38 = vadd.f32 %v3694_v4, %v11863_v12  ;;  %v3902_v37 = vmul.f32 %v9935_v43, %v3875_v9  ;;  %v5407_v47 = vmul.f32 %v10488_v33, %v5396_v22  ;;  %v3715_v32 = vadd.f32 %v3693_v10, %v11864_v24  ;;  %v11867_v9 = vld [vmem:[#allocation9_spill] sm:$0xff]  ;;  %v11868_v22 = vld [vmem:[#allocation40_spill] sm:$0xff]  ;;  %v11870_v24 = vld [vmem:[#allocation14_spill] sm:$0xff] }
 0x9ba   :  { %v10545_v36 = vpop.permute.xlu1 %5107  ;;  %v3896_v62 = vmul.f32 %v9935_v43, %v3869_v55  ;;  %v10567_v63 = vmul.f32 0.70710677, %v10543_v19  ;;  %v10570_v13 = vmul.f32 %v10351_v51, %v5463_v52  ;;  %v10572_v61 = vpop.eup %6776  ;;  %v3721_v4 = vadd.f32 %v3699_v60, %v11865_v35  ;;  %v11869_v10 = vld [vmem:[#allocation257_spill] sm:$0xff]  ;;  %v11871_v52 = vld [vmem:[#allocation150_spill] sm:$0xff] }
 0x9bb   :  { %v3919_v7 = vadd.f32 %v3897_v31, %v3716_v38  ;;  %v4281_v15 = vmul.f32 %v11867_v9, %v11866_v0  ;;  %v4276_v43 = vmul.f32 %v11870_v24, %v11869_v10  ;;  %v4099_v55 = vmul.f32 %v9961_v45, %v4072_v54  ;;  %v11872_v9 = vld [vmem:[#allocation253_spill] sm:$0xff]  ;;  %v11874_v54 = vld [vmem:[#allocation260_spill] sm:$0xff] }
 0x9bc   :  { %5117 = vrot.lane.b32.xlu1 %v10087_v42, %s6871_s17  ;;  %v4461_v40 = vadd.f32 %v10426_v53, %v4329_v17  ;;  %v4642_v51 = vmul.f32 %v10001_v2, %v4615_v3  ;;  %v5355_v31 = vadd.f32 1.0, %v5344_v58  ;;  %v3924_v38 = vadd.f32 %v3902_v37, %v3721_v4  ;;  %v11875_v24 = vld [vmem:[#allocation176_spill] sm:$0xff]  ;;  %v10593_v17 = vpop.permute.xlu0 %3759  ;;  %v11876_v37 = vld [vmem:[#allocation225_spill] sm:$0xff]  ;;  %v11877_v4 = vld [vmem:[#allocation151_spill] sm:$0xff] }
 0x9bd   :  { %v5418_v35 = vadd.f32 1.4214138, %v5407_v47  ;;  %v3918_v0 = vadd.f32 %v3896_v62, %v3715_v32  ;;  %v4818_v53 = vmul.f32 %v11875_v24, %v11874_v54  ;;  %v4122_v42 = vadd.f32 %v4100_v27, %v3919_v7  ;;  %v11880_v7 = vld [vmem:[#allocation25_spill] sm:$0xff] }
 0x9be   :  { %v3959_v41 = vpop.permute.xlu1 %3958  ;;  %v4308_v58 = vmul.f32 %v9972_v18, %v4281_v15  ;;  %v4303_v32 = vmul.f32 %v9972_v18, %v4276_v43  ;;  %6780 = vrcp.f32 %v5355_v31  ;;  %vm5311_vm7 = vcmp.ge.f32.partialorder %v10511_v57, 0.0 }
 0x9bf   :  { %v4078_v12 = vmul.f32 %v11868_v22, %v3959_v41  ;;  %v10587_v41 = vand.u32 2147483647, %v10567_v63  ;;  %v11873_v22 = vld [vmem:[#allocation39_spill] sm:$0xff]  ;;  %v4121_v62 = vadd.f32 %v4099_v55, %v3918_v0  ;;  %v5429_v54 = vmul.f32 %v10488_v33, %v5418_v35  ;;  %v11881_v55 = vld [vmem:[#allocation26_spill] sm:$0xff] }
 0x9c0   :  { %3526 = vrot.lane.b32.xlu1 %v11871_v52, %s6869_s15  ;;  %v4275_v10 = vmul.f32 %v11873_v22, %v11872_v9  ;;  %v5021_v9 = vmul.f32 %v11879_v20, %v11878_v46  ;;  %v10603_v22 = vpop.eup %6778  ;;  %v11884_v0 = vld [vmem:[#allocation154_spill] sm:$0xff]  ;;  %vm5310_vm8 = vcmp.ge.f32.partialorder %v10567_v63, 0.0  ;;  %v11974_v63 = vld [vmem:[#allocation148_spill] sm:$0xff] }
 0x9c1   :  { %v4105_v60 = vmul.f32 %v9961_v45, %v4078_v12  ;;  %v4616_v45 = vmul.f32 %v11877_v4, %v11876_v37  ;;  %v4664_v12 = vadd.f32 %v4642_v51, %v4461_v40  ;;  %v4845_v40 = vmul.f32 %v10032_v21, %v4818_v53  ;;  %v11882_v51 = vld [vmem:[#allocation216_spill] sm:$0xff] }
 0x9c2   :  { %v4700_v3 = vpop.permute.xlu1 %4699  ;;  %v4302_v43 = vmul.f32 %v9972_v18, %v4275_v10  ;;  %v5224_v46 = vmul.f32 %v11882_v51, %v11881_v55  ;;  %v4325_v37 = vadd.f32 %v4303_v32, %v4122_v42  ;;  %v5048_v18 = vmul.f32 %v10054_v11, %v5021_v9  ;;  %v10619_v10 = vpop.permute.xlu0 %4165  ;;  %v11886_v53 = vld [vmem:[#allocation92_spill] sm:$0xff]  ;;  %v11890_v32 = vld [vmem:[#allocation85_spill] sm:$0xff] }
 0x9c3   :  { %v4127_v47 = vadd.f32 %v4105_v60, %v3924_v38  ;;  %v4819_v15 = vmul.f32 %v11880_v7, %v4700_v3  ;;  %v5343_v38 = vmul.f32 0.3275911, %v10587_v41  ;;  %v11883_v60 = vld [vmem:[#allocation258_spill] sm:$0xff]  ;;  %v4643_v31 = vmul.f32 %v10001_v2, %v4616_v45  ;;  %v11887_v51 = vld [vmem:[#allocation196_spill] sm:$0xff] }
 0x9c4   :  { %3773 = vrot.lane.b32.xlu1 %v11871_v52, %s6858_s19  ;;  %v4611_v24 = vmul.f32 %v11884_v0, %v11883_v60  ;;  %v4324_v4 = vadd.f32 %v4302_v43, %v4121_v62  ;;  %v3673_v7 = vmul.f32 %v11886_v53, %v10417_v28  ;;  %v11888_v60 = vld [vmem:[#allocation247_spill] sm:$0xff]  ;;  %v11891_v62 = vld [vmem:[#allocation146_spill] sm:$0xff]  ;;  %v5251_v9 = vmul.f32 %v10071_v23, %v5224_v46  ;;  %v11894_v53 = vld [vmem:[#allocation117_spill] sm:$0xff] }
 0x9c5   :  { %v4330_v27 = vadd.f32 %v4308_v58, %v4127_v47  ;;  %v11885_v58 = vld [vmem:[#allocation193_spill] sm:$0xff]  ;;  %v4867_v47 = vadd.f32 %v4845_v40, %v4664_v12  ;;  %v4846_v45 = vmul.f32 %v10032_v21, %v4819_v15  ;;  %v4610_v12 = vmul.f32 %v11891_v62, %v11890_v32  ;;  %v11892_v28 = vld [vmem:[#allocation107_spill] sm:$0xff] }
 0x9c6   :  { %v5106_v20 = vpop.permute.xlu1 %5105  ;;  %v5022_v3 = vmul.f32 %v11885_v58, %v10407_v29  ;;  %v5440_v43 = vadd.f32 -0.28449672, %v5429_v54  ;;  %v5354_v40 = vadd.f32 1.0, %v5343_v38  ;;  %v11893_v58 = vld [vmem:[#allocation230_spill] sm:$0xff] }
 0x9c7   :  { %v4462_v35 = vadd.f32 %v10462_v59, %v4330_v27  ;;  %v5225_v29 = vmul.f32 %v11887_v51, %v5106_v20  ;;  %v11889_v59 = vld [vmem:[#allocation175_spill] sm:$0xff]  ;;  %v4457_v20 = vadd.f32 %v11893_v58, %v4325_v37  ;;  %v4456_v51 = vadd.f32 %v11894_v53, %v4324_v4  ;;  %v10645_v54 = vld [vmem:[%s11228_s2 + $0x6] ss:$0 sm:$0xff] }
 0x9c8   :  { %4179 = vrot.lane.b32.xlu1 %v11871_v52, %s6860_s21  ;;  %v4814_v42 = vmul.f32 %v11889_v59, %v11888_v60  ;;  %v5049_v0 = vmul.f32 %v10054_v11, %v5022_v3  ;;  %v5070_v60 = vadd.f32 %v5048_v18, %v4867_v47  ;;  %v3700_v38 = vmul.f32 %v10645_v54, %v3673_v7  ;;  %v11895_v37 = vld [vmem:[#allocation51_spill] sm:$0xff]  ;;  %v11896_v4 = vld [vmem:[#allocation170_spill] sm:$0xff]  ;;  %v10659_v32 = vpop.eup %6780 }
 0x9c9   :  { %v4665_v55 = vadd.f32 %v4643_v31, %v4462_v35  ;;  %v3876_v31 = vmul.f32 %v11892_v28, %v10440_v14  ;;  %v4638_v35 = vmul.f32 %v10001_v2, %v4611_v24  ;;  %v5252_v14 = vmul.f32 %v10071_v23, %v5225_v29  ;;  %v11897_v7 = vld [vmem:[#allocation259_spill] sm:$0xff]  ;;  %v11900_v28 = vld [vmem:[#allocation229_spill] sm:$0xff] }
 0x9ca   :  { %v10632_v27 = vpop.permute.xlu1 %3514  ;;  %v5529_v3 = vmul.f32 %v10572_v61, %v10570_v13  ;;  %v4637_v24 = vmul.f32 %v10001_v2, %v4610_v12  ;;  %v4813_v47 = vmul.f32 %v11896_v4, %v11895_v37  ;;  %v5273_v18 = vadd.f32 %v5251_v9, %v5070_v60  ;;  %v11898_v29 = vld [vmem:[#allocation179_spill] sm:$0xff]  ;;  %v10666_v2 = vld [vmem:[%s11228_s2 + $0x7] ss:$0 sm:$0xff] }
 0x9cb   :  { %v4868_v15 = vadd.f32 %v4846_v45, %v4665_v55  ;;  %v10654_v55 = vpop.permute.xlu0 %4500  ;;  %v5451_v59 = vmul.f32 %v10488_v33, %v5440_v43  ;;  %6782 = vrcp.f32 %v5354_v40  ;;  %v5017_v62 = vmul.f32 %v11898_v29, %v11897_v7  ;;  %v11899_v43 = vld [vmem:[#allocation29_spill] sm:$0xff]  ;;  %v11902_v53 = vld [vmem:[#allocation75_spill] sm:$0xff]  ;;  %v11907_v29 = vld [vmem:[#allocation128_spill] sm:$0xff] }
 0x9cc   :  { %4514 = vrot.lane.b32.xlu1 %v11871_v52, %s6861_s22  ;;  %v3903_v13 = vmul.f32 %v10666_v2, %v3876_v31  ;;  %v4841_v12 = vmul.f32 %v10032_v21, %v4814_v42  ;;  %v4660_v9 = vadd.f32 %v4638_v35, %v4457_v20  ;;  %v5570_v40 = vmul.f32 %v10549_v48, %v10481_v44  ;;  %v11903_v31 = vld [vmem:[#allocation78_spill] sm:$0xff]  ;;  %v11906_v35 = vld [vmem:[#allocation188_spill] sm:$0xff] }
 0x9cd   :  { %v5071_v46 = vadd.f32 %v5049_v0, %v4868_v15  ;;  %v4659_v0 = vadd.f32 %v4637_v24, %v4456_v51  ;;  %v11901_v15 = vld [vmem:[#allocation32_spill] sm:$0xff]  ;;  %v3722_v60 = vadd.f32 %v3700_v38, %v11902_v53  ;;  %v5540_v4 = vsub.f32 1.0, %v5529_v3  ;;  %v11905_v20 = vld [vmem:[#allocation62_spill] sm:$0xff] }
 0x9ce   :  { %v10656_v45 = vpop.permute.xlu1 %3761  ;;  %v4079_v58 = vmul.f32 %v11901_v15, %v11900_v28  ;;  %v4840_v42 = vmul.f32 %v10032_v21, %v4813_v47  ;;  %v5016_v51 = vmul.f32 %v11906_v35, %v11905_v20  ;;  %v5581_v7 = vmul.f32 %v5570_v40, %v5273_v18  ;;  %v11909_v15 = vld [vmem:[#allocation183_spill] sm:$0xff]  ;;  %v11914_v20 = vld [vmem:[#allocation6_spill] sm:$0xff] }
 0x9cf   :  { %v5274_v61 = vadd.f32 %v5252_v14, %v5071_v46  ;;  %v11904_v46 = vld [vmem:[#allocation185_spill] sm:$0xff]  ;;  %v5044_v44 = vmul.f32 %v10054_v11, %v5017_v62  ;;  %v3925_v48 = vadd.f32 %v3903_v13, %v3722_v60  ;;  %v4282_v38 = vmul.f32 %v11907_v29, %v10466_v49  ;;  %v10698_v18 = vld [vmem:[%s11228_s2 + $0x8] ss:$0 sm:$0xff]  ;;  %v11915_v29 = vld [vmem:[#allocation110_spill] sm:$0xff] }
 0x9d0   :  { %3974 = vrot.lane.b32.xlu1 %v11899_v43, %s6868_s3  ;;  %v5220_v14 = vmul.f32 %v11904_v46, %v11903_v31  ;;  %v5462_v28 = vadd.f32 0.2548296, %v5451_v59  ;;  %v4862_v3 = vadd.f32 %v4840_v42, %v4659_v0  ;;  %v10690_v31 = vpop.permute.xlu0 %5109  ;;  %v5487_v47 = vsub.f32 0.0, %v10535_v34  ;;  %v11911_v60 = vld [vmem:[#allocation57_spill] sm:$0xff]  ;;  %v11913_v42 = vld [vmem:[#allocation163_spill] sm:$0xff] }
 0x9d1   :  { %v5582_v37 = vmul.f32 %v10496_v16, %v5274_v61  ;;  %v4863_v16 = vadd.f32 %v4841_v12, %v4660_v9  ;;  %v11908_v61 = vld [vmem:[#allocation261_spill] sm:$0xff]  ;;  %v4106_v49 = vmul.f32 %v10698_v18, %v4079_v58  ;;  %v5551_v59 = vmul.f32 %v5540_v4, %v10501_v1  ;;  %v10718_v4 = vld [vmem:[%s11228_s2 + $0x9] ss:$0 sm:$0xff] }
 0x9d2   :  { %v10683_v24 = vpop.permute.xlu1 %4167  ;;  %v5219_v53 = vmul.f32 %v11909_v15, %v11908_v61  ;;  %v5388_v62 = vmul.f32 1.0614054, %v10659_v32  ;;  %v5247_v13 = vmul.f32 %v10071_v23, %v5220_v14  ;;  %v5043_v12 = vmul.f32 %v10054_v11, %v5016_v51  ;;  %v11910_v9 = vld [vmem:[#allocation93_spill] sm:$0xff] }
 0x9d3   :  { %v6410_v21 = vpack.c.bf16 %v5582_v37, %v5581_v7  ;;  %v3674_v0 = vmul.f32 %v11910_v9, %v10556_v25  ;;  %v11912_v37 = vld [vmem:[#allocation141_spill] sm:$0xff]  ;;  %v5287_v58 = vmul.f32 0.5, %v11913_v42  ;;  %vm5308_vm5 = vcmp.ge.f32.partialorder %v11914_v20, 0.0 }
 0x9d4   :  { %5119 = vrot.lane.b32.xlu1 %v10042_v5, %s6871_s17  ;;  %v10711_v46 = vmul.f32 %v11912_v37, %v11911_v60  ;;  %v4128_v1 = vadd.f32 %v4106_v49, %v3925_v48  ;;  %v4309_v11 = vmul.f32 %v10718_v4, %v4282_v38  ;;  %v5066_v25 = vadd.f32 %v5044_v44, %v4863_v16  ;;  %v11916_v38 = vld [vmem:[#allocation256_spill] sm:$0xff]  ;;  %v11925_v37 = vld [vmem:[#allocation262_spill] sm:$0xff]  ;;  %v11926_v42 = vld [vmem:[#allocation105_spill] sm:$0xff] }
 0x9d5   :  { %6411 = vmatprep.subr.bf16.mxu0 %v6410_v21  ;;  %v5065_v14 = vadd.f32 %v5043_v12, %v4862_v3  ;;  %v5246_v35 = vmul.f32 %v10071_v23, %v5219_v53  ;;  %v5473_v51 = vmul.f32 %v10488_v33, %v5462_v28  ;;  %v10725_v7 = vpop.eup %6782  ;;  %v5498_v48 = vmul.f32 %v5487_v47, %v10535_v34  ;;  %v11919_v23 = vld [vmem:[#allocation61_spill] sm:$0xff]  ;;  %v11920_v3 = vld [vmem:[#allocation96_spill] sm:$0xff]  ;;  %v10737_v33 = vpop.permute.xlu0 %3968  ;;  %v11921_v34 = vld [vmem:[#allocation227_spill] sm:$0xff] }
 0x9d6   :  { %v10707_v40 = vpop.permute.xlu1 %4502  ;;  %6413 = vmatpush3.bf16.msra.mxu0 %v6410_v21  ;;  %v3877_v61 = vmul.f32 %v11915_v29, %v10593_v17  ;;  %v5562_v15 = vadd.f32 1.0, %v5551_v59  ;;  %v5399_v49 = vadd.f32 -1.4531521, %v5388_v62  ;;  %v11917_v21 = vld [vmem:[#allocation123_spill] sm:$0xff]  ;;  %v10732_v16 = vadd.f32 %v5247_v13, %v5066_v25  ;;  %v11923_v13 = vld [vmem:[#allocation160_spill] sm:$0xff] }
 0x9d7   :  { %v4075_v44 = vmul.f32 %v11917_v21, %v11916_v38  ;;  %v3669_v53 = vmul.f32 %v11920_v3, %v11919_v23  ;;  %v3701_v12 = vmul.f32 %v10645_v54, %v3674_v0  ;;  %v10742_v47 = vmul.f32 0.5, %v11921_v34  ;;  %v11927_v21 = vld [vmem:[#allocation70_spill] sm:$0xff]  ;;  %v11932_v34 = vld [vmem:[#allocation184_spill] sm:$0xff] }
 0x9d8   :  { %4715 = vrot.lane.b32.xlu1 %v11899_v43, %s6870_s16  ;;  %11918 = vst [vmem:[#allocation45_spill] sm:$0xff] %v10732_v16  ;;  %v11922_v17 = vmov -1.0   ;;  %v4331_v62 = vadd.f32 %v4309_v11, %v4128_v1  ;;  %v4617_v9 = vmul.f32 %v11923_v13, %v10493_v26  ;;  %v10749_v60 = vadd.f32 %v5246_v35, %v5065_v14 }
 0x9d9   :  { %v5319_v59 = vsel %vm5308_vm5, 1.0, %v11922_v17  ;;  %v3872_v0 = vmul.f32 %v11926_v42, %v11925_v37  ;;  %v5528_v25 = vmul.f32 %v10603_v22, %v5473_v51  ;;  %v5387_v29 = vmul.f32 1.0614054, %v10725_v7  ;;  %v11928_v51 = vld [vmem:[#allocation12_spill] sm:$0xff] }
 0x9da   :  { %v10739_v28 = vpop.permute.xlu1 %5111  ;;  %11924 = vst [vmem:[#allocation50_spill] sm:$0xff] %v10749_v60  ;;  %v10757_v38 = vmul.f32 1.442695, %v5498_v48  ;;  %v3904_v20 = vmul.f32 %v10666_v2, %v3877_v61  ;;  %v10760_v1 = vmul.f32 %v5562_v15, %v5287_v58  ;;  %v5410_v26 = vmul.f32 %v10659_v32, %v5399_v49  ;;  %v10775_v58 = vld [vmem:[%s11228_s2 + $0xb] ss:$0 sm:$0xff]  ;;  %v11929_v15 = vld [vmem:[#allocation24_spill] sm:$0xff] }
 0x9db   :  { %v4102_v11 = vmul.f32 %v10698_v18, %v4075_v44  ;;  %v10765_v14 = vmul.f32 0.70710677, %v10732_v16  ;;  %v3696_v35 = vmul.f32 %v10645_v54, %v3669_v53  ;;  %v3723_v23 = vadd.f32 %v3701_v12, %v11927_v21  ;;  %v10783_v12 = vpop.permute.xlu0 %4709  ;;  %v11945_v16 = vld [vmem:[#allocation156_spill] sm:$0xff] }
 0x9dc   :  { %4918 = vrot.lane.b32.xlu1 %v11899_v43, %s6859_s20  ;;  %v4283_v48 = vmul.f32 %v11928_v51, %v10619_v10  ;;  %v4463_v3 = vadd.f32 %v10456_v30, %v4331_v62  ;;  %v4644_v61 = vmul.f32 %v10775_v58, %v4617_v9  ;;  %v10780_v44 = vmul.f32 0.70710677, %v10749_v60  ;;  %11931 = vst [vmem:[#allocation56_spill] sm:$0xff] %v10783_v12  ;;  %v11933_v62 = vld [vmem:[#allocation192_spill] sm:$0xff]  ;;  %v11944_v60 = vld [vmem:[#allocation53_spill] sm:$0xff] }
 0x9dd   :  { %v3899_v53 = vmul.f32 %v10666_v2, %v3872_v0  ;;  %v5539_v30 = vsub.f32 1.0, %v5528_v25  ;;  %v5398_v10 = vadd.f32 -1.4531521, %v5387_v29  ;;  %v4820_v13 = vmul.f32 %v11933_v62, %v11932_v34  ;;  %v11935_v0 = vld [vmem:[#allocation153_spill] sm:$0xff]  ;;  %v11938_v62 = vld [vmem:[#allocation124_spill] sm:$0xff] }
 0x9de   :  { %v3963_v22 = vpop.permute.xlu1 %3962  ;;  %11930 = vst [vmem:[#allocation136_spill] sm:$0xff] %v10780_v44  ;;  %v3926_v37 = vadd.f32 %v3904_v20, %v3723_v23  ;;  %v5421_v42 = vadd.f32 1.4214138, %v5410_v26  ;;  %v10791_v21 = vand.u32 2147483647, %v10765_v14  ;;  %v4310_v25 = vmul.f32 %v10718_v4, %v4283_v48  ;;  %v5592_v26 = vld [vmem:[%s11229_s4] sm:$0xff] }
 0x9df   :  { %v4080_v49 = vmul.f32 %v11929_v15, %v3963_v22  ;;  %v11934_v22 = vld [vmem:[#allocation71_spill] sm:$0xff]  ;;  %v4618_v15 = vmul.f32 %v11935_v0, %v10654_v55  ;;  %v4666_v29 = vadd.f32 %v4644_v61, %v4463_v3  ;;  %v10803_v23 = vand.u32 2147483647, %v10780_v44  ;;  %6380 = vmatprep.mubr.msk.f32.mxu0 %vm5596_vm6, %v5592_v26  ;;  %v11939_v3 = vld [vmem:[#allocation218_spill] sm:$0xff] }
 0x9e0   :  { %5121 = vrot.lane.b32.xlu1 %v11899_v43, %s6871_s17  ;;  %v3718_v51 = vadd.f32 %v3696_v35, %v11934_v22  ;;  %v11936_v43 = vld [vmem:[#allocation200_spill] sm:$0xff]  ;;  %v5409_v48 = vmul.f32 %v10725_v7, %v5398_v10  ;;  %v5226_v61 = vmul.f32 %v11939_v3, %v10545_v36  ;;  %v5346_v22 = vmul.f32 0.3275911, %v10791_v21  ;;  %v10822_v10 = vpop.permute.xlu0 %3516  ;;  %v10846_v3 = vld [vmem:[%s11228_s2 + $0xe] ss:$0 sm:$0xff] }
 0x9e1   :  { %v4107_v9 = vmul.f32 %v10698_v18, %v4080_v49  ;;  %v5023_v34 = vmul.f32 %v11936_v43, %v10521_v56  ;;  %v11937_v49 = vld [vmem:[#allocation66_spill] sm:$0xff]  ;;  %v10814_v56 = vld [vmem:[%s11228_s2 + $0xc] ss:$0 sm:$0xff]  ;;  %v5550_v26 = vmul.f32 %v5539_v30, %v5319_v59  ;;  %v5345_v30 = vmul.f32 0.3275911, %v10803_v23 }
 0x9e2   :  { %v4704_v5 = vpop.permute.xlu1 %4703  ;;  %v3921_v35 = vadd.f32 %v3899_v53, %v3718_v51  ;;  %v4278_v55 = vmul.f32 %v11938_v62, %v11937_v49  ;;  %v4847_v43 = vmul.f32 %v10814_v56, %v4820_v13  ;;  %v4645_v51 = vmul.f32 %v10775_v58, %v4618_v15  ;;  %v10828_v13 = vld [vmem:[%s11228_s2 + $0xd] ss:$0 sm:$0xff]  ;;  %v5698_v15 = vld [vmem:[%s11222_s5 + $0x260] sm:$0xff] }
 0x9e3   :  { %v4129_v20 = vadd.f32 %v4107_v9, %v3926_v37  ;;  %v11940_v37 = vld [vmem:[#allocation194_spill] sm:$0xff]  ;;  %v5432_v49 = vmul.f32 %v10659_v32, %v5421_v42  ;;  %v5050_v36 = vmul.f32 %v10828_v13, %v5023_v34  ;;  %v5699_v59 = vld [vmem:[%s11222_s5 + $0x268] sm:$0xff]  ;;  %5704 = vperm.xlu0 %6502, %v5698_v15   ;;  %v4613_v12 = vmul.f32 %v11945_v16, %v11944_v60 }
 0x9e4   :  { %5123 = vrot.lane.b32.xlu1 %v11871_v52, %s6871_s17  ;;  %v4821_v9 = vmul.f32 %v11940_v37, %v4704_v5  ;;  %v4869_v62 = vadd.f32 %v4847_v43, %v4666_v29  ;;  %v4124_v42 = vadd.f32 %v4102_v11, %v3921_v35  ;;  %v4305_v29 = vmul.f32 %v10718_v4, %v4278_v55  ;;  %v5701_v11 = vld [vmem:[%s11222_s5 + $0x278] sm:$0xff]  ;;  %v5700_v35 = vld [vmem:[%s11222_s5 + $0x270] sm:$0xff]  ;;  %v10864_v44 = vpop.permute.xlu0 %3763 }
 0x9e5   :  { %v4332_v53 = vadd.f32 %v4310_v25, %v4129_v20  ;;  %v11941_v25 = vld [vmem:[#allocation195_spill] sm:$0xff]  ;;  %v5420_v43 = vadd.f32 1.4214138, %v5409_v48  ;;  %v5357_v55 = vadd.f32 1.0, %v5346_v22  ;;  %v5443_v15 = vadd.f32 -0.28449672, %v5432_v49 }
 0x9e6   :  { %v4907_v0 = vpop.permute.xlu1 %4906  ;;  %v4327_v52 = vadd.f32 %v4305_v29, %v4124_v42  ;;  %6784 = vpow2.f32 %v10757_v38  ;;  %v11948_v42 = vld [vmem:[#allocation172_spill] sm:$0xff]  ;;  %v11949_v38 = vld [vmem:[#allocation19_spill] sm:$0xff]  ;;  %vm5313_vm9 = vcmp.ge.f32.partialorder %v10765_v14, 0.0 }
 0x9e7   :  { %v4464_v5 = vadd.f32 %v10711_v46, %v4332_v53  ;;  %v5024_v20 = vmul.f32 %v11941_v25, %v4907_v0  ;;  %v11942_v46 = vld [vmem:[#allocation206_spill] sm:$0xff]  ;;  %v5253_v53 = vmul.f32 %v10846_v3, %v5226_v61  ;;  %v4848_v0 = vmul.f32 %v10814_v56, %v4821_v9  ;;  %v11943_v61 = vld [vmem:[#allocation101_spill] sm:$0xff]  ;;  %5719 = vperm.xlu0 %6502, %v5701_v11  }
 0x9e8   :  { %5709 = vperm.xlu1 %6503, %v5699_v59   ;;  %v5227_v34 = vmul.f32 %v11942_v46, %v10690_v31  ;;  %v5486_v31 = vsub.f32 0.0, %v10587_v41  ;;  %v5561_v25 = vadd.f32 1.0, %v5550_v26  ;;  %v5072_v59 = vadd.f32 %v5050_v36, %v4869_v62  ;;  %v11946_v62 = vld [vmem:[#allocation109_spill] sm:$0xff] }
 0x9e9   :  { %v4667_v37 = vadd.f32 %v4645_v51, %v4464_v5  ;;  %v3675_v51 = vmul.f32 %v11943_v61, %v10632_v27  ;;  %v5051_v5 = vmul.f32 %v10828_v13, %v5024_v20  ;;  %v5356_v46 = vadd.f32 1.0, %v5345_v30  ;;  %v11947_v30 = vld [vmem:[#allocation65_spill] sm:$0xff] }
 0x9ea   :  { %v10857_v48 = vpop.permute.xlu1 %3518  ;;  %v5431_v22 = vmul.f32 %v10725_v7, %v5420_v43  ;;  %v5254_v26 = vmul.f32 %v10846_v3, %v5227_v34  ;;  %v5275_v49 = vadd.f32 %v5253_v53, %v5072_v59  ;;  %v3878_v27 = vmul.f32 %v11946_v62, %v10656_v45 }
 0x9eb   :  { %v4870_v9 = vadd.f32 %v4848_v0, %v4667_v37  ;;  %v5497_v20 = vmul.f32 %v5486_v31, %v10587_v41  ;;  %v4816_v16 = vmul.f32 %v11948_v42, %v11947_v30  ;;  %v5572_v29 = vmul.f32 %v5561_v25, %v10742_v47  ;;  %v11950_v0 = vld [vmem:[#allocation181_spill] sm:$0xff]  ;;  %v10885_v25 = vpop.permute.xlu0 %4169  ;;  %v11958_v42 = vld [vmem:[#allocation198_spill] sm:$0xff] }
 0x9ec   :  { %5714 = vperm.xlu1 %6503, %v5700_v35   ;;  %6786 = vrcp.f32 %v5357_v55  ;;  %v3702_v43 = vmul.f32 %v10645_v54, %v3675_v51  ;;  %v5454_v53 = vmul.f32 %v10659_v32, %v5443_v15  ;;  %v4459_v45 = vadd.f32 %v10395_v6, %v4327_v52  ;;  %v11951_v15 = vld [vmem:[#allocation10_spill] sm:$0xff]  ;;  %v11952_v52 = vld [vmem:[#allocation77_spill] sm:$0xff] }
 0x9ed   :  { %v5073_v36 = vadd.f32 %v5051_v5, %v4870_v9  ;;  %v4640_v37 = vmul.f32 %v10775_v58, %v4613_v12  ;;  %v4815_v41 = vmul.f32 %v11950_v0, %v11949_v38  ;;  %v5442_v11 = vadd.f32 -0.28449672, %v5431_v22  ;;  %v11953_v5 = vld [vmem:[#allocation64_spill] sm:$0xff] }
 0x9ee   :  { %v10874_v60 = vpop.permute.xlu1 %3765  ;;  %6788 = vrcp.f32 %v5356_v46  ;;  %v3905_v35 = vmul.f32 %v10666_v2, %v3878_v27  ;;  %v5583_v31 = vmul.f32 %v5572_v29, %v5275_v49  ;;  %v5512_v55 = vmul.f32 1.442695, %v5497_v20  ;;  %v11954_v46 = vld [vmem:[#allocation27_spill] sm:$0xff]  ;;  %v11955_v49 = vld [vmem:[#allocation224_spill] sm:$0xff] }
 0x9ef   :  { %v5276_v34 = vadd.f32 %v5254_v26, %v5073_v36  ;;  %v4081_v6 = vmul.f32 %v11951_v15, %v10438_v39  ;;  %v3724_v12 = vadd.f32 %v3702_v43, %v11952_v52  ;;  %v5465_v51 = vadd.f32 0.2548296, %v5454_v53  ;;  %v11957_v20 = vld [vmem:[#allocation16_spill] sm:$0xff] }
 0x9f0   :  { %v4662_v9 = vadd.f32 %v4640_v37, %v4459_v45  ;;  %v5019_v22 = vmul.f32 %v11954_v46, %v11953_v5  ;;  %v4842_v26 = vmul.f32 %v10814_v56, %v4815_v41  ;;  %v4843_v27 = vmul.f32 %v10814_v56, %v4816_v16  ;;  %v11959_v29 = vld [vmem:[#allocation212_spill] sm:$0xff]  ;;  %v11962_v37 = vld [vmem:[#allocation187_spill] sm:$0xff]  ;;  %v6785_v41 = vpop.eup %6784 }
 0x9f1   :  { %v5584_v47 = vmul.f32 %v10760_v1, %v5276_v34  ;;  %v11956_v1 = vld [vmem:[#allocation189_spill] sm:$0xff]  ;;  %v3927_v36 = vadd.f32 %v3905_v35, %v3724_v12  ;;  %v4284_v30 = vmul.f32 %v11957_v20, %v10683_v24  ;;  %v5453_v39 = vmul.f32 %v10725_v7, %v5442_v11  ;;  %v11960_v34 = vld [vmem:[#allocation226_spill] sm:$0xff]  ;;  %v11961_v45 = vld [vmem:[#allocation80_spill] sm:$0xff] }
 0x9f2   :  { %v10887_v59 = vpop.permute.xlu1 %4171  ;;  %v5018_v62 = vmul.f32 %v11956_v1, %v11955_v49  ;;  %6790 = vpow2.f32 %v5512_v55  ;;  %v5222_v43 = vmul.f32 %v11959_v29, %v11958_v42  ;;  %v4864_v53 = vadd.f32 %v4842_v26, %v11960_v34  ;;  %v11964_v1 = vld [vmem:[#allocation112_spill] sm:$0xff]  ;;  %v11966_v29 = vld [vmem:[#allocation58_spill] sm:$0xff] }
 0x9f3   :  { %v6414_v61 = vpack.c.bf16 %v5584_v47, %v5583_v31  ;;  %v5221_v38 = vmul.f32 %v11962_v37, %v11961_v45  ;;  %v4108_v16 = vmul.f32 %v10698_v18, %v4081_v6  ;;  %v4865_v35 = vadd.f32 %v4843_v27, %v4662_v9  ;;  %v10911_v31 = vpop.permute.xlu0 %4504 }
 0x9f4   :  { %v5046_v24 = vmul.f32 %v10828_v13, %v5019_v22  ;;  %v5045_v11 = vmul.f32 %v10828_v13, %v5018_v62  ;;  %v5476_v47 = vmul.f32 %v10659_v32, %v5465_v51  ;;  %v4311_v52 = vmul.f32 %v10718_v4, %v4284_v30  ;;  %v11963_v22 = vld [vmem:[#allocation95_spill] sm:$0xff] }
 0x9f5   :  { %6415 = vmatprep.subr.bf16.mxu0 %v6414_v61  ;;  %v4130_v15 = vadd.f32 %v4108_v16, %v3927_v36  ;;  %v5464_v12 = vadd.f32 0.2548296, %v5453_v39  ;;  %v5248_v6 = vmul.f32 %v10846_v3, %v5221_v38  ;;  %v3676_v26 = vmul.f32 %v11963_v22, %v10822_v10  ;;  %v11965_v36 = vld [vmem:[#allocation161_spill] sm:$0xff] }
 0x9f6   :  { %6417 = vmatpush3.bf16.msra.mxu0 %v6414_v61  ;;  %v10906_v0 = vpop.permute.xlu1 %4506  ;;  %v10914_v55 = vpop.eup %6786  ;;  %v5249_v61 = vmul.f32 %v10846_v3, %v5222_v43  ;;  %v5067_v5 = vadd.f32 %v5045_v11, %v4864_v53  ;;  %v5068_v32 = vadd.f32 %v5046_v24, %v4865_v35  ;;  %v5531_v51 = vmul.f32 %v6785_v41, %v5476_v47  ;;  %v11967_v43 = vld [vmem:[#allocation133_spill] sm:$0xff] }
 0x9f7   :  { %v5390_v49 = vmul.f32 1.0614054, %v10914_v55  ;;  %v3879_v62 = vmul.f32 %v11964_v1, %v10864_v44  ;;  %v4333_v27 = vadd.f32 %v4311_v52, %v4130_v15  ;;  %v4619_v20 = vmul.f32 %v11965_v36, %v10707_v40  ;;  %v10936_v10 = vpop.permute.xlu0 %5113  ;;  %v11968_v52 = vld [vmem:[#allocation59_spill] sm:$0xff]  ;;  %v11973_v1 = vld [vmem:[#allocation42_spill] sm:$0xff] }
 0x9f8   :  { %v10921_v46 = vpop.eup %6788  ;;  %v5475_v30 = vmul.f32 %v10725_v7, %v5464_v12  ;;  %v10932_v39 = vadd.f32 %v5249_v61, %v5068_v32  ;;  %v10934_v42 = vadd.f32 %v5248_v6, %v5067_v5  ;;  %v4443_v34 = vmul.f32 %v11967_v43, %v11966_v29  ;;  %v11969_v12 = vld [vmem:[#allocation143_spill] sm:$0xff]  ;;  %v11970_v6 = vld [vmem:[#allocation202_spill] sm:$0xff] }
 0x9f9   :  { %v5389_v45 = vmul.f32 1.0614054, %v10921_v46  ;;  %v10944_v44 = vmul.f32 0.5, %v10486_v8  ;;  %v10947_v40 = vmul.f32 0.5, %v10543_v19  ;;  %v3703_v7 = vmul.f32 %v10645_v54, %v3676_v26  ;;  %v11971_v26 = vld [vmem:[#allocation72_spill] sm:$0xff] }
 0x9fa   :  { %v10919_v9 = vpop.permute.xlu1 %4912  ;;  %v5322_v37 = vsel %vm5311_vm7, 1.0, %v11922_v17  ;;  %v5489_v16 = vsub.f32 0.0, %v10791_v21  ;;  %v5542_v41 = vsub.f32 1.0, %v5531_v51  ;;  %v5401_v35 = vadd.f32 -1.4531521, %v5390_v49  ;;  %v11972_v51 = vld [vmem:[#allocation15_spill] sm:$0xff] }
 0x9fb   :  { %v3906_v24 = vmul.f32 %v10666_v2, %v3879_v62  ;;  %v4465_v8 = vadd.f32 %v4443_v34, %v4333_v27  ;;  %v4646_v11 = vmul.f32 %v10775_v58, %v4619_v20  ;;  %v10958_v47 = vmul.f32 0.70710677, %v10932_v39  ;;  %v10975_v20 = vpop.permute.xlu0 %3972 }
 0x9fc   :  { %v6791_v38 = vpop.eup %6790  ;;  %v10961_v15 = vmul.f32 0.70710677, %v10934_v42  ;;  %v4444_v61 = vmul.f32 %v11969_v12, %v11968_v52  ;;  %v5400_v5 = vadd.f32 -1.4531521, %v5389_v45  ;;  %v4822_v22 = vmul.f32 %v11970_v6, %v10476_v50 }
 0x9fd   :  { %v5530_v19 = vmul.f32 %v6791_v38, %v5475_v30  ;;  %v3725_v32 = vadd.f32 %v3703_v7, %v11971_v26  ;;  %v4285_v49 = vmul.f32 %v11972_v51, %v10885_v25  ;;  %v5321_v27 = vsel %vm5310_vm8, 1.0, %v11922_v17  ;;  %v11975_v38 = vld [vmem:[#allocation207_spill] sm:$0xff]  ;;  %v11978_v51 = vld [vmem:[#allocation204_spill] sm:$0xff] }
 0x9fe   :  { %v10940_v53 = vpop.permute.xlu1 %5115  ;;  %v5500_v36 = vmul.f32 %v5489_v16, %v10791_v21  ;;  %v5553_v30 = vmul.f32 %v5542_v41, %v5322_v37  ;;  %v5412_v29 = vmul.f32 %v10914_v55, %v5401_v35  ;;  %v4668_v50 = vadd.f32 %v4646_v11, %v4465_v8  ;;  %v11976_v35 = vld [vmem:[#allocation155_spill] sm:$0xff] }
 0x9ff   :  { %v3928_v43 = vadd.f32 %v3906_v24, %v3725_v32  ;;  %v5541_v45 = vsub.f32 1.0, %v5530_v19  ;;  %v10980_v25 = vand.u32 2147483647, %v10958_v47  ;;  %v10983_v7 = vand.u32 2147483647, %v10961_v15  ;;  %v11977_v19 = vld [vmem:[#allocation171_spill] sm:$0xff] }
 0xa00   :  { %v5411_v16 = vmul.f32 %v10921_v46, %v5400_v5  ;;  %v4849_v37 = vmul.f32 %v10814_v56, %v4822_v22  ;;  %v4312_v41 = vmul.f32 %v10718_v4, %v4285_v49  ;;  %v4620_v24 = vmul.f32 %v11976_v35, %v10911_v31  ;;  %v11000_v31 = vpop.permute.xlu0 %4713 }
 0xa01   :  { %v5488_v11 = vsub.f32 0.0, %v10803_v23  ;;  %v10994_v52 = vmul.f32 0.70710677, %v11977_v19  ;;  %v5564_v12 = vadd.f32 1.0, %v5553_v30  ;;  %v5423_v6 = vadd.f32 1.4214138, %v5412_v29 }
 0xa02   :  { %v3967_v57 = vpop.permute.xlu1 %3966  ;;  %v4871_v26 = vadd.f32 %v4849_v37, %v4668_v50  ;;  %v5552_v5 = vmul.f32 %v5541_v45, %v5321_v27  ;;  %v5348_v22 = vmul.f32 0.3275911, %v10980_v25  ;;  %v5347_v49 = vmul.f32 0.3275911, %v10983_v7  ;;  %v11979_v30 = vld [vmem:[#allocation211_spill] sm:$0xff] }
 0xa03   :  { %v4082_v62 = vmul.f32 %v11973_v1, %v3967_v57  ;;  %v5025_v57 = vmul.f32 %v11975_v38, %v11974_v63  ;;  %v4647_v63 = vmul.f32 %v10775_v58, %v4620_v24  ;;  %v5228_v29 = vmul.f32 %v11979_v30, %v10739_v28  ;;  %v11980_v38 = vld [vmem:[#allocation197_spill] sm:$0xff] }
 0xa04   :  { %v5499_v27 = vmul.f32 %v5488_v11, %v10803_v23  ;;  %v11008_v45 = vand.u32 2147483647, %v10994_v52  ;;  %v5563_v23 = vadd.f32 1.0, %v5552_v5  ;;  %vm5315_vm11 = vcmp.ge.f32.partialorder %v10958_v47, 0.0 }
 0xa05   :  { %v4109_v34 = vmul.f32 %v10698_v18, %v4082_v62  ;;  %v5052_v62 = vmul.f32 %v10828_v13, %v5025_v57  ;;  %vm5314_vm12 = vcmp.ge.f32.partialorder %v10961_v15, 0.0  ;;  %vm5316_vm13 = vcmp.ge.f32.partialorder %v10994_v52, 0.0 }
 0xa06   :  { %v4708_v21 = vpop.permute.xlu1 %4707  ;;  %v5327_v52 = vsel %vm5316_vm13, 1.0, %v11922_v17 }
 0xa07   :  { %v4131_v8 = vadd.f32 %v4109_v34, %v3928_v43  ;;  %v4823_v1 = vmul.f32 %v11978_v51, %v4708_v21  ;;  %v5422_v34 = vadd.f32 1.4214138, %v5411_v16  ;;  %v11981_v21 = vld [vmem:[#allocation220_spill] sm:$0xff]  ;;  %v5074_v35 = vadd.f32 %v5052_v62, %v4871_v26  ;;  %v11982_v16 = vld [vmem:[#allocation97_spill] sm:$0xff] }
 0xa08   :  { %v5229_v57 = vmul.f32 %v11981_v21, %v10936_v10  ;;  %v3677_v24 = vmul.f32 %v11982_v16, %v10857_v48  ;;  %v11983_v10 = vld [vmem:[#allocation111_spill] sm:$0xff]  ;;  %v5518_v62 = vmul.f32 1.442695, %v5500_v36  ;;  %v5349_v48 = vmul.f32 0.3275911, %v11008_v45 }
 0xa09   :  { %v4334_v32 = vadd.f32 %v4312_v41, %v4131_v8  ;;  %v5434_v41 = vmul.f32 %v10914_v55, %v5423_v6  ;;  %v4850_v28 = vmul.f32 %v10814_v56, %v4823_v1  ;;  %v5433_v11 = vmul.f32 %v10921_v46, %v5422_v34 }
 0xa0a   :  { %v4911_v43 = vpop.permute.xlu1 %4910  ;;  %v3880_v30 = vmul.f32 %v11983_v10, %v10874_v60  ;;  %v3704_v5 = vmul.f32 %v10645_v54, %v3677_v24  ;;  %v5516_v34 = vmul.f32 1.442695, %v5499_v27  ;;  %v5575_v60 = vmul.f32 %v5564_v12, %v10944_v44  ;;  %v11985_v27 = vld [vmem:[#allocation79_spill] sm:$0xff]  ;;  %v11987_v10 = vld [vmem:[#allocation98_spill] sm:$0xff] }
 0xa0b   :  { %v4466_v50 = vadd.f32 %v4444_v61, %v4334_v32  ;;  %v5026_v37 = vmul.f32 %v11980_v38, %v4911_v43  ;;  %v5359_v61 = vadd.f32 1.0, %v5348_v22  ;;  %v5358_v32 = vadd.f32 1.0, %v5347_v49 }
 0xa0c   :  { %v5255_v43 = vmul.f32 %v10846_v3, %v5228_v29  ;;  %v5445_v1 = vadd.f32 -0.28449672, %v5434_v41  ;;  %v5256_v22 = vmul.f32 %v10846_v3, %v5229_v57  ;;  %v5444_v38 = vadd.f32 -0.28449672, %v5433_v11  ;;  %v11984_v57 = vld [vmem:[#allocation38_spill] sm:$0xff] }
 0xa0d   :  { %v4669_v8 = vadd.f32 %v4647_v63, %v4466_v50  ;;  %v5053_v26 = vmul.f32 %v10828_v13, %v5026_v37  ;;  %v3521_v63 = vpop.permute.xlu0 %3520  ;;  %6792 = vrcp.f32 %v5359_v61  ;;  %v3907_v36 = vmul.f32 %v10666_v2, %v3880_v30 }
 0xa0e   :  { %v11016_v51 = vpop.permute.xlu1 %3522  ;;  %v5277_v49 = vadd.f32 %v5255_v43, %v5074_v35  ;;  %6794 = vrcp.f32 %v5358_v32  ;;  %v5574_v21 = vmul.f32 %v5563_v23, %v10947_v40  ;;  %v4083_v41 = vmul.f32 %v11984_v57, %v10737_v33  ;;  %v11986_v40 = vld [vmem:[#allocation18_spill] sm:$0xff] }
 0xa0f   :  { %v4872_v6 = vadd.f32 %v4850_v28, %v4669_v8  ;;  %6796 = vpow2.f32 %v5518_v62  ;;  %v5456_v35 = vmul.f32 %v10914_v55, %v5445_v1  ;;  %v5360_v16 = vadd.f32 1.0, %v5349_v48 }
 0xa10   :  { %v3726_v24 = vadd.f32 %v3704_v5, %v11985_v27  ;;  %v5585_v8 = vmul.f32 %v5574_v21, %v5277_v49  ;;  %v5455_v12 = vmul.f32 %v10921_v46, %v5444_v38  ;;  %6798 = vpow2.f32 %v5516_v34  ;;  %v11988_v5 = vld [vmem:[#allocation114_spill] sm:$0xff]  ;;  %v11990_v27 = vld [vmem:[#allocation60_spill] sm:$0xff] }
 0xa11   :  { %v5075_v50 = vadd.f32 %v5053_v26, %v4872_v6  ;;  %v3768_v61 = vpop.permute.xlu0 %3767  ;;  %v4286_v23 = vmul.f32 %v11986_v40, %v10887_v59  ;;  %v5467_v43 = vadd.f32 0.2548296, %v5456_v35  ;;  %6800 = vrcp.f32 %v5360_v16 }
 0xa12   :  { %v11026_v29 = vpop.permute.xlu1 %3769  ;;  %v3929_v32 = vadd.f32 %v3907_v36, %v3726_v24  ;;  %v4110_v33 = vmul.f32 %v10698_v18, %v4083_v41  ;;  %v3678_v30 = vmul.f32 %v11987_v10, %v3521_v63  ;;  %v5466_v26 = vadd.f32 0.2548296, %v5455_v12  ;;  %v11991_v24 = vld [vmem:[#allocation135_spill] sm:$0xff] }
 0xa13   :  { %v5278_v37 = vadd.f32 %v5256_v22, %v5075_v50  ;;  %v4313_v48 = vmul.f32 %v10718_v4, %v4286_v23  ;;  %v5478_v59 = vmul.f32 %v10914_v55, %v5467_v43  ;;  %v3881_v50 = vmul.f32 %v11988_v5, %v3768_v61 }
 0xa14   :  { %v4132_v62 = vadd.f32 %v4110_v33, %v3929_v32  ;;  %v5477_v38 = vmul.f32 %v10921_v46, %v5466_v26  ;;  %v11994_v33 = vld [vmem:[#allocation41_spill] sm:$0xff] }
 0xa15   :  { %v5586_v28 = vmul.f32 %v5575_v60, %v5278_v37  ;;  %v4174_v22 = vpop.permute.xlu0 %4173  ;;  %v3705_v60 = vmul.f32 %v10645_v54, %v3678_v30  ;;  %v11989_v37 = vld [vmem:[#allocation162_spill] sm:$0xff]  ;;  %v3908_v16 = vmul.f32 %v10666_v2, %v3881_v50  ;;  %v11996_v26 = vld [vmem:[#allocation145_spill] sm:$0xff]  ;;  %v11997_v50 = vld [vmem:[#allocation136_spill] sm:$0xff] }
 0xa16   :  { %v11035_v44 = vpop.permute.xlu1 %4175  ;;  %v4335_v36 = vadd.f32 %v4313_v48, %v4132_v62  ;;  %v4621_v21 = vmul.f32 %v11989_v37, %v10906_v0  ;;  %v11993_v0 = vld [vmem:[#allocation125_spill] sm:$0xff]  ;;  %v11995_v30 = vld [vmem:[#allocation86_spill] sm:$0xff]  ;;  %vm5312_vm10 = vcmp.ge.f32.partialorder %v11997_v50, 0.0 }
 0xa17   :  { %v6418_v11 = vpack.c.bf16 %v5586_v28, %v5585_v8  ;;  %v11045_v1 = vpop.eup %6792  ;;  %v4445_v8 = vmul.f32 %v11991_v24, %v11990_v27  ;;  %v11992_v28 = vld [vmem:[#allocation74_spill] sm:$0xff]  ;;  %v4287_v23 = vmul.f32 %v11993_v0, %v4174_v22  ;;  %v4446_v62 = vmul.f32 %v11996_v26, %v11995_v30 }
 0xa18   :  { %v11048_v49 = vpop.eup %6794  ;;  %v5392_v55 = vmul.f32 1.0614054, %v11045_v1  ;;  %v3727_v61 = vadd.f32 %v3705_v60, %v11992_v28  ;;  %v4648_v43 = vmul.f32 %v10775_v58, %v4621_v21  ;;  %v11999_v60 = vld [vmem:[#allocation178_spill] sm:$0xff]  ;;  %v5324_v22 = vsel %vm5313_vm9, 1.0, %v11922_v17 }
 0xa19   :  { %6419 = vmatprep.subr.bf16.mxu0 %v6418_v11  ;;  %v6797_v34 = vpop.eup %6796  ;;  %v5391_v41 = vmul.f32 1.0614054, %v11048_v49  ;;  %v4509_v46 = vpop.permute.xlu0 %4508 }
 0xa1a   :  { %6421 = vmatpush3.bf16.msra.mxu0 %v6418_v11  ;;  %v11042_v6 = vpop.permute.xlu1 %4510  ;;  %v5533_v57 = vmul.f32 %v6797_v34, %v5478_v59  ;;  %v6799_v35 = vpop.eup %6798  ;;  %v4467_v11 = vadd.f32 %v4445_v8, %v4335_v36  ;;  %v5403_v5 = vadd.f32 -1.4531521, %v5392_v55  ;;  %v11998_v34 = vld [vmem:[#allocation56_spill] sm:$0xff]  ;;  %v3930_v37 = vadd.f32 %v3908_v16, %v3727_v61  ;;  %v12000_v36 = vld [vmem:[#allocation157_spill] sm:$0xff] }
 0xa1b   :  { %v5532_v32 = vmul.f32 %v6799_v35, %v5477_v38  ;;  %v11064_v40 = vpop.eup %6800  ;;  %v5402_v59 = vadd.f32 -1.4531521, %v5391_v41  ;;  %v4824_v38 = vmul.f32 %v11999_v60, %v11998_v34  ;;  %v4622_v21 = vmul.f32 %v12000_v36, %v4509_v46  ;;  %v12001_v8 = vld [vmem:[#allocation201_spill] sm:$0xff] }
 0xa1c   :  { %v5544_v48 = vsub.f32 1.0, %v5533_v57  ;;  %v5393_v57 = vmul.f32 1.0614054, %v11064_v40  ;;  %v4314_v41 = vmul.f32 %v10718_v4, %v4287_v23  ;;  %v4670_v55 = vadd.f32 %v4648_v43, %v4467_v11  ;;  %v12003_v11 = vld [vmem:[#allocation209_spill] sm:$0xff] }
 0xa1d   :  { %v5543_v24 = vsub.f32 1.0, %v5532_v32  ;;  %v5027_v28 = vmul.f32 %v12001_v8, %v10919_v9  ;;  %v5323_v16 = vsel %vm5312_vm10, 1.0, %v11922_v17  ;;  %v11084_v61 = vpop.permute.xlu0 %3976  ;;  %v5413_v14 = vmul.f32 %v11048_v49, %v5402_v59 }
 0xa1e   :  { %v11052_v63 = vpop.permute.xlu1 %4916  ;;  %v5555_v0 = vmul.f32 %v5544_v48, %v5324_v22  ;;  %v5414_v46 = vmul.f32 %v11045_v1, %v5403_v5  ;;  %v4851_v32 = vmul.f32 %v10814_v56, %v4824_v38  ;;  %v5491_v9 = vsub.f32 0.0, %v10980_v25  ;;  %v12004_v5 = vld [vmem:[#allocation213_spill] sm:$0xff] }
 0xa1f   :  { %v4649_v30 = vmul.f32 %v10775_v58, %v4622_v21  ;;  %v5554_v50 = vmul.f32 %v5543_v24, %v5323_v16  ;;  %v5404_v34 = vadd.f32 -1.4531521, %v5393_v57  ;;  %v5054_v59 = vmul.f32 %v10828_v13, %v5027_v28  ;;  %v12005_v38 = vld [vmem:[#allocation45_spill] sm:$0xff] }
 0xa20   :  { %v4873_v48 = vadd.f32 %v4851_v32, %v4670_v55  ;;  %v5424_v22 = vadd.f32 1.4214138, %v5413_v14  ;;  %v5490_v36 = vsub.f32 0.0, %v10983_v7  ;;  %v5502_v24 = vmul.f32 %v5491_v9, %v10980_v25 }
 0xa21   :  { %v11101_v57 = vpop.permute.xlu0 %4717  ;;  %v5565_v8 = vadd.f32 1.0, %v5554_v50  ;;  %v5415_v28 = vmul.f32 %v11064_v40, %v5404_v34  ;;  %v12009_v34 = vld [vmem:[#allocation113_spill] sm:$0xff] }
 0xa22   :  { %v3971_v12 = vpop.permute.xlu1 %3970  ;;  %v5435_v25 = vmul.f32 %v11048_v49, %v5424_v22  ;;  %v5501_v9 = vmul.f32 %v5490_v36, %v10983_v7  ;;  %v5522_v50 = vmul.f32 1.442695, %v5502_v24 }
 0xa23   :  { %v4084_v10 = vmul.f32 %v11994_v33, %v3971_v12  ;;  %v12002_v33 = vld [vmem:[#allocation217_spill] sm:$0xff] }
 0xa24   :  { %v5520_v36 = vmul.f32 1.442695, %v5501_v9  ;;  %6802 = vpow2.f32 %v5522_v50 }
 0xa25   :  { %v4111_v35 = vmul.f32 %v10698_v18, %v4084_v10  ;;  %v5230_v10 = vmul.f32 %v12002_v33, %v10940_v53  ;;  %v5425_v53 = vadd.f32 1.4214138, %v5414_v46  ;;  %v12006_v46 = vld [vmem:[#allocation219_spill] sm:$0xff]  ;;  %v12007_v33 = vld [vmem:[#allocation50_spill] sm:$0xff]  ;;  %v3525_v22 = vpop.permute.xlu0 %3524 }
 0xa26   :  { %v4712_v27 = vpop.permute.xlu1 %4711  ;;  %6804 = vpow2.f32 %v5520_v36  ;;  %v12018_v36 = vld [vmem:[#allocation83_spill] sm:$0xff] }
 0xa27   :  { %v4133_v12 = vadd.f32 %v4111_v35, %v3930_v37  ;;  %v4825_v43 = vmul.f32 %v12003_v11, %v4712_v27  ;;  %v5291_v35 = vmul.f32 0.5, %v12005_v38  ;;  %v5257_v27 = vmul.f32 %v10846_v3, %v5230_v10 }
 0xa28   :  { %v5290_v10 = vmul.f32 0.5, %v12007_v33 }
 0xa29   :  { %v4336_v23 = vadd.f32 %v4314_v41, %v4133_v12  ;;  %v4852_v21 = vmul.f32 %v10814_v56, %v4825_v43  ;;  %v5076_v12 = vadd.f32 %v5054_v59, %v4873_v48  ;;  %v5436_v43 = vmul.f32 %v11045_v1, %v5425_v53 }
 0xa2a   :  { %v4915_v26 = vpop.permute.xlu1 %4914  ;;  %v3882_v48 = vmul.f32 %v12009_v34, %v11026_v29 }
 0xa2b   :  { %v4468_v60 = vadd.f32 %v4446_v62, %v4336_v23  ;;  %v5028_v37 = vmul.f32 %v12004_v5, %v4915_v26  ;;  %v5566_v62 = vadd.f32 1.0, %v5555_v0  ;;  %v12008_v23 = vld [vmem:[#allocation100_spill] sm:$0xff]  ;;  %v5279_v0 = vadd.f32 %v5257_v27, %v5076_v12  ;;  %v12010_v12 = vld [vmem:[#allocation102_spill] sm:$0xff] }
 0xa2c   :  { %v3679_v11 = vmul.f32 %v12008_v23, %v11016_v51  ;;  %v5492_v5 = vsub.f32 0.0, %v11008_v45  ;;  %v5576_v51 = vmul.f32 %v5565_v8, %v5290_v10  ;;  %v5447_v7 = vadd.f32 -0.28449672, %v5436_v43  ;;  %v12013_v10 = vld [vmem:[#allocation115_spill] sm:$0xff] }
 0xa2d   :  { %v4671_v41 = vadd.f32 %v4649_v30, %v4468_v60  ;;  %v5055_v14 = vmul.f32 %v10828_v13, %v5028_v37  ;;  %v5426_v60 = vadd.f32 1.4214138, %v5415_v28  ;;  %v5577_v38 = vmul.f32 %v5566_v62, %v5291_v35  ;;  %v12011_v35 = vld [vmem:[#allocation2_spill] sm:$0xff] }
 0xa2e   :  { %v5118_v55 = vpop.permute.xlu1 %5117  ;;  %v3706_v53 = vmul.f32 %v10645_v54, %v3679_v11  ;;  %v5587_v27 = vmul.f32 %v5576_v51, %v5279_v0  ;;  %v3909_v24 = vmul.f32 %v10666_v2, %v3882_v48  ;;  %v5503_v28 = vmul.f32 %v5492_v5, %v11008_v45  ;;  %v3772_v11 = vpop.permute.xlu0 %3771  ;;  %v12014_v45 = vld [vmem:[#allocation20_spill] sm:$0xff] }
 0xa2f   :  { %v4874_v16 = vadd.f32 %v4852_v21, %v4671_v41  ;;  %v5231_v32 = vmul.f32 %v12006_v46, %v5118_v55  ;;  %v5446_v41 = vadd.f32 -0.28449672, %v5435_v25  ;;  %v5437_v29 = vmul.f32 %v11064_v40, %v5426_v60  ;;  %v12016_v60 = vld [vmem:[#allocation116_spill] sm:$0xff] }
 0xa30   :  { %v4085_v62 = vmul.f32 %v12011_v35, %v10975_v20  ;;  %v5458_v33 = vmul.f32 %v11045_v1, %v5447_v7  ;;  %v4288_v43 = vmul.f32 %v12014_v45, %v11035_v44  ;;  %v12015_v20 = vld [vmem:[#allocation99_spill] sm:$0xff]  ;;  %v3883_v5 = vmul.f32 %v12016_v60, %v3772_v11 }
 0xa31   :  { %v5077_v30 = vadd.f32 %v5055_v14, %v4874_v16  ;;  %v5258_v26 = vmul.f32 %v10846_v3, %v5231_v32  ;;  %v12012_v14 = vld [vmem:[#allocation81_spill] sm:$0xff]  ;;  %v5457_v32 = vmul.f32 %v11048_v49, %v5446_v41  ;;  %v5448_v0 = vadd.f32 -0.28449672, %v5437_v29  ;;  %v12017_v41 = vld [vmem:[#allocation36_spill] sm:$0xff]  ;;  %v6803_v29 = vpop.eup %6802 }
 0xa32   :  { %v3527_v59 = vpop.permute.xlu1 %3526  ;;  %v3728_v46 = vadd.f32 %v3706_v53, %v12012_v14  ;;  %v4112_v34 = vmul.f32 %v10698_v18, %v4085_v62  ;;  %v12020_v62 = vld [vmem:[#allocation164_spill] sm:$0xff] }
 0xa33   :  { %v5280_v37 = vadd.f32 %v5258_v26, %v5077_v30  ;;  %v3681_v16 = vmul.f32 %v12010_v12, %v3527_v59  ;;  %v5524_v30 = vmul.f32 1.442695, %v5503_v28  ;;  %v3680_v26 = vmul.f32 %v12015_v20, %v3525_v22 }
 0xa34   :  { %v3931_v25 = vadd.f32 %v3909_v24, %v3728_v46  ;;  %v5468_v48 = vadd.f32 0.2548296, %v5457_v32  ;;  %v5469_v59 = vadd.f32 0.2548296, %v5458_v33  ;;  %v5459_v53 = vmul.f32 %v11064_v40, %v5448_v0  ;;  %v12021_v33 = vld [vmem:[#allocation76_spill] sm:$0xff] }
 0xa35   :  { %v5588_v21 = vmul.f32 %v5577_v38, %v5280_v37  ;;  %v3708_v50 = vmul.f32 %v10645_v54, %v3681_v16  ;;  %v4315_v38 = vmul.f32 %v10718_v4, %v4288_v43  ;;  %6806 = vpow2.f32 %v5524_v30  ;;  %v12019_v16 = vld [vmem:[#allocation22_spill] sm:$0xff] }
 0xa36   :  { %v3774_v55 = vpop.permute.xlu1 %3773  ;;  %v4134_v51 = vadd.f32 %v4112_v34, %v3931_v25  ;;  %v4087_v22 = vmul.f32 %v12017_v41, %v11084_v61  ;;  %v3707_v7 = vmul.f32 %v10645_v54, %v3680_v26  ;;  %v5479_v24 = vmul.f32 %v11048_v49, %v5468_v48  ;;  %v6805_v54 = vpop.eup %6804  ;;  %v12022_v49 = vld [vmem:[#allocation127_spill] sm:$0xff]  ;;  %v12024_v25 = vld [vmem:[#allocation44_spill] sm:$0xff] }
 0xa37   :  { %v6422_v8 = vpack.c.bf16 %v5588_v21, %v5587_v27  ;;  %v3884_v23 = vmul.f32 %v12013_v10, %v3774_v55  ;;  %v3730_v27 = vadd.f32 %v3708_v50, %v12018_v36  ;;  %v4178_v21 = vpop.permute.xlu0 %4177  ;;  %v5480_v55 = vmul.f32 %v11045_v1, %v5469_v59  ;;  %v12023_v1 = vld [vmem:[#allocation11_spill] sm:$0xff] }
 0xa38   :  { %v3910_v28 = vmul.f32 %v10666_v2, %v3883_v5  ;;  %v4337_v35 = vadd.f32 %v4315_v38, %v4134_v51  ;;  %v4623_v14 = vmul.f32 %v12020_v62, %v11042_v6  ;;  %v5470_v46 = vadd.f32 0.2548296, %v5459_v53  ;;  %v12027_v51 = vld [vmem:[#allocation147_spill] sm:$0xff] }
 0xa39   :  { %6423 = vmatprep.subr.bf16.mxu0 %v6422_v8  ;;  %v3911_v37 = vmul.f32 %v10666_v2, %v3884_v23  ;;  %v4114_v32 = vmul.f32 %v10698_v18, %v4087_v22  ;;  %v3729_v10 = vadd.f32 %v3707_v7, %v12021_v33  ;;  %v4289_v23 = vmul.f32 %v12022_v49, %v4178_v21  ;;  %v12025_v2 = vld [vmem:[#allocation137_spill] sm:$0xff]  ;;  %v12028_v53 = vld [vmem:[#allocation215_spill] sm:$0xff] }
 0xa3a   :  { %6425 = vmatpush3.bf16.msra.mxu0 %v6422_v8  ;;  %v4180_v9 = vpop.permute.xlu1 %4179  ;;  %v4447_v45 = vmul.f32 %v12025_v2, %v12024_v25  ;;  %v5534_v43 = vmul.f32 %v6805_v54, %v5479_v24  ;;  %v4650_v34 = vmul.f32 %v10775_v58, %v4623_v14  ;;  %v5481_v59 = vmul.f32 %v11064_v40, %v5470_v46  ;;  %v12029_v36 = vld [vmem:[#allocation159_spill] sm:$0xff]  ;;  %v12030_v40 = vld [vmem:[#allocation165_spill] sm:$0xff] }
 0xa3b   :  { %v3933_v12 = vadd.f32 %v3911_v37, %v3730_v27  ;;  %v4290_v8 = vmul.f32 %v12019_v16, %v4180_v9  ;;  %v5535_v9 = vmul.f32 %v6803_v29, %v5480_v55  ;;  %v3932_v0 = vadd.f32 %v3910_v28, %v3729_v10  ;;  %v4513_v26 = vpop.permute.xlu0 %4512  ;;  %v12026_v37 = vld [vmem:[#allocation29_spill] sm:$0xff]  ;;  %v12031_v28 = vld [vmem:[#allocation150_spill] sm:$0xff] }
 0xa3c   :  { %v4469_v50 = vadd.f32 %v4447_v45, %v4337_v35  ;;  %v4316_v60 = vmul.f32 %v10718_v4, %v4289_v23  ;;  %v4448_v38 = vmul.f32 %v12027_v51, %v12026_v37  ;;  %v5545_v41 = vsub.f32 1.0, %v5534_v43  ;;  %v12033_v35 = vld [vmem:[#allocation203_spill] sm:$0xff] }
 0xa3d   :  { %v4136_v30 = vadd.f32 %v4114_v32, %v3933_v12  ;;  %v4317_v6 = vmul.f32 %v10718_v4, %v4290_v8  ;;  %v5546_v22 = vsub.f32 1.0, %v5535_v9  ;;  %v4624_v27 = vmul.f32 %v12029_v36, %v4513_v26  ;;  %v12032_v12 = vld [vmem:[#allocation139_spill] sm:$0xff] }
 0xa3e   :  { %v4515_v44 = vpop.permute.xlu1 %4514  ;;  %v5326_v4 = vsel %vm5315_vm11, 1.0, %v11922_v17  ;;  %v4672_v29 = vadd.f32 %v4650_v34, %v4469_v50  ;;  %v4449_v16 = vmul.f32 %v12032_v12, %v12031_v28  ;;  %v5029_v62 = vmul.f32 %v12033_v35, %v11052_v63  ;;  %v12035_v23 = vld [vmem:[#allocation223_spill] sm:$0xff] }
 0xa3f   :  { %v6807_v7 = vpop.eup %6806  ;;  %v4339_v21 = vadd.f32 %v4317_v6, %v4136_v30  ;;  %v4625_v24 = vmul.f32 %v12030_v40, %v4515_v44  ;;  %v5211_v55 = vpop.permute.xlu0 %5210  ;;  %v5557_v32 = vmul.f32 %v5546_v22, %v5326_v4  ;;  %v4651_v33 = vmul.f32 %v10775_v58, %v4624_v27  ;;  %v12037_v30 = vld [vmem:[#allocation221_spill] sm:$0xff] }
 0xa40   :  { %v5536_v8 = vmul.f32 %v6807_v7, %v5481_v59  ;;  %v5056_v43 = vmul.f32 %v10828_v13, %v5029_v62  ;;  %v5292_v22 = vmul.f32 0.5, %v10934_v42  ;;  %v5294_v28 = vmul.f32 0.5, %v11977_v19  ;;  %v5594_v19 = vld [vmem:[%s11229_s4 + $0x10] sm:$0xff] }
 0xa41   :  { %v4471_v10 = vadd.f32 %v4449_v16, %v4339_v21  ;;  %v4652_v49 = vmul.f32 %v10775_v58, %v4625_v24  ;;  %v5568_v59 = vadd.f32 1.0, %v5557_v32 }
 0xa42   :  { %v3975_v61 = vpop.permute.xlu1 %3974  ;;  %v5547_v45 = vsub.f32 1.0, %v5536_v8 }
 0xa43   :  { %v4086_v11 = vmul.f32 %v12023_v1, %v3975_v61  ;;  %v12034_v61 = vld [vmem:[#allocation180_spill] sm:$0xff]  ;;  %v4674_v26 = vadd.f32 %v4652_v49, %v4471_v10 }
 0xa45   :  { %v4113_v20 = vmul.f32 %v10698_v18, %v4086_v11  ;;  %v4826_v18 = vmul.f32 %v12028_v53, %v11000_v31  ;;  %v5325_v31 = vsel %vm5314_vm12, 1.0, %v11922_v17  ;;  %v12036_v11 = vld [vmem:[#allocation182_spill] sm:$0xff] }
 0xa46   :  { %v5120_v48 = vpop.permute.xlu1 %5119  ;;  %v5556_v54 = vmul.f32 %v5545_v41, %v5325_v31  ;;  %v4828_v25 = vmul.f32 %v12036_v11, %v11101_v57  ;;  %v12039_v53 = vld [vmem:[#allocation222_spill] sm:$0xff]  ;;  %v5293_v41 = vmul.f32 0.5, %v10932_v39 }
 0xa47   :  { %v4135_v5 = vadd.f32 %v4113_v20, %v3932_v0  ;;  %v4853_v44 = vmul.f32 %v10814_v56, %v4826_v18  ;;  %v5232_v1 = vmul.f32 %v12035_v23, %v5120_v48  ;;  %v4921_v20 = vpop.permute.xlu0 %4920  ;;  %v12042_v23 = vld [vmem:[#allocation37_spill] sm:$0xff] }
 0xa48   :  { %v4855_v57 = vmul.f32 %v10814_v56, %v4828_v25  ;;  %v5567_v48 = vadd.f32 1.0, %v5556_v54  ;;  %v5579_v40 = vmul.f32 %v5568_v59, %v5293_v41  ;;  %v12041_v54 = vld [vmem:[#allocation30_spill] sm:$0xff]  ;;  %v12043_v25 = vld [vmem:[#allocation4_spill] sm:$0xff] }
 0xa49   :  { %v4338_v47 = vadd.f32 %v4316_v60, %v4135_v5  ;;  %v4875_v63 = vadd.f32 %v4853_v44, %v4672_v29  ;;  %v5259_v58 = vmul.f32 %v10846_v3, %v5232_v1  ;;  %v5558_v60 = vmul.f32 %v5547_v45, %v5327_v52  ;;  %v12038_v5 = vld [vmem:[#allocation205_spill] sm:$0xff] }
 0xa4a   :  { %v4716_v15 = vpop.permute.xlu1 %4715  ;;  %v5031_v37 = vmul.f32 %v12038_v5, %v4921_v20  ;;  %v4877_v7 = vadd.f32 %v4855_v57, %v4674_v26  ;;  %v5578_v21 = vmul.f32 %v5567_v48, %v5292_v22 }
 0xa4b   :  { %v4470_v14 = vadd.f32 %v4448_v38, %v4338_v47  ;;  %v4827_v46 = vmul.f32 %v12034_v61, %v4716_v15  ;;  %v5078_v51 = vadd.f32 %v5056_v43, %v4875_v63  ;;  %v5569_v29 = vadd.f32 1.0, %v5558_v60 }
 0xa4c   :  { %v5058_v24 = vmul.f32 %v10828_v13, %v5031_v37 }
 0xa4d   :  { %v4673_v9 = vadd.f32 %v4651_v33, %v4470_v14  ;;  %v4854_v0 = vmul.f32 %v10814_v56, %v4827_v46  ;;  %v5281_v36 = vadd.f32 %v5259_v58, %v5078_v51  ;;  %v5580_v31 = vmul.f32 %v5569_v29, %v5294_v28  ;;  %v12040_v14 = vld [vmem:[#allocation5_spill] sm:$0xff] }
 0xa4e   :  { %v4919_v2 = vpop.permute.xlu1 %4918  ;;  %v5080_v12 = vadd.f32 %v5058_v24, %v4877_v7 }
 0xa4f   :  { %v5030_v6 = vmul.f32 %v12037_v30, %v4919_v2  ;;  %v4876_v38 = vadd.f32 %v4854_v0, %v4673_v9  ;;  %v5589_v16 = vmul.f32 %v5578_v21, %v5281_v36 }
 0xa51   :  { %v5057_v50 = vmul.f32 %v10828_v13, %v5030_v6  ;;  %v5593_v13 = vld [vmem:[%s11229_s4 + $0x8] sm:$0xff] }
 0xa52   :  { %v5122_v34 = vpop.permute.xlu1 %5121 }
 0xa53   :  { %v5233_v18 = vmul.f32 %v12039_v53, %v5122_v34  ;;  %v5079_v27 = vadd.f32 %v5057_v50, %v4876_v38 }
 0xa55   :  { %v5260_v17 = vmul.f32 %v10846_v3, %v5233_v18 }
 0xa56   :  { %v5124_v56 = vpop.permute.xlu1 %5123 }
 0xa57   :  { %v5282_v47 = vadd.f32 %v5260_v17, %v5079_v27  ;;  %v5234_v4 = vmul.f32 %v5211_v55, %v5124_v56 }
 0xa59   :  { %v5261_v39 = vmul.f32 %v10846_v3, %v5234_v4  ;;  %v5590_v42 = vmul.f32 %v5579_v40, %v5282_v47  ;;  %v5595_v3 = vld [vmem:[%s11229_s4 + $0x18] sm:$0xff] }
 0xa5b   :  { %v5283_v15 = vadd.f32 %v5261_v39, %v5080_v12  ;;  %v6426_v8 = vpack.c.bf16 %v5590_v42, %v5589_v16 }
 0xa5d   :  { %6427 = vmatprep.subr.bf16.mxu0 %v6426_v8  ;;  %v5591_v35 = vmul.f32 %v5580_v31, %v5283_v15 }
 0xa5e   :  { %6429 = vmatpush3.bf16.msra.mxu0 %v6426_v8 }
 0xa5f   :  { %6378 = vmatprep.subr.mxu0 %v5591_v35 }
 0xa62   :  { %6379 = vmatpush3.msra.mxu0 %v5591_v35  ;;  %v5705_v62 = vpop.permute.xlu0 %5704 }
 0xa63   :  { %6381 = vmatmul.mubr.msk.f32.vlgmr.msra.gmra.mrb[78].mxu0 %vm5596_vm6, %v5593_v13 }
 0xa64   :  { %6383 = vmatprep.mubr.msk.f32.mxu0 %vm5596_vm6, %v5594_v19 }
 0xa66   :  { %v5720_v2 = vpop.permute.xlu0 %5719 }
 0xa67   :  { %6384 = vmatmul.mubr.msk.f32.gmra.mrb[80].mxu0 %vm5596_vm6, %v5595_v3  ;;  %v5710_v44 = vpop.permute.xlu1 %5709 }
 0xa6b   :  { %v5715_v43 = vpop.permute.xlu1 %5714 }
 0xb36   :  { %v6382_v55 = vpop.f32.mrb[78].mxu0 }
 0xb37   :  { %v5695_v61 = vadd.f32 %v6382_v55, %v12040_v14  ;;  %v5675_v46 = vpop.f32.mrb[79].mxu0 }
 0xb38   :  { %v5694_v32 = vadd.f32 %v5675_v46, %v12041_v54 }
 0xb39   :  { %v5723_v33 = vadd.f32 %v5710_v44, %v5695_v61 }
 0xb3a   :  { %v5722_v10 = vadd.f32 %v5705_v62, %v5694_v32  ;;  %v6385_v49 = vpop.f32.mrb[80].mxu0 }
 0xb3b   :  { %5727 = vst [vmem:[%s11230_s8 + $0x8] sm:$0xff] %v5723_v33  ;;  %v5697_v1 = vadd.f32 %v6385_v49, %v12042_v23  ;;  %v5685_v11 = vpop.f32.mrb[81].mxu0 }
 0xb3c   :  { %5726 = vst [vmem:[%s11230_s8] sm:$0xff] %v5722_v10  ;;  %v5696_v63 = vadd.f32 %v5685_v11, %v12043_v25 }
 0xb3d   :  { %v5725_v45 = vadd.f32 %v5720_v2, %v5697_v1 }
 0xb3e   :  { %v5724_v9 = vadd.f32 %v5715_v43, %v5696_v63 }
 0xb3f   :  { %5729 = vst [vmem:[%s11230_s8 + $0x18] sm:$0xff] %v5725_v45 }
 0xb40   :  { %5728 = vst [vmem:[%s11230_s8 + $0x10] sm:$0xff] %v5724_v9 }

</bundles_post_ra>
